<compile_context>
chip_gen: v7x
topology: tpu7x:2x2x1
jax: 0.10.0
libtpu: 0.0.40
codegen_flags: <defaults>
</compile_context>

<pallas_src>
import functools
import math

import jax
import jax.numpy as jnp
from jax.experimental import pallas as pl
from jax.experimental.pallas import tpu as pltpu

KSIZE = 3
SCALES = (1.0, 0.9, 0.8, 0.7, 0.6)
SOFTMAX_SCALE = 10.0
ESCAPE_NAN = 1e-4  # the registered escape_NaN buffer
LANE = 128


def _round_up(x, m):
    return ((x + m - 1) // m) * m


# ----------------------------- Pallas kernel ------------------------------

def _flash_attn_kernel(x_ref, w_ref, r_ref, o_ref, m_ref, l_ref, acc_ref,
                       *, tl, l_valid, mask_keys):
    """One (query-tile, key-tile) step of the cross-scale attention.

    x_ref:  (1, tq, Kmp)  bf16 query patches (im2col of conv_match_L_base)
    w_ref:  (1, tl, Kmp)  bf16 normalized+scaled key patches (all scales)
    r_ref:  (1, tl, Kcp)  bf16 value patches (conv_assembly, all scales)
    o_ref:  (1, tq, Kcp)  f32 output, written on the last key tile
    scratch: m (tq,1), l (tq,1), acc (tq,Kcp) — online-softmax state.
    """
    li = pl.program_id(2)

    @pl.when(li == 0)
    def _init():
        m_ref[...] = jnp.full(m_ref.shape, -jnp.inf, jnp.float32)
        l_ref[...] = jnp.zeros(l_ref.shape, jnp.float32)
        acc_ref[...] = jnp.zeros(acc_ref.shape, jnp.float32)

    # scores = F.conv2d(xi, wi_normed) as an im2col matmul; the softmax scale
    # is already folded into w_ref, so no extra (tq, tl) multiply here.
    s = jax.lax.dot_general(x_ref[0], w_ref[0], (((1,), (1,)), ((), ())),
                            preferred_element_type=jnp.float32)  # (tq, tl) f32

    if mask_keys:
        # L (sum of pyramid patch counts) is not a multiple of tl: padded key
        # rows must not receive probability mass.
        key_idx = li * tl + jax.lax.broadcasted_iota(jnp.int32, s.shape, 1)
        s = jnp.where(key_idx < l_valid, s, -jnp.inf)

    m_prev = m_ref[...]
    m_new = jnp.maximum(m_prev, jnp.max(s, axis=1, keepdims=True))
    alpha = jnp.exp(m_prev - m_new)
    p = jnp.exp(s - m_new)
    l_ref[...] = alpha * l_ref[...] + jnp.sum(p, axis=1, keepdims=True)
    acc_ref[...] = alpha * acc_ref[...] + jnp.dot(
        p.astype(jnp.bfloat16), r_ref[0], preferred_element_type=jnp.float32)
    m_ref[...] = m_new

    @pl.when(li == pl.num_programs(2) - 1)
    def _finalize():
        # conv_transpose2d(yi, raw_wi)/4: the contraction + 1/4; spatial fold
        # happens outside.  1/l via approx reciprocal (EUP, off the VALU).
        inv_l = pl.reciprocal(l_ref[...], approx=True)
        o_ref[0] = (acc_ref[...] * (0.25 * inv_l)).astype(o_ref.dtype)


def attention_pallas(x_col, wn_bank, raw_bank):
    """x_col: (N, HW, Km); wn_bank: (N, L, Km) pre-normalized*scale; raw_bank: (N, L, Kc)."""
    N, HW, Km = x_col.shape
    L = wn_bank.shape[1]
    Kc = raw_bank.shape[2]

    # Lane-dense padding (128) and tile sizes.  Tiles kept modest so the
    # working set (double-buffered bf16 tiles + f32 acc + f32 score tile)
    # stays well inside v7x's 64 MiB VMEM while still amortizing per-step
    # overhead; tl is 256-aligned for the v6e/v7x 2x256^2 MXU.
    Kmp = _round_up(Km, LANE)
    Kcp = _round_up(Kc, LANE)
    tq = min(256, _round_up(HW, LANE))
    tl = min(1024, _round_up(L, 2 * LANE))
    HWp = _round_up(HW, tq)
    Lp = _round_up(L, tl)

    xq = jnp.pad(x_col, ((0, 0), (0, HWp - HW), (0, Kmp - Km))).astype(jnp.bfloat16)
    wb = jnp.pad(wn_bank, ((0, 0), (0, Lp - L), (0, Kmp - Km))).astype(jnp.bfloat16)
    rb = jnp.pad(raw_bank, ((0, 0), (0, Lp - L), (0, Kcp - Kc))).astype(jnp.bfloat16)

    kern = functools.partial(_flash_attn_kernel, tl=tl, l_valid=L,
                             mask_keys=(Lp != L))

    # TODO(synk): sweep pipeline_mode=pl.Buffered(3) on the streamed key/value
    # specs and a (N, L, C)-valued restructure of raw_bank (9x less DMA).
    out = pl.pallas_call(
        kern,
        out_shape=jax.ShapeDtypeStruct((N, HWp, Kcp), jnp.float32),
        grid_spec=pltpu.PrefetchScalarGridSpec(
            num_scalar_prefetch=0,
            grid=(N, HWp // tq, Lp // tl),
            in_specs=[
                # query tile stays resident across the inner L axis
                pl.BlockSpec((1, tq, Kmp), lambda b, qi, li: (b, qi, 0)),
                pl.BlockSpec((1, tl, Kmp), lambda b, qi, li: (b, li, 0)),
                pl.BlockSpec((1, tl, Kcp), lambda b, qi, li: (b, li, 0)),
            ],
            out_specs=pl.BlockSpec((1, tq, Kcp), lambda b, qi, li: (b, qi, 0)),
            scratch_shapes=[
                pltpu.VMEM((tq, 1), jnp.float32),    # running max m
                pltpu.VMEM((tq, 1), jnp.float32),    # running sum l
                pltpu.VMEM((tq, Kcp), jnp.float32),  # accumulator
            ],
        ),
        compiler_params=pltpu.CompilerParams(
            dimension_semantics=("parallel", "parallel", "arbitrary"),
            vmem_limit_bytes=64 * 1024 * 1024,
        ),
    )(xq, wb, rb)
    return out[:, :HW, :Kc]


# ------------------------------- JAX glue ---------------------------------

def pw_conv_prelu(x_nhwc, w, b, alpha):
    """1x1 conv + bias + PReLU in NHWC, left to XLA (memory-bound, per review)."""
    y = jnp.einsum("nhwc,cd->nhwd", x_nhwc, w) + b
    return jnp.where(y >= 0.0, y, alpha * y)


def im2col_3x3_same(x_nhwc):
    """(N,H,W,C) -> (N, H*W, 9*C); feature index = (kh*3+kw)*C + c."""
    N, H, W, C = x_nhwc.shape
    xp = jnp.pad(x_nhwc, ((0, 0), (1, 1), (1, 1), (0, 0)))
    cols = []
    for kh in range(KSIZE):
        for kw in range(KSIZE):
            cols.append(xp[:, kh:kh + H, kw:kw + W, :])
    col = jnp.stack(cols, axis=3)                       # (N, H, W, 9, C)
    return col.reshape(N, H * W, KSIZE * KSIZE * C)


def fold_3x3_same(o_col, C, H, W):
    """Adjoint of im2col = spatial scatter of conv_transpose2d (stride=1, pad=1)."""
    N = o_col.shape[0]
    o = o_col.reshape(N, H, W, KSIZE, KSIZE, C)
    out = jnp.zeros((N, H, W, C), jnp.float32)
    for kh in range(KSIZE):
        for kw in range(KSIZE):
            contrib = o[:, :, :, kh, kw, :]
            padded = jnp.pad(contrib, ((0, 0), (1, 1), (1, 1), (0, 0)))
            out = out + padded[:, 2 - kh:2 - kh + H, 2 - kw:2 - kw + W, :]
    return out


def _attention_ref(x_col, wn_bank, raw_bank):
    """Pure-JAX reference of the same math at the same (bf16 operand) precision."""
    xb = x_col.astype(jnp.bfloat16)
    wb = wn_bank.astype(jnp.bfloat16)
    rb = raw_bank.astype(jnp.bfloat16)
    s = jnp.einsum("npk,nlk->npl", xb, wb, preferred_element_type=jnp.float32)
    p = jax.nn.softmax(s, axis=2)
    o = jnp.einsum("npl,nlc->npc", p.astype(jnp.bfloat16), rb,
                   preferred_element_type=jnp.float32)
    return o * 0.25


def pyramid_attention(x, params, use_pallas=True):
    """Forward pass of PyramidAttention (res_scale=1, average=True, stride=1, ksize=3)."""
    N, C, H, W = x.shape
    xh = jnp.transpose(x, (0, 2, 3, 1))                 # NHWC end-to-end internally

    match_base = pw_conv_prelu(xh, params["w_match_L"], params["b_match_L"],
                               params["a_match_L"])

    w_banks, raw_banks = [], []
    for s in SCALES:
        if s != 1.0:
            Hs, Ws = int(math.floor(H * s)), int(math.floor(W * s))
            # F.interpolate(mode='bilinear', align_corners=False) equivalent.
            ref = jax.image.resize(xh, (N, Hs, Ws, C), method="bilinear",
                                   antialias=False)
        else:
            ref = xh
        base = pw_conv_prelu(ref, params["w_assembly"], params["b_assembly"],
                             params["a_assembly"])
        refm = pw_conv_prelu(ref, params["w_match"], params["b_match"],
                             params["a_match"])
        raw_banks.append(im2col_3x3_same(base))         # (N, Hs*Ws, 9*C)
        w_banks.append(im2col_3x3_same(refm))           # (N, Hs*Ws, 9*(C//2))

    w_bank = jnp.concatenate(w_banks, axis=1)           # (N, L, 9*(C//2))
    raw_bank = jnp.concatenate(raw_banks, axis=1)       # (N, L, 9*C)
    x_col = im2col_3x3_same(match_base)                 # (N, H*W, 9*(C//2))

    # Hoisted key-patch L2 normalization with escape_NaN floor; the softmax
    # scale is folded in so the kernel never multiplies the (HW, L) scores.
    norm = jnp.maximum(jnp.sqrt(jnp.sum(w_bank * w_bank, axis=2, keepdims=True)),
                       ESCAPE_NAN)
    wn_bank = w_bank * (SOFTMAX_SCALE / norm)

    if use_pallas:
        o_col = attention_pallas(x_col, wn_bank, raw_bank)
    else:
        o_col = _attention_ref(x_col, wn_bank, raw_bank)

    y = fold_3x3_same(o_col, C, H, W)                   # conv_transpose2d scatter (/4 in kernel)
    out = y + xh                                        # res_scale = 1
    return jnp.transpose(out, (0, 3, 1, 2))             # back to NCHW at the boundary


if __name__ == "__main__":
    key = jax.random.PRNGKey(0)
    N, C, H, W = 2, 8, 16, 16          # channel=8, reduction=2 -> Cm=4
    Cm = C // 2
    k_x, k1, k2, k3, k4, k5, k6 = jax.random.split(key, 7)
    x = jax.random.normal(k_x, (N, C, H, W), jnp.float32)

    params = {
        # conv_match_L_base: 1x1 conv C -> C//2 (+bias) + PReLU(init 0.25)
        "w_match_L": 0.1 * jax.random.normal(k1, (C, Cm), jnp.float32),
        "b_match_L": 0.1 * jax.random.normal(k2, (1, Cm), jnp.float32),
        "a_match_L": jnp.full((1,), 0.25, jnp.float32),
        # conv_match: 1x1 conv C -> C//2 (+bias) + PReLU
        "w_match": 0.1 * jax.random.normal(k3, (C, Cm), jnp.float32),
        "b_match": 0.1 * jax.random.normal(k4, (1, Cm), jnp.float32),
        "a_match": jnp.full((1,), 0.25, jnp.float32),
        # conv_assembly: 1x1 conv C -> C (+bias) + PReLU
        "w_assembly": 0.1 * jax.random.normal(k5, (C, C), jnp.float32),
        "b_assembly": 0.1 * jax.random.normal(k6, (1, C), jnp.float32),
        "a_assembly": jnp.full((1,), 0.25, jnp.float32),
    }

    fwd = jax.jit(functools.partial(pyramid_attention, use_pallas=True))
    y = fwd(x, params)
    jax.block_until_ready(y)

    # silent sanity check against a pure-JAX reference of the same math
    # (reference uses the same bf16 operand precision as the kernel).
    y_ref = pyramid_attention(x, params, use_pallas=False)
    assert y.shape == (N, C, H, W)
    assert bool(jnp.allclose(y, y_ref, rtol=2e-2, atol=2e-2)), float(
        jnp.max(jnp.abs(y - y_ref)))

    print("KERNEL_OK")
</pallas_src>

<mosaic_0001>
module attributes {stable_mosaic.version = 11 : i64} {
  func.func @_flash_attn_kernel(%arg0: i32, %arg1: i32, %arg2: i32, %arg3: memref<1x256x128xbf16, #tpu.memory_space<vmem>>, %arg4: memref<1x1024x128xbf16, #tpu.memory_space<vmem>>, %arg5: memref<1x1024x128xbf16, #tpu.memory_space<vmem>>, %arg6: memref<1x256x128xf32, #tpu.memory_space<vmem>>, %arg7: memref<256x1xf32, #tpu.memory_space<vmem>>, %arg8: memref<256x1xf32, #tpu.memory_space<vmem>>, %arg9: memref<256x128xf32, #tpu.memory_space<vmem>>) attributes {dimension_semantics = [#tpu.dimension_semantics<parallel>, #tpu.dimension_semantics<parallel>, #tpu.dimension_semantics<arbitrary>], iteration_bounds = array<i64: 2, 1, 1>, scalar_prefetch = 0 : i64, scratch_operands = 3 : i64, tpu.core_type = #tpu.core_type<tc>, window_params = [{transform_indices = @transform_0, window_bounds = array<i64: 1, 256, 128>}, {transform_indices = @transform_1, window_bounds = array<i64: 1, 1024, 128>}, {transform_indices = @transform_2, window_bounds = array<i64: 1, 1024, 128>}, {transform_indices = @transform_3, window_bounds = array<i64: 1, 256, 128>}]} {
    %c0_i32 = arith.constant 0 : i32
    %0 = arith.cmpi eq, %arg2, %c0_i32 : i32
    %1 = arith.extui %0 : i1 to i32
    %c0_i32_0 = arith.constant 0 : i32
    %2 = arith.cmpi ne, %1, %c0_i32_0 : i32
    scf.if %2 {
      %cst_27 = arith.constant 0xFF800000 : f32
      %44 = vector.broadcast %cst_27 : f32 to vector<256x1xf32>
      %c0_28 = arith.constant 0 : index
      %c0_29 = arith.constant 0 : index
      %45 = vector.load %arg7[%c0_28, %c0_29] : memref<256x1xf32, #tpu.memory_space<vmem>>, vector<256x1xf32>
      tpu.vector_store %arg7[%c0_28, %c0_29], %44 {strides = array<i32>} : memref<256x1xf32, #tpu.memory_space<vmem>>, vector<256x1xf32>,
      %cst_30 = arith.constant 0.000000e+00 : f32
      %46 = vector.broadcast %cst_30 : f32 to vector<256x1xf32>
      %c0_31 = arith.constant 0 : index
      %c0_32 = arith.constant 0 : index
      %47 = vector.load %arg8[%c0_31, %c0_32] : memref<256x1xf32, #tpu.memory_space<vmem>>, vector<256x1xf32>
      tpu.vector_store %arg8[%c0_31, %c0_32], %46 {strides = array<i32>} : memref<256x1xf32, #tpu.memory_space<vmem>>, vector<256x1xf32>,
      %cst_33 = arith.constant 0.000000e+00 : f32
      %48 = vector.broadcast %cst_33 : f32 to vector<256x128xf32>
      %c0_34 = arith.constant 0 : index
      %c0_35 = arith.constant 0 : index
      %49 = vector.load %arg9[%c0_34, %c0_35] : memref<256x128xf32, #tpu.memory_space<vmem>>, vector<256x128xf32>
      tpu.vector_store %arg9[%c0_34, %c0_35], %48 {strides = array<i32>} : memref<256x128xf32, #tpu.memory_space<vmem>>, vector<256x128xf32>,
    } else {
    }
    %c0 = arith.constant 0 : index
    %c0_1 = arith.constant 0 : index
    %c0_2 = arith.constant 0 : index
    %3 = vector.load %arg3[%c0, %c0_1, %c0_2] : memref<1x256x128xbf16, #tpu.memory_space<vmem>>, vector<1x256x128xbf16>
    %4 = vector.shape_cast %3 : vector<1x256x128xbf16> to vector<256x128xbf16>
    %c0_3 = arith.constant 0 : index
    %c0_4 = arith.constant 0 : index
    %c0_5 = arith.constant 0 : index
    %5 = vector.load %arg4[%c0_3, %c0_4, %c0_5] : memref<1x1024x128xbf16, #tpu.memory_space<vmem>>, vector<1x1024x128xbf16>
    %6 = vector.shape_cast %5 : vector<1x1024x128xbf16> to vector<1024x128xbf16>
    %cst = arith.constant dense<0.000000e+00> : vector<256x1024xf32>
    %7 = tpu.matmul %4, %6, %cst {dimension_numbers = #tpu.dot_dimension_numbers<[1], [1], [0], [0], [0, 0, 1, 0], [], []>} : vector<256x128xbf16>, vector<1024x128xbf16>, vector<256x1024xf32> -> vector<256x1024xf32>
    %c1024_i32 = arith.constant 1024 : i32
    %8 = arith.muli %arg2, %c1024_i32 : i32
    %9 = tpu.iota {dimensions = array<i32: 1>} : vector<256x1024xi32>
    %10 = vector.broadcast %8 : i32 to vector<256x1024xi32>
    %11 = arith.addi %10, %9 : vector<256x1024xi32>
    %c798_i32 = arith.constant 798 : i32
    %12 = vector.broadcast %c798_i32 : i32 to vector<256x1024xi32>
    %13 = arith.cmpi slt, %11, %12 : vector<256x1024xi32>
    %cst_6 = arith.constant 0xFF800000 : f32
    %14 = vector.broadcast %cst_6 : f32 to vector<256x1024xf32>
    %15 = arith.select %13, %7, %14 : vector<256x1024xi1>, vector<256x1024xf32>
    %c0_7 = arith.constant 0 : index
    %c0_8 = arith.constant 0 : index
    %16 = vector.load %arg7[%c0_7, %c0_8] : memref<256x1xf32, #tpu.memory_space<vmem>>, vector<256x1xf32>
    %cst_9 = arith.constant dense<0xFF800000> : vector<256xf32>
    %17 = vector.multi_reduction <maximumf>, %15, %cst_9 [1] : vector<256x1024xf32> to vector<256xf32>
    %18 = vector.shape_cast %17 : vector<256xf32> to vector<256x1xf32>
    %19 = arith.maximumf %16, %18 : vector<256x1xf32>
    %20 = arith.subf %16, %19 : vector<256x1xf32>
    %21 = math.exp %20 : vector<256x1xf32>
    %22 = vector.broadcast %19 : vector<256x1xf32> to vector<256x1024xf32>
    %23 = arith.subf %15, %22 : vector<256x1024xf32>
    %24 = math.exp %23 : vector<256x1024xf32>
    %c0_10 = arith.constant 0 : index
    %c0_11 = arith.constant 0 : index
    %25 = vector.load %arg8[%c0_10, %c0_11] : memref<256x1xf32, #tpu.memory_space<vmem>>, vector<256x1xf32>
    %26 = arith.mulf %21, %25 : vector<256x1xf32>
    %cst_12 = arith.constant dense<0.000000e+00> : vector<256xf32>
    %27 = vector.multi_reduction <add>, %24, %cst_12 [1] : vector<256x1024xf32> to vector<256xf32>
    %28 = vector.shape_cast %27 : vector<256xf32> to vector<256x1xf32>
    %29 = arith.addf %26, %28 : vector<256x1xf32>
    %c0_13 = arith.constant 0 : index
    %c0_14 = arith.constant 0 : index
    %30 = vector.load %arg8[%c0_13, %c0_14] : memref<256x1xf32, #tpu.memory_space<vmem>>, vector<256x1xf32>
    tpu.vector_store %arg8[%c0_13, %c0_14], %29 {strides = array<i32>} : memref<256x1xf32, #tpu.memory_space<vmem>>, vector<256x1xf32>,
    %c0_15 = arith.constant 0 : index
    %c0_16 = arith.constant 0 : index
    %31 = vector.load %arg9[%c0_15, %c0_16] : memref<256x128xf32, #tpu.memory_space<vmem>>, vector<256x128xf32>
    %32 = vector.broadcast %21 : vector<256x1xf32> to vector<256x128xf32>
    %33 = arith.mulf %32, %31 : vector<256x128xf32>
    %34 = arith.truncf %24 : vector<256x1024xf32> to vector<256x1024xbf16>
    %c0_17 = arith.constant 0 : index
    %c0_18 = arith.constant 0 : index
    %c0_19 = arith.constant 0 : index
    %35 = vector.load %arg5[%c0_17, %c0_18, %c0_19] : memref<1x1024x128xbf16, #tpu.memory_space<vmem>>, vector<1x1024x128xbf16>
    %36 = vector.shape_cast %35 : vector<1x1024x128xbf16> to vector<1024x128xbf16>
    %cst_20 = arith.constant dense<0.000000e+00> : vector<256x128xf32>
    %37 = tpu.matmul %34, %36, %cst_20 {dimension_numbers = #tpu.dot_dimension_numbers<[1], [0], [0], [1], [0, 0, 1, 1], [], []>} : vector<256x1024xbf16>, vector<1024x128xbf16>, vector<256x128xf32> -> vector<256x128xf32>
    %38 = arith.addf %33, %37 : vector<256x128xf32>
    %c0_21 = arith.constant 0 : index
    %c0_22 = arith.constant 0 : index
    %39 = vector.load %arg9[%c0_21, %c0_22] : memref<256x128xf32, #tpu.memory_space<vmem>>, vector<256x128xf32>
    tpu.vector_store %arg9[%c0_21, %c0_22], %38 {strides = array<i32>} : memref<256x128xf32, #tpu.memory_space<vmem>>, vector<256x128xf32>,
    %c0_23 = arith.constant 0 : index
    %c0_24 = arith.constant 0 : index
    %40 = vector.load %arg7[%c0_23, %c0_24] : memref<256x1xf32, #tpu.memory_space<vmem>>, vector<256x1xf32>
    tpu.vector_store %arg7[%c0_23, %c0_24], %19 {strides = array<i32>} : memref<256x1xf32, #tpu.memory_space<vmem>>, vector<256x1xf32>,
    %c0_i32_25 = arith.constant 0 : i32
    %41 = arith.cmpi eq, %arg2, %c0_i32_25 : i32
    %42 = arith.extui %41 : i1 to i32
    %c0_i32_26 = arith.constant 0 : i32
    %43 = arith.cmpi ne, %42, %c0_i32_26 : i32
    scf.if %43 {
      %c0_27 = arith.constant 0 : index
      %c0_28 = arith.constant 0 : index
      %44 = vector.load %arg8[%c0_27, %c0_28] : memref<256x1xf32, #tpu.memory_space<vmem>>, vector<256x1xf32>
      %45 = tpu.reciprocal %44 {approx = true} : vector<256x1xf32> -> vector<256x1xf32>
      %c0_29 = arith.constant 0 : index
      %c0_30 = arith.constant 0 : index
      %46 = vector.load %arg9[%c0_29, %c0_30] : memref<256x128xf32, #tpu.memory_space<vmem>>, vector<256x128xf32>
      %cst_31 = arith.constant 2.500000e-01 : f32
      %47 = vector.broadcast %cst_31 : f32 to vector<256x1xf32>
      %48 = arith.mulf %47, %45 : vector<256x1xf32>
      %49 = vector.broadcast %48 : vector<256x1xf32> to vector<256x128xf32>
      %50 = arith.mulf %46, %49 : vector<256x128xf32>
      %c0_32 = arith.constant 0 : index
      %c0_33 = arith.constant 0 : index
      %c0_34 = arith.constant 0 : index
      %51 = vector.load %arg6[%c0_32, %c0_33, %c0_34] : memref<1x256x128xf32, #tpu.memory_space<vmem>>, vector<1x256x128xf32>
      %52 = vector.shape_cast %51 : vector<1x256x128xf32> to vector<256x128xf32>
      %53 = vector.shape_cast %50 : vector<256x128xf32> to vector<1x256x128xf32>
      tpu.vector_store %arg6[%c0_32, %c0_33, %c0_34], %53 {strides = array<i32>} : memref<1x256x128xf32, #tpu.memory_space<vmem>>, vector<1x256x128xf32>,
    } else {
    }
    return
  }
  func.func @transform_0(%arg0: i32, %arg1: i32, %arg2: i32) -> (i32, i32, i32) {
    %c0_i32 = arith.constant 0 : i32
    %c0_i32_0 = arith.constant 0 : i32
    return %arg0, %arg1, %c0_i32 : i32, i32, i32
  }
  func.func @transform_1(%arg0: i32, %arg1: i32, %arg2: i32) -> (i32, i32, i32) {
    %c0_i32 = arith.constant 0 : i32
    %c0_i32_0 = arith.constant 0 : i32
    return %arg0, %arg2, %c0_i32 : i32, i32, i32
  }
  func.func @transform_2(%arg0: i32, %arg1: i32, %arg2: i32) -> (i32, i32, i32) {
    %c0_i32 = arith.constant 0 : i32
    %c0_i32_0 = arith.constant 0 : i32
    return %arg0, %arg2, %c0_i32 : i32, i32, i32
  }
  func.func @transform_3(%arg0: i32, %arg1: i32, %arg2: i32) -> (i32, i32, i32) {
    %c0_i32 = arith.constant 0 : i32
    %c0_i32_0 = arith.constant 0 : i32
    return %arg0, %arg1, %c0_i32 : i32, i32, i32
  }
}

</mosaic_0001>

<bundles_post_ra>
// kernel: pyramid_attention.1
= control target key start
LH: loop header
LB: loop body
LE: loop exit
PB: predicated region body
PF: predicated region fallthrough
CT: control target
= control target key end

     0   :  { %s12247_s0 = inlined_call_operand.hbm [shape: bf16[2,256,128], index: 0, kind: input, shape index: {}]   ;;  %s12248_s1 = inlined_call_operand.hbm [shape: bf16[2,1024,128], index: 1, kind: input, shape index: {}]   ;;  %s12249_s2 = inlined_call_operand.hbm [shape: bf16[2,1024,128], index: 2, kind: input, shape index: {}]   ;;  %s12250_s3 = inlined_call_operand.hbm [shape: f32[2,256,128], index: 3, kind: output, shape index: {}]  }
   0x1   :  { %12712 = sst [smem:[#allocation256_spill]] %s12248_s1 }
   0x2   :  { %8 = vsyncpa [#allocation6], 0 }
   0x3   :  { %10 = vsyncpa [#allocation6 + $0x1], 0 }
   0x4   :  { %11 = vsyncpa [#allocation9], 0 }
   0x5   :  { %13 = vsyncpa [#allocation9 + $0x1], 0 }
   0x6   :  { %14 = vsyncpa [#allocation7], 0 }
   0x7   :  { %16 = vsyncpa [#allocation7 + $0x1], 0  ;;  %s7892_s12 = smov 0   ;;  %s7894_s13 = smov 0  }
   0x8   :  { %s7896_s14 = smov 0   ;;  %s7898_s15 = smov 0  }
   0x9   :  { %s7900_s16 = smov 0   ;;  %s7902_s17 = smov 0  }
   0xa LB: > { %12713 = sst [smem:[#allocation15_spill]] %s7847_s14  ;;  %s7923_s18 = sadd.s32 4294967295, %s7859_s17   ;;  %s7859_s17 = sphi %s7902_s17, %s22_s17   ;;  %s7855_s16 = sphi %s7900_s16, %s13824_s16   ;;  %s7851_s15 = sphi %s7898_s15, %s13823_s15   ;;  %s7847_s14 = sphi %s7896_s14, %s13819_s14   ;;  %s7843_s13 = sphi %s7894_s13, %s13822_s13   ;;  %s7839_s12 = sphi %s7892_s12, %s13821_s12  }
   0xb   : > { %s6008_s19 = sadd.s32 4294967294, %s7859_s17   ;;  %s41_s20 = sadd.s32 1, %s7855_s16 }
   0xc   : > { %s50_s21 = sadd.s32 1, %s7847_s14  ;;  %p43_p0 = scmp.ge.s32.totalorder %s41_s20, 2 }
   0xd   : > { %p57_p1 = scmp.ne.s32.totalorder %s7847_s14, %s7843_s13  ;;  %p58_p2 = scmp.eq.s32.totalorder %s7859_s17, 0 }
   0xe   : > { %p63_p3 = scmp.ne.s32.totalorder %s7843_s13, %s7839_s12  ;;  %s13826_s20 = smov (%p43_p0, %s41_s20), 0 }
   0xf   : > { %12714 = sst [smem:[#allocation16_spill]] %s13826_s20  ;;  %p7935_p4 = por %p58_p2, %p57_p1 }
  0x10   : > { %p64_p5 = scmp.eq.s32.totalorder %s7923_s18, 0  ;;  %s45_s23 = ssub.s32 %s7855_s16, %s13826_s20 }
  0x11   : > { %p145_p6 = scmp.eq.s32.totalorder %s7923_s18, 1  ;;  %p48_p7 = scmp.eq.s32.totalorder %s45_s23, 0 }
  0x12   : > { %p7943_p8 = por %p64_p5, %p63_p3  ;;  %p151_p10 = scmp.eq.s32.totalorder %s6008_s19, 1 }
  0x13   : > { %p7947_p9 = por %p145_p6, %p57_p1  ;;  %p6840_p13 = scmp.lt.s32.totalorder %s7859_s17, 2 }
  0x14   : > { %s12716_s24 = scalar_select %p7943_p8, 1, 0 }
  0x15   : > { %s12717_s25 = scalar_select %p7947_p9, 1, 0 }
  0x16   : > { %s7952_s26 = scalar_select %p48_p7, %s7847_s14, %s50_s21  }
  0x17   : > { %p7954_p11 = por %p151_p10, %p63_p3  ;;  %s7961_s28 = sand.u32 1, %s7847_s14  }
  0x18   : > { %12718 = sst [smem:[#allocation17_spill]] %s7952_s26  ;;  %p7965_p0 = pnand %p6840_p13, %p7935_p4 }
  0x19   : > { %s12719_s27 = scalar_select %p7954_p11, 1, 0 }
  0x1a   : > { %s194_s30 = sand.u32 1, %s7859_s17   ;;  %s6014_s4 = sshll.u32 %s7961_s28, 9 }
  0x1b   : > { %s6175_s5 = sshll.u32 %s7855_s16, 13  ;;  %s198_s6 = scalar_lea.vmem [#allocation8], %s6014_s4 }
  0x1c   : > { %s207_s7 = sshll.u32 %s198_s6, 4  ;;  %s12721_s1 = sld [smem:[#allocation256_spill]]  ;;  %s7981_s7 = int_to_ptr.vmem [resolvable:$true] %s207_s7 }
  0x1d   : > { %s7983_s11 = scalar_lea.sflag [#allocation9], %s194_s30  ;;  %p7989_p2 = pneg %p7965_p0 }
  0x22   : > { %s7979_s10 = scalar_lea.hbm %s12721_s1, %s6175_s5  ;;  %s7688_s6 = scalar_lea.hbm %s12721_s1, 16384 }
  0x23   : > { %s7683_s19 = scalar_lea.hbm %s7979_s10, 8192  ;;  %p7689_p5 = scmp.lt.u32.totalorder %s7979_s10, %s12721_s1 }
  0x24   : > { %p7684_p1 = scmp.ne.s32.totalorder %s7979_s10, %s7683_s19  ;;  %p7690_p6 = scmp.lt.u32.totalorder %s7688_s6, %s7683_s19 }
  0x25   : > { %p7692_p10 = scmp.lt.u32.totalorder %s7683_s19, %s7979_s10 }
  0x26   : > { %p7686_p3 = pnand %p7989_p2, %p7684_p1  ;;  %p7691_p7 = por %p7690_p6, %p7689_p5 }
  0x28   : > { %p7687_p4 = pneg %p7686_p3  ;;  %p7693_p13 = por %p7692_p10, %p7691_p7 }
  0x2a   : > { %p7694_p12 = pnand %p7693_p13, %p7687_p4 }
  0x2c   : > { %7697 = shalt.err (!%p7694_p12)
}
  0x2d   : > { %s7698_s30 = scalar_lea.vmem %s7981_s7, 8192  ;;  %s7861_s22 = smov [#allocation8]  }
  0x2e   : > { %p7699_p1 = scmp.ne.s32.totalorder %s7981_s7, %s7698_s30  ;;  %s7703_s23 = sshll.u32 %s7861_s22, 4  ;;  %s7704_s23 = int_to_ptr.vmem [resolvable:$false] %s7703_s23 }
  0x2f   : > { %s7705_s8 = scalar_lea.vmem %s7704_s23, 16384  ;;  %p7706_p9 = scmp.lt.s32.totalorder %s7981_s7, %s7704_s23 }
  0x30   : > { %p7701_p3 = pnand %p7699_p1, %p7989_p2  ;;  %p7707_p8 = scmp.lt.s32.totalorder %s7705_s8, %s7698_s30 }
  0x32   : > { %p7702_p11 = pneg %p7701_p3  ;;  %p7708_p5 = por %p7707_p8, %p7706_p9 }
  0x34   : > { %p7709_p6 = pnand %p7708_p5, %p7702_p11 }
  0x36   : > { %7712 = shalt.err (!%p7709_p6)
}
  0x37   : > { %s12255_s19 = smov 64   ;;  %s7863_s6 = smov 4  }
  0x38   : > { %6832 = dma.hbm_to_vmem [thread:$0]  (!%p7965_p0), %s7979_s10, 8192, %s7981_s7, %s7983_s11, %s12255_s19, %s12255_s19, %s7863_s6  }
  0x39   : > { %s8021_s22 = scalar_lea.hbm %s12249_s2, %s6175_s5  ;;  %p6020_p8 = scmp.ge.s32.totalorder %s7859_s17, 1 }
  0x3a   : > { %s221_s23 = scalar_lea.vmem [#allocation10], %s6014_s4  ;;  %p238_p9 = scmp.lt.s32.totalorder %s7859_s17, 3 }
  0x3b   : > { %s230_s8 = sshll.u32 %s221_s23, 4  ;;  %s6011_s20 = sshll.u32 %s7961_s28, 7  ;;  %s8038_s8 = int_to_ptr.vmem [resolvable:$true] %s230_s8 }
  0x3c   : > { %p8027_p11 = pnand %p6020_p8, %p238_p9  ;;  %s6174_s26 = sshll.u32 %s7855_s16, 11 }
  0x3d   : > { %s8036_s10 = scalar_lea.hbm %s12247_s0, %s6174_s26  ;;  %s175_s4 = scalar_lea.vmem [#allocation5], %s6011_s20 }
  0x3e   : > { %s12723_s1 = scalar_select %p8027_p11, 1, 0 }
  0x3f   : > { %s184_s5 = sshll.u32 %s175_s4, 4  ;;  %s172_s9 = scalar_lea.sflag [#allocation6], %s7961_s28  ;;  %s8040_s5 = int_to_ptr.vmem [resolvable:$true] %s184_s5 }
  0x40   : > { %s7713_s30 = scalar_lea.hbm %s8036_s10, 2048  ;;  %s7718_s26 = scalar_lea.hbm %s12247_s0, 4096 }
  0x41   : > { %p7714_p12 = scmp.ne.s32.totalorder %s8036_s10, %s7713_s30  ;;  %p7719_p10 = scmp.lt.u32.totalorder %s8036_s10, %s12247_s0 }
  0x42   : > { %p7720_p13 = scmp.lt.u32.totalorder %s7718_s26, %s7713_s30  ;;  %p7722_p3 = scmp.lt.u32.totalorder %s7713_s30, %s8036_s10 }
  0x43   : > { %p7716_p4 = pnand %p7714_p12, %p7989_p2 }
  0x44   : > { %p7721_p1 = por %p7720_p13, %p7719_p10 }
  0x45   : > { %p7717_p7 = pneg %p7716_p4 }
  0x46   : > { %p7723_p5 = por %p7722_p3, %p7721_p1 }
  0x48   : > { %p7724_p6 = pnand %p7723_p5, %p7717_p7 }
  0x4a   : > { %7727 = shalt.err (!%p7724_p6)
}
  0x4b   : > { %s7728_s20 = scalar_lea.vmem %s8040_s5, 2048  ;;  %s7864_s4 = smov [#allocation5]  }
  0x4c   : > { %p7729_p8 = scmp.ne.s32.totalorder %s8040_s5, %s7728_s20  ;;  %s7733_s23 = sshll.u32 %s7864_s4, 4  ;;  %s7734_s23 = int_to_ptr.vmem [resolvable:$false] %s7733_s23 }
  0x4d   : > { %s7735_s19 = scalar_lea.vmem %s7734_s23, 4096  ;;  %p7736_p4 = scmp.lt.s32.totalorder %s8040_s5, %s7734_s23 }
  0x4e   : > { %p7731_p9 = pnand %p7729_p8, %p7989_p2  ;;  %p7737_p11 = scmp.lt.s32.totalorder %s7735_s19, %s7728_s20 }
  0x50   : > { %p7732_p12 = pneg %p7731_p9  ;;  %p7738_p10 = por %p7737_p11, %p7736_p4 }
  0x52   : > { %p7739_p13 = pnand %p7738_p10, %p7732_p12 }
  0x54   : > { %7742 = shalt.err (!%p7739_p13)
}
  0x55   : > { %s12724_s30 = smov 64   ;;  %s7743_s14 = scalar_lea.hbm %s8021_s22, 8192 }
  0x56   : > { %6829 = dma.hbm_to_vmem [thread:$0]  (!%p7965_p0), %s8036_s10, 2048, %s8040_s5, %s172_s9, %s12724_s30, %s12724_s30, %s7863_s6  }
  0x57   : > { %p7744_p7 = scmp.ne.s32.totalorder %s8021_s22, %s7743_s14  ;;  %s7748_s20 = scalar_lea.hbm %s12249_s2, 16384 }
  0x58   : > { %p7749_p3 = scmp.lt.u32.totalorder %s8021_s22, %s12249_s2  ;;  %p7750_p5 = scmp.lt.u32.totalorder %s7748_s20, %s7743_s14 }
  0x59   : > { %p7746_p11 = pnand %p7744_p7, %p7989_p2  ;;  %p7752_p8 = scmp.lt.u32.totalorder %s7743_s14, %s8021_s22 }
  0x5a   : > { %p7751_p6 = por %p7750_p5, %p7749_p3 }
  0x5b   : > { %p7747_p1 = pneg %p7746_p11 }
  0x5c   : > { %p7753_p9 = por %p7752_p8, %p7751_p6 }
  0x5e   : > { %p7754_p12 = pnand %p7753_p9, %p7747_p1 }
  0x60   : > { %7757 = shalt.err (!%p7754_p12)
}
  0x61   : > { %s7758_s28 = scalar_lea.vmem %s8038_s8, 8192  ;;  %s7865_s10 = smov [#allocation10]  }
  0x62   : > { %p7759_p4 = scmp.ne.s32.totalorder %s8038_s8, %s7758_s28  ;;  %s7763_s5 = sshll.u32 %s7865_s10, 4  ;;  %s7764_s5 = int_to_ptr.vmem [resolvable:$false] %s7763_s5 }
  0x63   : > { %s7765_s9 = scalar_lea.vmem %s7764_s5, 16384  ;;  %p7766_p7 = scmp.lt.s32.totalorder %s8038_s8, %s7764_s5 }
  0x64   : > { %p7761_p10 = pnand %p7759_p4, %p7989_p2  ;;  %p7767_p11 = scmp.lt.s32.totalorder %s7765_s9, %s7758_s28 }
  0x66   : > { %p7762_p13 = pneg %p7761_p10  ;;  %p7768_p3 = por %p7767_p11, %p7766_p7 }
  0x68   : > { %p7769_p5 = pnand %p7768_p3, %p7762_p13 }
  0x6a   : > { %7772 = shalt.err (!%p7769_p5)
}
  0x6b   : > { %6835 = dma.hbm_to_vmem [thread:$0]  (!%p7965_p0), %s8021_s22, 8192, %s8038_s8, %s7983_s11, %s12724_s30, %s12724_s30, %s7863_s6  }
  0x6c   : > { %p12725_p2 = scmp.ne.s32.totalorder %s12723_s1, 0 }
  0x6e   : > { %242 = sbr.rel (%p12725_p2) target bundleno = 1461 (0x5b5), region = 32 }
  0x75   : > { %s8097_s21 = sand.u32 1, %s7843_s13   ;;  %p12726_p1 = scmp.ne.s32.totalorder %s12716_s24, 0 }
  0x76   : > { %s6021_s19 = sshll.u32 %s8097_s21, 7  ;;  %s245_s14 = scalar_lea.sflag [#allocation6], %s8097_s21 }
  0x77   : > { %s8101_s26 = scalar_lea.vmem [#allocation5], %s6021_s19 }
  0x78   : > { %7826 = dma.done.wait (%p12726_p1), %s245_s14, 2048  }
  0x79   : > { %7828 = vsyncadd (%p12726_p1), %s245_s14, 4294965248  ;;  %s253_s1 = sand.u32 1, %s7923_s18   ;;  %s6022_s29 = sshll.u32 %s8097_s21, 9 }
  0x7a   : > { %s254_s11 = scalar_lea.sflag [#allocation9], %s253_s1  ;;  %s8111_s6 = scalar_lea.vmem [#allocation8], %s6022_s29 }
  0x7b   : > { %7830 = dma.done.wait (%p12726_p1), %s254_s11, 16384  }
  0x7c   : > { %7832 = vsyncadd (%p12726_p1), %s254_s11, 4294950912  ;;  %v6899_v0 = vld [vmem:[%s8111_s6 + $0x40] sm:$0xff]   ;;  %v6903_v4 = vld [vmem:[%s8111_s6 + $0x48] sm:$0xff]   ;;  %vm308_vm0 = vcmask 7168   ;;  %s9322_s18 = scalar_lea.vmem [#allocation10], %s6022_s29  ;;  %s6024_s24 = sshll.u32 %s8097_s21, 8 }
  0x7d   : > { %v6900_v1 = vld [vmem:[%s8111_s6] sm:$0xff]   ;;  %6178 = vmatprep.subr.bf16.mxu0 %v6899_v0  ;;  %v6905_v5 = vld [vmem:[%s8111_s6 + $0xc8] sm:$0xff]   ;;  %v6907_v7 = vld [vmem:[%s8111_s6 + $0x50] sm:$0xff]   ;;  %s12098_s22 = scalar_lea.vmem [#allocation11], %s6024_s24  ;;  %s6177_s8 = sshll.u32 %s7851_s15, 12 }
  0x7e   : > { %v6901_v2 = vld [vmem:[%s8111_s6 + $0xc0] sm:$0xff]   ;;  %6179 = vmatpush3.bf16.xpose.msra.mxu0 %v6900_v1  ;;  %v6904_v6 = vld [vmem:[%s8111_s6 + $0x8] sm:$0xff]   ;;  %v6909_v9 = vld [vmem:[%s8111_s6 + $0xd0] sm:$0xff]   ;;  %s5868_s30 = sshll.u32 %s12098_s22, 4  ;;  %s12194_s4 = scalar_lea.hbm %s12250_s3, %s6177_s8  ;;  %s12196_s30 = int_to_ptr.vmem [resolvable:$true] %s5868_s30 }
  0x7f   : > { %v6902_v3 = vld [vmem:[%s8111_s6 + $0x80] sm:$0xff]   ;;  %6226 = vmatprep.subr.bf16.mxu1 %v6901_v2  ;;  %6180 = vmatprep.subr.bf16.mxu0 %v6903_v4  ;;  %v6906_v8 = vld [vmem:[%s8111_s6 + $0x88] sm:$0xff]   ;;  %v6908_v10 = vld [vmem:[%s8111_s6 + $0x10] sm:$0xff]   ;;  %s5853_s23 = scalar_lea.sflag [#allocation7], %s8097_s21  ;;  %s7773_s15 = scalar_lea.vmem %s12196_s30, 4096 }
  0x80   : > { %6227 = vmatpush3.bf16.xpose.msra.mxu1 %v6902_v3  ;;  %v6911_v11 = vld [vmem:[%s8111_s6 + $0x58] sm:$0xff]   ;;  %v6910_v12 = vld [vmem:[%s8111_s6 + $0x90] sm:$0xff]   ;;  %v6915_v15 = vld [vmem:[%s8111_s6 + $0x60] sm:$0xff]   ;;  %p7774_p0 = scmp.ne.s32.totalorder %s12196_s30, %s7773_s15  ;;  %p13815_p6 = scmp.ne.s32.totalorder %s12717_s25, 0 }
  0x81   : > { %6228 = vmatprep.subr.bf16.mxu1 %v6905_v5  ;;  %v6913_v13 = vld [vmem:[%s8111_s6 + $0xd8] sm:$0xff]   ;;  %v6917_v17 = vld [vmem:[%s8111_s6 + $0xe0] sm:$0xff]   ;;  %v6919_v19 = vld [vmem:[%s8111_s6 + $0x68] sm:$0xff]   ;;  %s7869_s28 = smov [#allocation11]  }
  0x82   : > { %v6912_v14 = vld [vmem:[%s8111_s6 + $0x18] sm:$0xff]   ;;  %v6916_v18 = vld [vmem:[%s8111_s6 + $0x20] sm:$0xff]   ;;  %v6921_v22 = vld [vmem:[%s8111_s6 + $0xe8] sm:$0xff]   ;;  %p7775_p8 = pnand %p7774_p0, %p13815_p6  ;;  %s7777_s10 = sshll.u32 %s7869_s28, 4  ;;  %s7778_s10 = int_to_ptr.vmem [resolvable:$false] %s7777_s10 }
  0x83   : > { %v6914_v16 = vld [vmem:[%s8111_s6 + $0x98] sm:$0xff]   ;;  %v8138_v20 = vld [vmem:[%s8101_s26] sm:$0xff]   ;;  %v6920_v23 = vld [vmem:[%s8111_s6 + $0x28] sm:$0xff]   ;;  %s7779_s5 = scalar_lea.vmem %s7778_s10, 8192  ;;  %p7780_p12 = scmp.lt.s32.totalorder %s12196_s30, %s7778_s10 }
  0x84   : > { %v6918_v21 = vld [vmem:[%s8111_s6 + $0xa0] sm:$0xff]   ;;  %6194 = vmatprep.mubr.bf16.mxu0 %v8138_v20  ;;  %6242 = vmatprep.mubr.bf16.mxu1 %v8138_v20  ;;  %v6923_v24 = vld [vmem:[%s8111_s6 + $0x70] sm:$0xff]   ;;  %v6922_v25 = vld [vmem:[%s8111_s6 + $0xa8] sm:$0xff]   ;;  %p7776_p9 = pneg %p7775_p8  ;;  %p7781_p4 = scmp.lt.s32.totalorder %s7779_s5, %s7773_s15 }
  0x85   : > { %v6925_v26 = vld [vmem:[%s8111_s6 + $0xf0] sm:$0xff]   ;;  %v6927_v28 = vld [vmem:[%s8111_s6 + $0x78] sm:$0xff]   ;;  %v6932_v32 = vld [vmem:[%s8111_s6 + $0x140] sm:$0xff]  }
  0x86   : > { %6181 = vmatpush3.bf16.xpose.msra.mxu0 %v6904_v6  ;;  %v6924_v27 = vld [vmem:[%s8111_s6 + $0x30] sm:$0xff]   ;;  %v6929_v30 = vld [vmem:[%s8111_s6 + $0xf8] sm:$0xff]   ;;  %v6934_v34 = vld [vmem:[%s8111_s6 + $0x1c0] sm:$0xff]   ;;  %p7782_p10 = por %p7781_p4, %p7780_p12 }
  0x87   : > { %6182 = vmatprep.subr.bf16.mxu0 %v6907_v7  ;;  %v6926_v29 = vld [vmem:[%s8111_s6 + $0xb0] sm:$0xff]   ;;  %v6928_v31 = vld [vmem:[%s8111_s6 + $0x38] sm:$0xff]   ;;  %v6933_v35 = vld [vmem:[%s8111_s6 + $0x100] sm:$0xff]  }
  0x88   : > { %6229 = vmatpush3.bf16.xpose.msra.mxu1 %v6906_v8  ;;  %v6930_v33 = vld [vmem:[%s8111_s6 + $0xb8] sm:$0xff]   ;;  %v8158_v36 = vld [vmem:[%s8101_s26 + $0x8] sm:$0xff]   ;;  %v6935_v38 = vld [vmem:[%s8111_s6 + $0x180] sm:$0xff]   ;;  %p7783_p13 = pnand %p7782_p10, %p7776_p9 }
  0x89   : > { %6230 = vmatprep.subr.bf16.mxu1 %v6909_v9  ;;  %v6938_v37 = vld [vmem:[%s8111_s6 + $0x148] sm:$0xff]   ;;  %v8168_v40 = vld [vmem:[%s8101_s26 + $0x10] sm:$0xff]   ;;  %v8179_v45 = vld [vmem:[%s8101_s26 + $0x18] sm:$0xff]  }
  0x8a   : > { %v6940_v39 = vld [vmem:[%s8111_s6 + $0x1c8] sm:$0xff]   ;;  %v6944_v42 = vld [vmem:[%s8111_s6 + $0x150] sm:$0xff]   ;;  %v6950_v47 = vld [vmem:[%s8111_s6 + $0x158] sm:$0xff]  }
  0x8b   : > { %v6939_v41 = vld [vmem:[%s8111_s6 + $0x108] sm:$0xff]   ;;  %v6946_v44 = vld [vmem:[%s8111_s6 + $0x1d0] sm:$0xff]   ;;  %v6952_v49 = vld [vmem:[%s8111_s6 + $0x1d8] sm:$0xff]  }
  0x8c   : > { %v6941_v43 = vld [vmem:[%s8111_s6 + $0x188] sm:$0xff]   ;;  %v6945_v46 = vld [vmem:[%s8111_s6 + $0x110] sm:$0xff]   ;;  %v8190_v50 = vld [vmem:[%s8101_s26 + $0x20] sm:$0xff]  }
  0x8d   : > { %v6947_v48 = vld [vmem:[%s8111_s6 + $0x190] sm:$0xff]   ;;  %v6951_v51 = vld [vmem:[%s8111_s6 + $0x118] sm:$0xff]   ;;  %v6956_v52 = vld [vmem:[%s8111_s6 + $0x160] sm:$0xff]  }
  0x8e   : > { %6183 = vmatpush3.bf16.xpose.msra.mxu0 %v6908_v10  ;;  %v6953_v53 = vld [vmem:[%s8111_s6 + $0x198] sm:$0xff]   ;;  %v6958_v54 = vld [vmem:[%s8111_s6 + $0x1e0] sm:$0xff]   ;;  %v8201_v55 = vld [vmem:[%s8101_s26 + $0x28] sm:$0xff]  }
  0x8f   : > { %6184 = vmatprep.subr.bf16.mxu0 %v6911_v11  ;;  %v6957_v56 = vld [vmem:[%s8111_s6 + $0x120] sm:$0xff]   ;;  %v6962_v57 = vld [vmem:[%s8111_s6 + $0x168] sm:$0xff]   ;;  %v8212_v60 = vld [vmem:[%s8101_s26 + $0x30] sm:$0xff]  }
  0x90   : > { %6231 = vmatpush3.bf16.xpose.msra.mxu1 %v6910_v12  ;;  %v6959_v58 = vld [vmem:[%s8111_s6 + $0x1a0] sm:$0xff]   ;;  %v6964_v59 = vld [vmem:[%s8111_s6 + $0x1e8] sm:$0xff]   ;;  %v6968_v62 = vld [vmem:[%s8111_s6 + $0x170] sm:$0xff]  }
  0x91   : > { %6232 = vmatprep.subr.bf16.mxu1 %v6913_v13  ;;  %v6963_v61 = vld [vmem:[%s8111_s6 + $0x128] sm:$0xff]   ;;  %v6970_v0 = vld [vmem:[%s8111_s6 + $0x1f0] sm:$0xff]   ;;  %v8223_v1 = vld [vmem:[%s8101_s26 + $0x38] sm:$0xff]  }
  0x92   : > { %v6965_v63 = vld [vmem:[%s8111_s6 + $0x1a8] sm:$0xff]   ;;  %v6969_v2 = vld [vmem:[%s8111_s6 + $0x130] sm:$0xff]   ;;  %v6974_v3 = vld [vmem:[%s8111_s6 + $0x178] sm:$0xff]  }
  0x93   : > { %v6971_v4 = vld [vmem:[%s8111_s6 + $0x1b0] sm:$0xff]   ;;  %v6976_v5 = vld [vmem:[%s8111_s6 + $0x1f8] sm:$0xff]   ;;  %v8234_v6 = vld [vmem:[%s8101_s26 + $0x40] sm:$0xff]  }
  0x94   : > { %v6975_v7 = vld [vmem:[%s8111_s6 + $0x138] sm:$0xff]   ;;  %v8243_v9 = vld [vmem:[%s8101_s26 + $0x48] sm:$0xff]   ;;  %v8250_v10 = vld [vmem:[%s8101_s26 + $0x50] sm:$0xff]  }
  0x95   : > { %v6977_v8 = vld [vmem:[%s8111_s6 + $0x1b8] sm:$0xff]   ;;  %v8264_v12 = vld [vmem:[%s8101_s26 + $0x60] sm:$0xff]   ;;  %v8271_v13 = vld [vmem:[%s8101_s26 + $0x68] sm:$0xff]  }
  0x96   : > { %6185 = vmatpush3.bf16.xpose.msra.mxu0 %v6912_v14  ;;  %v8257_v11 = vld [vmem:[%s8101_s26 + $0x58] sm:$0xff]   ;;  %v8278_v14 = vld [vmem:[%s8101_s26 + $0x70] sm:$0xff]  }
  0x97   : > { %6186 = vmatprep.subr.bf16.mxu0 %v6915_v15  ;;  %v8285_v15 = vld [vmem:[%s8101_s26 + $0x78] sm:$0xff]  }
  0x98   : > { %6233 = vmatpush3.bf16.xpose.msra.mxu1 %v6914_v16 }
  0x99   : > { %6234 = vmatprep.subr.bf16.mxu1 %v6917_v17 }
  0x9e   : > { %6187 = vmatpush3.bf16.xpose.msra.mxu0 %v6916_v18 }
  0x9f   : > { %6188 = vmatprep.subr.bf16.mxu0 %v6919_v19 }
  0xa0   : > { %6235 = vmatpush3.bf16.xpose.msra.mxu1 %v6918_v21 }
  0xa1   : > { %6236 = vmatprep.subr.bf16.mxu1 %v6921_v22 }
  0xa6   : > { %6189 = vmatpush3.bf16.xpose.msra.mxu0 %v6920_v23 }
  0xa7   : > { %6190 = vmatprep.subr.bf16.mxu0 %v6923_v24 }
  0xa8   : > { %6237 = vmatpush3.bf16.xpose.msra.mxu1 %v6922_v25 }
  0xa9   : > { %6238 = vmatprep.subr.bf16.mxu1 %v6925_v26 }
  0xae   : > { %6191 = vmatpush3.bf16.xpose.msra.mxu0 %v6924_v27 }
  0xaf   : > { %6192 = vmatprep.subr.bf16.mxu0 %v6927_v28 }
  0xb0   : > { %6239 = vmatpush3.bf16.xpose.msra.mxu1 %v6926_v29 }
  0xb1   : > { %6240 = vmatprep.subr.bf16.mxu1 %v6929_v30 }
  0xb6   : > { %6193 = vmatpush3.bf16.xpose.msra.mxu0 %v6928_v31 }
  0xb7   : > { %6274 = vmatprep.subr.bf16.mxu0 %v6932_v32 }
  0xb8   : > { %6241 = vmatpush3.bf16.xpose.msra.mxu1 %v6930_v33 }
  0xb9   : > { %6322 = vmatprep.subr.bf16.mxu1 %v6934_v34 }
  0xbd   : > { %6195 = vmatmul.mubr.bf16.vlgmr.msra.gmra.mrb[0].mxu0 %v8138_v20 }
  0xbe   : > { %6275 = vmatpush3.bf16.xpose.msra.mxu0 %v6933_v35  ;;  %6196 = vmatprep.mubr.bf16.mxu0 %v8158_v36 }
  0xbf   : > { %6243 = vmatmul.mubr.bf16.vlgmr.msra.gmra.mrb[0].mxu1 %v8138_v20  ;;  %6276 = vmatprep.subr.bf16.mxu0 %v6938_v37 }
  0xc0   : > { %6323 = vmatpush3.bf16.xpose.msra.mxu1 %v6935_v38  ;;  %6244 = vmatprep.mubr.bf16.mxu1 %v8158_v36 }
  0xc1   : > { %6324 = vmatprep.subr.bf16.mxu1 %v6940_v39 }
  0xc5   : > { %6197 = vmatmul.mubr.bf16.gmra.mrb[4].mxu0 %v8158_v36 }
  0xc6   : > { %6198 = vmatprep.mubr.bf16.mxu0 %v8168_v40  ;;  %6277 = vmatpush3.bf16.xpose.msra.mxu0 %v6939_v41 }
  0xc7   : > { %6245 = vmatmul.mubr.bf16.gmra.mrb[4].mxu1 %v8158_v36  ;;  %6278 = vmatprep.subr.bf16.mxu0 %v6944_v42 }
  0xc8   : > { %6246 = vmatprep.mubr.bf16.mxu1 %v8168_v40  ;;  %6325 = vmatpush3.bf16.xpose.msra.mxu1 %v6941_v43 }
  0xc9   : > { %6326 = vmatprep.subr.bf16.mxu1 %v6946_v44 }
  0xcd   : > { %6199 = vmatmul.mubr.bf16.gmra.mrb[8].mxu0 %v8168_v40 }
  0xce   : > { %6200 = vmatprep.mubr.bf16.mxu0 %v8179_v45  ;;  %6279 = vmatpush3.bf16.xpose.msra.mxu0 %v6945_v46 }
  0xcf   : > { %6247 = vmatmul.mubr.bf16.gmra.mrb[8].mxu1 %v8168_v40  ;;  %6280 = vmatprep.subr.bf16.mxu0 %v6950_v47 }
  0xd0   : > { %6248 = vmatprep.mubr.bf16.mxu1 %v8179_v45  ;;  %6327 = vmatpush3.bf16.xpose.msra.mxu1 %v6947_v48 }
  0xd1   : > { %6328 = vmatprep.subr.bf16.mxu1 %v6952_v49 }
  0xd5   : > { %6201 = vmatmul.mubr.bf16.gmra.mrb[12].mxu0 %v8179_v45 }
  0xd6   : > { %6202 = vmatprep.mubr.bf16.mxu0 %v8190_v50  ;;  %6281 = vmatpush3.bf16.xpose.msra.mxu0 %v6951_v51 }
  0xd7   : > { %6249 = vmatmul.mubr.bf16.gmra.mrb[12].mxu1 %v8179_v45  ;;  %6282 = vmatprep.subr.bf16.mxu0 %v6956_v52 }
  0xd8   : > { %6250 = vmatprep.mubr.bf16.mxu1 %v8190_v50  ;;  %6329 = vmatpush3.bf16.xpose.msra.mxu1 %v6953_v53 }
  0xd9   : > { %6330 = vmatprep.subr.bf16.mxu1 %v6958_v54 }
  0xdd   : > { %6203 = vmatmul.mubr.bf16.gmra.mrb[16].mxu0 %v8190_v50 }
  0xde   : > { %6204 = vmatprep.mubr.bf16.mxu0 %v8201_v55  ;;  %6283 = vmatpush3.bf16.xpose.msra.mxu0 %v6957_v56 }
  0xdf   : > { %6251 = vmatmul.mubr.bf16.gmra.mrb[16].mxu1 %v8190_v50  ;;  %6284 = vmatprep.subr.bf16.mxu0 %v6962_v57 }
  0xe0   : > { %6252 = vmatprep.mubr.bf16.mxu1 %v8201_v55  ;;  %6331 = vmatpush3.bf16.xpose.msra.mxu1 %v6959_v58 }
  0xe1   : > { %6332 = vmatprep.subr.bf16.mxu1 %v6964_v59 }
  0xe5   : > { %6205 = vmatmul.mubr.bf16.gmra.mrb[20].mxu0 %v8201_v55 }
  0xe6   : > { %6206 = vmatprep.mubr.bf16.mxu0 %v8212_v60  ;;  %6285 = vmatpush3.bf16.xpose.msra.mxu0 %v6963_v61 }
  0xe7   : > { %6253 = vmatmul.mubr.bf16.gmra.mrb[20].mxu1 %v8201_v55  ;;  %6286 = vmatprep.subr.bf16.mxu0 %v6968_v62 }
  0xe8   : > { %6254 = vmatprep.mubr.bf16.mxu1 %v8212_v60  ;;  %6333 = vmatpush3.bf16.xpose.msra.mxu1 %v6965_v63 }
  0xe9   : > { %6334 = vmatprep.subr.bf16.mxu1 %v6970_v0 }
  0xed   : > { %6207 = vmatmul.mubr.bf16.gmra.mrb[24].mxu0 %v8212_v60 }
  0xee   : > { %6208 = vmatprep.mubr.bf16.mxu0 %v8223_v1  ;;  %6287 = vmatpush3.bf16.xpose.msra.mxu0 %v6969_v2 }
  0xef   : > { %6255 = vmatmul.mubr.bf16.gmra.mrb[24].mxu1 %v8212_v60  ;;  %6288 = vmatprep.subr.bf16.mxu0 %v6974_v3 }
  0xf0   : > { %6256 = vmatprep.mubr.bf16.mxu1 %v8223_v1  ;;  %6335 = vmatpush3.bf16.xpose.msra.mxu1 %v6971_v4 }
  0xf1   : > { %6336 = vmatprep.subr.bf16.mxu1 %v6976_v5 }
  0xf5   : > { %6209 = vmatmul.mubr.bf16.gmra.mrb[28].mxu0 %v8223_v1 }
  0xf6   : > { %6210 = vmatprep.mubr.bf16.mxu0 %v8234_v6  ;;  %6289 = vmatpush3.bf16.xpose.msra.mxu0 %v6975_v7 }
  0xf7   : > { %6257 = vmatmul.mubr.bf16.gmra.mrb[28].mxu1 %v8223_v1 }
  0xf8   : > { %6258 = vmatprep.mubr.bf16.mxu1 %v8234_v6  ;;  %6337 = vmatpush3.bf16.xpose.msra.mxu1 %v6977_v8 }
  0xfd   : > { %6211 = vmatmul.mubr.bf16.gmra.mrb[32].mxu0 %v8234_v6 }
  0xfe   : > { %6212 = vmatprep.mubr.bf16.mxu0 %v8243_v9 }
  0xff   : > { %6259 = vmatmul.mubr.bf16.gmra.mrb[32].mxu1 %v8234_v6 }
 0x100   : > { %6260 = vmatprep.mubr.bf16.mxu1 %v8243_v9 }
 0x105   : > { %6213 = vmatmul.mubr.bf16.gmra.mrb[36].mxu0 %v8243_v9 }
 0x106   : > { %6214 = vmatprep.mubr.bf16.mxu0 %v8250_v10 }
 0x107   : > { %6261 = vmatmul.mubr.bf16.gmra.mrb[36].mxu1 %v8243_v9 }
 0x108   : > { %6262 = vmatprep.mubr.bf16.mxu1 %v8250_v10 }
 0x10d   : > { %6215 = vmatmul.mubr.bf16.gmra.mrb[40].mxu0 %v8250_v10 }
 0x10e   : > { %6216 = vmatprep.mubr.bf16.mxu0 %v8257_v11 }
 0x10f   : > { %6263 = vmatmul.mubr.bf16.gmra.mrb[40].mxu1 %v8250_v10 }
 0x110   : > { %6264 = vmatprep.mubr.bf16.mxu1 %v8257_v11 }
 0x115   : > { %6217 = vmatmul.mubr.bf16.gmra.mrb[44].mxu0 %v8257_v11 }
 0x116   : > { %6218 = vmatprep.mubr.bf16.mxu0 %v8264_v12 }
 0x117   : > { %6265 = vmatmul.mubr.bf16.gmra.mrb[44].mxu1 %v8257_v11 }
 0x118   : > { %6266 = vmatprep.mubr.bf16.mxu1 %v8264_v12 }
 0x11d   : > { %6219 = vmatmul.mubr.bf16.gmra.mrb[48].mxu0 %v8264_v12 }
 0x11e   : > { %6220 = vmatprep.mubr.bf16.mxu0 %v8271_v13 }
 0x11f   : > { %6267 = vmatmul.mubr.bf16.gmra.mrb[48].mxu1 %v8264_v12 }
 0x120   : > { %6268 = vmatprep.mubr.bf16.mxu1 %v8271_v13 }
 0x125   : > { %6221 = vmatmul.mubr.bf16.gmra.mrb[52].mxu0 %v8271_v13 }
 0x126   : > { %6222 = vmatprep.mubr.bf16.mxu0 %v8278_v14 }
 0x127   : > { %6269 = vmatmul.mubr.bf16.gmra.mrb[52].mxu1 %v8271_v13 }
 0x128   : > { %6270 = vmatprep.mubr.bf16.mxu1 %v8278_v14 }
 0x12d   : > { %6223 = vmatmul.mubr.bf16.gmra.mrb[56].mxu0 %v8278_v14 }
 0x12e   : > { %6224 = vmatprep.mubr.bf16.mxu0 %v8285_v15 }
 0x12f   : > { %6271 = vmatmul.mubr.bf16.gmra.mrb[56].mxu1 %v8278_v14 }
 0x130   : > { %6272 = vmatprep.mubr.bf16.mxu1 %v8285_v15 }
 0x135   : > { %6225 = vmatmul.mubr.bf16.gmra.mrb[60].mxu0 %v8285_v15 }
 0x136   : > { %6290 = vmatprep.mubr.bf16.mxu0 %v8138_v20 }
 0x137   : > { %6273 = vmatmul.mubr.bf16.gmra.mrb[60].mxu1 %v8285_v15 }
 0x138   : > { %6338 = vmatprep.mubr.bf16.mxu1 %v8138_v20 }
 0x13d   : > { %6291 = vmatmul.mubr.bf16.vlgmr.msra.gmra.mrb[64].mxu0 %v8138_v20 }
 0x13e   : > { %6292 = vmatprep.mubr.bf16.mxu0 %v8158_v36 }
 0x13f   : > { %6339 = vmatmul.mubr.bf16.vlgmr.msra.gmra.mrb[64].mxu1 %v8138_v20 }
 0x140   : > { %6340 = vmatprep.mubr.bf16.mxu1 %v8158_v36 }
 0x145   : > { %6293 = vmatmul.mubr.bf16.gmra.mrb[68].mxu0 %v8158_v36 }
 0x146   : > { %6294 = vmatprep.mubr.bf16.mxu0 %v8168_v40 }
 0x147   : > { %6341 = vmatmul.mubr.bf16.gmra.mrb[68].mxu1 %v8158_v36 }
 0x148   : > { %6342 = vmatprep.mubr.bf16.mxu1 %v8168_v40 }
 0x14d   : > { %6295 = vmatmul.mubr.bf16.gmra.mrb[72].mxu0 %v8168_v40 }
 0x14e   : > { %6296 = vmatprep.mubr.bf16.mxu0 %v8179_v45 }
 0x14f   : > { %6343 = vmatmul.mubr.bf16.gmra.mrb[72].mxu1 %v8168_v40 }
 0x150   : > { %6344 = vmatprep.mubr.bf16.mxu1 %v8179_v45 }
 0x155   : > { %6297 = vmatmul.mubr.bf16.gmra.mrb[76].mxu0 %v8179_v45 }
 0x156   : > { %6298 = vmatprep.mubr.bf16.mxu0 %v8190_v50 }
 0x157   : > { %6345 = vmatmul.mubr.bf16.gmra.mrb[76].mxu1 %v8179_v45 }
 0x158   : > { %6346 = vmatprep.mubr.bf16.mxu1 %v8190_v50 }
 0x15d   : > { %6299 = vmatmul.mubr.bf16.gmra.mrb[80].mxu0 %v8190_v50 }
 0x15e   : > { %6300 = vmatprep.mubr.bf16.mxu0 %v8201_v55 }
 0x15f   : > { %6347 = vmatmul.mubr.bf16.gmra.mrb[80].mxu1 %v8190_v50 }
 0x160   : > { %6348 = vmatprep.mubr.bf16.mxu1 %v8201_v55 }
 0x165   : > { %6301 = vmatmul.mubr.bf16.gmra.mrb[84].mxu0 %v8201_v55 }
 0x166   : > { %6302 = vmatprep.mubr.bf16.mxu0 %v8212_v60 }
 0x167   : > { %6349 = vmatmul.mubr.bf16.gmra.mrb[84].mxu1 %v8201_v55 }
 0x168   : > { %6350 = vmatprep.mubr.bf16.mxu1 %v8212_v60 }
 0x16d   : > { %6303 = vmatmul.mubr.bf16.gmra.mrb[88].mxu0 %v8212_v60 }
 0x16e   : > { %6304 = vmatprep.mubr.bf16.mxu0 %v8223_v1 }
 0x16f   : > { %6351 = vmatmul.mubr.bf16.gmra.mrb[88].mxu1 %v8212_v60 }
 0x170   : > { %6352 = vmatprep.mubr.bf16.mxu1 %v8223_v1 }
 0x175   : > { %6305 = vmatmul.mubr.bf16.gmra.mrb[92].mxu0 %v8223_v1 }
 0x176   : > { %6306 = vmatprep.mubr.bf16.mxu0 %v8234_v6 }
 0x177   : > { %6353 = vmatmul.mubr.bf16.gmra.mrb[92].mxu1 %v8223_v1 }
 0x178   : > { %6354 = vmatprep.mubr.bf16.mxu1 %v8234_v6 }
 0x17d   : > { %6307 = vmatmul.mubr.bf16.gmra.mrb[96].mxu0 %v8234_v6 }
 0x17e   : > { %6308 = vmatprep.mubr.bf16.mxu0 %v8243_v9 }
 0x17f   : > { %6355 = vmatmul.mubr.bf16.gmra.mrb[96].mxu1 %v8234_v6 }
 0x180   : > { %6356 = vmatprep.mubr.bf16.mxu1 %v8243_v9 }
 0x185   : > { %6309 = vmatmul.mubr.bf16.gmra.mrb[100].mxu0 %v8243_v9 }
 0x186   : > { %6310 = vmatprep.mubr.bf16.mxu0 %v8250_v10 }
 0x187   : > { %6357 = vmatmul.mubr.bf16.gmra.mrb[100].mxu1 %v8243_v9 }
 0x188   : > { %6358 = vmatprep.mubr.bf16.mxu1 %v8250_v10 }
 0x18d   : > { %6311 = vmatmul.mubr.bf16.gmra.mrb[104].mxu0 %v8250_v10 }
 0x18e   : > { %6312 = vmatprep.mubr.bf16.mxu0 %v8257_v11 }
 0x18f   : > { %6359 = vmatmul.mubr.bf16.gmra.mrb[104].mxu1 %v8250_v10 }
 0x190   : > { %v8338_v16 = vpop.f32.mrb[0].mxu0  ;;  %6360 = vmatprep.mubr.bf16.mxu1 %v8257_v11 }
 0x191   : > { %12727 = vst [vmem:[#allocation18_spill] sm:$0xff] %v8338_v16  ;;  %v8341_v17 = vpop.f32.mrb[1].mxu0 }
 0x192   : > { %12728 = vst [vmem:[#allocation19_spill] sm:$0xff] %v8341_v17  ;;  %v2132_v18 = vmax.f32 %v8338_v16, %v8341_v17  ;;  %v8345_v19 = vpop.f32.mrb[0].mxu1  ;;  %v8347_v20 = vpop.f32.mrb[2].mxu0 }
 0x193   : > { %12729 = vst [vmem:[#allocation20_spill] sm:$0xff] %v8345_v19  ;;  %12730 = vst [vmem:[#allocation21_spill] sm:$0xff] %v8347_v20  ;;  %v8349_v21 = vpop.f32.mrb[1].mxu1  ;;  %v8351_v22 = vpop.f32.mrb[3].mxu0 }
 0x194   : > { %12731 = vst [vmem:[#allocation22_spill] sm:$0xff] %v8349_v21  ;;  %12732 = vst [vmem:[#allocation23_spill] sm:$0xff] %v8351_v22  ;;  %v8354_v23 = vmax.f32 %v2132_v18, %v8345_v19  ;;  %v2141_v24 = vmax.f32 %v8347_v20, %v8351_v22  ;;  %v8358_v25 = vpop.f32.mrb[2].mxu1 }
 0x195   : > { %12733 = vst [vmem:[#allocation24_spill] sm:$0xff] %v8358_v25  ;;  %v8360_v26 = vpop.f32.mrb[3].mxu1  ;;  %6313 = vmatmul.mubr.bf16.gmra.mrb[108].mxu0 %v8257_v11 }
 0x196   : > { %v8366_v28 = vmax.f32 %v2141_v24, %v8358_v25  ;;  %6314 = vmatprep.mubr.bf16.mxu0 %v8264_v12 }
 0x197   : > { %6361 = vmatmul.mubr.bf16.gmra.mrb[108].mxu1 %v8257_v11 }
 0x198   : > { %v8372_v30 = vpop.f32.mrb[4].mxu0  ;;  %6362 = vmatprep.mubr.bf16.mxu1 %v8264_v12 }
 0x199   : > { %12734 = vst [vmem:[#allocation25_spill] sm:$0xff] %v8372_v30  ;;  %v8375_v31 = vpop.f32.mrb[5].mxu0 }
 0x19a   : > { %12735 = vst [vmem:[#allocation26_spill] sm:$0xff] %v8375_v31  ;;  %v2150_v32 = vmax.f32 %v8372_v30, %v8375_v31  ;;  %v8379_v33 = vpop.f32.mrb[4].mxu1  ;;  %v8381_v34 = vpop.f32.mrb[6].mxu0 }
 0x19b   : > { %12736 = vst [vmem:[#allocation27_spill] sm:$0xff] %v8379_v33  ;;  %12737 = vst [vmem:[#allocation28_spill] sm:$0xff] %v8381_v34  ;;  %v8383_v35 = vpop.f32.mrb[5].mxu1  ;;  %v8385_v36 = vpop.f32.mrb[7].mxu0 }
 0x19c   : > { %12738 = vst [vmem:[#allocation29_spill] sm:$0xff] %v8385_v36  ;;  %v8388_v37 = vmax.f32 %v2150_v32, %v8379_v33  ;;  %v2159_v38 = vmax.f32 %v8381_v34, %v8385_v36  ;;  %v8392_v39 = vpop.f32.mrb[6].mxu1 }
 0x19d   : > { %12739 = vst [vmem:[#allocation30_spill] sm:$0xff] %v8392_v39  ;;  %v8394_v40 = vpop.f32.mrb[7].mxu1  ;;  %6315 = vmatmul.mubr.bf16.gmra.mrb[112].mxu0 %v8264_v12 }
 0x19e   : > { %v8400_v42 = vmax.f32 %v2159_v38, %v8392_v39  ;;  %6316 = vmatprep.mubr.bf16.mxu0 %v8271_v13 }
 0x19f   : > { %6363 = vmatmul.mubr.bf16.gmra.mrb[112].mxu1 %v8264_v12 }
 0x1a0   : > { %v8406_v44 = vpop.f32.mrb[8].mxu0  ;;  %6364 = vmatprep.mubr.bf16.mxu1 %v8271_v13 }
 0x1a1   : > { %12740 = vst [vmem:[#allocation31_spill] sm:$0xff] %v8406_v44  ;;  %v8409_v45 = vpop.f32.mrb[9].mxu0 }
 0x1a2   : > { %12741 = vst [vmem:[#allocation32_spill] sm:$0xff] %v8409_v45  ;;  %v2168_v46 = vmax.f32 %v8406_v44, %v8409_v45  ;;  %v8413_v47 = vpop.f32.mrb[8].mxu1  ;;  %v8415_v48 = vpop.f32.mrb[10].mxu0 }
 0x1a3   : > { %12742 = vst [vmem:[#allocation33_spill] sm:$0xff] %v8413_v47  ;;  %12743 = vst [vmem:[#allocation34_spill] sm:$0xff] %v8415_v48  ;;  %v8417_v49 = vpop.f32.mrb[9].mxu1  ;;  %v8419_v50 = vpop.f32.mrb[11].mxu0 }
 0x1a4   : > { %12744 = vst [vmem:[#allocation35_spill] sm:$0xff] %v8417_v49  ;;  %12745 = vst [vmem:[#allocation36_spill] sm:$0xff] %v8419_v50  ;;  %v8422_v51 = vmax.f32 %v2168_v46, %v8413_v47  ;;  %v2177_v52 = vmax.f32 %v8415_v48, %v8419_v50  ;;  %v8426_v53 = vpop.f32.mrb[10].mxu1 }
 0x1a5   : > { %12746 = vst [vmem:[#allocation37_spill] sm:$0xff] %v8426_v53  ;;  %v8428_v54 = vpop.f32.mrb[11].mxu1  ;;  %6317 = vmatmul.mubr.bf16.gmra.mrb[116].mxu0 %v8271_v13 }
 0x1a6   : > { %12747 = vst [vmem:[#allocation38_spill] sm:$0xff] %v8428_v54  ;;  %v8434_v56 = vmax.f32 %v2177_v52, %v8426_v53  ;;  %6318 = vmatprep.mubr.bf16.mxu0 %v8278_v14 }
 0x1a7   : > { %6365 = vmatmul.mubr.bf16.gmra.mrb[116].mxu1 %v8271_v13 }
 0x1a8   : > { %v8440_v58 = vpop.f32.mrb[12].mxu0  ;;  %6366 = vmatprep.mubr.bf16.mxu1 %v8278_v14 }
 0x1a9   : > { %12748 = vst [vmem:[#allocation39_spill] sm:$0xff] %v8440_v58  ;;  %v8443_v59 = vpop.f32.mrb[13].mxu0 }
 0x1aa   : > { %12749 = vst [vmem:[#allocation40_spill] sm:$0xff] %v8443_v59  ;;  %v2186_v60 = vmax.f32 %v8440_v58, %v8443_v59  ;;  %v8447_v61 = vpop.f32.mrb[12].mxu1  ;;  %v8449_v62 = vpop.f32.mrb[14].mxu0 }
 0x1ab   : > { %12750 = vst [vmem:[#allocation41_spill] sm:$0xff] %v8447_v61  ;;  %12751 = vst [vmem:[#allocation42_spill] sm:$0xff] %v8449_v62  ;;  %v8451_v63 = vpop.f32.mrb[13].mxu1  ;;  %v8453_v0 = vpop.f32.mrb[15].mxu0 }
 0x1ac   : > { %12752 = vst [vmem:[#allocation43_spill] sm:$0xff] %v8451_v63  ;;  %12753 = vst [vmem:[#allocation44_spill] sm:$0xff] %v8453_v0  ;;  %v8456_v1 = vmax.f32 %v2186_v60, %v8447_v61  ;;  %v2195_v2 = vmax.f32 %v8449_v62, %v8453_v0  ;;  %v8460_v3 = vpop.f32.mrb[14].mxu1 }
 0x1ad   : > { %12754 = vst [vmem:[#allocation45_spill] sm:$0xff] %v8460_v3  ;;  %v8462_v4 = vpop.f32.mrb[15].mxu1  ;;  %6319 = vmatmul.mubr.bf16.gmra.mrb[120].mxu0 %v8278_v14 }
 0x1ae   : > { %12755 = vst [vmem:[#allocation46_spill] sm:$0xff] %v8462_v4  ;;  %v8468_v6 = vmax.f32 %v2195_v2, %v8460_v3  ;;  %6320 = vmatprep.mubr.bf16.mxu0 %v8285_v15 }
 0x1af   : > { %6367 = vmatmul.mubr.bf16.gmra.mrb[120].mxu1 %v8278_v14 }
 0x1b0   : > { %v8474_v8 = vpop.f32.mrb[16].mxu0  ;;  %6368 = vmatprep.mubr.bf16.mxu1 %v8285_v15 }
 0x1b1   : > { %12756 = vst [vmem:[#allocation47_spill] sm:$0xff] %v8474_v8  ;;  %v8477_v9 = vpop.f32.mrb[17].mxu0 }
 0x1b2   : > { %12757 = vst [vmem:[#allocation48_spill] sm:$0xff] %v8477_v9  ;;  %v2204_v10 = vmax.f32 %v8474_v8, %v8477_v9  ;;  %v8481_v11 = vpop.f32.mrb[16].mxu1  ;;  %v8483_v12 = vpop.f32.mrb[18].mxu0 }
 0x1b3   : > { %12758 = vst [vmem:[#allocation49_spill] sm:$0xff] %v8481_v11  ;;  %12759 = vst [vmem:[#allocation50_spill] sm:$0xff] %v8483_v12  ;;  %v8485_v13 = vpop.f32.mrb[17].mxu1  ;;  %v8487_v18 = vpop.f32.mrb[19].mxu0 }
 0x1b4   : > { %12760 = vst [vmem:[#allocation51_spill] sm:$0xff] %v8485_v13  ;;  %12761 = vst [vmem:[#allocation52_spill] sm:$0xff] %v8487_v18  ;;  %v8490_v14 = vmax.f32 %v2204_v10, %v8481_v11  ;;  %v2213_v24 = vmax.f32 %v8483_v12, %v8487_v18  ;;  %v8494_v32 = vpop.f32.mrb[18].mxu1 }
 0x1b5   : > { %12762 = vst [vmem:[#allocation53_spill] sm:$0xff] %v8494_v32  ;;  %v8496_v38 = vpop.f32.mrb[19].mxu1  ;;  %6321 = vmatmul.mubr.bf16.gmra.mrb[124].mxu0 %v8285_v15 }
 0x1b6   : > { %12763 = vst [vmem:[#allocation54_spill] sm:$0xff] %v8496_v38  ;;  %v8502_v52 = vmax.f32 %v2213_v24, %v8494_v32 }
 0x1b7   : > { %6369 = vmatmul.mubr.bf16.gmra.mrb[124].mxu1 %v8285_v15 }
 0x1b8   : > { %v8507_v2 = vpop.f32.mrb[20].mxu0 }
 0x1b9   : > { %12764 = vst [vmem:[#allocation55_spill] sm:$0xff] %v8507_v2  ;;  %v8509_v10 = vpop.f32.mrb[21].mxu0 }
 0x1ba   : > { %12765 = vst [vmem:[#allocation56_spill] sm:$0xff] %v8509_v10  ;;  %v2222_v7 = vmax.f32 %v8507_v2, %v8509_v10  ;;  %v8513_v5 = vpop.f32.mrb[20].mxu1  ;;  %v8515_v57 = vpop.f32.mrb[22].mxu0 }
 0x1bb   : > { %12766 = vst [vmem:[#allocation57_spill] sm:$0xff] %v8513_v5  ;;  %12767 = vst [vmem:[#allocation58_spill] sm:$0xff] %v8515_v57  ;;  %v8517_v46 = vpop.f32.mrb[21].mxu1  ;;  %v8519_v24 = vpop.f32.mrb[23].mxu0 }
 0x1bc   : > { %12768 = vst [vmem:[#allocation59_spill] sm:$0xff] %v8517_v46  ;;  %12769 = vst [vmem:[#allocation60_spill] sm:$0xff] %v8519_v24  ;;  %v8522_v15 = vmax.f32 %v2222_v7, %v8513_v5  ;;  %v2231_v60 = vmax.f32 %v8515_v57, %v8519_v24  ;;  %v8526_v55 = vpop.f32.mrb[22].mxu1 }
 0x1bd   : > { %12770 = vst [vmem:[#allocation61_spill] sm:$0xff] %v8526_v55  ;;  %v8528_v43 = vpop.f32.mrb[23].mxu1 }
 0x1be   : > { %12771 = vst [vmem:[#allocation62_spill] sm:$0xff] %v8528_v43  ;;  %v8533_v29 = vmax.f32 %v2231_v60, %v8526_v55 }
 0x1c0   : > { %v8537_v2 = vpop.f32.mrb[24].mxu0 }
 0x1c1   : > { %12772 = vst [vmem:[#allocation63_spill] sm:$0xff] %v8537_v2  ;;  %v8539_v7 = vpop.f32.mrb[25].mxu0 }
 0x1c2   : > { %12773 = vst [vmem:[#allocation64_spill] sm:$0xff] %v8539_v7  ;;  %v2240_v57 = vmax.f32 %v8537_v2, %v8539_v7  ;;  %v8543_v24 = vpop.f32.mrb[24].mxu1  ;;  %v8545_v5 = vpop.f32.mrb[26].mxu0 }
 0x1c3   : > { %12774 = vst [vmem:[#allocation65_spill] sm:$0xff] %v8543_v24  ;;  %12775 = vst [vmem:[#allocation66_spill] sm:$0xff] %v8545_v5  ;;  %v8547_v10 = vpop.f32.mrb[25].mxu1  ;;  %v8549_v41 = vpop.f32.mrb[27].mxu0 }
 0x1c4   : > { %12776 = vst [vmem:[#allocation67_spill] sm:$0xff] %v8547_v10  ;;  %12777 = vst [vmem:[#allocation68_spill] sm:$0xff] %v8549_v41  ;;  %v8552_v60 = vmax.f32 %v2240_v57, %v8543_v24  ;;  %v2249_v27 = vmax.f32 %v8545_v5, %v8549_v41  ;;  %v8556_v55 = vpop.f32.mrb[26].mxu1 }
 0x1c5   : > { %12778 = vst [vmem:[#allocation69_spill] sm:$0xff] %v8556_v55  ;;  %v8558_v32 = vpop.f32.mrb[27].mxu1 }
 0x1c6   : > { %12779 = vst [vmem:[#allocation70_spill] sm:$0xff] %v8558_v32  ;;  %v8563_v7 = vmax.f32 %v2249_v27, %v8556_v55 }
 0x1c8   : > { %v8567_v18 = vpop.f32.mrb[28].mxu0 }
 0x1c9   : > { %12780 = vst [vmem:[#allocation71_spill] sm:$0xff] %v8567_v18  ;;  %v8569_v57 = vpop.f32.mrb[29].mxu0 }
 0x1ca   : > { %12781 = vst [vmem:[#allocation72_spill] sm:$0xff] %v8569_v57  ;;  %v2258_v5 = vmax.f32 %v8567_v18, %v8569_v57  ;;  %v8573_v41 = vpop.f32.mrb[28].mxu1  ;;  %v8575_v24 = vpop.f32.mrb[30].mxu0 }
 0x1cb   : > { %12782 = vst [vmem:[#allocation73_spill] sm:$0xff] %v8573_v41  ;;  %12783 = vst [vmem:[#allocation74_spill] sm:$0xff] %v8575_v24  ;;  %v8577_v11 = vpop.f32.mrb[29].mxu1  ;;  %v8579_v2 = vpop.f32.mrb[31].mxu0 }
 0x1cc   : > { %12784 = vst [vmem:[#allocation75_spill] sm:$0xff] %v8577_v11  ;;  %12785 = vst [vmem:[#allocation76_spill] sm:$0xff] %v8579_v2  ;;  %v8582_v27 = vmax.f32 %v2258_v5, %v8573_v41  ;;  %v2267_v12 = vmax.f32 %v8575_v24, %v8579_v2  ;;  %v8586_v55 = vpop.f32.mrb[30].mxu1 }
 0x1cd   : > { %12786 = vst [vmem:[#allocation77_spill] sm:$0xff] %v8586_v55  ;;  %v8588_v8 = vpop.f32.mrb[31].mxu1 }
 0x1ce   : > { %12787 = vst [vmem:[#allocation78_spill] sm:$0xff] %v8588_v8  ;;  %v8593_v57 = vmax.f32 %v2267_v12, %v8586_v55 }
 0x1d0   : > { %v8597_v3 = vpop.f32.mrb[32].mxu0 }
 0x1d1   : > { %12788 = vst [vmem:[#allocation79_spill] sm:$0xff] %v8597_v3  ;;  %v8599_v5 = vpop.f32.mrb[33].mxu0 }
 0x1d2   : > { %12789 = vst [vmem:[#allocation80_spill] sm:$0xff] %v8599_v5  ;;  %v2276_v24 = vmax.f32 %v8597_v3, %v8599_v5  ;;  %v8603_v2 = vpop.f32.mrb[32].mxu1  ;;  %v8605_v41 = vpop.f32.mrb[34].mxu0 }
 0x1d3   : > { %12790 = vst [vmem:[#allocation81_spill] sm:$0xff] %v8603_v2  ;;  %12791 = vst [vmem:[#allocation82_spill] sm:$0xff] %v8605_v41  ;;  %v8607_v62 = vpop.f32.mrb[33].mxu1  ;;  %v8609_v18 = vpop.f32.mrb[35].mxu0 }
 0x1d4   : > { %12792 = vst [vmem:[#allocation83_spill] sm:$0xff] %v8607_v62  ;;  %12793 = vst [vmem:[#allocation84_spill] sm:$0xff] %v8609_v18  ;;  %v8612_v12 = vmax.f32 %v2276_v24, %v8603_v2  ;;  %v2285_v9 = vmax.f32 %v8605_v41, %v8609_v18  ;;  %v8616_v55 = vpop.f32.mrb[34].mxu1 }
 0x1d5   : > { %12794 = vst [vmem:[#allocation85_spill] sm:$0xff] %v8616_v55  ;;  %v8618_v0 = vpop.f32.mrb[35].mxu1 }
 0x1d6   : > { %12795 = vst [vmem:[#allocation86_spill] sm:$0xff] %v8618_v0  ;;  %v8623_v5 = vmax.f32 %v2285_v9, %v8616_v55 }
 0x1d8   : > { %v8627_v58 = vpop.f32.mrb[36].mxu0 }
 0x1d9   : > { %12796 = vst [vmem:[#allocation87_spill] sm:$0xff] %v8627_v58  ;;  %v8629_v24 = vpop.f32.mrb[37].mxu0 }
 0x1da   : > { %12797 = vst [vmem:[#allocation88_spill] sm:$0xff] %v8629_v24  ;;  %v2294_v2 = vmax.f32 %v8627_v58, %v8629_v24  ;;  %v8633_v41 = vpop.f32.mrb[36].mxu1  ;;  %v8635_v18 = vpop.f32.mrb[38].mxu0 }
 0x1db   : > { %12798 = vst [vmem:[#allocation89_spill] sm:$0xff] %v8633_v41  ;;  %12799 = vst [vmem:[#allocation90_spill] sm:$0xff] %v8635_v18  ;;  %v8637_v59 = vpop.f32.mrb[37].mxu1  ;;  %v8639_v3 = vpop.f32.mrb[39].mxu0 }
 0x1dc   : > { %12800 = vst [vmem:[#allocation91_spill] sm:$0xff] %v8637_v59  ;;  %12801 = vst [vmem:[#allocation92_spill] sm:$0xff] %v8639_v3  ;;  %v8642_v9 = vmax.f32 %v2294_v2, %v8633_v41  ;;  %v2303_v61 = vmax.f32 %v8635_v18, %v8639_v3  ;;  %v8646_v55 = vpop.f32.mrb[38].mxu1 }
 0x1dd   : > { %12802 = vst [vmem:[#allocation93_spill] sm:$0xff] %v8646_v55  ;;  %v8648_v53 = vpop.f32.mrb[39].mxu1 }
 0x1de   : > { %12803 = vst [vmem:[#allocation94_spill] sm:$0xff] %v8648_v53  ;;  %v8653_v24 = vmax.f32 %v2303_v61, %v8646_v55 }
 0x1e0   : > { %v8657_v50 = vpop.f32.mrb[40].mxu0 }
 0x1e1   : > { %12804 = vst [vmem:[#allocation95_spill] sm:$0xff] %v8657_v50  ;;  %v8659_v2 = vpop.f32.mrb[41].mxu0 }
 0x1e2   : > { %12805 = vst [vmem:[#allocation96_spill] sm:$0xff] %v8659_v2  ;;  %v2312_v41 = vmax.f32 %v8657_v50, %v8659_v2  ;;  %v8663_v18 = vpop.f32.mrb[40].mxu1  ;;  %v8665_v3 = vpop.f32.mrb[42].mxu0 }
 0x1e3   : > { %12806 = vst [vmem:[#allocation97_spill] sm:$0xff] %v8663_v18  ;;  %12807 = vst [vmem:[#allocation98_spill] sm:$0xff] %v8665_v3  ;;  %v8667_v47 = vpop.f32.mrb[41].mxu1  ;;  %v8669_v58 = vpop.f32.mrb[43].mxu0 }
 0x1e4   : > { %12808 = vst [vmem:[#allocation99_spill] sm:$0xff] %v8667_v47  ;;  %12809 = vst [vmem:[#allocation100_spill] sm:$0xff] %v8669_v58  ;;  %v8672_v61 = vmax.f32 %v2312_v41, %v8663_v18  ;;  %v2321_v48 = vmax.f32 %v8665_v3, %v8669_v58  ;;  %v8676_v55 = vpop.f32.mrb[42].mxu1 }
 0x1e5   : > { %12810 = vst [vmem:[#allocation101_spill] sm:$0xff] %v8676_v55  ;;  %v8678_v44 = vpop.f32.mrb[43].mxu1 }
 0x1e6   : > { %12811 = vst [vmem:[#allocation102_spill] sm:$0xff] %v8678_v44  ;;  %v8683_v2 = vmax.f32 %v2321_v48, %v8676_v55 }
 0x1e8   : > { %v8687_v39 = vpop.f32.mrb[44].mxu0 }
 0x1e9   : > { %12812 = vst [vmem:[#allocation103_spill] sm:$0xff] %v8687_v39  ;;  %v8689_v41 = vpop.f32.mrb[45].mxu0 }
 0x1ea   : > { %12813 = vst [vmem:[#allocation104_spill] sm:$0xff] %v8689_v41  ;;  %v2330_v18 = vmax.f32 %v8687_v39, %v8689_v41  ;;  %v8693_v3 = vpop.f32.mrb[44].mxu1  ;;  %v8695_v58 = vpop.f32.mrb[46].mxu0 }
 0x1eb   : > { %12814 = vst [vmem:[#allocation105_spill] sm:$0xff] %v8693_v3  ;;  %12815 = vst [vmem:[#allocation106_spill] sm:$0xff] %v8695_v58  ;;  %v8697_v34 = vpop.f32.mrb[45].mxu1  ;;  %v8699_v50 = vpop.f32.mrb[47].mxu0 }
 0x1ec   : > { %12816 = vst [vmem:[#allocation107_spill] sm:$0xff] %v8697_v34  ;;  %12817 = vst [vmem:[#allocation108_spill] sm:$0xff] %v8699_v50  ;;  %v8702_v48 = vmax.f32 %v2330_v18, %v8693_v3  ;;  %v2339_v45 = vmax.f32 %v8695_v58, %v8699_v50  ;;  %v8706_v55 = vpop.f32.mrb[46].mxu1 }
 0x1ed   : > { %12818 = vst [vmem:[#allocation109_spill] sm:$0xff] %v8706_v55  ;;  %v8708_v36 = vpop.f32.mrb[47].mxu1 }
 0x1ee   : > { %12819 = vst [vmem:[#allocation110_spill] sm:$0xff] %v8708_v36  ;;  %v8713_v41 = vmax.f32 %v2339_v45, %v8706_v55 }
 0x1f0   : > { %v8717_v30 = vpop.f32.mrb[48].mxu0 }
 0x1f1   : > { %12820 = vst [vmem:[#allocation111_spill] sm:$0xff] %v8717_v30  ;;  %v8719_v18 = vpop.f32.mrb[49].mxu0 }
 0x1f2   : > { %12821 = vst [vmem:[#allocation112_spill] sm:$0xff] %v8719_v18  ;;  %v2348_v3 = vmax.f32 %v8717_v30, %v8719_v18  ;;  %v8723_v58 = vpop.f32.mrb[48].mxu1  ;;  %v8725_v50 = vpop.f32.mrb[50].mxu0 }
 0x1f3   : > { %12822 = vst [vmem:[#allocation113_spill] sm:$0xff] %v8723_v58  ;;  %12823 = vst [vmem:[#allocation114_spill] sm:$0xff] %v8725_v50  ;;  %v8727_v31 = vpop.f32.mrb[49].mxu1  ;;  %v8729_v39 = vpop.f32.mrb[51].mxu0 }
 0x1f4   : > { %12824 = vst [vmem:[#allocation115_spill] sm:$0xff] %v8727_v31  ;;  %12825 = vst [vmem:[#allocation116_spill] sm:$0xff] %v8729_v39  ;;  %v8732_v45 = vmax.f32 %v2348_v3, %v8723_v58  ;;  %v2357_v33 = vmax.f32 %v8725_v50, %v8729_v39  ;;  %v8736_v55 = vpop.f32.mrb[50].mxu1 }
 0x1f5   : > { %12827 = vst [vmem:[#allocation118_spill] sm:$0xff] %v8736_v55  ;;  %v8738_v25 = vpop.f32.mrb[51].mxu1 }
 0x1f6   : > { %12826 = vst [vmem:[#allocation117_spill] sm:$0xff] %v8732_v45  ;;  %12828 = vst [vmem:[#allocation119_spill] sm:$0xff] %v8738_v25  ;;  %v8743_v18 = vmax.f32 %v2357_v33, %v8736_v55 }
 0x1f8   : > { %12829 = vst [vmem:[#allocation120_spill] sm:$0xff] %v8743_v18  ;;  %v8747_v22 = vpop.f32.mrb[52].mxu0 }
 0x1f9   : > { %12830 = vst [vmem:[#allocation121_spill] sm:$0xff] %v8747_v22  ;;  %v8749_v3 = vpop.f32.mrb[53].mxu0 }
 0x1fa   : > { %12831 = vst [vmem:[#allocation122_spill] sm:$0xff] %v8749_v3  ;;  %v2366_v58 = vmax.f32 %v8747_v22, %v8749_v3  ;;  %v8753_v50 = vpop.f32.mrb[52].mxu1  ;;  %v8755_v39 = vpop.f32.mrb[54].mxu0 }
 0x1fb   : > { %12832 = vst [vmem:[#allocation123_spill] sm:$0xff] %v8753_v50  ;;  %12833 = vst [vmem:[#allocation124_spill] sm:$0xff] %v8755_v39  ;;  %v8757_v19 = vpop.f32.mrb[53].mxu1  ;;  %v8759_v30 = vpop.f32.mrb[55].mxu0 }
 0x1fc   : > { %12834 = vst [vmem:[#allocation125_spill] sm:$0xff] %v8757_v19  ;;  %12835 = vst [vmem:[#allocation126_spill] sm:$0xff] %v8759_v30  ;;  %v8762_v33 = vmax.f32 %v2366_v58, %v8753_v50  ;;  %v2375_v20 = vmax.f32 %v8755_v39, %v8759_v30  ;;  %v8766_v55 = vpop.f32.mrb[54].mxu1 }
 0x1fd   : > { %12837 = vst [vmem:[#allocation128_spill] sm:$0xff] %v8766_v55  ;;  %v8768_v16 = vpop.f32.mrb[55].mxu1 }
 0x1fe   : > { %12836 = vst [vmem:[#allocation127_spill] sm:$0xff] %v8762_v33  ;;  %12838 = vst [vmem:[#allocation129_spill] sm:$0xff] %v8768_v16  ;;  %v8773_v3 = vmax.f32 %v2375_v20, %v8766_v55  ;;  %v1818_v16 = vlaneseq }
 0x200   : > { %12839 = vst [vmem:[#allocation130_spill] sm:$0xff] %v8773_v3  ;;  %v8777_v25 = vpop.f32.mrb[56].mxu0 }
 0x201   : > { %12840 = vst [vmem:[#allocation131_spill] sm:$0xff] %v8777_v25  ;;  %v8779_v58 = vpop.f32.mrb[57].mxu0 }
 0x202   : > { %12841 = vst [vmem:[#allocation132_spill] sm:$0xff] %v8779_v58  ;;  %v2384_v50 = vmax.f32 %v8777_v25, %v8779_v58  ;;  %v8783_v39 = vpop.f32.mrb[56].mxu1  ;;  %v8785_v30 = vpop.f32.mrb[58].mxu0 }
 0x203   : > { %12842 = vst [vmem:[#allocation133_spill] sm:$0xff] %v8783_v39  ;;  %12843 = vst [vmem:[#allocation134_spill] sm:$0xff] %v8785_v30  ;;  %v8787_v18 = vpop.f32.mrb[57].mxu1  ;;  %v8789_v22 = vpop.f32.mrb[59].mxu0 }
 0x204   : > { %12844 = vst [vmem:[#allocation135_spill] sm:$0xff] %v8787_v18  ;;  %12845 = vst [vmem:[#allocation136_spill] sm:$0xff] %v8789_v22  ;;  %v8792_v20 = vmax.f32 %v2384_v50, %v8783_v39  ;;  %v2393_v17 = vmax.f32 %v8785_v30, %v8789_v22  ;;  %v8796_v55 = vpop.f32.mrb[58].mxu1  ;;  %v1819_v50 = vand.u32 127, %v1818_v16 }
 0x205   : > { %12846 = vst [vmem:[#allocation137_spill] sm:$0xff] %v8796_v55  ;;  %v8798_v3 = vpop.f32.mrb[59].mxu1 }
 0x206   : > { %12847 = vst [vmem:[#allocation138_spill] sm:$0xff] %v8798_v3  ;;  %v8803_v58 = vmax.f32 %v2393_v17, %v8796_v55  ;;  %v8828_v55 = vadd.s32 768, %v1819_v50  ;;  %v12859_v50 = vmax.f32 %v8354_v23, %v8349_v21 }
 0x208   : > { %12848 = vst [vmem:[#allocation139_spill] sm:$0xff] %v8803_v58  ;;  %v8807_v33 = vpop.f32.mrb[60].mxu0  ;;  %v7866_v58 = vmov -inf   ;;  %vm1842_vm1 = vcmp.lt.s32.totalorder %v8828_v55, 798 }
 0x209   : > { %12849 = vst [vmem:[#allocation140_spill] sm:$0xff] %v8807_v33  ;;  %v8809_v39 = vpop.f32.mrb[61].mxu0  ;;  %309 = vst.msk [vmem:[#allocation2] sm:$0xff] %vm308_vm0, %v7866_v58 }
 0x20a   : > { %12850 = vst [vmem:[#allocation141_spill] sm:$0xff] %v8809_v39  ;;  %v2402_v30 = vmax.f32 %v8807_v33, %v8809_v39  ;;  %v8813_v22 = vpop.f32.mrb[60].mxu1  ;;  %v8815_v31 = vpop.f32.mrb[62].mxu0  ;;  %310 = vst.msk [vmem:[#allocation2 + $0x8] sm:$0xff] %vm308_vm0, %v7866_v58 }
 0x20b   : > { %12851 = vst [vmem:[#allocation142_spill] sm:$0xff] %v8813_v22  ;;  %12852 = vst [vmem:[#allocation143_spill] sm:$0xff] %v8815_v31  ;;  %v8817_v45 = vpop.f32.mrb[61].mxu1  ;;  %v8819_v25 = vpop.f32.mrb[63].mxu0 }
 0x20c   : > { %12853 = vst [vmem:[#allocation144_spill] sm:$0xff] %v8817_v45  ;;  %12854 = vst [vmem:[#allocation145_spill] sm:$0xff] %v8819_v25  ;;  %v8822_v17 = vmax.f32 %v2402_v30, %v8813_v22  ;;  %v2411_v19 = vmax.f32 %v8815_v31, %v8819_v25  ;;  %v8826_v16 = vpop.f32.mrb[62].mxu1 }
 0x20d   : > { %12855 = vst [vmem:[#allocation146_spill] sm:$0xff] %v8826_v16  ;;  %v8830_v3 = vpop.f32.mrb[63].mxu1  ;;  %311 = vst.msk [vmem:[#allocation2 + $0x10] sm:$0xff] %vm308_vm0, %v7866_v58 }
 0x20e   : > { %12856 = vst [vmem:[#allocation147_spill] sm:$0xff] %v8830_v3  ;;  %v8835_v39 = vmax.f32 %v2411_v19, %v8826_v16  ;;  %312 = vst.msk [vmem:[#allocation2 + $0x18] sm:$0xff] %vm308_vm0, %v7866_v58  ;;  %v12863_v19 = vmax.f32 %v8366_v28, %v8360_v26  ;;  %v12867_v28 = vmax.f32 %v8388_v37, %v8383_v35 }
 0x20f   : > { %313 = vst.msk [vmem:[#allocation2 + $0x20] sm:$0xff] %vm308_vm0, %v7866_v58  ;;  %314 = vst.msk [vmem:[#allocation2 + $0x28] sm:$0xff] %vm308_vm0, %v7866_v58 }
 0x210   : > { %12857 = vst [vmem:[#allocation148_spill] sm:$0xff] %v8835_v39  ;;  %315 = vst.msk [vmem:[#allocation2 + $0x30] sm:$0xff] %vm308_vm0, %v7866_v58  ;;  %v8871_v30 = vpop.f32.mrb[64].mxu0 }
 0x211   : > { %316 = vst.msk [vmem:[#allocation2 + $0x38] sm:$0xff] %vm308_vm0, %v7866_v58  ;;  %317 = vst.msk [vmem:[#allocation2 + $0x40] sm:$0xff] %vm308_vm0, %v7866_v58  ;;  %v2135_v33 = vmax.f32 %v12859_v50, %v8871_v30  ;;  %v8878_v16 = vpop.f32.mrb[65].mxu0 }
 0x212   : > { %318 = vst.msk [vmem:[#allocation2 + $0x48] sm:$0xff] %vm308_vm0, %v7866_v58  ;;  %319 = vst.msk [vmem:[#allocation2 + $0x50] sm:$0xff] %vm308_vm0, %v7866_v58  ;;  %v1658_v22 = vpop.f32.mrb[64].mxu1  ;;  %v8880_v31 = vpop.f32.mrb[66].mxu0 }
 0x213   : > { %320 = vst.msk [vmem:[#allocation2 + $0x58] sm:$0xff] %vm308_vm0, %v7866_v58  ;;  %321 = vst.msk [vmem:[#allocation2 + $0x60] sm:$0xff] %vm308_vm0, %v7866_v58  ;;  %v2136_v25 = vmax.f32 %v2135_v33, %v8878_v16  ;;  %v2144_v3 = vmax.f32 %v12863_v19, %v8880_v31  ;;  %v1660_v39 = vpop.f32.mrb[65].mxu1  ;;  %v8891_v45 = vpop.f32.mrb[67].mxu0 }
 0x214   : > { %322 = vst.msk [vmem:[#allocation2 + $0x68] sm:$0xff] %vm308_vm0, %v7866_v58  ;;  %323 = vst.msk [vmem:[#allocation2 + $0x70] sm:$0xff] %vm308_vm0, %v7866_v58  ;;  %v1662_v23 = vpop.f32.mrb[66].mxu1 }
 0x215   : > { %324 = vst.msk [vmem:[#allocation2 + $0x78] sm:$0xff] %vm308_vm0, %v7866_v58  ;;  %325 = vst.msk [vmem:[#allocation2 + $0x80] sm:$0xff] %vm308_vm0, %v7866_v58  ;;  %v2145_v50 = vmax.f32 %v2144_v3, %v8891_v45  ;;  %v8897_v33 = vsel %vm1842_vm1, %v1662_v23, -inf  ;;  %v12871_v23 = vmax.f32 %v8400_v42, %v8394_v40  ;;  %v12875_v42 = vmax.f32 %v8422_v51, %v8417_v49 }
 0x216   : > { %326 = vst.msk [vmem:[#allocation2 + $0x88] sm:$0xff] %vm308_vm0, %v7866_v58  ;;  %327 = vst.msk [vmem:[#allocation2 + $0x90] sm:$0xff] %vm308_vm0, %v7866_v58 }
 0x217   : > { %328 = vst.msk [vmem:[#allocation2 + $0x98] sm:$0xff] %vm308_vm0, %v7866_v58  ;;  %329 = vst.msk [vmem:[#allocation2 + $0xa0] sm:$0xff] %vm308_vm0, %v7866_v58 }
 0x218   : > { %330 = vst.msk [vmem:[#allocation2 + $0xa8] sm:$0xff] %vm308_vm0, %v7866_v58  ;;  %331 = vst.msk [vmem:[#allocation2 + $0xb0] sm:$0xff] %vm308_vm0, %v7866_v58 }
 0x219   : > { %332 = vst.msk [vmem:[#allocation2 + $0xb8] sm:$0xff] %vm308_vm0, %v7866_v58  ;;  %333 = vst.msk [vmem:[#allocation2 + $0xc0] sm:$0xff] %vm308_vm0, %v7866_v58 }
 0x21a   : > { %334 = vst.msk [vmem:[#allocation2 + $0xc8] sm:$0xff] %vm308_vm0, %v7866_v58  ;;  %335 = vst.msk [vmem:[#allocation2 + $0xd0] sm:$0xff] %vm308_vm0, %v7866_v58 }
 0x21b   : > { %336 = vst.msk [vmem:[#allocation2 + $0xd8] sm:$0xff] %vm308_vm0, %v7866_v58  ;;  %337 = vst.msk [vmem:[#allocation2 + $0xe0] sm:$0xff] %vm308_vm0, %v7866_v58 }
 0x21c   : > { %338 = vst.msk [vmem:[#allocation2 + $0xe8] sm:$0xff] %vm308_vm0, %v7866_v58  ;;  %339 = vst.msk [vmem:[#allocation2 + $0xf0] sm:$0xff] %vm308_vm0, %v7866_v58 }
 0x21d   : > { %340 = vst.msk [vmem:[#allocation2 + $0xf8] sm:$0xff] %vm308_vm0, %v7866_v58  ;;  %12858 = vst [vmem:[#allocation149_spill] sm:$0xff] %v8871_v30  ;;  %v8885_v58 = vsel %vm1842_vm1, %v1658_v22, -inf  ;;  %v1664_v30 = vpop.f32.mrb[67].mxu1  ;;  %v8899_v22 = vpop.f32.mrb[68].mxu0 }
 0x21e   : > { %12860 = vst [vmem:[#allocation150_spill] sm:$0xff] %v8878_v16  ;;  %12861 = vst [vmem:[#allocation151_spill] sm:$0xff] %v8880_v31  ;;  %v2137_v21 = vmax.f32 %v2136_v25, %v8885_v58  ;;  %v2153_v39 = vmax.f32 %v12867_v28, %v8899_v22  ;;  %v8905_v19 = vpop.f32.mrb[69].mxu0  ;;  %v2146_v31 = vmax.f32 %v2145_v50, %v8897_v33  ;;  %v1668_v3 = vpop.f32.mrb[68].mxu1 }
 0x21f   : > { %12862 = vst [vmem:[#allocation152_spill] sm:$0xff] %v8885_v58  ;;  %12864 = vst [vmem:[#allocation153_spill] sm:$0xff] %v8891_v45  ;;  %v8908_v30 = vpop.f32.mrb[70].mxu0  ;;  %v8913_v25 = vsel %vm1842_vm1, %v1668_v3, -inf  ;;  %v1670_v37 = vpop.f32.mrb[69].mxu1 }
 0x220   : > { %2139 = vmax.xlane.f32.xlu0 %v2137_v21  ;;  %12865 = vst [vmem:[#allocation154_spill] sm:$0xff] %v8897_v33  ;;  %12866 = vst [vmem:[#allocation155_spill] sm:$0xff] %v8899_v22  ;;  %v2154_v21 = vmax.f32 %v2153_v39, %v8905_v19  ;;  %v2162_v45 = vmax.f32 %v12871_v23, %v8908_v30  ;;  %v8919_v28 = vpop.f32.mrb[71].mxu0  ;;  %v1672_v22 = vpop.f32.mrb[70].mxu1 }
 0x221   : > { %12868 = vst [vmem:[#allocation156_spill] sm:$0xff] %v8905_v19  ;;  %12869 = vst [vmem:[#allocation157_spill] sm:$0xff] %v8908_v30  ;;  %v1674_v33 = vpop.f32.mrb[71].mxu1  ;;  %v8925_v39 = vsel %vm1842_vm1, %v1672_v22, -inf  ;;  %v8927_v3 = vpop.f32.mrb[72].mxu0 }
 0x222   : > { %12870 = vst [vmem:[#allocation158_spill] sm:$0xff] %v8913_v25  ;;  %12872 = vst [vmem:[#allocation159_spill] sm:$0xff] %v8919_v28  ;;  %v2163_v50 = vmax.f32 %v2162_v45, %v8919_v28  ;;  %v2155_v58 = vmax.f32 %v2154_v21, %v8913_v25  ;;  %v8933_v23 = vpop.f32.mrb[73].mxu0  ;;  %v1678_v45 = vpop.f32.mrb[72].mxu1  ;;  %v12879_v21 = vmax.f32 %v8434_v56, %v8428_v54  ;;  %v7867_v56 = vmov 0  }
 0x223   : > { %12873 = vst [vmem:[#allocation160_spill] sm:$0xff] %v8925_v39  ;;  %12874 = vst [vmem:[#allocation161_spill] sm:$0xff] %v8927_v3  ;;  %v8936_v33 = vpop.f32.mrb[74].mxu0  ;;  %v8941_v22 = vsel %vm1842_vm1, %v1678_v45, -inf  ;;  %v1680_v51 = vpop.f32.mrb[73].mxu1  ;;  %6897 = vset.pattern.permute.xlu0 %v7867_v56  ;;  %6898 = vset.pattern.permute.xlu1 %v7867_v56 }
 0x224   : > { %2148 = vmax.xlane.f32.xlu0 %v2146_v31  ;;  %2157 = vmax.xlane.f32.xlu1 %v2155_v58  ;;  %v2171_v31 = vmax.f32 %v12875_v42, %v8927_v3  ;;  %12876 = vst [vmem:[#allocation162_spill] sm:$0xff] %v8933_v23  ;;  %v2164_v37 = vmax.f32 %v2163_v50, %v8925_v39  ;;  %12877 = vst [vmem:[#allocation163_spill] sm:$0xff] %v8936_v33  ;;  %v8947_v42 = vpop.f32.mrb[75].mxu0  ;;  %v1682_v30 = vpop.f32.mrb[74].mxu1 }
 0x225   : > { %12878 = vst [vmem:[#allocation164_spill] sm:$0xff] %v8941_v22  ;;  %v2180_v28 = vmax.f32 %v12879_v21, %v8936_v33  ;;  %12880 = vst [vmem:[#allocation165_spill] sm:$0xff] %v8947_v42  ;;  %v1684_v39 = vpop.f32.mrb[75].mxu1  ;;  %v12887_v51 = vmax.f32 %v8468_v6, %v8462_v4  ;;  %v12891_v6 = vmax.f32 %v8490_v14, %v8485_v13  ;;  %v9627_v4 = vld [vmem:[#allocation2 + $0xd0] sm:$0xff]  ;;  %v9637_v13 = vld [vmem:[#allocation2 + $0xd8] sm:$0xff] }
 0x226   : > { %v2172_v58 = vmax.f32 %v2171_v31, %v8933_v23  ;;  %v8953_v31 = vsel %vm1842_vm1, %v1682_v30, -inf }
 0x227   : > { %v2181_v50 = vmax.f32 %v2180_v28, %v8947_v42  ;;  %12881 = vst [vmem:[#allocation166_spill] sm:$0xff] %v8953_v31 }
 0x228   : > { %2166 = vmax.xlane.f32.xlu1 %v2164_v37  ;;  %v2173_v3 = vmax.f32 %v2172_v58, %v8941_v22  ;;  %v8956_v23 = vpop.f32.mrb[76].mxu0  ;;  %v12883_v37 = vmax.f32 %v8456_v1, %v8451_v63  ;;  %v9541_v22 = vld [vmem:[#allocation2 + $0x98] sm:$0xff] }
 0x229   : > { %v2182_v45 = vmax.f32 %v2181_v50, %v8953_v31  ;;  %12882 = vst [vmem:[#allocation167_spill] sm:$0xff] %v8956_v23  ;;  %v8962_v39 = vpop.f32.mrb[77].mxu0 }
 0x22a   : > { %2175 = vmax.xlane.f32.xlu0 %v2173_v3  ;;  %v2189_v28 = vmax.f32 %v12883_v37, %v8956_v23  ;;  %12884 = vst [vmem:[#allocation168_spill] sm:$0xff] %v8962_v39  ;;  %v1688_v58 = vpop.f32.mrb[76].mxu1  ;;  %v8964_v21 = vpop.f32.mrb[78].mxu0 }
 0x22b   : > { %12885 = vst [vmem:[#allocation169_spill] sm:$0xff] %v8964_v21  ;;  %v8968_v30 = vsel %vm1842_vm1, %v1688_v58, -inf  ;;  %v2198_v50 = vmax.f32 %v12887_v51, %v8964_v21  ;;  %v1690_v56 = vpop.f32.mrb[77].mxu1  ;;  %v8975_v1 = vpop.f32.mrb[79].mxu0 }
 0x22c   : > { %2184 = vmax.xlane.f32.xlu1 %v2182_v45  ;;  %12886 = vst [vmem:[#allocation170_spill] sm:$0xff] %v8968_v30  ;;  %v2190_v3 = vmax.f32 %v2189_v28, %v8962_v39  ;;  %12888 = vst [vmem:[#allocation171_spill] sm:$0xff] %v8975_v1  ;;  %v1692_v45 = vpop.f32.mrb[78].mxu1 }
 0x22d   : > { %v2199_v37 = vmax.f32 %v2198_v50, %v8975_v1  ;;  %v1694_v31 = vpop.f32.mrb[79].mxu1  ;;  %v8981_v58 = vsel %vm1842_vm1, %v1692_v45, -inf  ;;  %v12895_v45 = vmax.f32 %v8502_v52, %v8496_v38  ;;  %v12899_v52 = vmax.f32 %v8522_v15, %v8517_v46 }
 0x22e   : > { %v2191_v42 = vmax.f32 %v2190_v3, %v8968_v30  ;;  %12889 = vst [vmem:[#allocation172_spill] sm:$0xff] %v8981_v58 }
 0x22f   : > { %v2200_v28 = vmax.f32 %v2199_v37, %v8981_v58 }
 0x230   : > { %2193 = vmax.xlane.f32.xlu0 %v2191_v42  ;;  %v8984_v33 = vpop.f32.mrb[80].mxu0 }
 0x231   : > { %12890 = vst [vmem:[#allocation173_spill] sm:$0xff] %v8984_v33  ;;  %v2207_v51 = vmax.f32 %v12891_v6, %v8984_v33  ;;  %2202 = vmax.xlane.f32.xlu1 %v2200_v28  ;;  %v8990_v56 = vpop.f32.mrb[81].mxu0 }
 0x232   : > { %12892 = vst [vmem:[#allocation174_spill] sm:$0xff] %v8990_v56  ;;  %v1698_v31 = vpop.f32.mrb[80].mxu1  ;;  %v8992_v50 = vpop.f32.mrb[82].mxu0 }
 0x233   : > { %12893 = vst [vmem:[#allocation175_spill] sm:$0xff] %v8992_v50  ;;  %v8996_v3 = vsel %vm1842_vm1, %v1698_v31, -inf  ;;  %v2208_v42 = vmax.f32 %v2207_v51, %v8990_v56  ;;  %v2216_v37 = vmax.f32 %v12895_v45, %v8992_v50  ;;  %v1700_v58 = vpop.f32.mrb[81].mxu1  ;;  %v9003_v14 = vpop.f32.mrb[83].mxu0 }
 0x234   : > { %12894 = vst [vmem:[#allocation176_spill] sm:$0xff] %v8996_v3  ;;  %12896 = vst [vmem:[#allocation177_spill] sm:$0xff] %v9003_v14  ;;  %v1702_v28 = vpop.f32.mrb[82].mxu1 }
 0x235   : > { %v2217_v6 = vmax.f32 %v2216_v37, %v9003_v14  ;;  %v1704_v1 = vpop.f32.mrb[83].mxu1  ;;  %v2209_v21 = vmax.f32 %v2208_v42, %v8996_v3  ;;  %v9009_v31 = vsel %vm1842_vm1, %v1702_v28, -inf  ;;  %v12903_v28 = vmax.f32 %v8533_v29, %v8528_v43  ;;  %v9514_v3 = vld [vmem:[#allocation2 + $0x88] sm:$0xff] }
 0x236   : > { %12897 = vst [vmem:[#allocation178_spill] sm:$0xff] %v9009_v31  ;;  %v12907_v29 = vmax.f32 %v8552_v60, %v8547_v10 }
 0x237   : > { %2211 = vmax.xlane.f32.xlu0 %v2209_v21  ;;  %v2218_v51 = vmax.f32 %v2217_v6, %v9009_v31 }
 0x238   : > { %v9012_v56 = vpop.f32.mrb[84].mxu0 }
 0x239   : > { %12898 = vst [vmem:[#allocation179_spill] sm:$0xff] %v9012_v56  ;;  %v2225_v58 = vmax.f32 %v12899_v52, %v9012_v56  ;;  %2220 = vmax.xlane.f32.xlu1 %v2218_v51  ;;  %v9018_v45 = vpop.f32.mrb[85].mxu0  ;;  %v9512_v56 = vld [vmem:[#allocation2 + $0x80] sm:$0xff] }
 0x23a   : > { %12900 = vst [vmem:[#allocation180_spill] sm:$0xff] %v9018_v45  ;;  %v1708_v1 = vpop.f32.mrb[84].mxu1  ;;  %v9020_v37 = vpop.f32.mrb[86].mxu0 }
 0x23b   : > { %12901 = vst [vmem:[#allocation181_spill] sm:$0xff] %v9020_v37  ;;  %v9024_v42 = vsel %vm1842_vm1, %v1708_v1, -inf  ;;  %v2226_v21 = vmax.f32 %v2225_v58, %v9018_v45  ;;  %v2234_v6 = vmax.f32 %v12903_v28, %v9020_v37  ;;  %v1710_v31 = vpop.f32.mrb[85].mxu1  ;;  %v9031_v15 = vpop.f32.mrb[87].mxu0 }
 0x23c   : > { %12902 = vst [vmem:[#allocation182_spill] sm:$0xff] %v9024_v42  ;;  %12904 = vst [vmem:[#allocation183_spill] sm:$0xff] %v9031_v15  ;;  %v1712_v51 = vpop.f32.mrb[86].mxu1 }
 0x23d   : > { %v2235_v52 = vmax.f32 %v2234_v6, %v9031_v15  ;;  %v1714_v14 = vpop.f32.mrb[87].mxu1  ;;  %v2227_v50 = vmax.f32 %v2226_v21, %v9024_v42  ;;  %v9037_v1 = vsel %vm1842_vm1, %v1712_v51, -inf }
 0x23e   : > { %12905 = vst [vmem:[#allocation184_spill] sm:$0xff] %v9037_v1 }
 0x23f   : > { %2229 = vmax.xlane.f32.xlu0 %v2227_v50  ;;  %v2236_v58 = vmax.f32 %v2235_v52, %v9037_v1  ;;  %v12910_v50 = vmax.f32 %v8563_v7, %v8558_v32  ;;  %v9496_v32 = vld [vmem:[#allocation2 + $0x78] sm:$0xff] }
 0x240   : > { %v9040_v45 = vpop.f32.mrb[88].mxu0 }
 0x241   : > { %12906 = vst [vmem:[#allocation185_spill] sm:$0xff] %v9040_v45  ;;  %v2243_v31 = vmax.f32 %v12907_v29, %v9040_v45  ;;  %2238 = vmax.xlane.f32.xlu1 %v2236_v58  ;;  %v9046_v28 = vpop.f32.mrb[89].mxu0 }
 0x242   : > { %12908 = vst [vmem:[#allocation186_spill] sm:$0xff] %v9046_v28  ;;  %v9048_v14 = vpop.f32.mrb[90].mxu0  ;;  %v1718_v21 = vpop.f32.mrb[88].mxu1 }
 0x243   : > { %12909 = vst [vmem:[#allocation187_spill] sm:$0xff] %v9048_v14  ;;  %v2244_v6 = vmax.f32 %v2243_v31, %v9046_v28  ;;  %v2252_v51 = vmax.f32 %v12910_v50, %v9048_v14  ;;  %v9057_v52 = vsel %vm1842_vm1, %v1718_v21, -inf  ;;  %v9059_v1 = vpop.f32.mrb[91].mxu0  ;;  %v1720_v60 = vpop.f32.mrb[89].mxu1  ;;  %v12915_v21 = vmax.f32 %v8582_v27, %v8577_v11  ;;  %v9494_v11 = vld [vmem:[#allocation2 + $0x70] sm:$0xff] }
 0x244   : > { %12911 = vst [vmem:[#allocation188_spill] sm:$0xff] %v9057_v52  ;;  %12912 = vst [vmem:[#allocation189_spill] sm:$0xff] %v9059_v1  ;;  %v1722_v58 = vpop.f32.mrb[90].mxu1 }
 0x245   : > { %v2253_v29 = vmax.f32 %v2252_v51, %v9059_v1  ;;  %v9064_v45 = vsel %vm1842_vm1, %v1722_v58, -inf  ;;  %v2245_v31 = vmax.f32 %v2244_v6, %v9057_v52  ;;  %v1724_v28 = vpop.f32.mrb[91].mxu1 }
 0x246   : > { %12913 = vst [vmem:[#allocation190_spill] sm:$0xff] %v9064_v45  ;;  %v12918_v28 = vmax.f32 %v8593_v57, %v8588_v8 }
 0x247   : > { %2247 = vmax.xlane.f32.xlu0 %v2245_v31  ;;  %v2254_v7 = vmax.f32 %v2253_v29, %v9064_v45 }
 0x248   : > { %v9068_v50 = vpop.f32.mrb[92].mxu0 }
 0x249   : > { %12914 = vst [vmem:[#allocation191_spill] sm:$0xff] %v9068_v50  ;;  %v2261_v60 = vmax.f32 %v12915_v21, %v9068_v50  ;;  %2256 = vmax.xlane.f32.xlu1 %v2254_v7  ;;  %v9074_v14 = vpop.f32.mrb[93].mxu0  ;;  %v6999_v50 = vld [vmem:[%s9322_s18 + $0x68] sm:$0xff]  }
 0x24a   : > { %12916 = vst [vmem:[#allocation192_spill] sm:$0xff] %v9074_v14  ;;  %v9076_v51 = vpop.f32.mrb[94].mxu0  ;;  %v1728_v58 = vpop.f32.mrb[92].mxu1 }
 0x24b   : > { %12917 = vst [vmem:[#allocation193_spill] sm:$0xff] %v9076_v51  ;;  %v2262_v1 = vmax.f32 %v2261_v60, %v9074_v14  ;;  %v2270_v6 = vmax.f32 %v12918_v28, %v9076_v51  ;;  %v9085_v29 = vsel %vm1842_vm1, %v1728_v58, -inf  ;;  %v9087_v31 = vpop.f32.mrb[95].mxu0  ;;  %v1730_v27 = vpop.f32.mrb[93].mxu1  ;;  %v12923_v58 = vmax.f32 %v8612_v12, %v8607_v62 }
 0x24c   : > { %12919 = vst [vmem:[#allocation194_spill] sm:$0xff] %v9085_v29  ;;  %12920 = vst [vmem:[#allocation195_spill] sm:$0xff] %v9087_v31  ;;  %v1732_v7 = vpop.f32.mrb[94].mxu1 }
 0x24d   : > { %v2271_v21 = vmax.f32 %v2270_v6, %v9087_v31  ;;  %v9092_v45 = vsel %vm1842_vm1, %v1732_v7, -inf  ;;  %v2263_v60 = vmax.f32 %v2262_v1, %v9085_v29  ;;  %v1734_v14 = vpop.f32.mrb[95].mxu1  ;;  %v12926_v1 = vmax.f32 %v8623_v5, %v8618_v0  ;;  %v9360_v29 = vld [vmem:[#allocation2 + $0x18] sm:$0xff] }
 0x24e   : > { %12921 = vst [vmem:[#allocation196_spill] sm:$0xff] %v9092_v45 }
 0x24f   : > { %2265 = vmax.xlane.f32.xlu0 %v2263_v60  ;;  %v2272_v57 = vmax.f32 %v2271_v21, %v9092_v45 }
 0x250   : > { %v9096_v28 = vpop.f32.mrb[96].mxu0 }
 0x251   : > { %12922 = vst [vmem:[#allocation197_spill] sm:$0xff] %v9096_v28  ;;  %v2279_v27 = vmax.f32 %v12923_v58, %v9096_v28  ;;  %2274 = vmax.xlane.f32.xlu1 %v2272_v57  ;;  %v9102_v51 = vpop.f32.mrb[97].mxu0  ;;  %v6995_v28 = vld [vmem:[%s9322_s18 + $0x60] sm:$0xff]  }
 0x252   : > { %12924 = vst [vmem:[#allocation198_spill] sm:$0xff] %v9102_v51  ;;  %v9104_v6 = vpop.f32.mrb[98].mxu0  ;;  %v1738_v7 = vpop.f32.mrb[96].mxu1 }
 0x253   : > { %12925 = vst [vmem:[#allocation199_spill] sm:$0xff] %v9104_v6  ;;  %v2280_v31 = vmax.f32 %v2279_v27, %v9102_v51  ;;  %v2288_v14 = vmax.f32 %v12926_v1, %v9104_v6  ;;  %v9113_v21 = vsel %vm1842_vm1, %v1738_v7, -inf  ;;  %v9115_v60 = vpop.f32.mrb[99].mxu0  ;;  %v1740_v12 = vpop.f32.mrb[97].mxu1  ;;  %v12931_v7 = vmax.f32 %v8642_v9, %v8637_v59  ;;  %v9478_v59 = vld [vmem:[#allocation2 + $0x68] sm:$0xff] }
 0x254   : > { %12927 = vst [vmem:[#allocation200_spill] sm:$0xff] %v9113_v21  ;;  %12928 = vst [vmem:[#allocation201_spill] sm:$0xff] %v9115_v60  ;;  %v1742_v57 = vpop.f32.mrb[98].mxu1 }
 0x255   : > { %v2289_v58 = vmax.f32 %v2288_v14, %v9115_v60  ;;  %v9120_v45 = vsel %vm1842_vm1, %v1742_v57, -inf  ;;  %v2281_v27 = vmax.f32 %v2280_v31, %v9113_v21  ;;  %v1744_v51 = vpop.f32.mrb[99].mxu1 }
 0x256   : > { %12929 = vst [vmem:[#allocation202_spill] sm:$0xff] %v9120_v45  ;;  %v12934_v51 = vmax.f32 %v8653_v24, %v8648_v53 }
 0x257   : > { %2283 = vmax.xlane.f32.xlu0 %v2281_v27  ;;  %v2290_v5 = vmax.f32 %v2289_v58, %v9120_v45 }
 0x258   : > { %v9124_v1 = vpop.f32.mrb[100].mxu0 }
 0x259   : > { %12930 = vst [vmem:[#allocation203_spill] sm:$0xff] %v9124_v1  ;;  %v2297_v12 = vmax.f32 %v12931_v7, %v9124_v1  ;;  %2292 = vmax.xlane.f32.xlu1 %v2290_v5  ;;  %v9130_v6 = vpop.f32.mrb[101].mxu0  ;;  %v9333_v1 = vld [vmem:[#allocation2 + $0x8] sm:$0xff] }
 0x25a   : > { %12932 = vst [vmem:[#allocation204_spill] sm:$0xff] %v9130_v6  ;;  %v9132_v14 = vpop.f32.mrb[102].mxu0  ;;  %v1748_v57 = vpop.f32.mrb[100].mxu1 }
 0x25b   : > { %12933 = vst [vmem:[#allocation205_spill] sm:$0xff] %v9132_v14  ;;  %v2298_v60 = vmax.f32 %v2297_v12, %v9130_v6  ;;  %v2306_v31 = vmax.f32 %v12934_v51, %v9132_v14  ;;  %v9141_v58 = vsel %vm1842_vm1, %v1748_v57, -inf  ;;  %v9143_v27 = vpop.f32.mrb[103].mxu0  ;;  %v1750_v9 = vpop.f32.mrb[101].mxu1  ;;  %v12939_v57 = vmax.f32 %v8672_v61, %v8667_v47  ;;  %v9458_v47 = vld [vmem:[#allocation2 + $0x58] sm:$0xff] }
 0x25c   : > { %12935 = vst [vmem:[#allocation206_spill] sm:$0xff] %v9141_v58  ;;  %12936 = vst [vmem:[#allocation207_spill] sm:$0xff] %v9143_v27  ;;  %v1752_v5 = vpop.f32.mrb[102].mxu1 }
 0x25d   : > { %v2307_v7 = vmax.f32 %v2306_v31, %v9143_v27  ;;  %v9148_v45 = vsel %vm1842_vm1, %v1752_v5, -inf  ;;  %v2299_v12 = vmax.f32 %v2298_v60, %v9141_v58  ;;  %v1754_v6 = vpop.f32.mrb[103].mxu1 }
 0x25e   : > { %12937 = vst [vmem:[#allocation208_spill] sm:$0xff] %v9148_v45  ;;  %v12942_v6 = vmax.f32 %v8683_v2, %v8678_v44 }
 0x25f   : > { %2301 = vmax.xlane.f32.xlu0 %v2299_v12  ;;  %v2308_v24 = vmax.f32 %v2307_v7, %v9148_v45 }
 0x260   : > { %v9152_v51 = vpop.f32.mrb[104].mxu0 }
 0x261   : > { %12938 = vst [vmem:[#allocation209_spill] sm:$0xff] %v9152_v51  ;;  %v2315_v9 = vmax.f32 %v12939_v57, %v9152_v51  ;;  %2310 = vmax.xlane.f32.xlu1 %v2308_v24  ;;  %v9158_v14 = vpop.f32.mrb[105].mxu0 }
 0x262   : > { %12940 = vst [vmem:[#allocation210_spill] sm:$0xff] %v9158_v14  ;;  %v9160_v31 = vpop.f32.mrb[106].mxu0  ;;  %v1758_v5 = vpop.f32.mrb[104].mxu1 }
 0x263   : > { %12941 = vst [vmem:[#allocation211_spill] sm:$0xff] %v9160_v31  ;;  %v2316_v27 = vmax.f32 %v2315_v9, %v9158_v14  ;;  %v2324_v60 = vmax.f32 %v12942_v6, %v9160_v31  ;;  %v9169_v7 = vsel %vm1842_vm1, %v1758_v5, -inf  ;;  %v9171_v12 = vpop.f32.mrb[107].mxu0  ;;  %v1760_v61 = vpop.f32.mrb[105].mxu1  ;;  %v12947_v5 = vmax.f32 %v8702_v48, %v8697_v34 }
 0x264   : > { %12943 = vst [vmem:[#allocation212_spill] sm:$0xff] %v9169_v7  ;;  %12944 = vst [vmem:[#allocation213_spill] sm:$0xff] %v9171_v12  ;;  %v1762_v24 = vpop.f32.mrb[106].mxu1 }
 0x265   : > { %v2325_v57 = vmax.f32 %v2324_v60, %v9171_v12  ;;  %v9176_v45 = vsel %vm1842_vm1, %v1762_v24, -inf  ;;  %v2317_v9 = vmax.f32 %v2316_v27, %v9169_v7  ;;  %v1764_v14 = vpop.f32.mrb[107].mxu1 }
 0x266   : > { %12945 = vst [vmem:[#allocation214_spill] sm:$0xff] %v9176_v45  ;;  %v12950_v14 = vmax.f32 %v8713_v41, %v8708_v36  ;;  %v7009_v36 = vld [vmem:[%s9322_s18 + $0x38] sm:$0xff]  }
 0x267   : > { %2319 = vmax.xlane.f32.xlu1 %v2317_v9  ;;  %v2326_v2 = vmax.f32 %v2325_v57, %v9176_v45 }
 0x268   : > { %v9180_v6 = vpop.f32.mrb[108].mxu0 }
 0x269   : > { %12946 = vst [vmem:[#allocation215_spill] sm:$0xff] %v9180_v6  ;;  %v2333_v61 = vmax.f32 %v12947_v5, %v9180_v6  ;;  %2328 = vmax.xlane.f32.xlu0 %v2326_v2  ;;  %v9186_v31 = vpop.f32.mrb[109].mxu0 }
 0x26a   : > { %12948 = vst [vmem:[#allocation216_spill] sm:$0xff] %v9186_v31  ;;  %v9188_v60 = vpop.f32.mrb[110].mxu0  ;;  %v1768_v24 = vpop.f32.mrb[108].mxu1 }
 0x26b   : > { %12949 = vst [vmem:[#allocation217_spill] sm:$0xff] %v9188_v60  ;;  %v2334_v12 = vmax.f32 %v2333_v61, %v9186_v31  ;;  %v2342_v27 = vmax.f32 %v12950_v14, %v9188_v60  ;;  %v9197_v57 = vsel %vm1842_vm1, %v1768_v24, -inf  ;;  %v9199_v9 = vpop.f32.mrb[111].mxu0  ;;  %v1770_v48 = vpop.f32.mrb[109].mxu1  ;;  %v12955_v24 = vld [vmem:[#allocation117_spill] sm:$0xff]  ;;  %v12956_v60 = vld [vmem:[#allocation115_spill] sm:$0xff] }
 0x26c   : > { %12951 = vst [vmem:[#allocation218_spill] sm:$0xff] %v9197_v57  ;;  %12952 = vst [vmem:[#allocation219_spill] sm:$0xff] %v9199_v9  ;;  %v1772_v2 = vpop.f32.mrb[110].mxu1  ;;  %v12957_v6 = vmax.f32 %v12955_v24, %v12956_v60  ;;  %v9414_v60 = vld [vmem:[#allocation2 + $0x38] sm:$0xff] }
 0x26d   : > { %v2343_v5 = vmax.f32 %v2342_v27, %v9199_v9  ;;  %v9204_v45 = vsel %vm1842_vm1, %v1772_v2, -inf  ;;  %v2335_v61 = vmax.f32 %v2334_v12, %v9197_v57  ;;  %v1774_v31 = vpop.f32.mrb[111].mxu1  ;;  %v12961_v12 = vld [vmem:[#allocation119_spill] sm:$0xff] }
 0x26e   : > { %12953 = vst [vmem:[#allocation220_spill] sm:$0xff] %v9204_v45  ;;  %v12960_v31 = vld [vmem:[#allocation120_spill] sm:$0xff] }
 0x26f   : > { %2337 = vmax.xlane.f32.xlu1 %v2335_v61  ;;  %v2344_v41 = vmax.f32 %v2343_v5, %v9204_v45  ;;  %v12962_v61 = vmax.f32 %v12960_v31, %v12961_v12  ;;  %v7007_v12 = vld [vmem:[%s9322_s18 + $0x78] sm:$0xff]  }
 0x270   : > { %v9208_v14 = vpop.f32.mrb[112].mxu0 }
 0x271   : > { %12954 = vst [vmem:[#allocation221_spill] sm:$0xff] %v9208_v14  ;;  %v2351_v48 = vmax.f32 %v12957_v6, %v9208_v14  ;;  %2346 = vmax.xlane.f32.xlu0 %v2344_v41  ;;  %v9214_v7 = vpop.f32.mrb[113].mxu0 }
 0x272   : > { %12958 = vst [vmem:[#allocation117_spill] sm:$0xff] %v9214_v7  ;;  %v9216_v27 = vpop.f32.mrb[114].mxu0  ;;  %v1778_v2 = vpop.f32.mrb[112].mxu1 }
 0x273   : > { %12959 = vst [vmem:[#allocation222_spill] sm:$0xff] %v9216_v27  ;;  %v2352_v9 = vmax.f32 %v2351_v48, %v9214_v7  ;;  %v2360_v5 = vmax.f32 %v12962_v61, %v9216_v27  ;;  %v9225_v45 = vsel %vm1842_vm1, %v1778_v2, -inf  ;;  %v9227_v57 = vpop.f32.mrb[115].mxu0  ;;  %v1780_v6 = vpop.f32.mrb[113].mxu1  ;;  %v12967_v2 = vld [vmem:[#allocation127_spill] sm:$0xff]  ;;  %v12968_v27 = vld [vmem:[#allocation125_spill] sm:$0xff] }
 0x274   : > { %12963 = vst [vmem:[#allocation120_spill] sm:$0xff] %v9225_v45  ;;  %12964 = vst [vmem:[#allocation223_spill] sm:$0xff] %v9227_v57  ;;  %v1782_v41 = vpop.f32.mrb[114].mxu1  ;;  %v12969_v51 = vmax.f32 %v12967_v2, %v12968_v27  ;;  %v7003_v27 = vld [vmem:[%s9322_s18 + $0x70] sm:$0xff]  }
 0x275   : > { %v2361_v24 = vmax.f32 %v2360_v5, %v9227_v57  ;;  %v9232_v14 = vsel %vm1842_vm1, %v1782_v41, -inf  ;;  %v2353_v48 = vmax.f32 %v2352_v9, %v9225_v45  ;;  %v1784_v7 = vpop.f32.mrb[115].mxu1  ;;  %v12973_v9 = vld [vmem:[#allocation129_spill] sm:$0xff] }
 0x276   : > { %12965 = vst [vmem:[#allocation224_spill] sm:$0xff] %v9232_v14  ;;  %v12972_v7 = vld [vmem:[#allocation130_spill] sm:$0xff] }
 0x277   : > { %2355 = vmax.xlane.f32.xlu0 %v2353_v48  ;;  %v2362_v31 = vmax.f32 %v2361_v24, %v9232_v14  ;;  %v12974_v48 = vmax.f32 %v12972_v7, %v12973_v9 }
 0x278   : > { %v9236_v61 = vpop.f32.mrb[116].mxu0 }
 0x279   : > { %12966 = vst [vmem:[#allocation225_spill] sm:$0xff] %v9236_v61  ;;  %v2369_v6 = vmax.f32 %v12969_v51, %v9236_v61  ;;  %2364 = vmax.xlane.f32.xlu1 %v2362_v31  ;;  %v9242_v58 = vpop.f32.mrb[117].mxu0 }
 0x27a   : > { %12970 = vst [vmem:[#allocation127_spill] sm:$0xff] %v9242_v58  ;;  %v9244_v5 = vpop.f32.mrb[118].mxu0  ;;  %v1788_v41 = vpop.f32.mrb[116].mxu1 }
 0x27b   : > { %12971 = vst [vmem:[#allocation226_spill] sm:$0xff] %v9244_v5  ;;  %v2370_v57 = vmax.f32 %v2369_v6, %v9242_v58  ;;  %v2378_v24 = vmax.f32 %v12974_v48, %v9244_v5  ;;  %v9253_v14 = vsel %vm1842_vm1, %v1788_v41, -inf  ;;  %v9255_v45 = vpop.f32.mrb[119].mxu0  ;;  %v1790_v51 = vpop.f32.mrb[117].mxu1  ;;  %v12979_v41 = vmax.f32 %v8792_v20, %v8787_v18  ;;  %v9382_v18 = vld [vmem:[#allocation2 + $0x28] sm:$0xff] }
 0x27c   : > { %12975 = vst [vmem:[#allocation130_spill] sm:$0xff] %v9253_v14  ;;  %12976 = vst [vmem:[#allocation227_spill] sm:$0xff] %v9255_v45  ;;  %v1792_v31 = vpop.f32.mrb[118].mxu1 }
 0x27d   : > { %v2379_v2 = vmax.f32 %v2378_v24, %v9255_v45  ;;  %v9260_v61 = vsel %vm1842_vm1, %v1792_v31, -inf  ;;  %v2371_v6 = vmax.f32 %v2370_v57, %v9253_v14  ;;  %v1794_v58 = vpop.f32.mrb[119].mxu1  ;;  %v12983_v57 = vld [vmem:[#allocation138_spill] sm:$0xff] }
 0x27e   : > { %12977 = vst [vmem:[#allocation228_spill] sm:$0xff] %v9260_v61  ;;  %v12982_v58 = vld [vmem:[#allocation139_spill] sm:$0xff] }
 0x27f   : > { %2373 = vmax.xlane.f32.xlu1 %v2371_v6  ;;  %v2380_v7 = vmax.f32 %v2379_v2, %v9260_v61  ;;  %v12984_v6 = vmax.f32 %v12982_v58, %v12983_v57 }
 0x280   : > { %v9264_v48 = vpop.f32.mrb[120].mxu0 }
 0x281   : > { %12978 = vst [vmem:[#allocation229_spill] sm:$0xff] %v9264_v48  ;;  %v2387_v51 = vmax.f32 %v12979_v41, %v9264_v48  ;;  %2382 = vmax.xlane.f32.xlu0 %v2380_v7  ;;  %v9270_v5 = vpop.f32.mrb[121].mxu0 }
 0x282   : > { %12980 = vst [vmem:[#allocation230_spill] sm:$0xff] %v9270_v5  ;;  %v9272_v24 = vpop.f32.mrb[122].mxu0  ;;  %v1798_v31 = vpop.f32.mrb[120].mxu1 }
 0x283   : > { %12981 = vst [vmem:[#allocation231_spill] sm:$0xff] %v9272_v24  ;;  %v2388_v45 = vmax.f32 %v2387_v51, %v9270_v5  ;;  %v2396_v2 = vmax.f32 %v12984_v6, %v9272_v24  ;;  %v9281_v61 = vsel %vm1842_vm1, %v1798_v31, -inf  ;;  %v9283_v14 = vpop.f32.mrb[123].mxu0  ;;  %v1800_v20 = vpop.f32.mrb[121].mxu1  ;;  %v12989_v31 = vld [vmem:[#allocation144_spill] sm:$0xff] }
 0x284   : > { %12985 = vst [vmem:[#allocation139_spill] sm:$0xff] %v9281_v61  ;;  %12986 = vst [vmem:[#allocation232_spill] sm:$0xff] %v9283_v14  ;;  %v1802_v7 = vpop.f32.mrb[122].mxu1  ;;  %v12990_v20 = vmax.f32 %v8822_v17, %v12989_v31 }
 0x285   : > { %v2397_v41 = vmax.f32 %v2396_v2, %v9283_v14  ;;  %v9288_v48 = vsel %vm1842_vm1, %v1802_v7, -inf  ;;  %v2389_v51 = vmax.f32 %v2388_v45, %v9281_v61  ;;  %v1804_v5 = vpop.f32.mrb[123].mxu1  ;;  %v9327_v45 = vld [vmem:[#allocation2] sm:$0xff] }
 0x286   : > { %12987 = vst [vmem:[#allocation233_spill] sm:$0xff] %v9288_v48  ;;  %v12993_v5 = vld [vmem:[#allocation148_spill] sm:$0xff] }
 0x287   : > { %2391 = vmax.xlane.f32.xlu0 %v2389_v51  ;;  %v2398_v58 = vmax.f32 %v2397_v41, %v9288_v48  ;;  %v12994_v41 = vld [vmem:[#allocation147_spill] sm:$0xff] }
 0x288   : > { %v9292_v6 = vpop.f32.mrb[124].mxu0  ;;  %v12995_v51 = vmax.f32 %v12993_v5, %v12994_v41  ;;  %v6979_v5 = vld [vmem:[%s9322_s18 + $0x40] sm:$0xff]   ;;  %v6984_v41 = vld [vmem:[%s9322_s18 + $0xc8] sm:$0xff]  }
 0x289   : > { %12988 = vst [vmem:[#allocation234_spill] sm:$0xff] %v9292_v6  ;;  %v9298_v24 = vmax.f32 %v12990_v20, %v9292_v6  ;;  %2400 = vmax.xlane.f32.xlu1 %v2398_v58  ;;  %v9300_v2 = vpop.f32.mrb[125].mxu0  ;;  %6370 = vmatprep.subr.bf16.mxu0 %v6979_v5  ;;  %v6983_v58 = vld [vmem:[%s9322_s18 + $0x48] sm:$0xff]  }
 0x28a   : > { %12991 = vst [vmem:[#allocation235_spill] sm:$0xff] %v9300_v2  ;;  %v9302_v7 = vpop.f32.mrb[126].mxu0  ;;  %v9304_v14 = vpop.f32.mrb[124].mxu1  ;;  %v6985_v6 = vld [vmem:[%s9322_s18 + $0x8] sm:$0xff]  }
 0x28b   : > { %12992 = vst [vmem:[#allocation236_spill] sm:$0xff] %v9302_v7  ;;  %v9312_v48 = vmax.f32 %v12995_v51, %v9302_v7  ;;  %v9314_v61 = vpop.f32.mrb[127].mxu0  ;;  %v1810_v17 = vpop.f32.mrb[125].mxu1  ;;  %v6980_v51 = vld [vmem:[%s9322_s18 + $0xc0] sm:$0xff]   ;;  %v6986_v5 = vld [vmem:[%s9322_s18 + $0x88] sm:$0xff]  }
 0x28c   : > { %12996 = vst [vmem:[#allocation148_spill] sm:$0xff] %v9314_v61  ;;  %v9316_v20 = vpop.f32.mrb[126].mxu1  ;;  %v6981_v17 = vld [vmem:[%s9322_s18] sm:$0xff]   ;;  %6482 = vmatprep.subr.bf16.mxu1 %v6980_v51  ;;  %v6987_v51 = vld [vmem:[%s9322_s18 + $0x50] sm:$0xff]  }
 0x28d   : > { %v1814_v31 = vpop.f32.mrb[127].mxu1  ;;  %6371 = vmatpush3.bf16.msra.mxu0 %v6981_v17  ;;  %v6988_v17 = vld [vmem:[%s9322_s18 + $0xd0] sm:$0xff]   ;;  %v9519_v42 = vsel %vm1842_vm1, %v9316_v20, -inf  ;;  %v12998_v39 = vmax.f32 %v9312_v48, %v9314_v61  ;;  %v9562_v20 = vld [vmem:[#allocation2 + $0xa0] sm:$0xff] }
 0x28e   : > { %v6982_v31 = vld [vmem:[%s9322_s18 + $0x80] sm:$0xff]   ;;  %6372 = vmatprep.subr.bf16.mxu0 %v6983_v58  ;;  %12997 = vst [vmem:[#allocation237_spill] sm:$0xff] %v9519_v42 }
 0x28f   : > { %6483 = vmatpush3.bf16.msra.mxu1 %v6982_v31  ;;  %v6991_v31 = vld [vmem:[%s9322_s18 + $0x58] sm:$0xff]   ;;  %v2416_v23 = vmax.f32 %v12998_v39, %v9519_v42  ;;  %v9564_v42 = vld [vmem:[#allocation2 + $0xa8] sm:$0xff] }
 0x290   : > { %6484 = vmatprep.subr.bf16.mxu1 %v6984_v41  ;;  %v6989_v41 = vld [vmem:[%s9322_s18 + $0x10] sm:$0xff]  }
 0x291   : > { %6373 = vmatpush3.bf16.msra.mxu0 %v6985_v6 }
 0x292   : > { %6374 = vmatprep.subr.bf16.mxu0 %v6987_v51  ;;  %v6992_v51 = vld [vmem:[%s9322_s18 + $0xd8] sm:$0xff]  }
 0x293   : > { %6485 = vmatpush3.bf16.msra.mxu1 %v6986_v5  ;;  %v9351_v5 = vld [vmem:[#allocation2 + $0x10] sm:$0xff] }
 0x294   : > { %6486 = vmatprep.subr.bf16.mxu1 %v6988_v17 }
 0x295   : > { %6375 = vmatpush3.bf16.msra.mxu0 %v6989_v41 }
 0x296   : > { %6376 = vmatprep.subr.bf16.mxu0 %v6991_v31  ;;  %v6996_v31 = vld [vmem:[%s9322_s18 + $0xe0] sm:$0xff]  }
 0x2ad   : > { %v2140_v7 = vpop.xlane.xlu0 %2139 }
 0x2ae   : > { %v9337_v21 = vmax.f32 %v9327_v45, %v2140_v7  ;;  %v6990_v7 = vld [vmem:[%s9322_s18 + $0x90] sm:$0xff]  }
 0x2af   : > { %6487 = vmatpush3.bf16.msra.mxu1 %v6990_v7  ;;  %v6994_v7 = vld [vmem:[%s9322_s18 + $0x98] sm:$0xff]  }
 0x2b0   : > { %5465 = vst.msk [vmem:[#allocation2] sm:$0xff] %vm308_vm0, %v9337_v21  ;;  %2550 = vperm.xlu0 %6897, %v9337_v21   ;;  %6488 = vmatprep.subr.bf16.mxu1 %v6992_v51  ;;  %v6997_v51 = vld [vmem:[%s9322_s18 + $0x20] sm:$0xff]  }
 0x2b1   : > { %v2149_v58 = vpop.xlane.xlu0 %2148  ;;  %v2158_v17 = vpop.xlane.xlu1 %2157 }
 0x2b2   : > { %v9349_v6 = vmax.f32 %v9333_v1, %v2149_v58  ;;  %v6993_v58 = vld [vmem:[%s9322_s18 + $0x18] sm:$0xff]   ;;  %v9364_v41 = vmax.f32 %v9351_v5, %v2158_v17  ;;  %v9374_v17 = vld [vmem:[#allocation2 + $0x20] sm:$0xff] }
 0x2b3   : > { %6377 = vmatpush3.bf16.msra.mxu0 %v6993_v58  ;;  %6489 = vmatpush3.bf16.msra.mxu1 %v6994_v7  ;;  %v6998_v58 = vld [vmem:[%s9322_s18 + $0xa0] sm:$0xff]  }
 0x2b4   : > { %5466 = vst.msk [vmem:[#allocation2 + $0x8] sm:$0xff] %vm308_vm0, %v9349_v6  ;;  %2555 = vperm.xlu1 %6898, %v9349_v6   ;;  %5467 = vst.msk [vmem:[#allocation2 + $0x10] sm:$0xff] %vm308_vm0, %v9364_v41  ;;  %6378 = vmatprep.subr.bf16.mxu0 %v6995_v28  ;;  %v13003_v54 = vsub.f32 %v9351_v5, %v9364_v41 }
 0x2b5   : > { %v2167_v52 = vpop.xlane.xlu1 %2166  ;;  %6490 = vmatprep.subr.bf16.mxu1 %v6996_v31  ;;  %v7001_v31 = vld [vmem:[%s9322_s18 + $0x28] sm:$0xff]  }
 0x2b6   : > { %v9378_v57 = vmax.f32 %v9360_v29, %v2167_v52  ;;  %v7000_v52 = vld [vmem:[%s9322_s18 + $0xe8] sm:$0xff]   ;;  %v2488_v16 = vmul.f32 1.442695, %v13003_v54 }
 0x2b7   : > { %6379 = vmatpush3.bf16.msra.mxu0 %v6997_v51  ;;  %6491 = vmatpush3.bf16.msra.mxu1 %v6998_v58  ;;  %v2176_v28 = vpop.xlane.xlu0 %2175  ;;  %v7002_v51 = vld [vmem:[%s9322_s18 + $0xa8] sm:$0xff]   ;;  %v7004_v58 = vld [vmem:[%s9322_s18 + $0xf0] sm:$0xff]  }
 0x2b8   : > { %2560 = vperm.xlu1 %6898, %v9364_v41   ;;  %5468 = vst.msk [vmem:[#allocation2 + $0x18] sm:$0xff] %vm308_vm0, %v9378_v57  ;;  %6380 = vmatprep.subr.bf16.mxu0 %v6999_v50  ;;  %v9392_v9 = vmax.f32 %v9374_v17, %v2176_v28  ;;  %v7005_v28 = vld [vmem:[%s9322_s18 + $0x30] sm:$0xff]  }
 0x2b9   : > { %6492 = vmatprep.subr.bf16.mxu1 %v7000_v52  ;;  %v2185_v7 = vpop.xlane.xlu1 %2184  ;;  %v9405_v52 = vld [vmem:[#allocation2 + $0x30] sm:$0xff] }
 0x2ba   : > { %5469 = vst.msk [vmem:[#allocation2 + $0x20] sm:$0xff] %vm308_vm0, %v9392_v9  ;;  %v9401_v50 = vmax.f32 %v9382_v18, %v2185_v7  ;;  %2570 = vperm.xlu0 %6897, %v9392_v9   ;;  %v7006_v7 = vld [vmem:[%s9322_s18 + $0xb0] sm:$0xff]  }
 0x2bb   : > { %6381 = vmatpush3.bf16.msra.mxu0 %v7001_v31  ;;  %6493 = vmatpush3.bf16.msra.mxu1 %v7002_v51  ;;  %v7008_v51 = vld [vmem:[%s9322_s18 + $0xf8] sm:$0xff]  }
 0x2bc   : > { %2565 = vperm.xlu1 %6898, %v9378_v57   ;;  %6382 = vmatprep.subr.bf16.mxu0 %v7003_v27  ;;  %5470 = vst.msk [vmem:[#allocation2 + $0x28] sm:$0xff] %vm308_vm0, %v9401_v50  ;;  %v7010_v31 = vld [vmem:[%s9322_s18 + $0xb8] sm:$0xff]   ;;  %v13006_v5 = vsub.f32 %v9382_v18, %v9401_v50 }
 0x2bd   : > { %6494 = vmatprep.subr.bf16.mxu1 %v7004_v58  ;;  %v2194_v27 = vpop.xlane.xlu0 %2193 }
 0x2be   : > { %2575 = vperm.xlu0 %6897, %v9401_v50   ;;  %v9420_v34 = vmax.f32 %v9405_v52, %v2194_v27  ;;  %v2203_v44 = vpop.xlane.xlu1 %2202  ;;  %v2494_v41 = vmul.f32 1.442695, %v13006_v5 }
 0x2bf   : > { %6383 = vmatpush3.bf16.msra.mxu0 %v7005_v28  ;;  %6495 = vmatpush3.bf16.msra.mxu1 %v7006_v7  ;;  %v9428_v28 = vmax.f32 %v9414_v60, %v2203_v44  ;;  %v9435_v7 = vld [vmem:[#allocation2 + $0x40] sm:$0xff] }
 0x2c0   : > { %6384 = vmatprep.subr.bf16.mxu0 %v7007_v12  ;;  %6496 = vmatprep.subr.bf16.mxu1 %v7008_v51  ;;  %5471 = vst.msk [vmem:[#allocation2 + $0x30] sm:$0xff] %vm308_vm0, %v9420_v34 }
 0x2c1   : > { %2580 = vperm.xlu1 %6898, %v9420_v34   ;;  %5472 = vst.msk [vmem:[#allocation2 + $0x38] sm:$0xff] %vm308_vm0, %v9428_v28 }
 0x2c3   : > { %6385 = vmatpush3.bf16.msra.mxu0 %v7009_v36  ;;  %6497 = vmatpush3.bf16.msra.mxu1 %v7010_v31  ;;  %v9438_v36 = vld [vmem:[#allocation2 + $0x48] sm:$0xff] }
 0x2c4   : > { %v2212_v51 = vpop.xlane.xlu0 %2211 }
 0x2c5   : > { %2585 = vperm.xlu1 %6898, %v9428_v28   ;;  %v9441_v27 = vmax.f32 %v9435_v7, %v2212_v51  ;;  %v9455_v51 = vld [vmem:[#allocation2 + $0x50] sm:$0xff] }
 0x2c6   : > { %v2221_v44 = vpop.xlane.xlu1 %2220 }
 0x2c7   : > { %5473 = vst.msk [vmem:[#allocation2 + $0x40] sm:$0xff] %vm308_vm0, %v9441_v27  ;;  %v9448_v12 = vmax.f32 %v9438_v36, %v2221_v44  ;;  %2590 = vperm.xlu0 %6897, %v9441_v27  }
 0x2c9   : > { %5474 = vst.msk [vmem:[#allocation2 + $0x48] sm:$0xff] %vm308_vm0, %v9448_v12 }
 0x2cb   : > { %2595 = vperm.xlu0 %6897, %v9448_v12  }
 0x2cc   : > { %v2230_v31 = vpop.xlane.xlu0 %2229 }
 0x2cd   : > { %v9461_v53 = vmax.f32 %v9455_v51, %v2230_v31  ;;  %v9475_v31 = vld [vmem:[#allocation2 + $0x60] sm:$0xff] }
 0x2ce   : > { %v2239_v44 = vpop.xlane.xlu1 %2238 }
 0x2cf   : > { %5475 = vst.msk [vmem:[#allocation2 + $0x50] sm:$0xff] %vm308_vm0, %v9461_v53  ;;  %v9468_v58 = vmax.f32 %v9458_v47, %v2239_v44  ;;  %2600 = vperm.xlu1 %6898, %v9461_v53  }
 0x2d1   : > { %5476 = vst.msk [vmem:[#allocation2 + $0x58] sm:$0xff] %vm308_vm0, %v9468_v58 }
 0x2d3   : > { %2605 = vperm.xlu1 %6898, %v9468_v58  }
 0x2d4   : > { %v2248_v37 = vpop.xlane.xlu0 %2247 }
 0x2d5   : > { %v9481_v0 = vmax.f32 %v9475_v31, %v2248_v37 }
 0x2d6   : > { %v2257_v44 = vpop.xlane.xlu1 %2256 }
 0x2d7   : > { %5477 = vst.msk [vmem:[#allocation2 + $0x60] sm:$0xff] %vm308_vm0, %v9481_v0  ;;  %v9488_v15 = vmax.f32 %v9478_v59, %v2257_v44 }
 0x2d9   : > { %5478 = vst.msk [vmem:[#allocation2 + $0x68] sm:$0xff] %vm308_vm0, %v9488_v15 }
 0x2dc   : > { %v2266_v37 = vpop.xlane.xlu0 %2265 }
 0x2dd   : > { %v9499_v10 = vmax.f32 %v9494_v11, %v2266_v37 }
 0x2de   : > { %v2275_v62 = vpop.xlane.xlu1 %2274 }
 0x2df   : > { %5479 = vst.msk [vmem:[#allocation2 + $0x70] sm:$0xff] %vm308_vm0, %v9499_v10  ;;  %v9506_v44 = vmax.f32 %v9496_v32, %v2275_v62 }
 0x2e1   : > { %5480 = vst.msk [vmem:[#allocation2 + $0x78] sm:$0xff] %vm308_vm0, %v9506_v44 }
 0x2e4   : > { %v2284_v37 = vpop.xlane.xlu0 %2283 }
 0x2e5   : > { %v9522_v33 = vmax.f32 %v9512_v56, %v2284_v37  ;;  %v9539_v37 = vld [vmem:[#allocation2 + $0x90] sm:$0xff] }
 0x2e6   : > { %v2293_v62 = vpop.xlane.xlu1 %2292 }
 0x2e7   : > { %5481 = vst.msk [vmem:[#allocation2 + $0x80] sm:$0xff] %vm308_vm0, %v9522_v33  ;;  %v9529_v30 = vmax.f32 %v9514_v3, %v2293_v62 }
 0x2e9   : > { %5482 = vst.msk [vmem:[#allocation2 + $0x88] sm:$0xff] %vm308_vm0, %v9529_v30 }
 0x2ea   : > { %2418 = vmax.xlane.f32.xlu0 %v2416_v23 }
 0x2ec   : > { %v2302_v8 = vpop.xlane.xlu0 %2301 }
 0x2ed   : > { %v9544_v62 = vmax.f32 %v9539_v37, %v2302_v8  ;;  %v9560_v8 = vsel %vm1842_vm1, %v9304_v14, -inf }
 0x2ee   : > { %v2311_v25 = vpop.xlane.xlu1 %2310  ;;  %12999 = vst [vmem:[#allocation238_spill] sm:$0xff] %v9560_v8 }
 0x2ef   : > { %5483 = vst.msk [vmem:[#allocation2 + $0x90] sm:$0xff] %vm308_vm0, %v9544_v62  ;;  %v9551_v39 = vmax.f32 %v9541_v22, %v2311_v25  ;;  %v13000_v25 = vmax.f32 %v9298_v24, %v9300_v2 }
 0x2f1   : > { %5484 = vst.msk [vmem:[#allocation2 + $0x98] sm:$0xff] %vm308_vm0, %v9551_v39  ;;  %v2407_v23 = vmax.f32 %v13000_v25, %v9560_v8  ;;  %v9586_v25 = vld [vmem:[#allocation2 + $0xb8] sm:$0xff] }
 0x2f4   : > { %v2320_v48 = vpop.xlane.xlu1 %2319 }
 0x2f5   : > { %v9567_v61 = vmax.f32 %v9562_v20, %v2320_v48  ;;  %v9584_v48 = vld [vmem:[#allocation2 + $0xb0] sm:$0xff] }
 0x2f6   : > { %v2329_v19 = vpop.xlane.xlu0 %2328 }
 0x2f7   : > { %5485 = vst.msk [vmem:[#allocation2 + $0xa0] sm:$0xff] %vm308_vm0, %v9567_v61  ;;  %v9578_v55 = vmax.f32 %v9564_v42, %v2329_v19  ;;  %2409 = vmax.xlane.f32.xlu1 %v2407_v23  ;;  %v9606_v19 = vld [vmem:[#allocation2 + $0xc8] sm:$0xff] }
 0x2f9   : > { %5486 = vst.msk [vmem:[#allocation2 + $0xa8] sm:$0xff] %vm308_vm0, %v9578_v55 }
 0x2fc   : > { %v2338_v24 = vpop.xlane.xlu1 %2337 }
 0x2fd   : > { %v9589_v43 = vmax.f32 %v9584_v48, %v2338_v24  ;;  %v9603_v24 = vld [vmem:[#allocation2 + $0xc0] sm:$0xff] }
 0x2fe   : > { %v2347_v8 = vpop.xlane.xlu0 %2346 }
 0x2ff   : > { %5487 = vst.msk [vmem:[#allocation2 + $0xb0] sm:$0xff] %vm308_vm0, %v9589_v43  ;;  %v9596_v23 = vmax.f32 %v9586_v25, %v2347_v8 }
 0x300   : > { %2610 = vperm.xlu0 %6897, %v9481_v0  }
 0x301   : > { %5488 = vst.msk [vmem:[#allocation2 + $0xb8] sm:$0xff] %vm308_vm0, %v9596_v23 }
 0x304   : > { %v2356_v2 = vpop.xlane.xlu0 %2355  ;;  %2615 = vperm.xlu0 %6897, %v9488_v15  }
 0x305   : > { %v9609_v46 = vmax.f32 %v9603_v24, %v2356_v2  ;;  %v13001_v2 = vsub.f32 %v9327_v45, %v9337_v21  ;;  %v13004_v21 = vsub.f32 %v9360_v29, %v9378_v57  ;;  %v9673_v57 = vld [vmem:[#allocation2 + $0xe0] sm:$0xff] }
 0x306   : > { %v2365_v8 = vpop.xlane.xlu1 %2364 }
 0x307   : > { %5489 = vst.msk [vmem:[#allocation2 + $0xc0] sm:$0xff] %vm308_vm0, %v9609_v46  ;;  %v9616_v14 = vmax.f32 %v9606_v19, %v2365_v8  ;;  %v2484_v38 = vmul.f32 1.442695, %v13001_v2  ;;  %v13002_v8 = vsub.f32 %v9333_v1, %v9349_v6  ;;  %v2490_v45 = vmul.f32 1.442695, %v13004_v21  ;;  %v9683_v21 = vld [vmem:[#allocation2 + $0xe8] sm:$0xff] }
 0x308   : > { %2630 = vperm.xlu1 %6898, %v9522_v33   ;;  %2620 = vperm.xlu0 %6897, %v9499_v10   ;;  %v13005_v1 = vsub.f32 %v9374_v17, %v9392_v9  ;;  %v13010_v17 = vsub.f32 %v9438_v36, %v9448_v12 }
 0x309   : > { %5490 = vst.msk [vmem:[#allocation2 + $0xc8] sm:$0xff] %vm308_vm0, %v9616_v14  ;;  %v2486_v63 = vmul.f32 1.442695, %v13002_v8  ;;  %7043 = vpow2.f32 %v2484_v38  ;;  %v13007_v38 = vsub.f32 %v9405_v52, %v9420_v34  ;;  %v13009_v34 = vsub.f32 %v9435_v7, %v9441_v27 }
 0x30a   : > { %v2492_v6 = vmul.f32 1.442695, %v13005_v1  ;;  %v2502_v50 = vmul.f32 1.442695, %v13010_v17  ;;  %v13012_v7 = vsub.f32 %v9458_v47, %v9468_v58 }
 0x30b   : > { %7045 = vpow2.f32 %v2486_v63  ;;  %v2496_v29 = vmul.f32 1.442695, %v13007_v38  ;;  %v13008_v63 = vsub.f32 %v9414_v60, %v9428_v28  ;;  %v13011_v60 = vsub.f32 %v9455_v51, %v9461_v53 }
 0x30c   : > { %v2374_v49 = vpop.xlane.xlu1 %2373  ;;  %2655 = vperm.xlu1 %6898, %v9578_v55   ;;  %2625 = vperm.xlu0 %6897, %v9506_v44   ;;  %7047 = vpow2.f32 %v2488_v16  ;;  %v2500_v16 = vmul.f32 1.442695, %v13009_v34  ;;  %v2506_v27 = vmul.f32 1.442695, %v13012_v7  ;;  %v13013_v53 = vsub.f32 %v9475_v31, %v9481_v0 }
 0x30d   : > { %v9643_v2 = vmax.f32 %v9627_v4, %v2374_v49  ;;  %7049 = vpow2.f32 %v2490_v45  ;;  %v2498_v18 = vmul.f32 1.442695, %v13008_v63  ;;  %v2504_v52 = vmul.f32 1.442695, %v13011_v60 }
 0x30e   : > { %v2383_v54 = vpop.xlane.xlu0 %2382  ;;  %7051 = vpow2.f32 %v2492_v6  ;;  %v2508_v36 = vmul.f32 1.442695, %v13013_v53  ;;  %v13014_v45 = vsub.f32 %v9478_v59, %v9488_v15  ;;  %v13016_v0 = vsub.f32 %v9494_v11, %v9499_v10 }
 0x30f   : > { %v2478_v8 = vsub.f32 %v9627_v4, %v9643_v2  ;;  %5491 = vst.msk [vmem:[#allocation2 + $0xd0] sm:$0xff] %vm308_vm0, %v9643_v2  ;;  %v9656_v49 = vmax.f32 %v9637_v13, %v2383_v54  ;;  %7053 = vpow2.f32 %v2494_v41  ;;  %v13018_v15 = vsub.f32 %v9496_v32, %v9506_v44 }
 0x310   : > { %2665 = vperm.xlu1 %6898, %v9596_v23   ;;  %2635 = vperm.xlu0 %6897, %v9529_v30   ;;  %7055 = vpow2.f32 %v2496_v29  ;;  %v2510_v1 = vmul.f32 1.442695, %v13014_v45  ;;  %v2512_v31 = vmul.f32 1.442695, %v13016_v0  ;;  %v13020_v11 = vsub.f32 %v9512_v56, %v9522_v33  ;;  %v13044_v45 = vld [vmem:[#allocation22_spill] sm:$0xff]  ;;  %v13046_v0 = vld [vmem:[#allocation20_spill] sm:$0xff] }
 0x311   : > { %v2479_v9 = vsub.f32 %v9637_v13, %v9656_v49  ;;  %5492 = vst.msk [vmem:[#allocation2 + $0xd8] sm:$0xff] %vm308_vm0, %v9656_v49  ;;  %7057 = vpow2.f32 %v2498_v18  ;;  %v2514_v54 = vmul.f32 1.442695, %v13018_v15  ;;  %v13022_v32 = vsub.f32 %v9514_v3, %v9529_v30 }
 0x312   : > { %7059 = vpow2.f32 %v2500_v16  ;;  %v2516_v10 = vmul.f32 1.442695, %v13020_v11  ;;  %v13024_v63 = vsub.f32 %v9539_v37, %v9544_v62  ;;  %v13026_v56 = vsub.f32 %v9541_v22, %v9551_v39 }
 0x313   : > { %7061 = vpow2.f32 %v2502_v50  ;;  %v9704_v58 = vpop.eup %7043  ;;  %v2518_v44 = vmul.f32 1.442695, %v13022_v32  ;;  %v13028_v3 = vsub.f32 %v9562_v20, %v9567_v61  ;;  %v13032_v22 = vsub.f32 %v9584_v48, %v9589_v43 }
 0x314   : > { %v2392_v28 = vpop.xlane.xlu0 %2391  ;;  %2675 = vperm.xlu1 %6898, %v9616_v14   ;;  %2640 = vperm.xlu0 %6897, %v9544_v62   ;;  %13015 = vst [vmem:[#allocation239_spill] sm:$0xff] %v9704_v58  ;;  %7063 = vpow2.f32 %v2504_v52  ;;  %v2520_v18 = vmul.f32 1.442695, %v13024_v63  ;;  %v2522_v34 = vmul.f32 1.442695, %v13026_v56  ;;  %v13030_v62 = vsub.f32 %v9564_v42, %v9578_v55 }
 0x315   : > { %v9689_v12 = vmax.f32 %v9673_v57, %v2392_v28  ;;  %v9711_v59 = vpop.eup %7045  ;;  %7065 = vpow2.f32 %v2506_v27  ;;  %v2524_v16 = vmul.f32 1.442695, %v13028_v3  ;;  %v13036_v55 = vsub.f32 %v9603_v24, %v9609_v46  ;;  %v7011_v24 = vld [vmem:[%s9322_s18 + $0x140] sm:$0xff]  }
 0x316   : > { %v2401_v51 = vpop.xlane.xlu1 %2400  ;;  %13017 = vst [vmem:[#allocation240_spill] sm:$0xff] %v9711_v59  ;;  %v9720_v41 = vpop.eup %7047  ;;  %7067 = vpow2.f32 %v2508_v36  ;;  %v2526_v17 = vmul.f32 1.442695, %v13030_v62  ;;  %v13039_v28 = vsub.f32 %v9606_v19, %v9616_v14  ;;  %v7013_v27 = vld [vmem:[%s9322_s18 + $0x1c0] sm:$0xff]   ;;  %v2538_v36 = vmul.f32 1.442695, %v2479_v9  ;;  %6594 = vmatprep.subr.bf16.mxu0 %v7011_v24 }
 0x317   : > { %v2480_v6 = vsub.f32 %v9673_v57, %v9689_v12  ;;  %5493 = vst.msk [vmem:[#allocation2 + $0xe0] sm:$0xff] %vm308_vm0, %v9689_v12  ;;  %v9702_v47 = vmax.f32 %v9683_v21, %v2401_v51  ;;  %13019 = vst [vmem:[#allocation241_spill] sm:$0xff] %v9720_v41  ;;  %v9725_v38 = vpop.eup %7049  ;;  %7069 = vpow2.f32 %v2510_v1  ;;  %v2532_v52 = vmul.f32 1.442695, %v13036_v55  ;;  %6706 = vmatprep.subr.bf16.mxu1 %v7013_v27  ;;  %v13054_v62 = vld [vmem:[#allocation24_spill] sm:$0xff]  ;;  %v13059_v27 = vld [vmem:[#allocation25_spill] sm:$0xff] }
 0x318   : > { %2685 = vperm.xlu1 %6898, %v9656_v49   ;;  %2645 = vperm.xlu0 %6897, %v9551_v39   ;;  %13021 = vst [vmem:[#allocation242_spill] sm:$0xff] %v9725_v38  ;;  %v9730_v29 = vpop.eup %7051  ;;  %7071 = vpow2.f32 %v2512_v31  ;;  %v2528_v39 = vmul.f32 1.442695, %v13032_v22  ;;  %v2534_v7 = vmul.f32 1.442695, %v13039_v28  ;;  %v7868_v15 = vmov 0.0  }
 0x319   : > { %v2481_v5 = vsub.f32 %v9683_v21, %v9702_v47  ;;  %5494 = vst.msk [vmem:[#allocation2 + $0xe8] sm:$0xff] %vm308_vm0, %v9702_v47  ;;  %13023 = vst [vmem:[#allocation243_spill] sm:$0xff] %v9730_v29  ;;  %v9737_v33 = vpop.eup %7053  ;;  %7073 = vpow2.f32 %v2514_v54  ;;  %v7024_v59 = vld [vmem:[%s9322_s18 + $0x118] sm:$0xff]  }
 0x31a   : > { %13025 = vst [vmem:[#allocation244_spill] sm:$0xff] %v9737_v33  ;;  %v9742_v30 = vpop.eup %7055  ;;  %7075 = vpow2.f32 %v2516_v10  ;;  %341 = vst.msk [vmem:[#allocation3] sm:$0xff] %vm308_vm0, %v7868_v15  ;;  %v7025_v38 = vld [vmem:[%s9322_s18 + $0x1d8] sm:$0xff]  }
 0x31b   : > { %13027 = vst [vmem:[#allocation245_spill] sm:$0xff] %v9742_v30  ;;  %v9747_v37 = vpop.eup %7057  ;;  %7077 = vpow2.f32 %v2518_v44  ;;  %342 = vst.msk [vmem:[#allocation3 + $0x8] sm:$0xff] %vm308_vm0, %v7868_v15  ;;  %v7026_v41 = vld [vmem:[%s9322_s18 + $0x198] sm:$0xff]  }
 0x31c   : > { %2695 = vperm.xlu1 %6898, %v9702_v47   ;;  %2650 = vperm.xlu0 %6897, %v9567_v61   ;;  %13029 = vst [vmem:[#allocation246_spill] sm:$0xff] %v9747_v37  ;;  %v9752_v50 = vpop.eup %7059  ;;  %7079 = vpow2.f32 %v2520_v18  ;;  %v13034_v61 = vsub.f32 %v9586_v25, %v9596_v23  ;;  %v2536_v23 = vmul.f32 1.442695, %v2478_v8  ;;  %v13045_v8 = vld [vmem:[#allocation18_spill] sm:$0xff]  ;;  %343 = vst.msk [vmem:[#allocation3 + $0x10] sm:$0xff] %vm308_vm0, %v7868_v15  ;;  %v13051_v18 = vld [vmem:[#allocation23_spill] sm:$0xff] }
 0x31d   : > { %13031 = vst [vmem:[#allocation247_spill] sm:$0xff] %v9752_v50  ;;  %v9758_v60 = vpop.eup %7061  ;;  %7081 = vpow2.f32 %v2522_v34  ;;  %344 = vst.msk [vmem:[#allocation3 + $0x18] sm:$0xff] %vm308_vm0, %v7868_v15  ;;  %v13052_v34 = vld [vmem:[#allocation21_spill] sm:$0xff] }
 0x31e   : > { %13033 = vst [vmem:[#allocation248_spill] sm:$0xff] %v9758_v60  ;;  %v2530_v20 = vmul.f32 1.442695, %v13034_v61  ;;  %v9763_v42 = vpop.eup %7063  ;;  %7083 = vpow2.f32 %v2524_v16  ;;  %345 = vst.msk [vmem:[#allocation3 + $0x20] sm:$0xff] %vm308_vm0, %v7868_v15  ;;  %v7023_v37 = vld [vmem:[%s9322_s18 + $0x158] sm:$0xff]  }
 0x31f   : > { %13035 = vst [vmem:[#allocation249_spill] sm:$0xff] %v9763_v42  ;;  %v9768_v48 = vpop.eup %7065  ;;  %7085 = vpow2.f32 %v2526_v17  ;;  %346 = vst.msk [vmem:[#allocation3 + $0x28] sm:$0xff] %vm308_vm0, %v7868_v15 }
 0x320   : > { %2660 = vperm.xlu0 %6897, %v9589_v43   ;;  %13037 = vst [vmem:[#allocation250_spill] sm:$0xff] %v9768_v48  ;;  %v9770_v43 = vpop.eup %7067  ;;  %7087 = vpow2.f32 %v2528_v39  ;;  %347 = vst.msk [vmem:[#allocation3 + $0x30] sm:$0xff] %vm308_vm0, %v7868_v15 }
 0x321   : > { %13038 = vst [vmem:[#allocation251_spill] sm:$0xff] %v9770_v43  ;;  %v9776_v25 = vpop.eup %7069  ;;  %7089 = vpow2.f32 %v2530_v20  ;;  %348 = vst.msk [vmem:[#allocation3 + $0x38] sm:$0xff] %vm308_vm0, %v7868_v15 }
 0x322   : > { %13040 = vst [vmem:[#allocation252_spill] sm:$0xff] %v9776_v25  ;;  %v9783_v53 = vpop.eup %7071  ;;  %7091 = vpow2.f32 %v2532_v52  ;;  %349 = vst.msk [vmem:[#allocation3 + $0x40] sm:$0xff] %vm308_vm0, %v7868_v15 }
 0x323   : > { %13041 = vst [vmem:[#allocation253_spill] sm:$0xff] %v9783_v53  ;;  %v9790_v19 = vpop.eup %7073  ;;  %350 = vst.msk [vmem:[#allocation3 + $0x48] sm:$0xff] %vm308_vm0, %v7868_v15  ;;  %7093 = vpow2.f32 %v2534_v7  ;;  %v13058_v7 = vld [vmem:[#allocation26_spill] sm:$0xff] }
 0x324   : > { %2670 = vperm.xlu0 %6897, %v9609_v46   ;;  %13042 = vst [vmem:[#allocation254_spill] sm:$0xff] %v9790_v19  ;;  %v13043_v46 = vld [vmem:[#allocation19_spill] sm:$0xff]  ;;  %351 = vst.msk [vmem:[#allocation3 + $0x50] sm:$0xff] %vm308_vm0, %v7868_v15  ;;  %v9832_v13 = vpop.eup %7075  ;;  %7095 = vpow2.f32 %v2536_v23 }
 0x325   : > { %352 = vst.msk [vmem:[#allocation3 + $0x58] sm:$0xff] %vm308_vm0, %v7868_v15  ;;  %353 = vst.msk [vmem:[#allocation3 + $0x60] sm:$0xff] %vm308_vm0, %v7868_v15  ;;  %v9835_v49 = vpop.eup %7077  ;;  %7097 = vpow2.f32 %v2538_v36  ;;  %v13097_v19 = vld [vmem:[#allocation151_spill] sm:$0xff] }
 0x326   : > { %354 = vst.msk [vmem:[#allocation3 + $0x68] sm:$0xff] %vm308_vm0, %v7868_v15  ;;  %355 = vst.msk [vmem:[#allocation3 + $0x70] sm:$0xff] %vm308_vm0, %v7868_v15  ;;  %v9837_v10 = vpop.eup %7079 }
 0x327   : > { %356 = vst.msk [vmem:[#allocation3 + $0x78] sm:$0xff] %vm308_vm0, %v7868_v15  ;;  %357 = vst.msk [vmem:[#allocation3 + $0x80] sm:$0xff] %vm308_vm0, %v7868_v15  ;;  %v9841_v63 = vpop.eup %7081 }
 0x328   : > { %358 = vst.msk [vmem:[#allocation3 + $0x88] sm:$0xff] %vm308_vm0, %v7868_v15  ;;  %359 = vst.msk [vmem:[#allocation3 + $0x90] sm:$0xff] %vm308_vm0, %v7868_v15  ;;  %2680 = vperm.xlu0 %6897, %v9643_v2   ;;  %v9849_v16 = vpop.eup %7083 }
 0x329   : > { %360 = vst.msk [vmem:[#allocation3 + $0x98] sm:$0xff] %vm308_vm0, %v7868_v15  ;;  %361 = vst.msk [vmem:[#allocation3 + $0xa0] sm:$0xff] %vm308_vm0, %v7868_v15  ;;  %v9854_v22 = vpop.eup %7085 }
 0x32a   : > { %362 = vst.msk [vmem:[#allocation3 + $0xa8] sm:$0xff] %vm308_vm0, %v7868_v15  ;;  %363 = vst.msk [vmem:[#allocation3 + $0xb0] sm:$0xff] %vm308_vm0, %v7868_v15  ;;  %v9856_v55 = vpop.eup %7087 }
 0x32b   : > { %364 = vst.msk [vmem:[#allocation3 + $0xb8] sm:$0xff] %vm308_vm0, %v7868_v15  ;;  %365 = vst.msk [vmem:[#allocation3 + $0xc0] sm:$0xff] %vm308_vm0, %v7868_v15  ;;  %v9860_v28 = vpop.eup %7089 }
 0x32c   : > { %366 = vst.msk [vmem:[#allocation3 + $0xc8] sm:$0xff] %vm308_vm0, %v7868_v15  ;;  %367 = vst.msk [vmem:[#allocation3 + $0xd0] sm:$0xff] %vm308_vm0, %v7868_v15  ;;  %2690 = vperm.xlu0 %6897, %v9689_v12   ;;  %v13068_v12 = vld [vmem:[#allocation149_spill] sm:$0xff] }
 0x32d   : > { %368 = vst.msk [vmem:[#allocation3 + $0xd8] sm:$0xff] %vm308_vm0, %v7868_v15  ;;  %369 = vst.msk [vmem:[#allocation3 + $0xe0] sm:$0xff] %vm308_vm0, %v7868_v15 }
 0x32e   : > { %370 = vst.msk [vmem:[#allocation3 + $0xe8] sm:$0xff] %vm308_vm0, %v7868_v15  ;;  %371 = vst.msk [vmem:[#allocation3 + $0xf0] sm:$0xff] %vm308_vm0, %v7868_v15 }
 0x32f   : > { %v9788_v14 = vpop.permute.xlu0 %2550  ;;  %372 = vst.msk [vmem:[#allocation3 + $0xf8] sm:$0xff] %vm308_vm0, %v7868_v15  ;;  %13047 = vst [vmem:[#allocation19_spill] sm:$0xff] %v9832_v13  ;;  %v13089_v13 = vld [vmem:[#allocation47_spill] sm:$0xff] }
 0x330   : > { %v2709_v51 = vsub.f32 %v13043_v46, %v9788_v14  ;;  %v2711_v4 = vsub.f32 %v13044_v45, %v9788_v14  ;;  %v2708_v1 = vsub.f32 %v13045_v8, %v9788_v14  ;;  %v2710_v31 = vsub.f32 %v13046_v0, %v9788_v14  ;;  %13048 = vst [vmem:[#allocation22_spill] sm:$0xff] %v9835_v49  ;;  %v9868_v46 = vpop.eup %7091 }
 0x331   : > { %13049 = vst [vmem:[#allocation18_spill] sm:$0xff] %v9837_v10  ;;  %13050 = vst [vmem:[#allocation20_spill] sm:$0xff] %v9841_v63  ;;  %v9872_v0 = vpop.eup %7093  ;;  %v7022_v10 = vld [vmem:[%s9322_s18 + $0x190] sm:$0xff]  }
 0x332   : > { %v2966_v9 = vmul.f32 1.442695, %v2709_v51  ;;  %v2970_v54 = vmul.f32 1.442695, %v2711_v4  ;;  %v2964_v11 = vmul.f32 1.442695, %v2708_v1 }
 0x333   : > { %v9839_v32 = vpop.permute.xlu1 %2555  ;;  %v2968_v44 = vmul.f32 1.442695, %v2710_v31  ;;  %13053 = vst [vmem:[#allocation23_spill] sm:$0xff] %v9849_v16  ;;  %13055 = vst [vmem:[#allocation21_spill] sm:$0xff] %v9854_v22  ;;  %v13061_v51 = vld [vmem:[#allocation27_spill] sm:$0xff] }
 0x334   : > { %v2717_v56 = vsub.f32 %v13051_v18, %v9839_v32  ;;  %7099 = vpow2.f32 %v2966_v9  ;;  %v2719_v2 = vsub.f32 %v8360_v26, %v9839_v32  ;;  %v2716_v3 = vsub.f32 %v13052_v34, %v9839_v32  ;;  %13056 = vst [vmem:[#allocation24_spill] sm:$0xff] %v9856_v55  ;;  %13057 = vst [vmem:[#allocation255_spill] sm:$0xff] %v9860_v28  ;;  %v13064_v9 = vld [vmem:[#allocation29_spill] sm:$0xff]  ;;  %v13067_v34 = vld [vmem:[#allocation30_spill] sm:$0xff] }
 0x335   : > { %7101 = vpow2.f32 %v2970_v54  ;;  %v2718_v17 = vsub.f32 %v13054_v62, %v9839_v32  ;;  %13060 = vst [vmem:[#allocation26_spill] sm:$0xff] %v9868_v46  ;;  %13062 = vst [vmem:[#allocation25_spill] sm:$0xff] %v9872_v0  ;;  %v7017_v46 = vld [vmem:[%s9322_s18 + $0x1c8] sm:$0xff]   ;;  %v7021_v28 = vld [vmem:[%s9322_s18 + $0x1d0] sm:$0xff]  }
 0x336   : > { %v2982_v39 = vmul.f32 1.442695, %v2717_v56  ;;  %v2986_v61 = vmul.f32 1.442695, %v2719_v2  ;;  %7103 = vpow2.f32 %v2964_v11  ;;  %v2980_v20 = vmul.f32 1.442695, %v2716_v3 }
 0x337   : > { %v9858_v26 = vpop.permute.xlu1 %2560  ;;  %7105 = vpow2.f32 %v2968_v44  ;;  %v2984_v52 = vmul.f32 1.442695, %v2718_v17  ;;  %v13065_v44 = vld [vmem:[#allocation28_spill] sm:$0xff]  ;;  %v9889_v2 = vmul.f32 1.442695, %v2480_v6  ;;  %v7015_v6 = vld [vmem:[%s9322_s18 + $0x148] sm:$0xff]  }
 0x338   : > { %7107 = vpow2.f32 %v2982_v39  ;;  %v2725_v23 = vsub.f32 %v13058_v7, %v9858_v26  ;;  %v2727_v24 = vsub.f32 %v8383_v35, %v9858_v26  ;;  %v2724_v36 = vsub.f32 %v13059_v27, %v9858_v26  ;;  %v9876_v35 = vpop.eup %7095  ;;  %v13070_v27 = vld [vmem:[#allocation35_spill] sm:$0xff] }
 0x339   : > { %7109 = vpow2.f32 %v2986_v61  ;;  %v2726_v45 = vsub.f32 %v13061_v51, %v9858_v26  ;;  %13063 = vst [vmem:[#allocation27_spill] sm:$0xff] %v9876_v35  ;;  %v9884_v56 = vpop.eup %7097  ;;  %v13071_v51 = vld [vmem:[#allocation31_spill] sm:$0xff] }
 0x33a   : > { %7111 = vpow2.f32 %v2980_v20  ;;  %v2998_v4 = vmul.f32 1.442695, %v2725_v23  ;;  %v3002_v8 = vmul.f32 1.442695, %v2727_v24  ;;  %v2996_v1 = vmul.f32 1.442695, %v2724_v36 }
 0x33b   : > { %v9874_v31 = vpop.permute.xlu1 %2565  ;;  %7113 = vpow2.f32 %v2984_v52  ;;  %v3000_v15 = vmul.f32 1.442695, %v2726_v45  ;;  %13066 = vst [vmem:[#allocation29_spill] sm:$0xff] %v9884_v56  ;;  %v9896_v20 = vmul.f32 1.442695, %v2481_v5  ;;  %v9898_v52 = vpop.permute.xlu0 %2570  ;;  %v13069_v23 = vld [vmem:[#allocation32_spill] sm:$0xff] }
 0x33c   : > { %v2733_v54 = vsub.f32 %v13064_v9, %v9874_v31  ;;  %7115 = vpow2.f32 %v2998_v4  ;;  %v2735_v11 = vsub.f32 %v8394_v40, %v9874_v31  ;;  %v2732_v18 = vsub.f32 %v13065_v44, %v9874_v31  ;;  %v13072_v5 = vld [vmem:[#allocation33_spill] sm:$0xff]  ;;  %v13073_v4 = vld [vmem:[#allocation150_spill] sm:$0xff] }
 0x33d   : > { %7117 = vpow2.f32 %v3002_v8  ;;  %v2734_v3 = vsub.f32 %v13067_v34, %v9874_v31  ;;  %v2741_v24 = vsub.f32 %v13069_v23, %v9898_v52  ;;  %v2743_v36 = vsub.f32 %v13070_v27, %v9898_v52  ;;  %v13074_v27 = vld [vmem:[#allocation36_spill] sm:$0xff]  ;;  %v7014_v8 = vld [vmem:[%s9322_s18 + $0x180] sm:$0xff]  }
 0x33e   : > { %v7100_v62 = vpop.eup %7099  ;;  %v3014_v17 = vmul.f32 1.442695, %v2733_v54  ;;  %v3018_v39 = vmul.f32 1.442695, %v2735_v11  ;;  %7119 = vpow2.f32 %v2996_v1  ;;  %v3012_v61 = vmul.f32 1.442695, %v2732_v18 }
 0x33f   : > { %v7102_v40 = vpop.eup %7101  ;;  %7121 = vpow2.f32 %v3000_v15  ;;  %v3016_v57 = vmul.f32 1.442695, %v2734_v3  ;;  %v2740_v21 = vsub.f32 %v13071_v51, %v9898_v52  ;;  %v2742_v45 = vsub.f32 %v13072_v5, %v9898_v52  ;;  %v9914_v18 = vpop.permute.xlu0 %2575 }
 0x340   : > { %v7104_v7 = vpop.eup %7103  ;;  %7123 = vpow2.f32 %v3014_v17  ;;  %v3030_v9 = vmul.f32 1.442695, %v2741_v24  ;;  %v3034_v54 = vmul.f32 1.442695, %v2743_v36  ;;  %v2749_v51 = vsub.f32 %v13074_v27, %v9914_v18  ;;  %v7012_v36 = vld [vmem:[%s9322_s18 + $0x100] sm:$0xff]  }
 0x341   : > { %v7106_v47 = vpop.eup %7105  ;;  %7125 = vpow2.f32 %v3018_v39  ;;  %v3540_v1 = vadd.f32 %v7104_v7, %v7100_v62  ;;  %v3028_v11 = vmul.f32 1.442695, %v2740_v21  ;;  %v3032_v3 = vmul.f32 1.442695, %v2742_v45  ;;  %v13077_v45 = vld [vmem:[#allocation37_spill] sm:$0xff] }
 0x342   : > { %v7108_v15 = vpop.eup %7107  ;;  %7127 = vpow2.f32 %v3012_v61  ;;  %v13075_v61 = vld [vmem:[#allocation38_spill] sm:$0xff]  ;;  %v3046_v27 = vmul.f32 1.442695, %v2749_v51 }
 0x343   : > { %v9912_v44 = vpop.eup %7109  ;;  %v4118_v34 = vpack.c.bf16 %v7108_v15, %v7100_v62  ;;  %7129 = vpow2.f32 %v3016_v57  ;;  %v3541_v17 = vadd.f32 %v7106_v47, %v3540_v1  ;;  %v2751_v24 = vsub.f32 %v13075_v61, %v9914_v18  ;;  %v13076_v57 = vld [vmem:[#allocation34_spill] sm:$0xff] }
 0x344   : > { %v7112_v39 = vpop.eup %7111  ;;  %v4120_v23 = vpack.c.bf16 %v9912_v44, %v7102_v40  ;;  %7131 = vpow2.f32 %v3030_v9  ;;  %v2748_v5 = vsub.f32 %v13076_v57, %v9914_v18  ;;  %v2750_v1 = vsub.f32 %v13077_v45, %v9914_v18 }
 0x345   : > { %v7114_v21 = vpop.eup %7113  ;;  %4789 = vmatprep.mubr.bf16.mxu0 %v4118_v34  ;;  %v4117_v62 = vpack.c.bf16 %v7112_v39, %v7104_v7  ;;  %7133 = vpow2.f32 %v3034_v54  ;;  %v3050_v61 = vmul.f32 1.442695, %v2751_v24  ;;  %v9933_v7 = vpop.permute.xlu1 %2580  ;;  %v9935_v45 = vadd.f32 %v7102_v40, %v3541_v17  ;;  %v13080_v24 = vld [vmem:[#allocation39_spill] sm:$0xff]  ;;  %v13081_v40 = vld [vmem:[#allocation41_spill] sm:$0xff] }
 0x346   : > { %v9928_v35 = vpop.eup %7115  ;;  %4950 = vmatprep.mubr.bf16.mxu1 %v4120_v23  ;;  %v4119_v9 = vpack.c.bf16 %v7114_v21, %v7106_v47  ;;  %7135 = vpow2.f32 %v3028_v11  ;;  %v3044_v54 = vmul.f32 1.442695, %v2748_v5  ;;  %v3048_v57 = vmul.f32 1.442695, %v2750_v1  ;;  %v13078_v47 = vld [vmem:[#allocation40_spill] sm:$0xff]  ;;  %v13079_v23 = vld [vmem:[#allocation43_spill] sm:$0xff] }
 0x347   : > { %v9931_v34 = vpop.eup %7117  ;;  %4790 = vmatmul.mubr.bf16.vlgmr.msra.gmra.mrb[128].mxu0 %v4117_v62  ;;  %7137 = vpow2.f32 %v3032_v3  ;;  %v2757_v11 = vsub.f32 %v13078_v47, %v9933_v7  ;;  %v2759_v51 = vsub.f32 %v13079_v23, %v9933_v7  ;;  %v2756_v62 = vsub.f32 %v13080_v24, %v9933_v7  ;;  %v7016_v5 = vld [vmem:[%s9322_s18 + $0x108] sm:$0xff]  }
 0x348   : > { %v9937_v56 = vpop.eup %7119  ;;  %4951 = vmatmul.mubr.bf16.vlgmr.msra.gmra.mrb[128].mxu1 %v4119_v9  ;;  %7139 = vpow2.f32 %v3046_v27  ;;  %6595 = vmatpush3.bf16.msra.mxu0 %v7012_v36  ;;  %v2758_v17 = vsub.f32 %v13081_v40, %v9933_v7  ;;  %v7018_v1 = vld [vmem:[%s9322_s18 + $0x188] sm:$0xff]   ;;  %v13082_v9 = vld [vmem:[#allocation152_spill] sm:$0xff]  ;;  %v3549_v47 = vadd.f32 %v7112_v39, %v7108_v15 }
 0x349   : > { %v9946_v3 = vpop.eup %7121  ;;  %7141 = vpow2.f32 %v3050_v61  ;;  %6707 = vmatpush3.bf16.msra.mxu1 %v7014_v8  ;;  %6596 = vmatprep.subr.bf16.mxu0 %v7015_v6  ;;  %v3062_v23 = vmul.f32 1.442695, %v2757_v11  ;;  %v3066_v24 = vmul.f32 1.442695, %v2759_v51  ;;  %v3060_v36 = vmul.f32 1.442695, %v2756_v62  ;;  %v9957_v61 = vpop.permute.xlu1 %2585 }
 0x34a   : > { %v9953_v55 = vpop.eup %7123  ;;  %7143 = vpow2.f32 %v3044_v54  ;;  %6708 = vmatprep.subr.bf16.mxu1 %v7017_v46  ;;  %v3064_v6 = vmul.f32 1.442695, %v2758_v17  ;;  %v3550_v40 = vadd.f32 %v7114_v21, %v3549_v47  ;;  %v13083_v39 = vld [vmem:[#allocation44_spill] sm:$0xff]  ;;  %v13084_v46 = vld [vmem:[#allocation46_spill] sm:$0xff]  ;;  %v13086_v17 = vld [vmem:[#allocation45_spill] sm:$0xff] }
 0x34b   : > { %v9955_v0 = vpop.eup %7125  ;;  %v4126_v8 = vpack.c.bf16 %v9953_v55, %v9928_v35  ;;  %7145 = vpow2.f32 %v3048_v57  ;;  %v2765_v54 = vsub.f32 %v13083_v39, %v9957_v61  ;;  %v2767_v11 = vsub.f32 %v13084_v46, %v9957_v61  ;;  %v13085_v57 = vld [vmem:[#allocation42_spill] sm:$0xff]  ;;  %v7019_v46 = vld [vmem:[%s9322_s18 + $0x150] sm:$0xff]  }
 0x34c   : > { %v9961_v16 = vpop.eup %7127  ;;  %v4128_v15 = vpack.c.bf16 %v9955_v0, %v9931_v34  ;;  %7147 = vpow2.f32 %v3062_v23  ;;  %6597 = vmatpush3.bf16.msra.mxu0 %v7016_v5  ;;  %v2764_v62 = vsub.f32 %v13085_v57, %v9957_v61  ;;  %v2766_v47 = vsub.f32 %v13086_v17, %v9957_v61  ;;  %v9985_v57 = vpop.permute.xlu0 %2590 }
 0x34d   : > { %v9969_v51 = vpop.eup %7129  ;;  %4797 = vmatprep.mubr.bf16.mxu0 %v4126_v8  ;;  %v4125_v21 = vpack.c.bf16 %v9961_v16, %v9937_v56  ;;  %7149 = vpow2.f32 %v3066_v24  ;;  %6709 = vmatpush3.bf16.msra.mxu1 %v7018_v1  ;;  %v3078_v8 = vmul.f32 1.442695, %v2765_v54  ;;  %v3082_v39 = vmul.f32 1.442695, %v2767_v11  ;;  %v7020_v24 = vld [vmem:[%s9322_s18 + $0x110] sm:$0xff]   ;;  %v13088_v11 = vld [vmem:[#allocation51_spill] sm:$0xff] }
 0x34e   : > { %v9977_v23 = vpop.eup %7131  ;;  %4958 = vmatprep.mubr.bf16.mxu1 %v4128_v15  ;;  %v4127_v5 = vpack.c.bf16 %v9969_v51, %v9946_v3  ;;  %7151 = vpow2.f32 %v3060_v36  ;;  %v3076_v17 = vmul.f32 1.442695, %v2764_v62  ;;  %v3080_v1 = vmul.f32 1.442695, %v2766_v47  ;;  %v13087_v36 = vld [vmem:[#allocation48_spill] sm:$0xff]  ;;  %6598 = vmatprep.subr.bf16.mxu0 %v7019_v46  ;;  %v10045_v43 = vpop.permute.xlu1 %2600 }
 0x34f   : > { %v9983_v27 = vpop.eup %7133  ;;  %4798 = vmatmul.mubr.bf16.gmra.mrb[132].mxu0 %v4125_v21  ;;  %7153 = vpow2.f32 %v3064_v6  ;;  %v9990_v15 = vadd.f32 %v9912_v44, %v3550_v40  ;;  %v2773_v54 = vsub.f32 %v13087_v36, %v9985_v57  ;;  %v2775_v21 = vsub.f32 %v13088_v11, %v9985_v57  ;;  %v13090_v44 = vld [vmem:[#allocation49_spill] sm:$0xff]  ;;  %6710 = vmatprep.subr.bf16.mxu1 %v7021_v28 }
 0x350   : > { %v9992_v22 = vpop.eup %7135  ;;  %4959 = vmatmul.mubr.bf16.gmra.mrb[132].mxu1 %v4127_v5  ;;  %7155 = vpow2.f32 %v3078_v8  ;;  %v2772_v62 = vsub.f32 %v13089_v13, %v9985_v57  ;;  %v2774_v40 = vsub.f32 %v13090_v44, %v9985_v57  ;;  %6599 = vmatpush3.bf16.msra.mxu0 %v7020_v24  ;;  %v13091_v5 = vsub.f32 %v13068_v12, %v9788_v14  ;;  %v10014_v63 = vpop.permute.xlu0 %2595 }
 0x351   : > { %v10000_v6 = vpop.eup %7137  ;;  %7157 = vpow2.f32 %v3082_v39  ;;  %v3094_v13 = vmul.f32 1.442695, %v2773_v54  ;;  %v3098_v46 = vmul.f32 1.442695, %v2775_v21  ;;  %6711 = vmatpush3.bf16.msra.mxu1 %v7022_v10  ;;  %v13092_v12 = vsub.f32 %v13073_v4, %v9788_v14  ;;  %v13093_v10 = vld [vmem:[#allocation52_spill] sm:$0xff]  ;;  %v13094_v21 = vld [vmem:[#allocation54_spill] sm:$0xff]  ;;  %6600 = vmatprep.subr.bf16.mxu0 %v7023_v37 }
 0x352   : > { %v10008_v8 = vmul.f32 1.442695, %v13091_v5  ;;  %v10010_v36 = vpop.eup %7139  ;;  %7159 = vpow2.f32 %v3076_v17  ;;  %v3092_v11 = vmul.f32 1.442695, %v2772_v62  ;;  %v3096_v24 = vmul.f32 1.442695, %v2774_v40  ;;  %6712 = vmatprep.subr.bf16.mxu1 %v7025_v38 }
 0x353   : > { %v10012_v39 = vpop.eup %7141  ;;  %v4134_v28 = vpack.c.bf16 %v10010_v36, %v9977_v23  ;;  %7161 = vpow2.f32 %v3080_v1  ;;  %v10021_v44 = vmul.f32 1.442695, %v13092_v12  ;;  %v2781_v54 = vsub.f32 %v13093_v10, %v10014_v63  ;;  %v13095_v1 = vld [vmem:[#allocation50_spill] sm:$0xff]  ;;  %v13096_v12 = vld [vmem:[#allocation53_spill] sm:$0xff]  ;;  %v13111_v37 = vld [vmem:[#allocation155_spill] sm:$0xff] }
 0x354   : > { %v10023_v5 = vpop.eup %7143  ;;  %v4136_v17 = vpack.c.bf16 %v10012_v39, %v9983_v27  ;;  %7163 = vpow2.f32 %v3094_v13  ;;  %v2783_v62 = vsub.f32 %v13094_v21, %v10014_v63  ;;  %v2780_v40 = vsub.f32 %v13095_v1, %v10014_v63  ;;  %6601 = vmatpush3.bf16.msra.mxu0 %v7024_v59  ;;  %v13113_v59 = vld [vmem:[#allocation156_spill] sm:$0xff] }
 0x355   : > { %v10031_v47 = vpop.eup %7145  ;;  %4805 = vmatprep.mubr.bf16.mxu0 %v4134_v28  ;;  %v4133_v4 = vpack.c.bf16 %v10023_v5, %v9992_v22  ;;  %7165 = vpow2.f32 %v3098_v46  ;;  %v2782_v53 = vsub.f32 %v13096_v12, %v10014_v63  ;;  %v3110_v10 = vmul.f32 1.442695, %v2781_v54  ;;  %6713 = vmatpush3.bf16.msra.mxu1 %v7026_v41 }
 0x356   : > { %v10039_v49 = vpop.eup %7147  ;;  %4966 = vmatprep.mubr.bf16.mxu1 %v4136_v17  ;;  %v4135_v13 = vpack.c.bf16 %v10031_v47, %v10000_v6  ;;  %v3114_v21 = vmul.f32 1.442695, %v2783_v62  ;;  %7167 = vpow2.f32 %v3092_v11  ;;  %v3108_v46 = vmul.f32 1.442695, %v2780_v40  ;;  %v13098_v17 = vld [vmem:[#allocation56_spill] sm:$0xff]  ;;  %v13099_v11 = vld [vmem:[#allocation59_spill] sm:$0xff] }
 0x357   : > { %v10043_v28 = vpop.eup %7149  ;;  %4806 = vmatmul.mubr.bf16.gmra.mrb[136].mxu0 %v4133_v4  ;;  %7169 = vpow2.f32 %v3096_v24  ;;  %v3112_v1 = vmul.f32 1.442695, %v2782_v53  ;;  %v2789_v54 = vsub.f32 %v13098_v17, %v10045_v43  ;;  %v2791_v62 = vsub.f32 %v13099_v11, %v10045_v43  ;;  %v13100_v4 = vld [vmem:[#allocation55_spill] sm:$0xff]  ;;  %v13101_v53 = vld [vmem:[#allocation57_spill] sm:$0xff] }
 0x358   : > { %v10049_v42 = vpop.eup %7151  ;;  %4967 = vmatmul.mubr.bf16.gmra.mrb[136].mxu1 %v4135_v13  ;;  %7171 = vpow2.f32 %v3110_v10  ;;  %v2788_v25 = vsub.f32 %v13100_v4, %v10045_v43  ;;  %v2790_v24 = vsub.f32 %v13101_v53, %v10045_v43  ;;  %v13102_v40 = vld [vmem:[#allocation153_spill] sm:$0xff]  ;;  %v3558_v13 = vadd.f32 %v9937_v56, %v9928_v35  ;;  %v10069_v4 = vpop.permute.xlu1 %2605  ;;  %v13104_v56 = vld [vmem:[#allocation60_spill] sm:$0xff] }
 0x359   : > { %v10057_v50 = vpop.eup %7153  ;;  %7173 = vpow2.f32 %v3114_v21  ;;  %v2721_v12 = vsub.f32 %v13102_v40, %v9839_v32  ;;  %v3126_v17 = vmul.f32 1.442695, %v2789_v54  ;;  %v3130_v11 = vmul.f32 1.442695, %v2791_v62  ;;  %13103 = vst [vmem:[#allocation28_spill] sm:$0xff] %v10069_v4 }
 0x35a   : > { %v10065_v10 = vpop.eup %7155  ;;  %7175 = vpow2.f32 %v3108_v46  ;;  %v3124_v48 = vmul.f32 1.442695, %v2788_v25  ;;  %v3128_v53 = vmul.f32 1.442695, %v2790_v24  ;;  %v3559_v40 = vadd.f32 %v9946_v3, %v3558_v13  ;;  %v13105_v46 = vld [vmem:[#allocation62_spill] sm:$0xff]  ;;  %v13107_v13 = vld [vmem:[#allocation61_spill] sm:$0xff] }
 0x35b   : > { %v10067_v30 = vpop.eup %7157  ;;  %v4142_v21 = vpack.c.bf16 %v10065_v10, %v10039_v49  ;;  %7177 = vpow2.f32 %v3112_v1  ;;  %v2797_v25 = vsub.f32 %v13104_v56, %v10069_v4  ;;  %v2799_v54 = vsub.f32 %v13105_v46, %v10069_v4  ;;  %v13106_v1 = vld [vmem:[#allocation58_spill] sm:$0xff] }
 0x35c   : > { %v10074_v60 = vpop.eup %7159  ;;  %v4144_v35 = vpack.c.bf16 %v10067_v30, %v10043_v28  ;;  %7179 = vpow2.f32 %v3126_v17  ;;  %v2796_v24 = vsub.f32 %v13106_v1, %v10069_v4  ;;  %v2798_v56 = vsub.f32 %v13107_v13, %v10069_v4 }
 0x35d   : > { %v10082_v62 = vpop.eup %7161  ;;  %4813 = vmatprep.mubr.bf16.mxu0 %v4142_v21  ;;  %v4141_v3 = vpack.c.bf16 %v10074_v60, %v10049_v42  ;;  %7181 = vpow2.f32 %v3130_v11  ;;  %v3142_v46 = vmul.f32 1.442695, %v2797_v25  ;;  %v3146_v21 = vmul.f32 1.442695, %v2799_v54 }
 0x35e   : > { %v10090_v29 = vpop.eup %7163  ;;  %4974 = vmatprep.mubr.bf16.mxu1 %v4144_v35  ;;  %v4143_v17 = vpack.c.bf16 %v10082_v62, %v10057_v50  ;;  %7183 = vpow2.f32 %v3124_v48  ;;  %v3140_v33 = vmul.f32 1.442695, %v2796_v24  ;;  %v3144_v1 = vmul.f32 1.442695, %v2798_v56 }
 0x35f   : > { %v10096_v11 = vpop.eup %7165  ;;  %4814 = vmatmul.mubr.bf16.gmra.mrb[140].mxu0 %v4141_v3  ;;  %7185 = vpow2.f32 %v3128_v53  ;;  %v10101_v13 = vadd.f32 %v9931_v34, %v3559_v40  ;;  %v13108_v48 = vsub.f32 %v13082_v9, %v9788_v14  ;;  %v13109_v54 = vsub.f32 -inf, %v9788_v14  ;;  %v13110_v53 = vld [vmem:[#allocation154_spill] sm:$0xff] }
 0x360   : > { %v10103_v35 = vpop.eup %7167  ;;  %4975 = vmatmul.mubr.bf16.gmra.mrb[140].mxu1 %v4143_v17  ;;  %7187 = vpow2.f32 %v3142_v46  ;;  %v2722_v24 = vsub.f32 %v13110_v53, %v9839_v32  ;;  %v2723_v34 = vsub.f32 -inf, %v9839_v32  ;;  %v2728_v40 = vsub.f32 %v13111_v37, %v9858_v26  ;;  %v13116_v53 = vld [vmem:[#allocation161_spill] sm:$0xff] }
 0x361   : > { %v2976_v25 = vmul.f32 1.442695, %v13108_v48  ;;  %v10110_v3 = vmul.f32 1.442695, %v13109_v54  ;;  %v10114_v56 = vpop.eup %7169  ;;  %7189 = vpow2.f32 %v3146_v21  ;;  %v3576_v9 = vadd.f32 %v9992_v22, %v9977_v23  ;;  %v13115_v22 = vld [vmem:[#allocation158_spill] sm:$0xff] }
 0x362   : > { %v10121_v17 = vpop.eup %7171  ;;  %7191 = vpow2.f32 %v3140_v33  ;;  %v13112_v14 = vsub.f32 %v13097_v19, %v9839_v32  ;;  %v10126_v48 = vmul.f32 1.442695, %v2721_v12  ;;  %v2729_v38 = vsub.f32 %v13113_v59, %v9858_v26 }
 0x363   : > { %v10130_v21 = vpop.eup %7173  ;;  %v4150_v54 = vpack.c.bf16 %v10121_v17, %v10090_v29  ;;  %7193 = vpow2.f32 %v3144_v1  ;;  %v2730_v23 = vsub.f32 %v13115_v22, %v9858_v26  ;;  %v3577_v41 = vadd.f32 %v10000_v6, %v3576_v9  ;;  %v13118_v22 = vld [vmem:[#allocation162_spill] sm:$0xff] }
 0x364   : > { %v2988_v46 = vmul.f32 1.442695, %v13112_v14  ;;  %13114 = vst [vmem:[#allocation30_spill] sm:$0xff] %v10130_v21  ;;  %v10137_v33 = vpop.eup %7175  ;;  %v4152_v19 = vpack.c.bf16 %v10130_v21, %v10096_v11  ;;  %v10141_v32 = vmul.f32 1.442695, %v2722_v24  ;;  %v2731_v12 = vsub.f32 -inf, %v9858_v26 }
 0x365   : > { %v2744_v37 = vsub.f32 %v13116_v53, %v9898_v52  ;;  %v10146_v14 = vpop.eup %7177  ;;  %4821 = vmatprep.mubr.bf16.mxu0 %v4150_v54  ;;  %v4149_v6 = vpack.c.bf16 %v10137_v33, %v10103_v35  ;;  %v10150_v1 = vmul.f32 1.442695, %v2723_v34  ;;  %v3004_v9 = vmul.f32 1.442695, %v2728_v40  ;;  %v13119_v53 = vld [vmem:[#allocation164_spill] sm:$0xff]  ;;  %v7028_v40 = vld [vmem:[%s9322_s18 + $0x120] sm:$0xff]  }
 0x366   : > { %13117 = vst [vmem:[#allocation149_spill] sm:$0xff] %v10146_v14  ;;  %v10153_v59 = vadd.f32 %v9983_v27, %v3577_v41  ;;  %v10155_v24 = vpop.eup %7179  ;;  %4982 = vmatprep.mubr.bf16.mxu1 %v4152_v19  ;;  %v4151_v26 = vpack.c.bf16 %v10146_v14, %v10114_v56  ;;  %7195 = vpow2.f32 %v10008_v8  ;;  %v2745_v54 = vsub.f32 %v13118_v22, %v9898_v52  ;;  %v7027_v27 = vld [vmem:[%s9322_s18 + $0x160] sm:$0xff]  }
 0x367   : > { %v2746_v4 = vsub.f32 %v13119_v53, %v9898_v52  ;;  %v10164_v34 = vpop.eup %7181  ;;  %7197 = vpow2.f32 %v9889_v2  ;;  %4822 = vmatmul.mubr.bf16.gmra.mrb[144].mxu0 %v4149_v6  ;;  %v3006_v41 = vmul.f32 1.442695, %v2729_v38  ;;  %v10169_v19 = vmul.f32 1.442695, %v2730_v23  ;;  %6602 = vmatprep.subr.bf16.mxu0 %v7027_v27  ;;  %v13120_v38 = vld [vmem:[#allocation157_spill] sm:$0xff]  ;;  %v13123_v27 = vld [vmem:[#allocation160_spill] sm:$0xff] }
 0x368   : > { %v3567_v21 = vadd.f32 %v9961_v16, %v9953_v55  ;;  %v10173_v8 = vpop.eup %7183  ;;  %7199 = vpow2.f32 %v9896_v20  ;;  %4983 = vmatmul.mubr.bf16.gmra.mrb[144].mxu1 %v4151_v26  ;;  %v10176_v22 = vmul.f32 1.442695, %v2731_v12  ;;  %v2747_v53 = vsub.f32 -inf, %v9898_v52  ;;  %6603 = vmatpush3.bf16.msra.mxu0 %v7028_v40 }
 0x369   : > { %v3036_v14 = vmul.f32 1.442695, %v2744_v37  ;;  %v10179_v2 = vpop.eup %7185  ;;  %7201 = vpow2.f32 %v10021_v44  ;;  %v2736_v16 = vsub.f32 %v13120_v38, %v9874_v31  ;;  %v3594_v20 = vadd.f32 %v10049_v42, %v10039_v49  ;;  %v13121_v37 = vld [vmem:[#allocation159_spill] sm:$0xff] }
 0x36a   : > { %v3568_v55 = vadd.f32 %v9969_v51, %v3567_v21  ;;  %v10187_v23 = vpop.eup %7187  ;;  %7203 = vpow2.f32 %v2976_v25  ;;  %v3038_v52 = vmul.f32 1.442695, %v2745_v54  ;;  %v10189_v12 = vmul.f32 1.442695, %v2746_v4  ;;  %v7029_v51 = vld [vmem:[%s9322_s18 + $0x1e0] sm:$0xff]  }
 0x36b   : > { %v2737_v6 = vsub.f32 %v13121_v37, %v9874_v31  ;;  %v10193_v44 = vpop.eup %7189  ;;  %v4158_v26 = vpack.c.bf16 %v10187_v23, %v10155_v24  ;;  %7205 = vpow2.f32 %v2988_v46  ;;  %v7030_v21 = vld [vmem:[%s9322_s18 + $0x1a0] sm:$0xff]   ;;  %v3595_v49 = vadd.f32 %v10057_v50, %v3594_v20  ;;  %6714 = vmatprep.subr.bf16.mxu1 %v7029_v51 }
 0x36c   : > { %13122 = vst [vmem:[#allocation32_spill] sm:$0xff] %v10193_v44  ;;  %v10200_v42 = vadd.f32 %v9955_v0, %v3568_v55  ;;  %v10203_v25 = vpop.eup %7191  ;;  %v4160_v4 = vpack.c.bf16 %v10193_v44, %v10164_v34  ;;  %7207 = vpow2.f32 %v10110_v3  ;;  %v10208_v54 = vmul.f32 1.442695, %v2747_v53  ;;  %6715 = vmatpush3.bf16.msra.mxu1 %v7030_v21  ;;  %v13124_v55 = vld [vmem:[#allocation167_spill] sm:$0xff]  ;;  %v7040_v44 = vld [vmem:[%s9322_s18 + $0x138] sm:$0xff]  }
 0x36d   : > { %v2738_v40 = vsub.f32 %v13123_v27, %v9874_v31  ;;  %v10212_v46 = vpop.eup %7193  ;;  %4829 = vmatprep.mubr.bf16.mxu0 %v4158_v26  ;;  %v4157_v0 = vpack.c.bf16 %v10203_v25, %v10173_v8  ;;  %7209 = vpow2.f32 %v3004_v9  ;;  %v2739_v50 = vsub.f32 -inf, %v9874_v31  ;;  %v13125_v31 = vld [vmem:[#allocation168_spill] sm:$0xff] }
 0x36e   : > { %v10218_v38 = vadd.f32 %v10043_v28, %v3595_v49  ;;  %4990 = vmatprep.mubr.bf16.mxu1 %v4160_v4  ;;  %v4159_v3 = vpack.c.bf16 %v10212_v46, %v10179_v2  ;;  %7211 = vpow2.f32 %v10126_v48  ;;  %v3020_v53 = vmul.f32 1.442695, %v2736_v16  ;;  %v13126_v28 = vld [vmem:[#allocation170_spill] sm:$0xff]  ;;  %v13129_v4 = vld [vmem:[#allocation163_spill] sm:$0xff] }
 0x36f   : > { %v2760_v20 = vsub.f32 %v13124_v55, %v9933_v7  ;;  %4830 = vmatmul.mubr.bf16.gmra.mrb[148].mxu0 %v4157_v0  ;;  %7213 = vpow2.f32 %v10141_v32  ;;  %v3022_v9 = vmul.f32 1.442695, %v2737_v6  ;;  %v2761_v37 = vsub.f32 %v13125_v31, %v9933_v7 }
 0x370   : > { %v2762_v26 = vsub.f32 %v13126_v28, %v9933_v7  ;;  %v10230_v51 = vpop.eup %7195  ;;  %4991 = vmatmul.mubr.bf16.gmra.mrb[148].mxu1 %v4159_v3  ;;  %7215 = vpow2.f32 %v3006_v41  ;;  %v3024_v48 = vmul.f32 1.442695, %v2738_v40  ;;  %v2763_v16 = vsub.f32 -inf, %v9933_v7  ;;  %v13131_v7 = vld [vmem:[#allocation165_spill] sm:$0xff] }
 0x371   : > { %13127 = vst [vmem:[#allocation35_spill] sm:$0xff] %v10230_v51  ;;  %v3585_v21 = vadd.f32 %v10023_v5, %v10010_v36  ;;  %v10235_v49 = vpop.eup %7197  ;;  %v3543_v32 = vadd.f32 %v10230_v51, %v9935_v45  ;;  %7217 = vpow2.f32 %v3036_v14  ;;  %v3026_v6 = vmul.f32 1.442695, %v2739_v50  ;;  %v13133_v50 = vld [vmem:[#allocation166_spill] sm:$0xff] }
 0x372   : > { %13128 = vst [vmem:[#allocation31_spill] sm:$0xff] %v10235_v49  ;;  %v2752_v27 = vsub.f32 %v13129_v4, %v9914_v18  ;;  %v10241_v0 = vpop.eup %7199  ;;  %7219 = vpow2.f32 %v10150_v1  ;;  %v3068_v41 = vmul.f32 1.442695, %v2760_v20  ;;  %v2753_v40 = vsub.f32 %v13131_v7, %v9914_v18  ;;  %v7031_v4 = vld [vmem:[%s9322_s18 + $0x168] sm:$0xff]  }
 0x373   : > { %13130 = vst [vmem:[#allocation33_spill] sm:$0xff] %v10241_v0  ;;  %v3586_v36 = vadd.f32 %v10031_v47, %v3585_v21  ;;  %v10247_v5 = vpop.eup %7201  ;;  %7221 = vpow2.f32 %v10169_v19  ;;  %v3070_v45 = vmul.f32 1.442695, %v2761_v37  ;;  %v3072_v14 = vmul.f32 1.442695, %v2762_v26  ;;  %6604 = vmatprep.subr.bf16.mxu0 %v7031_v4  ;;  %v7034_v4 = vld [vmem:[%s9322_s18 + $0x1a8] sm:$0xff]  }
 0x374   : > { %13132 = vst [vmem:[#allocation150_spill] sm:$0xff] %v10247_v5  ;;  %v2754_v3 = vsub.f32 %v13133_v50, %v9914_v18  ;;  %v10252_v55 = vpop.eup %7203  ;;  %7223 = vpow2.f32 %v10176_v22  ;;  %v3074_v1 = vmul.f32 1.442695, %v2763_v16  ;;  %v2755_v20 = vsub.f32 -inf, %v9914_v18  ;;  %v13137_v22 = vld [vmem:[#allocation173_spill] sm:$0xff] }
 0x375   : > { %13134 = vst [vmem:[#allocation36_spill] sm:$0xff] %v10252_v55  ;;  %v10257_v31 = vadd.f32 %v10012_v39, %v3586_v36  ;;  %v10259_v47 = vpop.eup %7205  ;;  %v3544_v19 = vadd.f32 %v10247_v5, %v3543_v32  ;;  %7225 = vpow2.f32 %v3038_v52  ;;  %v10262_v37 = vmul.f32 1.442695, %v2752_v27  ;;  %v13139_v32 = vld [vmem:[#allocation174_spill] sm:$0xff]  ;;  %v7032_v27 = vld [vmem:[%s9322_s18 + $0x128] sm:$0xff]   ;;  %v13233_v5 = vld [vmem:[#allocation28_spill] sm:$0xff] }
 0x376   : > { %13135 = vst [vmem:[#allocation38_spill] sm:$0xff] %v10259_v47  ;;  %v3612_v28 = vadd.f32 %v10103_v35, %v10090_v29  ;;  %v10266_v26 = vpop.eup %7207  ;;  %v3552_v18 = vadd.f32 %v10259_v47, %v9990_v15  ;;  %7227 = vpow2.f32 %v10189_v12  ;;  %v10271_v39 = vmul.f32 1.442695, %v2753_v40  ;;  %6605 = vmatpush3.bf16.msra.mxu0 %v7032_v27 }
 0x377   : > { %13136 = vst [vmem:[#allocation34_spill] sm:$0xff] %v10266_v26  ;;  %v2776_v16 = vsub.f32 %v13137_v22, %v9985_v57  ;;  %v10275_v21 = vpop.eup %7209  ;;  %7229 = vpow2.f32 %v3020_v53  ;;  %v10277_v52 = vmul.f32 1.442695, %v2754_v3  ;;  %v2777_v29 = vsub.f32 %v13139_v32, %v9985_v57  ;;  %v13141_v53 = vld [vmem:[#allocation176_spill] sm:$0xff] }
 0x378   : > { %13138 = vst [vmem:[#allocation37_spill] sm:$0xff] %v10275_v21  ;;  %v3613_v35 = vadd.f32 %v10114_v56, %v3612_v28  ;;  %v10284_v15 = vpop.eup %7211  ;;  %v3561_v12 = vadd.f32 %v10275_v21, %v10101_v13  ;;  %7231 = vpow2.f32 %v10208_v54  ;;  %v10289_v7 = vmul.f32 1.442695, %v2755_v20 }
 0x379   : > { %13140 = vst [vmem:[#allocation40_spill] sm:$0xff] %v10284_v15  ;;  %v2778_v40 = vsub.f32 %v13141_v53, %v9985_v57  ;;  %v10293_v36 = vpop.eup %7213  ;;  %v3545_v50 = vadd.f32 %v10252_v55, %v3544_v19  ;;  %7233 = vpow2.f32 %v3022_v9  ;;  %v2779_v56 = vsub.f32 -inf, %v9985_v57  ;;  %v13145_v57 = vld [vmem:[#allocation169_spill] sm:$0xff] }
 0x37a   : > { %13142 = vst [vmem:[#allocation43_spill] sm:$0xff] %v10293_v36  ;;  %v10298_v3 = vadd.f32 %v10096_v11, %v3613_v35  ;;  %v10300_v13 = vpop.eup %7215  ;;  %v3553_v54 = vadd.f32 %v10284_v15, %v3552_v18  ;;  %7235 = vpow2.f32 %v3024_v48  ;;  %v3100_v20 = vmul.f32 1.442695, %v2776_v16  ;;  %v13146_v11 = vld [vmem:[#allocation171_spill] sm:$0xff] }
 0x37b   : > { %13143 = vst [vmem:[#allocation39_spill] sm:$0xff] %v10300_v13  ;;  %v3603_v28 = vadd.f32 %v10074_v60, %v10065_v10  ;;  %v10305_v19 = vpop.eup %7217  ;;  %7237 = vpow2.f32 %v3026_v6  ;;  %v3102_v9 = vmul.f32 1.442695, %v2777_v29  ;;  %v2768_v22 = vsub.f32 %v13145_v57, %v9957_v61  ;;  %v7033_v35 = vld [vmem:[%s9322_s18 + $0x1e8] sm:$0xff]   ;;  %v10326_v57 = vld [vmem:[#allocation2 + $0xf8] sm:$0xff] }
 0x37c   : > { %13144 = vst [vmem:[#allocation41_spill] sm:$0xff] %v10305_v19  ;;  %v2769_v32 = vsub.f32 %v13146_v11, %v9957_v61  ;;  %v10313_v53 = vpop.eup %7219  ;;  %v3562_v48 = vadd.f32 %v10300_v13, %v3561_v12  ;;  %v3579_v60 = vadd.f32 %v10305_v19, %v10153_v59  ;;  %7239 = vpow2.f32 %v3068_v41  ;;  %6716 = vmatprep.subr.bf16.mxu1 %v7033_v35  ;;  %v13152_v59 = vld [vmem:[#allocation172_spill] sm:$0xff]  ;;  %v2419_v11 = vpop.xlane.xlu0 %2418 }
 0x37d   : > { %13147 = vst [vmem:[#allocation152_spill] sm:$0xff] %v10313_v53  ;;  %v3604_v10 = vadd.f32 %v10082_v62, %v3603_v28  ;;  %v10319_v6 = vpop.eup %7221  ;;  %v10322_v18 = vadd.f32 %v10266_v26, %v3545_v50  ;;  %7241 = vpow2.f32 %v3070_v45  ;;  %v3104_v16 = vmul.f32 1.442695, %v2778_v40  ;;  %13151 = vst [vmem:[#allocation45_spill] sm:$0xff] %v10326_v57  ;;  %6717 = vmatpush3.bf16.msra.mxu1 %v7034_v4  ;;  %v13227_v26 = vld [vmem:[#allocation243_spill] sm:$0xff] }
 0x37e   : > { %13148 = vst [vmem:[#allocation44_spill] sm:$0xff] %v10319_v6  ;;  %v3106_v29 = vmul.f32 1.442695, %v2779_v56  ;;  %v10324_v27 = vpop.eup %7223  ;;  %v3554_v12 = vadd.f32 %v10293_v36, %v3553_v54  ;;  %7243 = vpow2.f32 %v3072_v14  ;;  %v2770_v41 = vsub.f32 %v13152_v59, %v9957_v61 }
 0x37f   : > { %13149 = vst [vmem:[#allocation46_spill] sm:$0xff] %v10322_v18  ;;  %13150 = vst [vmem:[#allocation42_spill] sm:$0xff] %v10324_v27  ;;  %v10332_v62 = vadd.f32 %v10067_v30, %v3604_v10  ;;  %v10334_v50 = vpop.eup %7225  ;;  %7245 = vpow2.f32 %v3074_v1  ;;  %v2771_v45 = vsub.f32 -inf, %v9957_v61  ;;  %v3084_v40 = vmul.f32 1.442695, %v2768_v22  ;;  %v13157_v61 = vld [vmem:[#allocation179_spill] sm:$0xff] }
 0x380   : > { %13153 = vst [vmem:[#allocation48_spill] sm:$0xff] %v10334_v50  ;;  %v3086_v56 = vmul.f32 1.442695, %v2769_v32  ;;  %v10337_v28 = vpop.eup %7227  ;;  %v3563_v54 = vadd.f32 %v10319_v6, %v3562_v48  ;;  %v3580_v14 = vadd.f32 %v10334_v50, %v3579_v60  ;;  %7247 = vpow2.f32 %v10262_v37  ;;  %v13158_v32 = vld [vmem:[#allocation180_spill] sm:$0xff]  ;;  %v13191_v6 = vld [vmem:[#allocation70_spill] sm:$0xff]  ;;  %v13243_v18 = vld [vmem:[#allocation85_spill] sm:$0xff] }
 0x381   : > { %13154 = vst [vmem:[#allocation51_spill] sm:$0xff] %v10337_v28  ;;  %v3630_v30 = vadd.f32 %v10173_v8, %v10155_v24  ;;  %v10344_v35 = vpop.eup %7229  ;;  %v10347_v1 = vmax.f32 %v10326_v57, %v2419_v11  ;;  %7249 = vpow2.f32 %v10271_v39  ;;  %v2792_v22 = vsub.f32 %v13157_v61, %v10045_v43  ;;  %v13160_v24 = vld [vmem:[#allocation182_spill] sm:$0xff]  ;;  %v13182_v57 = vld [vmem:[#allocation241_spill] sm:$0xff] }
 0x382   : > { %13155 = vst [vmem:[#allocation47_spill] sm:$0xff] %v10344_v35  ;;  %v2793_v4 = vsub.f32 %v13158_v32, %v10045_v43  ;;  %v10354_v48 = vpop.eup %7231  ;;  %v3570_v37 = vadd.f32 %v10344_v35, %v10200_v42  ;;  %7251 = vpow2.f32 %v10277_v52  ;;  %v2794_v8 = vsub.f32 %v13160_v24, %v10045_v43  ;;  %v13192_v35 = vld [vmem:[#allocation66_spill] sm:$0xff] }
 0x383   : > { %13156 = vst [vmem:[#allocation49_spill] sm:$0xff] %v10347_v1  ;;  %13159 = vst [vmem:[#allocation52_spill] sm:$0xff] %v10354_v48  ;;  %v3631_v60 = vadd.f32 %v10179_v2, %v3630_v30  ;;  %v10362_v10 = vpop.eup %7233  ;;  %2705 = vperm.xlu1 %6898, %v10347_v1   ;;  %v10370_v59 = vadd.f32 %v10313_v53, %v3554_v12  ;;  %7253 = vpow2.f32 %v10289_v7  ;;  %v2795_v42 = vsub.f32 -inf, %v10045_v43 }
 0x384   : > { %13161 = vst [vmem:[#allocation54_spill] sm:$0xff] %v10362_v10  ;;  %5496 = vst.msk [vmem:[#allocation2 + $0xf8] sm:$0xff] %vm308_vm0, %v10347_v1  ;;  %v10374_v52 = vpop.eup %7235  ;;  %v3581_v2 = vadd.f32 %v10337_v28, %v3580_v14  ;;  %7255 = vpow2.f32 %v3100_v20  ;;  %v3088_v11 = vmul.f32 1.442695, %v2770_v41  ;;  %v10383_v32 = vadd.f32 %v10324_v27, %v3563_v54  ;;  %v13170_v54 = vld [vmem:[#allocation175_spill] sm:$0xff] }
 0x385   : > { %13162 = vst [vmem:[#allocation50_spill] sm:$0xff] %v10370_v59  ;;  %13163 = vst [vmem:[#allocation53_spill] sm:$0xff] %v10374_v52  ;;  %v10378_v30 = vadd.f32 %v10164_v34, %v3631_v60  ;;  %v10380_v61 = vpop.eup %7237  ;;  %7257 = vpow2.f32 %v3102_v9  ;;  %v3090_v12 = vmul.f32 1.442695, %v2771_v45  ;;  %v3132_v7 = vmul.f32 1.442695, %v2792_v22 }
 0x386   : > { %13164 = vst [vmem:[#allocation151_spill] sm:$0xff] %v10380_v61  ;;  %13165 = vst [vmem:[#allocation56_spill] sm:$0xff] %v10383_v32  ;;  %v10385_v24 = vpop.eup %7239  ;;  %v3571_v43 = vadd.f32 %v10362_v10, %v3570_v37  ;;  %7259 = vpow2.f32 %v3104_v16  ;;  %v3134_v14 = vmul.f32 1.442695, %v2793_v4  ;;  %v10388_v20 = vmul.f32 1.442695, %v2794_v8  ;;  %v10402_v16 = vpop.permute.xlu0 %2610 }
 0x387   : > { %13166 = vst [vmem:[#allocation59_spill] sm:$0xff] %v10385_v24  ;;  %v10390_v41 = vpop.eup %7241  ;;  %3927 = vperm.xlu1 %6898, %v9704_v58   ;;  %7261 = vpow2.f32 %v3106_v29  ;;  %v10393_v34 = vmul.f32 1.442695, %v2795_v42  ;;  %v2784_v9 = vsub.f32 %v13170_v54, %v10014_v63  ;;  %v3621_v45 = vadd.f32 %v10137_v33, %v10121_v17  ;;  %v7035_v22 = vld [vmem:[%s9322_s18 + $0x170] sm:$0xff]   ;;  %v13173_v37 = vld [vmem:[#allocation177_spill] sm:$0xff]  ;;  %v13174_v8 = vld [vmem:[#allocation178_spill] sm:$0xff] }
 0x388   : > { %13167 = vst [vmem:[#allocation55_spill] sm:$0xff] %v10388_v20  ;;  %13168 = vst [vmem:[#allocation57_spill] sm:$0xff] %v10390_v41  ;;  %v10400_v60 = vpop.eup %7243  ;;  %v10405_v4 = vadd.f32 %v10354_v48, %v3581_v2  ;;  %7263 = vpow2.f32 %v3084_v40  ;;  %v13176_v54 = vld [vmem:[#allocation64_spill] sm:$0xff]  ;;  %v13177_v33 = vld [vmem:[#allocation67_spill] sm:$0xff]  ;;  %6606 = vmatprep.subr.bf16.mxu0 %v7035_v22  ;;  %v3572_v2 = vadd.f32 %v10374_v52, %v3571_v43  ;;  %v2787_v22 = vsub.f32 -inf, %v10014_v63 }
 0x389   : > { %13169 = vst [vmem:[#allocation153_spill] sm:$0xff] %v10393_v34  ;;  %13171 = vst [vmem:[#allocation60_spill] sm:$0xff] %v10400_v60  ;;  %v10411_v39 = vpop.eup %7245  ;;  %v2805_v17 = vsub.f32 %v13176_v54, %v10402_v16  ;;  %v2807_v58 = vsub.f32 %v13177_v33, %v10402_v16  ;;  %v13178_v28 = vld [vmem:[#allocation63_spill] sm:$0xff]  ;;  %7265 = vpow2.f32 %v3086_v56  ;;  %v3597_v42 = vadd.f32 %v10385_v24, %v10218_v38  ;;  %v13180_v29 = vld [vmem:[#allocation149_spill] sm:$0xff] }
 0x38a   : > { %13172 = vst [vmem:[#allocation62_spill] sm:$0xff] %v10405_v4  ;;  %13175 = vst [vmem:[#allocation58_spill] sm:$0xff] %v10411_v39  ;;  %v2804_v19 = vsub.f32 %v13178_v28, %v10402_v16  ;;  %v10419_v40 = vpop.eup %7247  ;;  %7267 = vpow2.f32 %v3088_v11  ;;  %v3622_v1 = vadd.f32 %v13180_v29, %v3621_v45  ;;  %v10428_v33 = vld [vmem:[#allocation2 + $0xf0] sm:$0xff]  ;;  %v10433_v43 = vpop.permute.xlu0 %2615  ;;  %v13186_v11 = vld [vmem:[#allocation65_spill] sm:$0xff] }
 0x38b   : > { %13179 = vst [vmem:[#allocation61_spill] sm:$0xff] %v10419_v40  ;;  %v10425_v54 = vpop.eup %7249  ;;  %3937 = vperm.xlu1 %6898, %v13182_v57   ;;  %13183 = vst [vmem:[#allocation155_spill] sm:$0xff] %v10428_v33  ;;  %v3158_v28 = vmul.f32 1.442695, %v2805_v17  ;;  %v3162_v56 = vmul.f32 1.442695, %v2807_v58  ;;  %7269 = vpow2.f32 %v3090_v12  ;;  %v2806_v24 = vsub.f32 %v13186_v11, %v10402_v16  ;;  %v2410_v17 = vpop.xlane.xlu1 %2409 }
 0x38c   : > { %13181 = vst [vmem:[#allocation154_spill] sm:$0xff] %v10425_v54  ;;  %v10431_v48 = vpop.eup %7251  ;;  %13185 = vst [vmem:[#allocation158_spill] sm:$0xff] %v10433_v43  ;;  %v3156_v38 = vmul.f32 1.442695, %v2804_v19  ;;  %7271 = vpow2.f32 %v3132_v7  ;;  %v13187_v45 = vld [vmem:[#allocation30_spill] sm:$0xff]  ;;  %v7036_v57 = vld [vmem:[%s9322_s18 + $0x130] sm:$0xff]   ;;  %v2815_v50 = vsub.f32 %v13191_v6, %v10433_v43  ;;  %v2812_v19 = vsub.f32 %v13192_v35, %v10433_v43 }
 0x38d   : > { %13184 = vst [vmem:[#allocation156_spill] sm:$0xff] %v10431_v48  ;;  %v10438_v29 = vadd.f32 %v13187_v45, %v3622_v1  ;;  %v10441_v52 = vpop.eup %7253  ;;  %v13190_v58 = vld [vmem:[#allocation68_spill] sm:$0xff]  ;;  %7273 = vpow2.f32 %v3134_v14  ;;  %v10452_v7 = vmax.f32 %v10428_v33, %v2410_v17  ;;  %v13195_v1 = vld [vmem:[#allocation69_spill] sm:$0xff]  ;;  %v10456_v45 = vmul.f32 1.442695, %v2784_v9  ;;  %6607 = vmatpush3.bf16.msra.mxu0 %v7036_v57  ;;  %v13198_v6 = vld [vmem:[#allocation242_spill] sm:$0xff] }
 0x38e   : > { %13189 = vst [vmem:[#allocation162_spill] sm:$0xff] %v10441_v52  ;;  %v2813_v12 = vsub.f32 %v13190_v58, %v10433_v43  ;;  %v10449_v21 = vpop.eup %7255  ;;  %7275 = vpow2.f32 %v3158_v28  ;;  %v2814_v11 = vsub.f32 %v13195_v1, %v10433_v43  ;;  %v3178_v14 = vmul.f32 1.442695, %v2815_v50  ;;  %v10468_v57 = vpop.permute.xlu0 %2620  ;;  %v7037_v1 = vld [vmem:[%s9322_s18 + $0x1f0] sm:$0xff]   ;;  %v13202_v28 = vld [vmem:[#allocation75_spill] sm:$0xff] }
 0x38f   : > { %13188 = vst [vmem:[#allocation161_spill] sm:$0xff] %v10438_v29  ;;  %13193 = vst [vmem:[#allocation164_spill] sm:$0xff] %v10449_v21  ;;  %v10458_v58 = vpop.eup %7257  ;;  %3942 = vperm.xlu1 %6898, %v13198_v6   ;;  %7277 = vpow2.f32 %v3162_v56  ;;  %v3172_v27 = vmul.f32 1.442695, %v2812_v19  ;;  %2700 = vperm.xlu0 %6897, %v10452_v7   ;;  %v3160_v9 = vmul.f32 1.442695, %v2806_v24  ;;  %v2823_v6 = vsub.f32 %v13202_v28, %v10468_v57  ;;  %v10493_v28 = vpop.permute.xlu1 %2630 }
 0x390   : > { %13194 = vst [vmem:[#allocation157_spill] sm:$0xff] %v10452_v7  ;;  %13196 = vst [vmem:[#allocation159_spill] sm:$0xff] %v10456_v45  ;;  %v3174_v35 = vmul.f32 1.442695, %v2813_v12  ;;  %v10461_v36 = vpop.eup %7259  ;;  %7279 = vpow2.f32 %v3156_v38  ;;  %v3176_v17 = vmul.f32 1.442695, %v2814_v11  ;;  %v10483_v24 = vadd.f32 %v10380_v61, %v3572_v2  ;;  %6718 = vmatprep.subr.bf16.mxu1 %v7037_v1 }
 0x391   : > { %13197 = vst [vmem:[#allocation160_spill] sm:$0xff] %v10458_v58  ;;  %13199 = vst [vmem:[#allocation167_spill] sm:$0xff] %v10461_v36  ;;  %v7038_v12 = vld [vmem:[%s9322_s18 + $0x1b0] sm:$0xff]   ;;  %v10472_v56 = vpop.eup %7261  ;;  %v13203_v33 = vld [vmem:[#allocation71_spill] sm:$0xff]  ;;  %v3598_v38 = vadd.f32 %v10390_v41, %v3597_v42  ;;  %v13206_v11 = vsub.f32 %v13173_v37, %v10014_v63  ;;  %v13211_v2 = vsub.f32 %v13174_v8, %v10014_v63 }
 0x392   : > { %5495 = vst.msk [vmem:[#allocation2 + $0xf0] sm:$0xff] %vm308_vm0, %v10452_v7  ;;  %13200 = vst [vmem:[#allocation168_spill] sm:$0xff] %v10472_v56  ;;  %7281 = vpow2.f32 %v3174_v35  ;;  %v13201_v50 = vld [vmem:[#allocation72_spill] sm:$0xff]  ;;  %v2820_v55 = vsub.f32 %v13203_v33, %v10468_v57  ;;  %v10480_v7 = vpop.eup %7263  ;;  %6719 = vmatpush3.bf16.msra.mxu1 %v7038_v12  ;;  %v10504_v1 = vpop.permute.xlu0 %2625  ;;  %v13216_v41 = vld [vmem:[#allocation73_spill] sm:$0xff] }
 0x393   : > { %v2821_v19 = vsub.f32 %v13201_v50, %v10468_v57  ;;  %13204 = vst [vmem:[#allocation170_spill] sm:$0xff] %v10480_v7  ;;  %7283 = vpow2.f32 %v3178_v14  ;;  %13205 = vst [vmem:[#allocation163_spill] sm:$0xff] %v10483_v24  ;;  %v10489_v35 = vmul.f32 1.442695, %v13206_v11  ;;  %v10491_v50 = vpop.eup %7265  ;;  %v13210_v10 = vld [vmem:[#allocation244_spill] sm:$0xff]  ;;  %v13220_v12 = vld [vmem:[#allocation78_spill] sm:$0xff] }
 0x394   : > { %13208 = vst [vmem:[#allocation166_spill] sm:$0xff] %v10491_v50  ;;  %13209 = vst [vmem:[#allocation173_spill] sm:$0xff] %v10493_v28  ;;  %3952 = vperm.xlu1 %6898, %v13210_v10   ;;  %7285 = vpow2.f32 %v3172_v27  ;;  %v3194_v14 = vmul.f32 1.442695, %v2823_v6  ;;  %v10499_v61 = vmul.f32 1.442695, %v13211_v2  ;;  %v10501_v42 = vpop.eup %7267  ;;  %v2822_v10 = vsub.f32 %v13216_v41, %v10468_v57 }
 0x395   : > { %13207 = vst [vmem:[#allocation165_spill] sm:$0xff] %v10489_v35  ;;  %v3190_v33 = vmul.f32 1.442695, %v2821_v19  ;;  %13213 = vst [vmem:[#allocation176_spill] sm:$0xff] %v10501_v42  ;;  %v13214_v37 = vld [vmem:[#allocation240_spill] sm:$0xff]  ;;  %7287 = vpow2.f32 %v3160_v9  ;;  %v10510_v6 = vpop.eup %7269  ;;  %v2831_v19 = vsub.f32 %v13220_v12, %v10504_v1  ;;  %v13221_v2 = vld [vmem:[#allocation74_spill] sm:$0xff] }
 0x396   : > { %13212 = vst [vmem:[#allocation174_spill] sm:$0xff] %v10499_v61  ;;  %3932 = vperm.xlu0 %6897, %v13214_v37   ;;  %13215 = vst [vmem:[#allocation169_spill] sm:$0xff] %v10504_v1  ;;  %v3188_v11 = vmul.f32 1.442695, %v2820_v55  ;;  %v10508_v27 = vmul.f32 1.442695, %v2787_v22  ;;  %7289 = vpow2.f32 %v3176_v17  ;;  %v2828_v37 = vsub.f32 %v13221_v2, %v10504_v1  ;;  %v10518_v13 = vpop.eup %7271 }
 0x397   : > { %13218 = vst [vmem:[#allocation172_spill] sm:$0xff] %v10510_v6  ;;  %v13219_v63 = vld [vmem:[#allocation76_spill] sm:$0xff]  ;;  %13222 = vst [vmem:[#allocation179_spill] sm:$0xff] %v10518_v13  ;;  %7291 = vpow2.f32 %v3190_v33  ;;  %v13223_v55 = vld [vmem:[#allocation77_spill] sm:$0xff]  ;;  %v3599_v17 = vadd.f32 %v10400_v60, %v3598_v38  ;;  %v10525_v47 = vpop.eup %7273  ;;  %v3210_v12 = vmul.f32 1.442695, %v2831_v19  ;;  %v10531_v33 = vpop.permute.xlu0 %2635  ;;  %v3588_v38 = vadd.f32 %v10419_v40, %v10257_v31 }
 0x398   : > { %13217 = vst [vmem:[#allocation171_spill] sm:$0xff] %v10508_v27  ;;  %v2829_v8 = vsub.f32 %v13219_v63, %v10504_v1  ;;  %v2830_v41 = vsub.f32 %v13223_v55, %v10504_v1  ;;  %v13224_v22 = vld [vmem:[#allocation80_spill] sm:$0xff]  ;;  %13225 = vst [vmem:[#allocation180_spill] sm:$0xff] %v10525_v47  ;;  %v13226_v63 = vld [vmem:[#allocation246_spill] sm:$0xff]  ;;  %7293 = vpow2.f32 %v3194_v14  ;;  %v3204_v53 = vmul.f32 1.442695, %v2828_v37  ;;  %v10528_v2 = vpop.eup %7275 }
 0x399   : > { %v2837_v9 = vsub.f32 %v13224_v22, %v10493_v28  ;;  %3962 = vperm.xlu1 %6898, %v13226_v63   ;;  %13228 = vst [vmem:[#allocation182_spill] sm:$0xff] %v10531_v33  ;;  %7295 = vpow2.f32 %v3188_v11  ;;  %v3192_v55 = vmul.f32 1.442695, %v2822_v10  ;;  %v13229_v22 = vld [vmem:[#allocation83_spill] sm:$0xff]  ;;  %v10537_v60 = vpop.eup %7277  ;;  %v13230_v37 = vld [vmem:[#allocation84_spill] sm:$0xff]  ;;  %v13231_v19 = vld [vmem:[#allocation86_spill] sm:$0xff] }
 0x39a   : > { %v3206_v51 = vmul.f32 1.442695, %v2829_v8  ;;  %3947 = vperm.xlu0 %6897, %v13227_v26   ;;  %v2839_v15 = vsub.f32 %v13229_v22, %v10493_v28  ;;  %v3208_v14 = vmul.f32 1.442695, %v2830_v41  ;;  %v2845_v8 = vsub.f32 %v13230_v37, %v10531_v33  ;;  %v10543_v26 = vpop.eup %7279  ;;  %v13232_v11 = vld [vmem:[#allocation79_spill] sm:$0xff]  ;;  %v13234_v24 = vld [vmem:[#allocation181_spill] sm:$0xff] }
 0x39b   : > { %v2847_v63 = vsub.f32 %v13231_v19, %v10531_v33  ;;  %v3222_v10 = vmul.f32 1.442695, %v2837_v9  ;;  %v2836_v22 = vsub.f32 %v13232_v11, %v10493_v28  ;;  %v13236_v37 = vld [vmem:[#allocation82_spill] sm:$0xff]  ;;  %v13237_v19 = vld [vmem:[#allocation183_spill] sm:$0xff]  ;;  %v13239_v9 = vld [vmem:[#allocation245_spill] sm:$0xff]  ;;  %v10559_v11 = vpop.permute.xlu0 %2640 }
 0x39c   : > { %7297 = vpow2.f32 %v3206_v51  ;;  %v10549_v40 = vpop.eup %7281  ;;  %v13235_v51 = vld [vmem:[#allocation248_spill] sm:$0xff]  ;;  %v3238_v41 = vmul.f32 1.442695, %v2845_v8  ;;  %v2844_v4 = vsub.f32 %v13236_v37, %v10531_v33  ;;  %13240 = vst [vmem:[#allocation177_spill] sm:$0xff] %v10559_v11  ;;  %v3226_v59 = vmul.f32 1.442695, %v2839_v15 }
 0x39d   : > { %7299 = vpow2.f32 %v3210_v12  ;;  %3972 = vperm.xlu1 %6898, %v13235_v51   ;;  %v10556_v12 = vpop.eup %7283  ;;  %v4166_v31 = vpack.c.bf16 %v10549_v40, %v10528_v2  ;;  %v3242_v32 = vmul.f32 1.442695, %v2847_v63  ;;  %v3220_v15 = vmul.f32 1.442695, %v2836_v22  ;;  %v13249_v22 = vld [vmem:[#allocation247_spill] sm:$0xff] }
 0x39e   : > { %7301 = vpow2.f32 %v3204_v53  ;;  %13238 = vst [vmem:[#allocation175_spill] sm:$0xff] %v10556_v12  ;;  %3957 = vperm.xlu0 %6897, %v13239_v9   ;;  %v13241_v53 = vld [vmem:[#allocation81_spill] sm:$0xff]  ;;  %v10565_v51 = vpop.eup %7285  ;;  %v4168_v37 = vpack.c.bf16 %v10556_v12, %v10537_v60  ;;  %v2846_v9 = vsub.f32 %v13243_v18, %v10531_v33  ;;  %v3236_v63 = vmul.f32 1.442695, %v2844_v4  ;;  %v13251_v4 = vld [vmem:[#allocation91_spill] sm:$0xff] }
 0x39f   : > { %7303 = vpow2.f32 %v3192_v55  ;;  %v2838_v8 = vsub.f32 %v13241_v53, %v10493_v28  ;;  %13242 = vst [vmem:[#allocation178_spill] sm:$0xff] %v10565_v51  ;;  %v10571_v29 = vpop.eup %7287  ;;  %4837 = vmatprep.mubr.bf16.mxu0 %v4166_v31  ;;  %v4165_v55 = vpack.c.bf16 %v10565_v51, %v10543_v26  ;;  %v13244_v53 = vld [vmem:[#allocation88_spill] sm:$0xff]  ;;  %v13246_v28 = vld [vmem:[#allocation250_spill] sm:$0xff]  ;;  %v10581_v18 = vadd.f32 %v10411_v39, %v3599_v17 }
 0x3a0   : > { %7305 = vpow2.f32 %v3208_v14  ;;  %v2853_v1 = vsub.f32 %v13244_v53, %v10559_v11  ;;  %v10577_v27 = vpop.eup %7289  ;;  %4998 = vmatprep.mubr.bf16.mxu1 %v4168_v37  ;;  %v13248_v14 = vld [vmem:[#allocation184_spill] sm:$0xff]  ;;  %v10590_v53 = vpop.permute.xlu0 %2645 }
 0x3a1   : > { %7307 = vpow2.f32 %v3222_v10  ;;  %13245 = vst [vmem:[#allocation64_spill] sm:$0xff] %v10577_v27  ;;  %3982 = vperm.xlu1 %6898, %v13246_v28   ;;  %13247 = vst [vmem:[#allocation67_spill] sm:$0xff] %v10581_v18  ;;  %v10585_v33 = vpop.eup %7291  ;;  %4838 = vmatmul.mubr.bf16.gmra.mrb[152].mxu0 %v4165_v55  ;;  %v4167_v10 = vpack.c.bf16 %v10577_v27, %v10571_v29  ;;  %v3224_v37 = vmul.f32 1.442695, %v2838_v8  ;;  %v3240_v28 = vmul.f32 1.442695, %v2846_v9 }
 0x3a2   : > { %7309 = vpow2.f32 %v3238_v41  ;;  %3967 = vperm.xlu0 %6897, %v13249_v22   ;;  %13250 = vst [vmem:[#allocation63_spill] sm:$0xff] %v10590_v53  ;;  %v2855_v41 = vsub.f32 %v13251_v4, %v10559_v11  ;;  %v10594_v17 = vpop.eup %7293  ;;  %v13252_v31 = vld [vmem:[#allocation92_spill] sm:$0xff]  ;;  %v13253_v55 = vld [vmem:[#allocation94_spill] sm:$0xff]  ;;  %v3254_v22 = vmul.f32 1.442695, %v2853_v1  ;;  %v3589_v4 = vadd.f32 %v10425_v54, %v3588_v38  ;;  %v10616_v1 = vpop.permute.xlu1 %2655  ;;  %v13264_v54 = vld [vmem:[#allocation93_spill] sm:$0xff] }
 0x3a3   : > { %7311 = vpow2.f32 %v3226_v59  ;;  %v2861_v39 = vsub.f32 %v13252_v31, %v10590_v53  ;;  %v2863_v18 = vsub.f32 %v13253_v55, %v10590_v53  ;;  %v10600_v61 = vpop.eup %7295  ;;  %4999 = vmatmul.mubr.bf16.gmra.mrb[152].mxu1 %v4167_v10  ;;  %v13254_v59 = vld [vmem:[#allocation87_spill] sm:$0xff]  ;;  %v13257_v31 = vld [vmem:[#allocation90_spill] sm:$0xff]  ;;  %v10612_v55 = vadd.f32 %v10449_v21, %v10298_v3  ;;  %13259 = vst [vmem:[#allocation30_spill] sm:$0xff] %v10616_v1  ;;  %v13260_v10 = vld [vmem:[#allocation249_spill] sm:$0xff] }
 0x3a4   : > { %7313 = vpow2.f32 %v3242_v32  ;;  %v2852_v8 = vsub.f32 %v13254_v59, %v10559_v11  ;;  %v13256_v32 = vld [vmem:[#allocation252_spill] sm:$0xff]  ;;  %v2860_v12 = vsub.f32 %v13257_v31, %v10590_v53  ;;  %v10619_v38 = vpop.permute.xlu0 %2650  ;;  %v13280_v27 = vld [vmem:[#allocation97_spill] sm:$0xff] }
 0x3a5   : > { %7315 = vpow2.f32 %v3220_v15  ;;  %3992 = vperm.xlu1 %6898, %v13256_v32   ;;  %v3270_v9 = vmul.f32 1.442695, %v2861_v39  ;;  %13261 = vst [vmem:[#allocation68_spill] sm:$0xff] %v10619_v38  ;;  %v3258_v39 = vmul.f32 1.442695, %v2855_v41  ;;  %v2870_v43 = vsub.f32 %v13280_v27, %v10619_v38 }
 0x3a6   : > { %v10605_v35 = vpop.eup %7297  ;;  %7317 = vpow2.f32 %v3236_v63  ;;  %3977 = vperm.xlu0 %6897, %v13260_v10   ;;  %v13262_v63 = vld [vmem:[#allocation89_spill] sm:$0xff]  ;;  %v3274_v21 = vmul.f32 1.442695, %v2863_v18  ;;  %v2862_v10 = vsub.f32 %v13264_v54, %v10590_v53  ;;  %v3252_v41 = vmul.f32 1.442695, %v2852_v8  ;;  %v13268_v54 = vld [vmem:[#allocation100_spill] sm:$0xff] }
 0x3a7   : > { %13255 = vst [vmem:[#allocation149_spill] sm:$0xff] %v10605_v35  ;;  %v10614_v15 = vpop.eup %7299  ;;  %v4174_v59 = vpack.c.bf16 %v10605_v35, %v10585_v33  ;;  %7319 = vpow2.f32 %v3224_v37  ;;  %v2854_v31 = vsub.f32 %v13262_v63, %v10559_v11  ;;  %v13265_v63 = vld [vmem:[#allocation96_spill] sm:$0xff]  ;;  %v2877_v18 = vsub.f32 %v13268_v54, %v10616_v1  ;;  %v13269_v8 = vld [vmem:[#allocation251_spill] sm:$0xff]  ;;  %v13272_v54 = vld [vmem:[#allocation102_spill] sm:$0xff] }
 0x3a8   : > { %13258 = vst [vmem:[#allocation65_spill] sm:$0xff] %v10614_v15  ;;  %v10625_v32 = vpop.eup %7301  ;;  %v4176_v3 = vpack.c.bf16 %v10614_v15, %v10594_v17  ;;  %7321 = vpow2.f32 %v3240_v28  ;;  %v2869_v11 = vsub.f32 %v13265_v63, %v10619_v38  ;;  %v13267_v15 = vld [vmem:[#allocation254_spill] sm:$0xff]  ;;  %v3268_v28 = vmul.f32 1.442695, %v2860_v12 }
 0x3a9   : > { %13263 = vst [vmem:[#allocation70_spill] sm:$0xff] %v10625_v32  ;;  %v10631_v45 = vpop.eup %7303  ;;  %4845 = vmatprep.mubr.bf16.mxu0 %v4174_v59  ;;  %v4173_v37 = vpack.c.bf16 %v10625_v32, %v10600_v61  ;;  %7323 = vpow2.f32 %v3254_v22  ;;  %4002 = vperm.xlu1 %6898, %v13267_v15   ;;  %v3590_v59 = vadd.f32 %v10431_v48, %v3589_v4  ;;  %v3272_v15 = vmul.f32 1.442695, %v2862_v10  ;;  %v13273_v48 = vld [vmem:[#allocation98_spill] sm:$0xff]  ;;  %v7039_v32 = vld [vmem:[%s9322_s18 + $0x178] sm:$0xff]   ;;  %v13277_v10 = vld [vmem:[#allocation95_spill] sm:$0xff] }
 0x3aa   : > { %v10637_v35 = vpop.eup %7305  ;;  %5006 = vmatprep.mubr.bf16.mxu1 %v4176_v3  ;;  %7325 = vpow2.f32 %v3270_v9  ;;  %3987 = vperm.xlu0 %6897, %v13269_v8   ;;  %v3256_v3 = vmul.f32 1.442695, %v2854_v31  ;;  %v13270_v9 = vld [vmem:[#allocation99_spill] sm:$0xff]  ;;  %v2879_v4 = vsub.f32 %v13272_v54, %v10616_v1  ;;  %v10660_v8 = vpop.permute.xlu1 %2665  ;;  %v3302_v34 = vmul.f32 1.442695, %v2877_v18 }
 0x3ab   : > { %13266 = vst [vmem:[#allocation66_spill] sm:$0xff] %v10637_v35  ;;  %v10643_v53 = vpop.eup %7307  ;;  %4846 = vmatmul.mubr.bf16.gmra.mrb[156].mxu0 %v4173_v37  ;;  %v4175_v22 = vpack.c.bf16 %v10637_v35, %v10631_v45  ;;  %7327 = vpow2.f32 %v3258_v39  ;;  %v2871_v63 = vsub.f32 %v13270_v9, %v10619_v38  ;;  %v2876_v37 = vsub.f32 %v13273_v48, %v10616_v1  ;;  %v10662_v39 = vpop.permute.xlu0 %2660  ;;  %v13279_v48 = vld [vmem:[#allocation22_spill] sm:$0xff] }
 0x3ac   : > { %v10650_v12 = vpop.eup %7309  ;;  %7329 = vpow2.f32 %v3274_v21  ;;  %13275 = vst [vmem:[#allocation75_spill] sm:$0xff] %v10660_v8  ;;  %13276 = vst [vmem:[#allocation71_spill] sm:$0xff] %v10662_v39  ;;  %v3286_v21 = vmul.f32 1.442695, %v2869_v11  ;;  %v2868_v9 = vsub.f32 %v13277_v10, %v10619_v38  ;;  %6608 = vmatprep.subr.bf16.mxu0 %v7039_v32  ;;  %v3306_v27 = vmul.f32 1.442695, %v2879_v4 }
 0x3ad   : > { %13271 = vst [vmem:[#allocation69_spill] sm:$0xff] %v10650_v12  ;;  %v10658_v35 = vpop.eup %7311  ;;  %5007 = vmatmul.mubr.bf16.gmra.mrb[156].mxu1 %v4175_v22  ;;  %v4182_v31 = vpack.c.bf16 %v10650_v12, %v10643_v53  ;;  %7331 = vpow2.f32 %v3252_v41  ;;  %4012 = vperm.xlu1 %6898, %v13279_v48   ;;  %v13281_v22 = vld [vmem:[#allocation101_spill] sm:$0xff]  ;;  %v3290_v10 = vmul.f32 1.442695, %v2871_v63  ;;  %v3300_v63 = vmul.f32 1.442695, %v2876_v37 }
 0x3ae   : > { %13274 = vst [vmem:[#allocation72_spill] sm:$0xff] %v10658_v35  ;;  %v10668_v54 = vpop.eup %7313  ;;  %7333 = vpow2.f32 %v3268_v28  ;;  %v2878_v20 = vsub.f32 %v13281_v22, %v10616_v1  ;;  %v13282_v41 = vld [vmem:[#allocation253_spill] sm:$0xff]  ;;  %v10681_v28 = vadd.f32 %v10441_v52, %v3590_v59  ;;  %v13285_v22 = vld [vmem:[#allocation104_spill] sm:$0xff]  ;;  %6609 = vmatpush3.bf16.msra.mxu0 %v7040_v44  ;;  %v3284_v59 = vmul.f32 1.442695, %v2868_v9  ;;  %v10702_v52 = vpop.permute.xlu1 %2675  ;;  %v13297_v1 = vld [vmem:[#allocation103_spill] sm:$0xff] }
 0x3af   : > { %13278 = vst [vmem:[#allocation73_spill] sm:$0xff] %v10668_v54  ;;  %v10675_v51 = vpop.eup %7315  ;;  %4853 = vmatprep.mubr.bf16.mxu0 %v4182_v31  ;;  %v4184_v11 = vpack.c.bf16 %v10668_v54, %v10658_v35  ;;  %3997 = vperm.xlu0 %6897, %v13282_v41   ;;  %7335 = vpow2.f32 %v3256_v3  ;;  %v2885_v32 = vsub.f32 %v13285_v22, %v10662_v39  ;;  %v3288_v4 = vmul.f32 1.442695, %v2870_v43 }
 0x3b0   : > { %13283 = vst [vmem:[#allocation76_spill] sm:$0xff] %v10681_v28  ;;  %v10683_v18 = vpop.eup %7317  ;;  %7337 = vpow2.f32 %v3272_v15  ;;  %v10689_v31 = vadd.f32 %v10458_v58, %v10612_v55  ;;  %v13288_v15 = vld [vmem:[#allocation20_spill] sm:$0xff]  ;;  %v3304_v22 = vmul.f32 1.442695, %v2878_v20  ;;  %13291 = vst [vmem:[#allocation83_spill] sm:$0xff] %v10702_v52  ;;  %v13295_v20 = vld [vmem:[#allocation110_spill] sm:$0xff]  ;;  %v2884_v28 = vsub.f32 %v13297_v1, %v10662_v39 }
 0x3b1   : > { %13284 = vst [vmem:[#allocation78_spill] sm:$0xff] %v10683_v18  ;;  %v10691_v48 = vpop.eup %7319  ;;  %5014 = vmatprep.mubr.bf16.mxu1 %v4184_v11  ;;  %v4181_v3 = vpack.c.bf16 %v10683_v18, %v10675_v51  ;;  %7339 = vpow2.f32 %v3286_v21  ;;  %4022 = vperm.xlu1 %6898, %v13288_v15   ;;  %v13289_v55 = vld [vmem:[#allocation108_spill] sm:$0xff]  ;;  %v10704_v11 = vpop.permute.xlu0 %2670  ;;  %v13293_v21 = vld [vmem:[#allocation19_spill] sm:$0xff]  ;;  %v2895_v9 = vsub.f32 %v13295_v20, %v10660_v8  ;;  %v3318_v15 = vmul.f32 1.442695, %v2885_v32  ;;  %v13303_v1 = vld [vmem:[#allocation21_spill] sm:$0xff] }
 0x3b2   : > { %13286 = vst [vmem:[#allocation74_spill] sm:$0xff] %v10691_v48  ;;  %v10695_v41 = vpop.eup %7321  ;;  %7341 = vpow2.f32 %v3302_v34  ;;  %v2893_v58 = vsub.f32 %v13289_v55, %v10660_v8  ;;  %13292 = vst [vmem:[#allocation84_spill] sm:$0xff] %v10704_v11  ;;  %v13294_v34 = vld [vmem:[#allocation107_spill] sm:$0xff] }
 0x3b3   : > { %13287 = vst [vmem:[#allocation77_spill] sm:$0xff] %v10695_v41  ;;  %v10700_v44 = vpop.eup %7323  ;;  %4854 = vmatmul.mubr.bf16.gmra.mrb[160].mxu0 %v4181_v3  ;;  %v4183_v37 = vpack.c.bf16 %v10695_v41, %v10691_v48  ;;  %4007 = vperm.xlu0 %6897, %v13293_v21   ;;  %7343 = vpow2.f32 %v3290_v10  ;;  %v2887_v43 = vsub.f32 %v13294_v34, %v10662_v39  ;;  %v13298_v3 = vld [vmem:[#allocation106_spill] sm:$0xff]  ;;  %v13300_v34 = vld [vmem:[#allocation105_spill] sm:$0xff] }
 0x3b4   : > { %13290 = vst [vmem:[#allocation80_spill] sm:$0xff] %v10700_v44  ;;  %v10713_v55 = vpop.eup %7325  ;;  %7345 = vpow2.f32 %v3306_v27  ;;  %v2892_v38 = vsub.f32 %v13298_v3, %v10660_v8  ;;  %v2886_v20 = vsub.f32 %v13300_v34, %v10662_v39  ;;  %v13301_v27 = vld [vmem:[#allocation109_spill] sm:$0xff]  ;;  %v3334_v3 = vmul.f32 1.442695, %v2893_v58  ;;  %v13307_v39 = vld [vmem:[#allocation18_spill] sm:$0xff] }
 0x3b5   : > { %13296 = vst [vmem:[#allocation86_spill] sm:$0xff] %v10713_v55  ;;  %v10719_v54 = vpop.eup %7327  ;;  %5015 = vmatmul.mubr.bf16.gmra.mrb[160].mxu1 %v4183_v37  ;;  %v4190_v10 = vpack.c.bf16 %v10713_v55, %v10700_v44  ;;  %7347 = vpow2.f32 %v3284_v59  ;;  %v2894_v32 = vsub.f32 %v13301_v27, %v10660_v8  ;;  %4032 = vperm.xlu1 %6898, %v13303_v1   ;;  %v13304_v37 = vld [vmem:[#allocation112_spill] sm:$0xff]  ;;  %v3322_v27 = vmul.f32 1.442695, %v2887_v43  ;;  %v7041_v1 = vld [vmem:[%s9322_s18 + $0x1f8] sm:$0xff]  }
 0x3b6   : > { %13299 = vst [vmem:[#allocation79_spill] sm:$0xff] %v10719_v54  ;;  %v10727_v21 = vpop.eup %7329  ;;  %7349 = vpow2.f32 %v3300_v63  ;;  %v2901_v41 = vsub.f32 %v13304_v37, %v10704_v11  ;;  %v13305_v55 = vld [vmem:[#allocation116_spill] sm:$0xff]  ;;  %v3338_v8 = vmul.f32 1.442695, %v2895_v9  ;;  %v7042_v63 = vld [vmem:[%s9322_s18 + $0x1b8] sm:$0xff]   ;;  %6720 = vmatprep.subr.bf16.mxu1 %v7041_v1 }
 0x3b7   : > { %13302 = vst [vmem:[#allocation28_spill] sm:$0xff] %v10727_v21  ;;  %v2909_v59 = vsub.f32 %v13305_v55, %v10702_v52  ;;  %v10734_v18 = vpop.eup %7331  ;;  %4861 = vmatprep.mubr.bf16.mxu0 %v4190_v10  ;;  %v4192_v34 = vpack.c.bf16 %v10727_v21, %v10719_v54  ;;  %4017 = vperm.xlu0 %6897, %v13307_v39   ;;  %7351 = vpow2.f32 %v3288_v4  ;;  %v3316_v37 = vmul.f32 1.442695, %v2884_v28  ;;  %v13309_v55 = vld [vmem:[#allocation115_spill] sm:$0xff]  ;;  %v10751_v39 = vpop.permute.xlu1 %2685 }
 0x3b8   : > { %13306 = vst [vmem:[#allocation181_spill] sm:$0xff] %v10734_v18  ;;  %v10741_v58 = vpop.eup %7333  ;;  %7353 = vpow2.f32 %v3304_v22  ;;  %v3332_v12 = vmul.f32 1.442695, %v2892_v38  ;;  %v2903_v44 = vsub.f32 %v13309_v55, %v10704_v11  ;;  %v3320_v4 = vmul.f32 1.442695, %v2886_v20  ;;  %13312 = vst [vmem:[#allocation85_spill] sm:$0xff] %v10751_v39  ;;  %v10753_v22 = vpop.permute.xlu0 %2680  ;;  %6721 = vmatpush3.bf16.msra.mxu1 %v7042_v63 }
 0x3b9   : > { %13308 = vst [vmem:[#allocation82_spill] sm:$0xff] %v10741_v58  ;;  %v10745_v35 = vpop.eup %7335  ;;  %5022 = vmatprep.mubr.bf16.mxu1 %v4192_v34  ;;  %v4189_v10 = vpack.c.bf16 %v10741_v58, %v10734_v18  ;;  %7355 = vpow2.f32 %v3318_v15  ;;  %v3336_v43 = vmul.f32 1.442695, %v2894_v32  ;;  %13313 = vst [vmem:[#allocation88_spill] sm:$0xff] %v10753_v22  ;;  %v13314_v38 = vld [vmem:[#allocation255_spill] sm:$0xff]  ;;  %v13321_v63 = vld [vmem:[#allocation113_spill] sm:$0xff] }
 0x3ba   : > { %13310 = vst [vmem:[#allocation183_spill] sm:$0xff] %v10745_v35  ;;  %v10749_v9 = vpop.eup %7337  ;;  %4042 = vperm.xlu1 %6898, %v13314_v38   ;;  %7357 = vpow2.f32 %v3334_v3  ;;  %v3350_v28 = vmul.f32 1.442695, %v2901_v41  ;;  %v3366_v55 = vmul.f32 1.442695, %v2909_v59  ;;  %v13315_v34 = vld [vmem:[#allocation119_spill] sm:$0xff]  ;;  %v2902_v38 = vsub.f32 %v13321_v63, %v10704_v11 }
 0x3bb   : > { %13311 = vst [vmem:[#allocation81_spill] sm:$0xff] %v10749_v9  ;;  %v2911_v21 = vsub.f32 %v13315_v34, %v10702_v52  ;;  %v10758_v58 = vpop.eup %7339  ;;  %4862 = vmatmul.mubr.bf16.gmra.mrb[164].mxu0 %v4189_v10  ;;  %v4191_v15 = vpack.c.bf16 %v10749_v9, %v10745_v35  ;;  %v13317_v20 = vld [vmem:[#allocation23_spill] sm:$0xff]  ;;  %7359 = vpow2.f32 %v3322_v27  ;;  %v13319_v3 = vld [vmem:[#allocation114_spill] sm:$0xff]  ;;  %v3354_v34 = vmul.f32 1.442695, %v2903_v44  ;;  %v13327_v35 = vld [vmem:[#allocation25_spill] sm:$0xff]  ;;  %v10799_v48 = vpop.permute.xlu1 %2695 }
 0x3bc   : > { %13316 = vst [vmem:[#allocation184_spill] sm:$0xff] %v10758_v58  ;;  %4027 = vperm.xlu0 %6897, %v13317_v20   ;;  %v13318_v32 = vld [vmem:[#allocation111_spill] sm:$0xff]  ;;  %v2908_v41 = vsub.f32 %v13319_v3, %v10702_v52  ;;  %v10767_v59 = vpop.eup %7341  ;;  %7361 = vpow2.f32 %v3338_v8  ;;  %v13322_v10 = vld [vmem:[#allocation118_spill] sm:$0xff]  ;;  %13335 = vst [vmem:[#allocation93_spill] sm:$0xff] %v10799_v48 }
 0x3bd   : > { %v2900_v1 = vsub.f32 %v13318_v32, %v10704_v11  ;;  %13320 = vst [vmem:[#allocation91_spill] sm:$0xff] %v10767_v59  ;;  %v2910_v54 = vsub.f32 %v13322_v10, %v10702_v52  ;;  %v10773_v9 = vpop.eup %7343  ;;  %5023 = vmatmul.mubr.bf16.gmra.mrb[164].mxu1 %v4191_v15  ;;  %v4198_v27 = vpack.c.bf16 %v10767_v59, %v10758_v58  ;;  %7363 = vpow2.f32 %v3316_v37  ;;  %v13324_v32 = vld [vmem:[#allocation122_spill] sm:$0xff]  ;;  %v13328_v10 = vld [vmem:[#allocation125_spill] sm:$0xff] }
 0x3be   : > { %13323 = vst [vmem:[#allocation92_spill] sm:$0xff] %v10773_v9  ;;  %v2917_v3 = vsub.f32 %v13324_v32, %v10753_v22  ;;  %v13325_v20 = vld [vmem:[#allocation126_spill] sm:$0xff]  ;;  %v10781_v44 = vpop.eup %7345  ;;  %4052 = vperm.xlu1 %6898, %v13327_v35   ;;  %7365 = vpow2.f32 %v3332_v12  ;;  %v3370_v63 = vmul.f32 1.442695, %v2911_v21  ;;  %v2919_v52 = vsub.f32 %v13328_v10, %v10753_v22  ;;  %v13329_v15 = vld [vmem:[#allocation129_spill] sm:$0xff]  ;;  %v13331_v32 = vld [vmem:[#allocation24_spill] sm:$0xff] }
 0x3bf   : > { %v2925_v8 = vsub.f32 %v13325_v20, %v10751_v39  ;;  %13326 = vst [vmem:[#allocation94_spill] sm:$0xff] %v10781_v44  ;;  %v2927_v11 = vsub.f32 %v13329_v15, %v10751_v39  ;;  %v10788_v59 = vpop.eup %7347  ;;  %4869 = vmatprep.mubr.bf16.mxu0 %v4198_v27  ;;  %v4200_v37 = vpack.c.bf16 %v10781_v44, %v10773_v9  ;;  %7367 = vpow2.f32 %v3320_v4  ;;  %v13333_v10 = vld [vmem:[#allocation121_spill] sm:$0xff]  ;;  %v10801_v27 = vpop.permute.xlu0 %2690 }
 0x3c0   : > { %13330 = vst [vmem:[#allocation87_spill] sm:$0xff] %v10788_v59  ;;  %4037 = vperm.xlu0 %6897, %v13331_v32   ;;  %v3348_v20 = vmul.f32 1.442695, %v2900_v1  ;;  %v3364_v58 = vmul.f32 1.442695, %v2908_v41  ;;  %v10793_v35 = vpop.eup %7349  ;;  %7369 = vpow2.f32 %v3336_v43  ;;  %v2916_v18 = vsub.f32 %v13333_v10, %v10753_v22  ;;  %v13337_v43 = vld [vmem:[#allocation29_spill] sm:$0xff] }
 0x3c1   : > { %13332 = vst [vmem:[#allocation90_spill] sm:$0xff] %v10793_v35  ;;  %v3352_v12 = vmul.f32 1.442695, %v2902_v38  ;;  %v3368_v21 = vmul.f32 1.442695, %v2910_v54  ;;  %v10797_v15 = vpop.eup %7351  ;;  %5030 = vmatprep.mubr.bf16.mxu1 %v4200_v37  ;;  %v4197_v4 = vpack.c.bf16 %v10793_v35, %v10788_v59  ;;  %7371 = vpow2.f32 %v3350_v28  ;;  %v13338_v10 = vld [vmem:[#allocation124_spill] sm:$0xff] }
 0x3c2   : > { %13334 = vst [vmem:[#allocation89_spill] sm:$0xff] %v10797_v15  ;;  %v3382_v1 = vmul.f32 1.442695, %v2917_v3  ;;  %v3398_v41 = vmul.f32 1.442695, %v2925_v8  ;;  %v10805_v32 = vpop.eup %7353  ;;  %4062 = vperm.xlu1 %6898, %v13337_v43   ;;  %7373 = vpow2.f32 %v3366_v55  ;;  %v2924_v44 = vsub.f32 %v13338_v10, %v10751_v39  ;;  %v13340_v35 = vld [vmem:[#allocation26_spill] sm:$0xff] }
 0x3c3   : > { %13336 = vst [vmem:[#allocation96_spill] sm:$0xff] %v10805_v32  ;;  %v3386_v54 = vmul.f32 1.442695, %v2919_v52  ;;  %v3402_v38 = vmul.f32 1.442695, %v2927_v11  ;;  %v10810_v9 = vpop.eup %7355  ;;  %4870 = vmatmul.mubr.bf16.gmra.mrb[168].mxu0 %v4197_v4  ;;  %v4199_v37 = vpack.c.bf16 %v10805_v32, %v10797_v15  ;;  %7375 = vpow2.f32 %v3354_v34  ;;  %v13341_v28 = vld [vmem:[#allocation123_spill] sm:$0xff] }
 0x3c4   : > { %13339 = vst [vmem:[#allocation100_spill] sm:$0xff] %v10810_v9  ;;  %4047 = vperm.xlu0 %6897, %v13340_v35   ;;  %v2918_v3 = vsub.f32 %v13341_v28, %v10753_v22  ;;  %v13342_v8 = vld [vmem:[#allocation128_spill] sm:$0xff]  ;;  %v10819_v52 = vpop.eup %7357  ;;  %7377 = vpow2.f32 %v3370_v63  ;;  %v3380_v11 = vmul.f32 1.442695, %v2916_v18  ;;  %v13346_v28 = vld [vmem:[#allocation135_spill] sm:$0xff]  ;;  %v13347_v35 = vld [vmem:[#allocation138_spill] sm:$0xff] }
 0x3c5   : > { %v2926_v55 = vsub.f32 %v13342_v8, %v10751_v39  ;;  %13343 = vst [vmem:[#allocation99_spill] sm:$0xff] %v10819_v52  ;;  %v13344_v10 = vld [vmem:[#allocation132_spill] sm:$0xff]  ;;  %v10825_v32 = vpop.eup %7359  ;;  %5031 = vmatmul.mubr.bf16.gmra.mrb[168].mxu1 %v4199_v37  ;;  %v4206_v34 = vpack.c.bf16 %v10819_v52, %v10810_v9  ;;  %7379 = vpow2.f32 %v3348_v20  ;;  %v2935_v8 = vsub.f32 %v13346_v28, %v10801_v27  ;;  %v13350_v37 = vld [vmem:[#allocation134_spill] sm:$0xff]  ;;  %v13351_v28 = vld [vmem:[#allocation27_spill] sm:$0xff] }
 0x3c6   : > { %v2933_v43 = vsub.f32 %v13344_v10, %v10801_v27  ;;  %v13345_v4 = vld [vmem:[#allocation136_spill] sm:$0xff]  ;;  %v2943_v63 = vsub.f32 %v13347_v35, %v10799_v48  ;;  %v10833_v18 = vpop.eup %7361  ;;  %4072 = vperm.xlu1 %6898, %v10241_v0   ;;  %7381 = vpow2.f32 %v3364_v58  ;;  %v13349_v10 = vld [vmem:[#allocation131_spill] sm:$0xff]  ;;  %v2940_v39 = vsub.f32 %v13350_v37, %v10799_v48 }
 0x3c7   : > { %v2941_v59 = vsub.f32 %v13345_v4, %v10799_v48  ;;  %13348 = vst [vmem:[#allocation102_spill] sm:$0xff] %v10833_v18  ;;  %v2932_v4 = vsub.f32 %v13349_v10, %v10801_v27  ;;  %v3606_v20 = vadd.f32 %v10480_v7, %v10332_v62  ;;  %v10842_v22 = vpop.eup %7363  ;;  %4877 = vmatprep.mubr.bf16.mxu0 %v4206_v34  ;;  %7383 = vpow2.f32 %v3352_v12 }
 0x3c8   : > { %v4208_v35 = vpack.c.bf16 %v10833_v18, %v10825_v32  ;;  %4057 = vperm.xlu0 %6897, %v13351_v28   ;;  %v3396_v0 = vmul.f32 1.442695, %v2924_v44  ;;  %v3384_v58 = vmul.f32 1.442695, %v2918_v3  ;;  %v10847_v52 = vpop.eup %7365  ;;  %7385 = vpow2.f32 %v3368_v21 }
 0x3c9   : > { %v3400_v10 = vmul.f32 1.442695, %v2926_v55  ;;  %v3414_v9 = vmul.f32 1.442695, %v2933_v43  ;;  %v3430_v37 = vmul.f32 1.442695, %v2941_v59  ;;  %v10849_v15 = vpop.eup %7367  ;;  %v4205_v62 = vpack.c.bf16 %v10847_v52, %v10842_v22 }
 0x3ca   : > { %5038 = vmatprep.mubr.bf16.mxu1 %v4208_v35  ;;  %7387 = vpow2.f32 %v3382_v1  ;;  %v3418_v34 = vmul.f32 1.442695, %v2935_v8  ;;  %v3434_v7 = vmul.f32 1.442695, %v2943_v63  ;;  %v10853_v18 = vpop.eup %7369  ;;  %v3412_v44 = vmul.f32 1.442695, %v2932_v4 }
 0x3cb   : > { %7389 = vpow2.f32 %v3398_v41  ;;  %v10855_v12 = vmul.f32 1.442695, %v2940_v39  ;;  %v3607_v21 = vadd.f32 %v10491_v50, %v3606_v20  ;;  %v10858_v3 = vpop.eup %7371  ;;  %4878 = vmatmul.mubr.bf16.gmra.mrb[172].mxu0 %v4205_v62  ;;  %v4207_v59 = vpack.c.bf16 %v10853_v18, %v10849_v15  ;;  %v13352_v1 = vld [vmem:[#allocation133_spill] sm:$0xff]  ;;  %v13391_v50 = vld [vmem:[#allocation198_spill] sm:$0xff] }
 0x3cc   : > { %4067 = vperm.xlu0 %6897, %v10235_v49   ;;  %7391 = vpow2.f32 %v3386_v54  ;;  %v2934_v43 = vsub.f32 %v13352_v1, %v10801_v27  ;;  %v13353_v55 = vld [vmem:[#allocation137_spill] sm:$0xff]  ;;  %v10867_v8 = vpop.eup %7373  ;;  %v3617_v39 = vadd.f32 %v10461_v36, %v10689_v31  ;;  %v3633_v63 = vadd.f32 %v10518_v13, %v10378_v30  ;;  %v13379_v36 = vld [vmem:[#allocation159_spill] sm:$0xff] }
 0x3cd   : > { %v2942_v41 = vsub.f32 %v13353_v55, %v10799_v48  ;;  %7393 = vpow2.f32 %v3402_v38  ;;  %v3648_v4 = vadd.f32 %v10543_v26, %v10528_v2  ;;  %v10875_v20 = vpop.eup %7375  ;;  %5039 = vmatmul.mubr.bf16.gmra.mrb[172].mxu1 %v4207_v59  ;;  %v4214_v54 = vpack.c.bf16 %v10867_v8, %v10858_v3  ;;  %v13354_v35 = vld [vmem:[#allocation185_spill] sm:$0xff]  ;;  %v13355_v38 = vld [vmem:[#allocation186_spill] sm:$0xff]  ;;  %v13357_v26 = vld [vmem:[#allocation188_spill] sm:$0xff] }
 0x3ce   : > { %7395 = vpow2.f32 %v3380_v11  ;;  %v2808_v62 = vsub.f32 %v13354_v35, %v10402_v16  ;;  %v2809_v1 = vsub.f32 %v13355_v38, %v10402_v16  ;;  %v10883_v31 = vpop.eup %7377  ;;  %v3608_v30 = vadd.f32 %v10501_v42, %v3607_v21  ;;  %v13388_v42 = vld [vmem:[#allocation74_spill] sm:$0xff] }
 0x3cf   : > { %13356 = vst [vmem:[#allocation98_spill] sm:$0xff] %v10883_v31  ;;  %7397 = vpow2.f32 %v3396_v0  ;;  %v2810_v2 = vsub.f32 %v13357_v26, %v10402_v16  ;;  %v3649_v59 = vadd.f32 %v10571_v29, %v3648_v4  ;;  %v10889_v55 = vpop.eup %7379  ;;  %4885 = vmatprep.mubr.bf16.mxu0 %v4214_v54  ;;  %v4216_v11 = vpack.c.bf16 %v10883_v31, %v10875_v20 }
 0x3d0   : > { %7399 = vpow2.f32 %v3384_v58  ;;  %v3416_v35 = vmul.f32 1.442695, %v2934_v43  ;;  %v2811_v38 = vsub.f32 -inf, %v10402_v16  ;;  %v10894_v49 = vpop.eup %7381  ;;  %v3432_v0 = vmul.f32 1.442695, %v2942_v41 }
 0x3d1   : > { %7401 = vpow2.f32 %v3400_v10  ;;  %v10897_v21 = vadd.f32 %v10472_v56, %v3617_v39  ;;  %v10900_v26 = vadd.f32 %v10537_v60, %v3649_v59  ;;  %v10902_v29 = vpop.eup %7383  ;;  %5046 = vmatprep.mubr.bf16.mxu1 %v4216_v11  ;;  %v4213_v4 = vpack.c.bf16 %v10894_v49, %v10889_v55 }
 0x3d2   : > { %7403 = vpow2.f32 %v3414_v9  ;;  %v10907_v58 = vadd.f32 %v10525_v47, %v3633_v63  ;;  %v10909_v16 = vmul.f32 1.442695, %v2808_v62  ;;  %v10911_v10 = vpop.eup %7385  ;;  %v10914_v43 = vadd.f32 %v10510_v6, %v3608_v30 }
 0x3d3   : > { %13358 = vst [vmem:[#allocation95_spill] sm:$0xff] %v10911_v10  ;;  %7405 = vpow2.f32 %v3430_v37  ;;  %v10916_v60 = vmul.f32 1.442695, %v2809_v1  ;;  %v10918_v41 = vmul.f32 1.442695, %v2810_v2  ;;  %4886 = vmatmul.mubr.bf16.gmra.mrb[176].mxu0 %v4213_v4  ;;  %v4215_v9 = vpack.c.bf16 %v10911_v10, %v10902_v29 }
 0x3d4   : > { %v10920_v39 = vpop.eup %7387  ;;  %7407 = vpow2.f32 %v3418_v34  ;;  %v10924_v63 = vmul.f32 1.442695, %v2811_v38  ;;  %v3639_v54 = vadd.f32 %v10203_v25, %v10187_v23  ;;  %v2803_v62 = vsub.f32 -inf, %v13233_v5  ;;  %v13361_v23 = vld [vmem:[#allocation191_spill] sm:$0xff] }
 0x3d5   : > { %v10928_v37 = vpop.eup %7389  ;;  %7409 = vpow2.f32 %v3434_v7  ;;  %v13360_v1 = vsub.f32 %v13234_v24, %v13233_v5  ;;  %v3666_v2 = vadd.f32 %v10600_v61, %v10585_v33  ;;  %5047 = vmatmul.mubr.bf16.gmra.mrb[176].mxu1 %v4215_v9  ;;  %v2824_v25 = vsub.f32 %v13361_v23, %v10468_v57  ;;  %v13362_v7 = vld [vmem:[#allocation192_spill] sm:$0xff]  ;;  %v13365_v33 = vld [vmem:[#allocation194_spill] sm:$0xff] }
 0x3d6   : > { %13359 = vst [vmem:[#allocation97_spill] sm:$0xff] %v10928_v37  ;;  %v10938_v59 = vpop.eup %7391  ;;  %v4222_v34 = vpack.c.bf16 %v10928_v37, %v10920_v39  ;;  %7411 = vpow2.f32 %v3412_v44  ;;  %v2825_v11 = vsub.f32 %v13362_v7, %v10468_v57  ;;  %v13364_v61 = vsub.f32 %v13237_v19, %v13233_v5 }
 0x3d7   : > { %v10934_v30 = vmul.f32 1.442695, %v13360_v1  ;;  %v10946_v38 = vpop.eup %7393  ;;  %7413 = vpow2.f32 %v10855_v12  ;;  %v2826_v4 = vsub.f32 %v13365_v33, %v10468_v57  ;;  %v3667_v44 = vadd.f32 %v10631_v45, %v3666_v2  ;;  %v13368_v2 = vld [vmem:[#allocation178_spill] sm:$0xff] }
 0x3d8   : > { %13363 = vst [vmem:[#allocation101_spill] sm:$0xff] %v10946_v38  ;;  %v10952_v24 = vmul.f32 1.442695, %v13364_v61  ;;  %v10957_v9 = vpop.eup %7395  ;;  %4893 = vmatprep.mubr.bf16.mxu0 %v4222_v34  ;;  %v4224_v1 = vpack.c.bf16 %v10946_v38, %v10938_v59  ;;  %7415 = vpow2.f32 %v3416_v35  ;;  %v13366_v12 = vsub.f32 %v13248_v14, %v13233_v5 }
 0x3d9   : > { %v3640_v19 = vadd.f32 %v10212_v46, %v3639_v54  ;;  %v10967_v7 = vpop.eup %7397  ;;  %7417 = vpow2.f32 %v3432_v0  ;;  %v10969_v61 = vmul.f32 1.442695, %v2803_v62  ;;  %v10972_v45 = vadd.f32 %v10594_v17, %v3667_v44  ;;  %v13370_v54 = vld [vmem:[#allocation55_spill] sm:$0xff]  ;;  %v13371_v62 = vld [vmem:[#allocation158_spill] sm:$0xff] }
 0x3da   : > { %v10964_v23 = vmul.f32 1.442695, %v13366_v12  ;;  %13367 = vst [vmem:[#allocation104_spill] sm:$0xff] %v10967_v7  ;;  %v3657_v34 = vadd.f32 %v13368_v2, %v10549_v40  ;;  %v10976_v33 = vpop.eup %7399  ;;  %5054 = vmatprep.mubr.bf16.mxu1 %v4224_v1  ;;  %v4221_v5 = vpack.c.bf16 %v10967_v7, %v10957_v9  ;;  %v2827_v14 = vsub.f32 -inf, %v10468_v57  ;;  %v13372_v40 = vld [vmem:[#allocation187_spill] sm:$0xff]  ;;  %v13373_v12 = vld [vmem:[#allocation64_spill] sm:$0xff] }
 0x3db   : > { %v10981_v46 = vmul.f32 1.442695, %v2824_v25  ;;  %v10983_v35 = vmul.f32 1.442695, %v2825_v11  ;;  %v10985_v0 = vpop.eup %7401  ;;  %7419 = vpow2.f32 %v13370_v54  ;;  %v10988_v17 = vmul.f32 1.442695, %v2826_v4 }
 0x3dc   : > { %13369 = vst [vmem:[#allocation108_spill] sm:$0xff] %v10985_v0  ;;  %v2816_v44 = vsub.f32 %v13372_v40, %v13371_v62  ;;  %v3658_v1 = vadd.f32 %v13373_v12, %v3657_v34  ;;  %v10993_v2 = vpop.eup %7403  ;;  %4894 = vmatmul.mubr.bf16.gmra.mrb[180].mxu0 %v4221_v5  ;;  %v4223_v57 = vpack.c.bf16 %v10985_v0, %v10976_v33  ;;  %v13375_v25 = vld [vmem:[#allocation153_spill] sm:$0xff]  ;;  %v13376_v11 = vld [vmem:[#allocation32_spill] sm:$0xff]  ;;  %v13380_v34 = vld [vmem:[#allocation190_spill] sm:$0xff] }
 0x3dd   : > { %13374 = vst [vmem:[#allocation107_spill] sm:$0xff] %v10993_v2  ;;  %7421 = vpow2.f32 %v13375_v25  ;;  %v10999_v28 = vadd.f32 %v13376_v11, %v3640_v19  ;;  %v13377_v54 = vld [vmem:[#allocation189_spill] sm:$0xff]  ;;  %v11003_v13 = vpop.eup %7405  ;;  %v2818_v40 = vsub.f32 %v13380_v34, %v13371_v62  ;;  %v13381_v12 = vld [vmem:[#allocation175_spill] sm:$0xff]  ;;  %v3684_v47 = vadd.f32 %v10675_v51, %v10643_v53  ;;  %v13385_v34 = vld [vmem:[#allocation174_spill] sm:$0xff] }
 0x3de   : > { %v2817_v4 = vsub.f32 %v13377_v54, %v13371_v62  ;;  %13378 = vst [vmem:[#allocation110_spill] sm:$0xff] %v11003_v13  ;;  %7423 = vpow2.f32 %v13379_v36  ;;  %v11009_v5 = vadd.f32 %v13381_v12, %v3658_v1  ;;  %v11013_v25 = vpop.eup %7407  ;;  %5055 = vmatmul.mubr.bf16.gmra.mrb[180].mxu1 %v4223_v57  ;;  %v4230_v19 = vpack.c.bf16 %v11003_v13, %v10993_v2  ;;  %v13383_v11 = vld [vmem:[#allocation165_spill] sm:$0xff] }
 0x3df   : > { %13382 = vst [vmem:[#allocation103_spill] sm:$0xff] %v11013_v25  ;;  %7425 = vpow2.f32 %v13383_v11  ;;  %v11018_v54 = vmul.f32 1.442695, %v2827_v14  ;;  %v2819_v36 = vsub.f32 -inf, %v13371_v62  ;;  %v11021_v56 = vpop.eup %7409  ;;  %v11024_v1 = vmul.f32 1.442695, %v2816_v44 }
 0x3e0   : > { %13384 = vst [vmem:[#allocation106_spill] sm:$0xff] %v11021_v56  ;;  %7427 = vpow2.f32 %v13385_v34  ;;  %v13386_v12 = vld [vmem:[#allocation173_spill] sm:$0xff]  ;;  %v3685_v57 = vadd.f32 %v13388_v42, %v3684_v47  ;;  %v11029_v6 = vpop.eup %7411  ;;  %4901 = vmatprep.mubr.bf16.mxu0 %v4230_v19  ;;  %v4232_v14 = vpack.c.bf16 %v11021_v56, %v11013_v25  ;;  %v13390_v11 = vld [vmem:[#allocation171_spill] sm:$0xff]  ;;  %v11034_v62 = vmul.f32 1.442695, %v2817_v4  ;;  %v13393_v47 = vld [vmem:[#allocation200_spill] sm:$0xff] }
 0x3e1   : > { %v13387_v51 = vld [vmem:[#allocation197_spill] sm:$0xff]  ;;  %13389 = vst [vmem:[#allocation105_spill] sm:$0xff] %v11029_v6  ;;  %7429 = vpow2.f32 %v13390_v11  ;;  %v2841_v34 = vsub.f32 %v13391_v50, %v13386_v12  ;;  %v11038_v44 = vpop.eup %7413  ;;  %v2842_v42 = vsub.f32 %v13393_v47, %v13386_v12  ;;  %v13394_v19 = vld [vmem:[#allocation72_spill] sm:$0xff]  ;;  %v11053_v50 = vmul.f32 1.442695, %v2819_v36 }
 0x3e2   : > { %v2840_v53 = vsub.f32 %v13387_v51, %v13386_v12  ;;  %13392 = vst [vmem:[#allocation109_spill] sm:$0xff] %v11038_v44  ;;  %7431 = vpow2.f32 %v10909_v16  ;;  %v11041_v51 = vmul.f32 1.442695, %v2818_v40  ;;  %v11046_v13 = vadd.f32 %v13394_v19, %v3685_v57  ;;  %v11048_v56 = vpop.eup %7415  ;;  %5062 = vmatprep.mubr.bf16.mxu1 %v4232_v14  ;;  %v13396_v11 = vld [vmem:[#allocation149_spill] sm:$0xff]  ;;  %v13397_v16 = vld [vmem:[#allocation70_spill] sm:$0xff] }
 0x3e3   : > { %13395 = vst [vmem:[#allocation112_spill] sm:$0xff] %v11048_v56  ;;  %v4229_v4 = vpack.c.bf16 %v11038_v44, %v11029_v6  ;;  %7433 = vpow2.f32 %v10916_v60  ;;  %v3675_v40 = vadd.f32 %v13397_v16, %v13396_v11  ;;  %v11057_v48 = vpop.eup %7417  ;;  %v2843_v57 = vsub.f32 -inf, %v13386_v12  ;;  %v13399_v19 = vld [vmem:[#allocation169_spill] sm:$0xff]  ;;  %v13401_v11 = vld [vmem:[#allocation66_spill] sm:$0xff]  ;;  %v13403_v12 = vld [vmem:[#allocation195_spill] sm:$0xff] }
 0x3e4   : > { %13398 = vst [vmem:[#allocation116_spill] sm:$0xff] %v11057_v48  ;;  %7435 = vpow2.f32 %v10918_v41  ;;  %v11061_v47 = vmul.f32 1.442695, %v2840_v53  ;;  %v13400_v14 = vld [vmem:[#allocation193_spill] sm:$0xff]  ;;  %v4231_v60 = vpack.c.bf16 %v11057_v48, %v11048_v56  ;;  %v11068_v36 = vmul.f32 1.442695, %v2841_v34 }
 0x3e5   : > { %v2832_v38 = vsub.f32 %v13400_v14, %v13399_v19  ;;  %4902 = vmatmul.mubr.bf16.gmra.mrb[184].mxu0 %v4229_v4  ;;  %7437 = vpow2.f32 %v10924_v63  ;;  %v3676_v16 = vadd.f32 %v13401_v11, %v3675_v40  ;;  %v11071_v44 = vpop.eup %7419  ;;  %v11074_v41 = vmul.f32 1.442695, %v2842_v42  ;;  %v13404_v4 = vld [vmem:[#allocation196_spill] sm:$0xff]  ;;  %v13406_v34 = vld [vmem:[#allocation65_spill] sm:$0xff] }
 0x3e6   : > { %13402 = vst [vmem:[#allocation115_spill] sm:$0xff] %v11071_v44  ;;  %7439 = vpow2.f32 %v10934_v30  ;;  %v2833_v53 = vsub.f32 %v13403_v12, %v13399_v19  ;;  %v2834_v14 = vsub.f32 %v13404_v4, %v13399_v19  ;;  %5063 = vmatmul.mubr.bf16.gmra.mrb[184].mxu1 %v4231_v60  ;;  %v2835_v63 = vsub.f32 -inf, %v13399_v19  ;;  %v13407_v11 = vld [vmem:[#allocation80_spill] sm:$0xff]  ;;  %v13408_v30 = vld [vmem:[#allocation181_spill] sm:$0xff]  ;;  %v13411_v60 = vld [vmem:[#allocation203_spill] sm:$0xff] }
 0x3e7   : > { %v11080_v0 = vpop.eup %7421  ;;  %7441 = vpow2.f32 %v10952_v24  ;;  %v11085_v40 = vadd.f32 %v13406_v34, %v3676_v16  ;;  %v3702_v42 = vadd.f32 %v13408_v30, %v13407_v11  ;;  %v11092_v12 = vmul.f32 1.442695, %v2843_v57  ;;  %v13410_v7 = vld [vmem:[#allocation177_spill] sm:$0xff]  ;;  %v13414_v34 = vld [vmem:[#allocation204_spill] sm:$0xff]  ;;  %v13415_v30 = vld [vmem:[#allocation183_spill] sm:$0xff] }
 0x3e8   : > { %13405 = vst [vmem:[#allocation119_spill] sm:$0xff] %v11080_v0  ;;  %v11089_v48 = vpop.eup %7423  ;;  %7443 = vpow2.f32 %v10964_v23  ;;  %v11094_v4 = vmul.f32 1.442695, %v2832_v38  ;;  %v2856_v37 = vsub.f32 %v13411_v60, %v13410_v7  ;;  %v13413_v19 = vld [vmem:[#allocation161_spill] sm:$0xff]  ;;  %v2857_v11 = vsub.f32 %v13414_v34, %v13410_v7  ;;  %v13417_v60 = vld [vmem:[#allocation206_spill] sm:$0xff] }
 0x3e9   : > { %13409 = vst [vmem:[#allocation111_spill] sm:$0xff] %v11089_v48  ;;  %v11098_v24 = vpop.eup %7425  ;;  %v3624_v16 = vadd.f32 %v11089_v48, %v13413_v19  ;;  %7445 = vpow2.f32 %v10981_v46  ;;  %v3703_v25 = vadd.f32 %v13415_v30, %v3702_v42  ;;  %v11109_v38 = vmul.f32 1.442695, %v2833_v53  ;;  %v13419_v42 = vld [vmem:[#allocation79_spill] sm:$0xff]  ;;  %v13422_v53 = vld [vmem:[#allocation50_spill] sm:$0xff] }
 0x3ea   : > { %13412 = vst [vmem:[#allocation114_spill] sm:$0xff] %v11098_v24  ;;  %v11106_v23 = vpop.eup %7427  ;;  %7447 = vpow2.f32 %v10969_v61  ;;  %v11111_v57 = vmul.f32 1.442695, %v2834_v14  ;;  %v2858_v56 = vsub.f32 %v13417_v60, %v13410_v7  ;;  %v11118_v46 = vmul.f32 1.442695, %v2835_v63  ;;  %v13421_v61 = vld [vmem:[#allocation46_spill] sm:$0xff]  ;;  %3556 = vadd.xlane.f32.xlu1 %v13422_v53 }
 0x3eb   : > { %13416 = vst [vmem:[#allocation113_spill] sm:$0xff] %v11106_v23  ;;  %v11115_v31 = vpop.eup %7429  ;;  %7449 = vpow2.f32 %v10983_v35  ;;  %v2859_v19 = vsub.f32 -inf, %v13410_v7  ;;  %v11122_v34 = vadd.f32 %v13419_v42, %v3703_v25  ;;  %3547 = vadd.xlane.f32.xlu0 %v13421_v61  ;;  %v3635_v14 = vadd.f32 %v11071_v44, %v10907_v58  ;;  %v13423_v35 = vld [vmem:[#allocation182_spill] sm:$0xff]  ;;  %v13424_v63 = vld [vmem:[#allocation199_spill] sm:$0xff]  ;;  %v13426_v61 = vld [vmem:[#allocation69_spill] sm:$0xff] }
 0x3ec   : > { %13418 = vst [vmem:[#allocation118_spill] sm:$0xff] %v11115_v31  ;;  %v11124_v30 = vpop.eup %7431  ;;  %7451 = vpow2.f32 %v10988_v17  ;;  %v11131_v60 = vmul.f32 1.442695, %v2856_v37  ;;  %v2848_v48 = vsub.f32 %v13424_v63, %v13423_v35  ;;  %v3625_v25 = vadd.f32 %v11098_v24, %v3624_v16  ;;  %v13427_v53 = vld [vmem:[#allocation78_spill] sm:$0xff]  ;;  %v13429_v37 = vld [vmem:[#allocation201_spill] sm:$0xff] }
 0x3ed   : > { %13420 = vst [vmem:[#allocation122_spill] sm:$0xff] %v11124_v30  ;;  %v11135_v7 = vpop.eup %7433  ;;  %7453 = vpow2.f32 %v11018_v54  ;;  %v11139_v42 = vmul.f32 1.442695, %v2857_v11  ;;  %v3693_v6 = vadd.f32 %v13427_v53, %v13426_v61  ;;  %v11146_v58 = vmul.f32 1.442695, %v2858_v56  ;;  %v13430_v63 = vld [vmem:[#allocation202_spill] sm:$0xff] }
 0x3ee   : > { %13425 = vst [vmem:[#allocation126_spill] sm:$0xff] %v11135_v7  ;;  %v11143_v2 = vpop.eup %7435  ;;  %7455 = vpow2.f32 %v11024_v1  ;;  %v2849_v17 = vsub.f32 %v13429_v37, %v13423_v35  ;;  %v2850_v44 = vsub.f32 %v13430_v63, %v13423_v35  ;;  %v3651_v54 = vadd.f32 %v11124_v30, %v10900_v26  ;;  %v13432_v61 = vld [vmem:[#allocation77_spill] sm:$0xff]  ;;  %v13434_v56 = vld [vmem:[#allocation56_spill] sm:$0xff]  ;;  %v13435_v24 = vld [vmem:[#allocation62_spill] sm:$0xff] }
 0x3ef   : > { %13428 = vst [vmem:[#allocation125_spill] sm:$0xff] %v11143_v2  ;;  %v11152_v16 = vpop.eup %7437  ;;  %7457 = vpow2.f32 %v11034_v62  ;;  %v2851_v11 = vsub.f32 -inf, %v13423_v35  ;;  %v3694_v53 = vadd.f32 %v13432_v61, %v3693_v6  ;;  %3565 = vadd.xlane.f32.xlu0 %v13434_v56  ;;  %3583 = vadd.xlane.f32.xlu1 %v13435_v24  ;;  %v11164_v37 = vadd.f32 %v11080_v0, %v3635_v14  ;;  %v13437_v61 = vld [vmem:[#allocation73_spill] sm:$0xff]  ;;  %v13441_v30 = vld [vmem:[#allocation184_spill] sm:$0xff]  ;;  %v13442_v0 = vld [vmem:[#allocation87_spill] sm:$0xff] }
 0x3f0   : > { %13431 = vst [vmem:[#allocation129_spill] sm:$0xff] %v11152_v16  ;;  %v11159_v1 = vpop.eup %7439  ;;  %7459 = vpow2.f32 %v11041_v51  ;;  %v11167_v63 = vmul.f32 1.442695, %v2859_v19  ;;  %v11169_v26 = vmul.f32 1.442695, %v2848_v48  ;;  %v3626_v35 = vadd.f32 %v11106_v23, %v3625_v25  ;;  %v13439_v48 = vld [vmem:[#allocation68_spill] sm:$0xff] }
 0x3f1   : > { %13433 = vst [vmem:[#allocation121_spill] sm:$0xff] %v11159_v1  ;;  %v11171_v62 = vpop.eup %7441  ;;  %v3642_v6 = vadd.f32 %v11159_v1, %v10999_v28  ;;  %7461 = vpow2.f32 %v11061_v47  ;;  %v11178_v24 = vadd.f32 %v13437_v61, %v3694_v53  ;;  %v11183_v51 = vmul.f32 1.442695, %v2849_v17  ;;  %v13440_v19 = vld [vmem:[#allocation209_spill] sm:$0xff]  ;;  %v13445_v17 = vld [vmem:[#allocation67_spill] sm:$0xff] }
 0x3f2   : > { %13436 = vst [vmem:[#allocation124_spill] sm:$0xff] %v11171_v62  ;;  %v11180_v14 = vpop.eup %7443  ;;  %7463 = vpow2.f32 %v11053_v50  ;;  %v2872_v56 = vsub.f32 %v13440_v19, %v13439_v48  ;;  %v3720_v25 = vadd.f32 %v13442_v0, %v13441_v30  ;;  %v3652_v28 = vadd.f32 %v11135_v7, %v3651_v54  ;;  %v13444_v50 = vld [vmem:[#allocation163_spill] sm:$0xff]  ;;  %v13446_v0 = vld [vmem:[#allocation210_spill] sm:$0xff]  ;;  %v13447_v54 = vld [vmem:[#allocation89_spill] sm:$0xff] }
 0x3f3   : > { %13438 = vst [vmem:[#allocation123_spill] sm:$0xff] %v11180_v14  ;;  %v11189_v23 = vpop.eup %7445  ;;  %7465 = vpow2.f32 %v11068_v36  ;;  %v11193_v47 = vmul.f32 1.442695, %v2850_v44  ;;  %v11195_v53 = vmul.f32 1.442695, %v2851_v11  ;;  %3574 = vadd.xlane.f32.xlu0 %v13444_v50  ;;  %3601 = vadd.xlane.f32.xlu1 %v13445_v17  ;;  %v2873_v30 = vsub.f32 %v13446_v0, %v13439_v48  ;;  %v13449_v50 = vld [vmem:[#allocation212_spill] sm:$0xff] }
 0x3f4   : > { %13443 = vst [vmem:[#allocation128_spill] sm:$0xff] %v11189_v23  ;;  %v11197_v61 = vpop.eup %7447  ;;  %v3669_v19 = vadd.f32 %v11189_v23, %v10972_v45  ;;  %7467 = vpow2.f32 %v11074_v41  ;;  %v3721_v36 = vadd.f32 %v13447_v54, %v3720_v25  ;;  %v3627_v11 = vadd.f32 %v11115_v31, %v3626_v35  ;;  %v13451_v0 = vld [vmem:[#allocation92_spill] sm:$0xff] }
 0x3f5   : > { %v11207_v44 = vpop.eup %7449  ;;  %v3643_v7 = vadd.f32 %v11171_v62, %v3642_v6  ;;  %7469 = vpow2.f32 %v11094_v4  ;;  %v2874_v17 = vsub.f32 %v13449_v50, %v13439_v48  ;;  %v2875_v45 = vsub.f32 -inf, %v13439_v48  ;;  %v13453_v4 = vld [vmem:[#allocation63_spill] sm:$0xff]  ;;  %v13454_v6 = vld [vmem:[#allocation205_spill] sm:$0xff]  ;;  %v13455_v50 = vld [vmem:[#allocation86_spill] sm:$0xff] }
 0x3f6   : > { %13448 = vst [vmem:[#allocation132_spill] sm:$0xff] %v11207_v44  ;;  %v11214_v1 = vpop.eup %7451  ;;  %7471 = vpow2.f32 %v11092_v12  ;;  %v3292_v41 = vmul.f32 1.442695, %v2872_v56  ;;  %v11219_v25 = vadd.f32 %v13451_v0, %v3721_v36  ;;  %v3653_v35 = vadd.f32 %v11143_v2, %v3652_v28  ;;  %v13456_v62 = vld [vmem:[#allocation82_spill] sm:$0xff]  ;;  %v13458_v12 = vld [vmem:[#allocation76_spill] sm:$0xff]  ;;  %v13459_v28 = vld [vmem:[#allocation207_spill] sm:$0xff] }
 0x3f7   : > { %13450 = vst [vmem:[#allocation136_spill] sm:$0xff] %v11214_v1  ;;  %v11221_v54 = vpop.eup %7453  ;;  %7473 = vpow2.f32 %v11109_v38  ;;  %v2864_v23 = vsub.f32 %v13454_v6, %v13453_v4  ;;  %v3711_v31 = vadd.f32 %v13456_v62, %v13455_v50  ;;  %3592 = vadd.xlane.f32.xlu0 %v13458_v12  ;;  %3619 = vadd.xlane.f32.xlu1 %v10897_v21  ;;  %v3294_v56 = vmul.f32 1.442695, %v2873_v30  ;;  %v13460_v6 = vld [vmem:[#allocation81_spill] sm:$0xff] }
 0x3f8   : > { %13452 = vst [vmem:[#allocation135_spill] sm:$0xff] %v11221_v54  ;;  %v11229_v10 = vpop.eup %7455  ;;  %v3670_v48 = vadd.f32 %v11207_v44, %v3669_v19  ;;  %7475 = vpow2.f32 %v11111_v57  ;;  %v2865_v38 = vsub.f32 %v13459_v28, %v13453_v4  ;;  %v3644_v0 = vadd.f32 %v11180_v14, %v3643_v7  ;;  %v13462_v19 = vld [vmem:[#allocation208_spill] sm:$0xff]  ;;  %v13589_v44 = vld [vmem:[#allocation150_spill] sm:$0xff] }
 0x3f9   : > { %13457 = vst [vmem:[#allocation138_spill] sm:$0xff] %v11229_v10  ;;  %v11237_v36 = vpop.eup %7457  ;;  %v3660_v62 = vadd.f32 %v11229_v10, %v11009_v5  ;;  %7477 = vpow2.f32 %v11131_v60  ;;  %v3712_v50 = vadd.f32 %v13460_v6, %v3711_v31  ;;  %v3296_v57 = vmul.f32 1.442695, %v2874_v17 }
 0x3fa   : > { %v11244_v21 = vpop.eup %7459  ;;  %7479 = vpow2.f32 %v11118_v46  ;;  %v2866_v30 = vsub.f32 %v13462_v19, %v13453_v4  ;;  %v2867_v12 = vsub.f32 -inf, %v13453_v4  ;;  %v3654_v7 = vadd.f32 %v11152_v16, %v3653_v35 }
 0x3fb   : > { %13461 = vst [vmem:[#allocation131_spill] sm:$0xff] %v11244_v21  ;;  %v11250_v28 = vpop.eup %7461  ;;  %7481 = vpow2.f32 %v11139_v42  ;;  %v3298_v5 = vmul.f32 1.442695, %v2875_v45  ;;  %v3276_v60 = vmul.f32 1.442695, %v2864_v23  ;;  %3610 = vadd.xlane.f32.xlu0 %v10914_v43  ;;  %3637 = vadd.xlane.f32.xlu1 %v11164_v37  ;;  %v3671_v31 = vadd.f32 %v11214_v1, %v3670_v48  ;;  %v13466_v45 = vld [vmem:[#allocation100_spill] sm:$0xff] }
 0x3fc   : > { %13463 = vst [vmem:[#allocation134_spill] sm:$0xff] %v11250_v28  ;;  %v11254_v2 = vpop.eup %7463  ;;  %v3687_v46 = vadd.f32 %v11250_v28, %v11046_v13  ;;  %7483 = vpow2.f32 %v11146_v58  ;;  %v3278_v17 = vmul.f32 1.442695, %v2865_v38  ;;  %v3645_v42 = vadd.f32 %v11197_v61, %v3644_v0  ;;  %v13469_v38 = vld [vmem:[#allocation71_spill] sm:$0xff]  ;;  %v13579_v1 = vld [vmem:[#allocation109_spill] sm:$0xff] }
 0x3fd   : > { %13464 = vst [vmem:[#allocation133_spill] sm:$0xff] %v11254_v2  ;;  %v11262_v4 = vpop.eup %7465  ;;  %v3661_v23 = vadd.f32 %v11237_v36, %v3660_v62  ;;  %7485 = vpow2.f32 %v11167_v63  ;;  %v3738_v43 = vadd.f32 %v10842_v22, %v13466_v45  ;;  %v3280_v13 = vmul.f32 1.442695, %v2866_v30  ;;  %v13470_v0 = vld [vmem:[#allocation215_spill] sm:$0xff]  ;;  %v13471_v63 = vld [vmem:[#allocation216_spill] sm:$0xff] }
 0x3fe   : > { %13465 = vst [vmem:[#allocation137_spill] sm:$0xff] %v11262_v4  ;;  %v11269_v37 = vpop.eup %7467  ;;  %v3688_v35 = vadd.f32 %v11262_v4, %v3687_v46  ;;  %7487 = vpow2.f32 %v11169_v26  ;;  %v11273_v58 = vmul.f32 1.442695, %v2867_v12  ;;  %v2888_v62 = vsub.f32 %v13470_v0, %v13469_v38 }
 0x3ff   : > { %13467 = vst [vmem:[#allocation185_spill] sm:$0xff] %v11269_v37  ;;  %v11275_v48 = vpop.eup %7469  ;;  %7489 = vpow2.f32 %v11183_v51  ;;  %v2889_v6 = vsub.f32 %v13471_v63, %v13469_v38  ;;  %v3739_v22 = vadd.f32 %v10849_v15, %v3738_v43  ;;  %3628 = vadd.xlane.f32.xlu0 %v3627_v11  ;;  %3655 = vadd.xlane.f32.xlu1 %v3654_v7  ;;  %v13473_v51 = vld [vmem:[#allocation218_spill] sm:$0xff]  ;;  %v2891_v15 = vsub.f32 -inf, %v13469_v38 }
 0x400   : > { %13468 = vst [vmem:[#allocation186_spill] sm:$0xff] %v11275_v48  ;;  %v11283_v19 = vpop.eup %7471  ;;  %v3672_v26 = vadd.f32 %v11221_v54, %v3671_v31  ;;  %v3678_v30 = vadd.f32 %v11275_v48, %v11085_v40  ;;  %7491 = vpow2.f32 %v11193_v47  ;;  %v2890_v12 = vsub.f32 %v13473_v51, %v13469_v38  ;;  %v13476_v47 = vld [vmem:[#allocation28_spill] sm:$0xff]  ;;  %v13478_v38 = vld [vmem:[#allocation91_spill] sm:$0xff]  ;;  %v13479_v63 = vld [vmem:[#allocation90_spill] sm:$0xff] }
 0x401   : > { %13472 = vst [vmem:[#allocation188_spill] sm:$0xff] %v11283_v19  ;;  %v11291_v46 = vpop.eup %7473  ;;  %v3662_v45 = vadd.f32 %v11244_v21, %v3661_v23  ;;  %7493 = vpow2.f32 %v3292_v41  ;;  %v11296_v11 = vadd.f32 %v10825_v32, %v3739_v22  ;;  %v3689_v31 = vadd.f32 %v11269_v37, %v3688_v35  ;;  %v13483_v51 = vld [vmem:[#allocation213_spill] sm:$0xff] }
 0x402   : > { %13474 = vst [vmem:[#allocation191_spill] sm:$0xff] %v11291_v46  ;;  %v11298_v7 = vpop.eup %7475  ;;  %v3679_v40 = vadd.f32 %v11291_v46, %v3678_v30  ;;  %7495 = vpow2.f32 %v11195_v53  ;;  %v11304_v43 = vadd.f32 %v13476_v47, %v3712_v50  ;;  %v3324_v41 = vmul.f32 1.442695, %v2888_v62  ;;  %v13481_v53 = vld [vmem:[#allocation30_spill] sm:$0xff]  ;;  %v13482_v30 = vld [vmem:[#allocation211_spill] sm:$0xff] }
 0x403   : > { %13475 = vst [vmem:[#allocation192_spill] sm:$0xff] %v11298_v7  ;;  %v11306_v0 = vpop.eup %7477  ;;  %7497 = vpow2.f32 %v3294_v56  ;;  %v3326_v23 = vmul.f32 1.442695, %v2889_v6  ;;  %v3729_v32 = vadd.f32 %v13479_v63, %v13478_v38  ;;  %3646 = vadd.xlane.f32.xlu0 %v3645_v42  ;;  %3673 = vadd.xlane.f32.xlu1 %v3672_v26  ;;  %v2880_v50 = vsub.f32 %v13482_v30, %v13481_v53  ;;  %v13485_v38 = vld [vmem:[#allocation96_spill] sm:$0xff] }
 0x404   : > { %13477 = vst [vmem:[#allocation194_spill] sm:$0xff] %v11306_v0  ;;  %v11310_v22 = vpop.eup %7479  ;;  %v3705_v35 = vadd.f32 %v11306_v0, %v11122_v34  ;;  %7499 = vpow2.f32 %v3296_v57  ;;  %v2881_v47 = vsub.f32 %v13483_v51, %v13481_v53  ;;  %v3663_v62 = vadd.f32 %v11254_v2, %v3662_v45  ;;  %v13488_v0 = vld [vmem:[#allocation214_spill] sm:$0xff] }
 0x405   : > { %13480 = vst [vmem:[#allocation178_spill] sm:$0xff] %v11310_v22  ;;  %v11318_v56 = vpop.eup %7481  ;;  %7501 = vpow2.f32 %v3276_v60  ;;  %v3328_v6 = vmul.f32 1.442695, %v2890_v12  ;;  %v3730_v63 = vadd.f32 %v13485_v38, %v3729_v32  ;;  %v3690_v26 = vadd.f32 %v11283_v19, %v3689_v31  ;;  %v13572_v19 = vld [vmem:[#allocation93_spill] sm:$0xff] }
 0x406   : > { %13484 = vst [vmem:[#allocation55_spill] sm:$0xff] %v11318_v56  ;;  %v11322_v42 = vpop.eup %7483  ;;  %v3680_v34 = vadd.f32 %v11298_v7, %v3679_v40  ;;  %v3706_v57 = vadd.f32 %v11318_v56, %v3705_v35  ;;  %7503 = vpow2.f32 %v3298_v5  ;;  %v3330_v51 = vmul.f32 1.442695, %v2891_v15  ;;  %v13492_v15 = vld [vmem:[#allocation221_spill] sm:$0xff] }
 0x407   : > { %13486 = vst [vmem:[#allocation158_spill] sm:$0xff] %v11322_v42  ;;  %v11327_v30 = vpop.eup %7485  ;;  %7505 = vpow2.f32 %v3278_v17  ;;  %v2882_v45 = vsub.f32 %v13488_v0, %v13481_v53  ;;  %v2883_v60 = vsub.f32 -inf, %v13481_v53  ;;  %3664 = vadd.xlane.f32.xlu0 %v3663_v62  ;;  %3691 = vadd.xlane.f32.xlu1 %v3690_v26  ;;  %v3308_v40 = vmul.f32 1.442695, %v2880_v50  ;;  %v13491_v17 = vld [vmem:[#allocation84_spill] sm:$0xff]  ;;  %v13494_v50 = vld [vmem:[#allocation117_spill] sm:$0xff] }
 0x408   : > { %13487 = vst [vmem:[#allocation187_spill] sm:$0xff] %v11327_v30  ;;  %v11332_v12 = vpop.eup %7487  ;;  %v3707_v31 = vadd.f32 %v11322_v42, %v3706_v57  ;;  %7507 = vpow2.f32 %v3280_v13  ;;  %v3310_v32 = vmul.f32 1.442695, %v2881_v47  ;;  %v2904_v0 = vsub.f32 %v13492_v15, %v13491_v17  ;;  %v13513_v42 = vld [vmem:[#allocation225_spill] sm:$0xff] }
 0x409   : > { %13489 = vst [vmem:[#allocation64_spill] sm:$0xff] %v11332_v12  ;;  %v11335_v35 = vpop.eup %7489  ;;  %v3696_v5 = vadd.f32 %v11332_v12, %v11178_v24  ;;  %7509 = vpow2.f32 %v3324_v41  ;;  %v3756_v53 = vadd.f32 %v10889_v55, %v10858_v3  ;;  %v3681_v62 = vadd.f32 %v11310_v22, %v3680_v34  ;;  %v13496_v41 = vld [vmem:[#allocation120_spill] sm:$0xff] }
 0x40a   : > { %13490 = vst [vmem:[#allocation153_spill] sm:$0xff] %v11335_v35  ;;  %v11343_v38 = vpop.eup %7491  ;;  %v3708_v13 = vadd.f32 %v11327_v30, %v3707_v31  ;;  %7511 = vpow2.f32 %v11273_v58  ;;  %v2905_v47 = vsub.f32 %v13494_v50, %v13491_v17  ;;  %v2906_v57 = vsub.f32 %v13496_v41, %v13491_v17 }
 0x40b   : > { %13493 = vst [vmem:[#allocation32_spill] sm:$0xff] %v11343_v38  ;;  %v11350_v26 = vpop.eup %7493  ;;  %v3697_v24 = vadd.f32 %v11335_v35, %v3696_v5  ;;  %7513 = vpow2.f32 %v3326_v23  ;;  %v3757_v3 = vadd.f32 %v10902_v29, %v3756_v53  ;;  %3682 = vadd.xlane.f32.xlu0 %v3681_v62  ;;  %v3312_v34 = vmul.f32 1.442695, %v2882_v45  ;;  %v13501_v45 = vld [vmem:[#allocation217_spill] sm:$0xff] }
 0x40c   : > { %13495 = vst [vmem:[#allocation189_spill] sm:$0xff] %v11350_v26  ;;  %v11356_v55 = vpop.eup %7495  ;;  %3709 = vadd.xlane.f32.xlu1 %v3708_v13  ;;  %v3723_v58 = vadd.f32 %v11350_v26, %v11219_v25  ;;  %v3314_v31 = vmul.f32 1.442695, %v2883_v60  ;;  %v2907_v15 = vsub.f32 -inf, %v13491_v17  ;;  %7515 = vpow2.f32 %v3328_v6  ;;  %v13500_v25 = vld [vmem:[#allocation75_spill] sm:$0xff] }
 0x40d   : > { %13497 = vst [vmem:[#allocation159_spill] sm:$0xff] %v11356_v55  ;;  %v11361_v50 = vpop.eup %7497  ;;  %v3698_v23 = vadd.f32 %v11343_v38, %v3697_v24  ;;  %v3356_v5 = vmul.f32 1.442695, %v2904_v0  ;;  %v11365_v41 = vadd.f32 %v10875_v20, %v3757_v3  ;;  %7517 = vpow2.f32 %v3308_v40  ;;  %v13503_v24 = vld [vmem:[#allocation94_spill] sm:$0xff]  ;;  %v11378_v20 = vpop.permute.xlu1 %2705 }
 0x40e   : > { %13498 = vst [vmem:[#allocation190_spill] sm:$0xff] %v11361_v50  ;;  %v11367_v29 = vpop.eup %7499  ;;  %v3724_v53 = vadd.f32 %v11361_v50, %v3723_v58  ;;  %v3358_v62 = vmul.f32 1.442695, %v2905_v47  ;;  %v2896_v60 = vsub.f32 %v13501_v45, %v13500_v25  ;;  %7519 = vpow2.f32 %v3330_v51  ;;  %v13505_v47 = vld [vmem:[#allocation219_spill] sm:$0xff] }
 0x40f   : > { %13499 = vst [vmem:[#allocation175_spill] sm:$0xff] %v11367_v29  ;;  %v11372_v13 = vpop.eup %7501  ;;  %v3699_v17 = vadd.f32 %v11356_v55, %v3698_v23  ;;  %v3731_v6 = vadd.f32 %v13503_v24, %v3730_v63  ;;  %v3360_v0 = vmul.f32 1.442695, %v2906_v57  ;;  %7521 = vpow2.f32 %v3310_v32  ;;  %v13507_v63 = vld [vmem:[#allocation220_spill] sm:$0xff] }
 0x410   : > { %13502 = vst [vmem:[#allocation165_spill] sm:$0xff] %v11372_v13  ;;  %v11376_v26 = vpop.eup %7503  ;;  %v3725_v3 = vadd.f32 %v11367_v29, %v3724_v53  ;;  %v3714_v40 = vadd.f32 %v11372_v13, %v11304_v43  ;;  %v2897_v58 = vsub.f32 %v13505_v47, %v13500_v25  ;;  %7523 = vpow2.f32 %v3312_v34  ;;  %v13510_v47 = vld [vmem:[#allocation236_spill] sm:$0xff]  ;;  %v13511_v34 = vld [vmem:[#allocation99_spill] sm:$0xff] }
 0x411   : > { %13504 = vst [vmem:[#allocation174_spill] sm:$0xff] %v11376_v26  ;;  %v11385_v45 = vpop.eup %7505  ;;  %3700 = vadd.xlane.f32.xlu0 %v3699_v17  ;;  %v3362_v51 = vmul.f32 1.442695, %v2907_v15  ;;  %v2898_v57 = vsub.f32 %v13507_v63, %v13500_v25  ;;  %v2899_v23 = vsub.f32 -inf, %v13500_v25  ;;  %7525 = vpow2.f32 %v3356_v5  ;;  %v13512_v63 = vld [vmem:[#allocation88_spill] sm:$0xff] }
 0x412   : > { %13506 = vst [vmem:[#allocation173_spill] sm:$0xff] %v11385_v45  ;;  %v11390_v24 = vpop.eup %7507  ;;  %v3726_v53 = vadd.f32 %v11376_v26, %v3725_v3  ;;  %v3715_v43 = vadd.f32 %v11385_v45, %v3714_v40  ;;  %v3340_v32 = vmul.f32 1.442695, %v2896_v60  ;;  %v2960_v17 = vsub.f32 %v13510_v47, %v11378_v20  ;;  %v13516_v47 = vld [vmem:[#allocation127_spill] sm:$0xff] }
 0x413   : > { %13508 = vst [vmem:[#allocation197_spill] sm:$0xff] %v11390_v24  ;;  %v11394_v29 = vpop.eup %7509  ;;  %7527 = vpow2.f32 %v3314_v31  ;;  %v3747_v15 = vadd.f32 %v10847_v52, %v13511_v34  ;;  %v2920_v25 = vsub.f32 %v13513_v42, %v13512_v63  ;;  %v3342_v60 = vmul.f32 1.442695, %v2897_v58  ;;  %v13517_v34 = vld [vmem:[#allocation130_spill] sm:$0xff] }
 0x414   : > { %13509 = vst [vmem:[#allocation74_spill] sm:$0xff] %v11394_v29  ;;  %v11402_v50 = vpop.eup %7511  ;;  %3727 = vadd.xlane.f32.xlu1 %v3726_v53  ;;  %v3716_v3 = vadd.f32 %v11390_v24, %v3715_v43  ;;  %v3741_v5 = vadd.f32 %v11394_v29, %v11296_v11  ;;  %7529 = vpow2.f32 %v3358_v62  ;;  %v3344_v31 = vmul.f32 1.442695, %v2898_v57  ;;  %v11422_v57 = vpop.permute.xlu1 %3927 }
 0x415   : > { %13514 = vst [vmem:[#allocation171_spill] sm:$0xff] %v11402_v50  ;;  %v11407_v40 = vpop.eup %7513  ;;  %7531 = vpow2.f32 %v3360_v0  ;;  %v2921_v52 = vsub.f32 %v13516_v47, %v13512_v63  ;;  %v2922_v42 = vsub.f32 %v13517_v34, %v13512_v63  ;;  %v3346_v43 = vmul.f32 1.442695, %v2899_v23  ;;  %13520 = vst [vmem:[#allocation149_spill] sm:$0xff] %v11422_v57  ;;  %v13521_v23 = vld [vmem:[#allocation83_spill] sm:$0xff] }
 0x416   : > { %13515 = vst [vmem:[#allocation198_spill] sm:$0xff] %v11407_v40  ;;  %v3717_v26 = vadd.f32 %v11402_v50, %v3716_v3  ;;  %v3742_v53 = vadd.f32 %v11407_v40, %v3741_v5  ;;  %7533 = vpow2.f32 %v3340_v32  ;;  %v11415_v24 = vpop.eup %7515  ;;  %v3748_v11 = vadd.f32 %v10853_v18, %v3747_v15  ;;  %v13522_v5 = vld [vmem:[#allocation222_spill] sm:$0xff] }
 0x417   : > { %13518 = vst [vmem:[#allocation200_spill] sm:$0xff] %v11415_v24  ;;  %7535 = vpow2.f32 %v3362_v51  ;;  %v3388_v62 = vmul.f32 1.442695, %v2920_v25  ;;  %v3774_v0 = vadd.f32 %v10957_v9, %v10920_v39  ;;  %v11420_v58 = vpop.eup %7517  ;;  %v2923_v32 = vsub.f32 -inf, %v13512_v63  ;;  %v13526_v63 = vld [vmem:[#allocation224_spill] sm:$0xff] }
 0x418   : > { %13519 = vst [vmem:[#allocation72_spill] sm:$0xff] %v11420_v58  ;;  %3718 = vadd.xlane.f32.xlu0 %v3717_v26  ;;  %v3743_v3 = vadd.f32 %v11415_v24, %v3742_v53  ;;  %7537 = vpow2.f32 %v3342_v60  ;;  %v2912_v47 = vsub.f32 %v13522_v5, %v13521_v23  ;;  %v11428_v51 = vpop.eup %7519  ;;  %v3732_v18 = vadd.f32 %v11420_v58, %v3731_v6  ;;  %v13525_v60 = vld [vmem:[#allocation223_spill] sm:$0xff]  ;;  %v11455_v24 = vpop.permute.xlu1 %3937 }
 0x419   : > { %13523 = vst [vmem:[#allocation70_spill] sm:$0xff] %v11428_v51  ;;  %v3390_v15 = vmul.f32 1.442695, %v2921_v52  ;;  %v3392_v25 = vmul.f32 1.442695, %v2922_v42  ;;  %v3775_v39 = vadd.f32 %v10976_v33, %v3774_v0  ;;  %v11432_v9 = vpop.eup %7521  ;;  %7539 = vpow2.f32 %v3344_v31  ;;  %v13529_v33 = vld [vmem:[#allocation102_spill] sm:$0xff] }
 0x41a   : > { %13524 = vst [vmem:[#allocation169_spill] sm:$0xff] %v11432_v9  ;;  %v3744_v26 = vadd.f32 %v11428_v51, %v3743_v3  ;;  %v2913_v34 = vsub.f32 %v13525_v60, %v13521_v23  ;;  %v2914_v53 = vsub.f32 %v13526_v63, %v13521_v23  ;;  %v11439_v5 = vpop.eup %7523  ;;  %v3733_v57 = vadd.f32 %v11432_v9, %v3732_v18  ;;  %v13557_v9 = vld [vmem:[#allocation104_spill] sm:$0xff] }
 0x41b   : > { %13527 = vst [vmem:[#allocation193_spill] sm:$0xff] %v11439_v5  ;;  %7541 = vpow2.f32 %v3388_v62  ;;  %v2915_v6 = vsub.f32 -inf, %v13521_v23  ;;  %v11443_v52 = vpop.eup %7525  ;;  %v3749_v42 = vadd.f32 %v13529_v33, %v3748_v11  ;;  %v3394_v31 = vmul.f32 1.442695, %v2923_v32  ;;  %13531 = vst [vmem:[#allocation196_spill] sm:$0xff] %v11455_v24  ;;  %v13534_v33 = vld [vmem:[#allocation230_spill] sm:$0xff] }
 0x41c   : > { %13528 = vst [vmem:[#allocation66_spill] sm:$0xff] %v11443_v52  ;;  %3745 = vadd.xlane.f32.xlu1 %v3744_v26  ;;  %7543 = vpow2.f32 %v3346_v43  ;;  %v3372_v0 = vmul.f32 1.442695, %v2912_v47  ;;  %v3734_v60 = vadd.f32 %v11439_v5, %v3733_v57  ;;  %v3759_v63 = vadd.f32 %v11443_v52, %v11365_v41  ;;  %v11461_v47 = vpop.permute.xlu0 %2700 }
 0x41d   : > { %v11446_v3 = vpop.eup %7527  ;;  %7545 = vpow2.f32 %v3390_v15  ;;  %v3374_v18 = vmul.f32 1.442695, %v2913_v34  ;;  %v11453_v23 = vmul.f32 1.442695, %v2960_v17  ;;  %v3376_v43 = vmul.f32 1.442695, %v2914_v53 }
 0x41e   : > { %13530 = vst [vmem:[#allocation195_spill] sm:$0xff] %v11446_v3  ;;  %v11451_v62 = vpop.eup %7529  ;;  %7547 = vpow2.f32 %v3392_v25  ;;  %v3765_v11 = vadd.f32 %v10894_v49, %v10867_v8  ;;  %v3735_v57 = vadd.f32 %v11446_v3, %v3734_v60  ;;  %v6386_v15 = vpop.f32.mrb[128].mxu0  ;;  %v3378_v26 = vmul.f32 1.442695, %v2915_v6  ;;  %v13533_v49 = vld [vmem:[#allocation229_spill] sm:$0xff] }
 0x41f   : > { %v11459_v32 = vpop.eup %7531  ;;  %v3760_v41 = vadd.f32 %v11451_v62, %v3759_v63  ;;  %7549 = vpow2.f32 %v3372_v0  ;;  %v3776_v25 = vadd.f32 %v10938_v59, %v3775_v39  ;;  %v6498_v34 = vpop.f32.mrb[128].mxu1  ;;  %v2936_v8 = vsub.f32 %v13533_v49, %v10801_v27  ;;  %v13536_v49 = vld [vmem:[#allocation95_spill] sm:$0xff]  ;;  %v13556_v3 = vld [vmem:[#allocation97_spill] sm:$0xff] }
 0x420   : > { %v11465_v17 = vpop.eup %7533  ;;  %7551 = vpow2.f32 %v3394_v31  ;;  %v6387_v53 = vpop.f32.mrb[129].mxu0  ;;  %v2937_v24 = vsub.f32 %v13534_v33, %v10801_v27  ;;  %3736 = vadd.xlane.f32.xlu0 %v3735_v57  ;;  %v3766_v51 = vadd.f32 %v13536_v49, %v3765_v11  ;;  %v13537_v33 = vld [vmem:[#allocation139_spill] sm:$0xff]  ;;  %v3783_v13 = vadd.f32 %v13557_v9, %v13556_v3  ;;  %v13560_v9 = vld [vmem:[#allocation145_spill] sm:$0xff] }
 0x421   : > { %13532 = vst [vmem:[#allocation65_spill] sm:$0xff] %v11465_v17  ;;  %v11472_v52 = vpop.eup %7535  ;;  %v3761_v60 = vadd.f32 %v11459_v32, %v3760_v41  ;;  %v3750_v6 = vadd.f32 %v11465_v17, %v3749_v42  ;;  %v6388_v0 = vadd.f32 %v6387_v53, %v6386_v15  ;;  %v6499_v63 = vpop.f32.mrb[129].mxu1  ;;  %7553 = vpow2.f32 %v3374_v18 }
 0x422   : > { %v6389_v31 = vpop.f32.mrb[130].mxu0  ;;  %v11476_v59 = vpop.eup %7537  ;;  %v6500_v39 = vadd.f32 %v6499_v63, %v6498_v34  ;;  %7555 = vpow2.f32 %v3376_v43  ;;  %v2938_v5 = vsub.f32 %v13537_v33, %v10801_v27  ;;  %v2939_v42 = vsub.f32 -inf, %v10801_v27  ;;  %v13542_v33 = vld [vmem:[#allocation105_spill] sm:$0xff] }
 0x423   : > { %13535 = vst [vmem:[#allocation80_spill] sm:$0xff] %v11476_v59  ;;  %v6501_v29 = vpop.f32.mrb[130].mxu1  ;;  %v3762_v57 = vadd.f32 %v11472_v52, %v3761_v60  ;;  %v3751_v41 = vadd.f32 %v11476_v59, %v3750_v6  ;;  %7557 = vpow2.f32 %v3378_v26  ;;  %v6390_v15 = vpop.f32.mrb[131].mxu0  ;;  %v3420_v34 = vmul.f32 1.442695, %v2936_v8  ;;  %v13541_v26 = vld [vmem:[#allocation107_spill] sm:$0xff] }
 0x424   : > { %v6502_v53 = vpop.f32.mrb[131].mxu1  ;;  %v11484_v18 = vpop.eup %7539  ;;  %v11486_v17 = vadd.f32 %v6500_v39, %v6388_v0  ;;  %v3422_v43 = vmul.f32 1.442695, %v2937_v24  ;;  %v3424_v63 = vmul.f32 1.442695, %v2938_v5  ;;  %v3792_v27 = vadd.f32 %v13542_v33, %v13541_v26  ;;  %v13544_v39 = vld [vmem:[#allocation98_spill] sm:$0xff] }
 0x425   : > { %13538 = vst [vmem:[#allocation181_spill] sm:$0xff] %v11484_v18  ;;  %v11488_v11 = vpop.eup %7541  ;;  %v11490_v49 = vpop.permute.xlu0 %3932  ;;  %3763 = vadd.xlane.f32.xlu1 %v3762_v57  ;;  %v3752_v60 = vadd.f32 %v11484_v18, %v3751_v41  ;;  %v3426_v6 = vmul.f32 1.442695, %v2939_v42  ;;  %v6391_v59 = vadd.f32 %v6390_v15, %v6389_v31  ;;  %v3767_v8 = vadd.f32 %v13544_v39, %v3766_v51  ;;  %v13546_v41 = vld [vmem:[#allocation112_spill] sm:$0xff]  ;;  %v13548_v26 = vld [vmem:[#allocation226_spill] sm:$0xff] }
 0x426   : > { %13539 = vst [vmem:[#allocation177_spill] sm:$0xff] %v11486_v17  ;;  %13540 = vst [vmem:[#allocation203_spill] sm:$0xff] %v11490_v49  ;;  %v11495_v40 = vpop.eup %7543  ;;  %v3777_v0 = vadd.f32 %v11488_v11, %v3776_v25  ;;  %7559 = vpow2.f32 %v3420_v34  ;;  %v6503_v24 = vadd.f32 %v6502_v53, %v6501_v29  ;;  %v11501_v17 = vpop.permute.xlu1 %3942  ;;  %v3793_v42 = vadd.f32 %v13546_v41, %v3792_v27  ;;  %v13547_v49 = vld [vmem:[#allocation85_spill] sm:$0xff]  ;;  %v13550_v29 = vld [vmem:[#allocation227_spill] sm:$0xff] }
 0x427   : > { %13543 = vst [vmem:[#allocation161_spill] sm:$0xff] %v11495_v40  ;;  %v11499_v5 = vpop.eup %7545  ;;  %13545 = vst [vmem:[#allocation204_spill] sm:$0xff] %v11501_v17  ;;  %v3753_v57 = vadd.f32 %v11495_v40, %v3752_v60  ;;  %7561 = vpow2.f32 %v3422_v43  ;;  %v2928_v31 = vsub.f32 %v13548_v26, %v13547_v49  ;;  %v6392_v15 = vpop.f32.mrb[132].mxu0  ;;  %v2929_v53 = vsub.f32 %v13550_v29, %v13547_v49  ;;  %v13552_v43 = vld [vmem:[#allocation234_spill] sm:$0xff]  ;;  %v13553_v41 = vld [vmem:[#allocation228_spill] sm:$0xff] }
 0x428   : > { %v11507_v33 = vpop.eup %7547  ;;  %v3778_v25 = vadd.f32 %v11499_v5, %v3777_v0  ;;  %7563 = vpow2.f32 %v3424_v63  ;;  %v11510_v51 = vadd.f32 %v6503_v24, %v6391_v59  ;;  %v6504_v34 = vpop.f32.mrb[132].mxu1  ;;  %v2930_v26 = vsub.f32 %v13553_v41, %v13547_v49  ;;  %v13555_v41 = vld [vmem:[#allocation103_spill] sm:$0xff] }
 0x429   : > { %v6393_v39 = vpop.f32.mrb[133].mxu0  ;;  %v11514_v60 = vpop.eup %7549  ;;  %3754 = vadd.xlane.f32.xlu0 %v3753_v57  ;;  %7565 = vpow2.f32 %v3426_v6  ;;  %v2931_v0 = vsub.f32 -inf, %v13547_v49  ;;  %v3404_v17 = vmul.f32 1.442695, %v2928_v31  ;;  %v3794_v27 = vadd.f32 %v13555_v41, %v3793_v42  ;;  %v13561_v41 = vld [vmem:[#allocation144_spill] sm:$0xff] }
 0x42a   : > { %13549 = vst [vmem:[#allocation183_spill] sm:$0xff] %v11510_v51  ;;  %13551 = vst [vmem:[#allocation206_spill] sm:$0xff] %v11514_v60  ;;  %v6505_v63 = vpop.f32.mrb[133].mxu1  ;;  %v11521_v59 = vpop.eup %7551  ;;  %v3779_v24 = vadd.f32 %v11507_v33, %v3778_v25  ;;  %v3768_v29 = vadd.f32 %v11514_v60, %v3767_v8  ;;  %v3406_v51 = vmul.f32 1.442695, %v2929_v53  ;;  %v13558_v60 = vld [vmem:[#allocation141_spill] sm:$0xff]  ;;  %v2957_v3 = vsub.f32 %v13560_v9, %v11378_v20 }
 0x42b   : > { %v11525_v18 = vpop.f32.mrb[134].mxu0  ;;  %v11527_v40 = vpop.f32.mrb[134].mxu1  ;;  %v3408_v49 = vmul.f32 1.442695, %v2930_v26  ;;  %v3410_v58 = vmul.f32 1.442695, %v2931_v0  ;;  %7567 = vpow2.f32 %v3404_v17  ;;  %v2949_v50 = vsub.f32 %v13558_v60, %v11461_v47 }
 0x42c   : > { %v11529_v57 = vpop.eup %7553  ;;  %v11531_v6 = vpop.permute.xlu0 %3947  ;;  %v3780_v31 = vadd.f32 %v11521_v59, %v3779_v24  ;;  %7569 = vpow2.f32 %v3406_v51  ;;  %v13559_v26 = vld [vmem:[#allocation108_spill] sm:$0xff]  ;;  %v2951_v30 = vsub.f32 %v13561_v41, %v11461_v47  ;;  %v13564_v51 = vld [vmem:[#allocation101_spill] sm:$0xff] }
 0x42d   : > { %13554 = vst [vmem:[#allocation79_spill] sm:$0xff] %v11531_v6  ;;  %v11536_v25 = vpop.f32.mrb[135].mxu0  ;;  %v11538_v8 = vpop.eup %7555  ;;  %v3769_v53 = vadd.f32 %v11529_v57, %v3768_v29  ;;  %v3784_v0 = vadd.f32 %v13559_v26, %v3783_v13  ;;  %7571 = vpow2.f32 %v3408_v49  ;;  %v3446_v60 = vmul.f32 1.442695, %v2949_v50  ;;  %v13563_v29 = vld [vmem:[#allocation147_spill] sm:$0xff] }
 0x42e   : > { %v11544_v6 = vpop.f32.mrb[135].mxu1  ;;  %v11546_v42 = vpop.eup %7557  ;;  %3781 = vadd.xlane.f32.xlu1 %v3780_v31  ;;  %v2959_v38 = vsub.f32 %v13563_v29, %v11378_v20  ;;  %7573 = vpow2.f32 %v3410_v58  ;;  %v3462_v13 = vmul.f32 1.442695, %v2957_v3  ;;  %v3450_v26 = vmul.f32 1.442695, %v2951_v30  ;;  %v13566_v30 = vld [vmem:[#allocation140_spill] sm:$0xff] }
 0x42f   : > { %v11553_v24 = vpop.permute.xlu1 %3952  ;;  %v3770_v17 = vadd.f32 %v11538_v8, %v3769_v53  ;;  %v3785_v37 = vadd.f32 %v13564_v51, %v3784_v0  ;;  %v11559_v45 = vpop.f32.mrb[136].mxu0  ;;  %7575 = vpow2.f32 %v3446_v60  ;;  %v2948_v3 = vsub.f32 %v13566_v30, %v11461_v47  ;;  %v13567_v29 = vld [vmem:[#allocation143_spill] sm:$0xff] }
 0x430   : > { %13562 = vst [vmem:[#allocation46_spill] sm:$0xff] %v11553_v24  ;;  %v11561_v9 = vpop.eup %7559  ;;  %v3466_v31 = vmul.f32 1.442695, %v2959_v38  ;;  %v6394_v24 = vadd.f32 %v6393_v39, %v6392_v15  ;;  %v11564_v53 = vpop.f32.mrb[136].mxu1  ;;  %7577 = vpow2.f32 %v3462_v13  ;;  %v6506_v15 = vadd.f32 %v6505_v63, %v6504_v34  ;;  %v13568_v39 = vld [vmem:[#allocation142_spill] sm:$0xff] }
 0x431   : > { %v3771_v41 = vadd.f32 %v11546_v42, %v3770_v17  ;;  %v11566_v50 = vpop.f32.mrb[137].mxu0  ;;  %v11568_v49 = vpop.eup %7561  ;;  %v3795_v0 = vadd.f32 %v11561_v9, %v3794_v27  ;;  %v2956_v17 = vsub.f32 %v13567_v29, %v11378_v20  ;;  %7579 = vpow2.f32 %v3450_v26 }
 0x432   : > { %v11570_v58 = vpop.permute.xlu0 %3957  ;;  %v11577_v60 = vpop.f32.mrb[137].mxu1  ;;  %v2950_v51 = vsub.f32 %v13568_v39, %v11461_v47  ;;  %7581 = vpow2.f32 %v3466_v31  ;;  %v3444_v12 = vmul.f32 1.442695, %v2948_v3  ;;  %v11597_v63 = vadd.f32 %v6506_v15, %v6394_v24  ;;  %v13574_v3 = vld [vmem:[#allocation232_spill] sm:$0xff]  ;;  %v13576_v15 = vld [vmem:[#allocation233_spill] sm:$0xff] }
 0x433   : > { %13565 = vst [vmem:[#allocation50_spill] sm:$0xff] %v11570_v58  ;;  %v11579_v38 = vpop.eup %7563  ;;  %3772 = vadd.xlane.f32.xlu0 %v3771_v41  ;;  %v13569_v58 = vld [vmem:[#allocation146_spill] sm:$0xff]  ;;  %v11585_v13 = vpop.f32.mrb[138].mxu0  ;;  %v3796_v29 = vadd.f32 %v11568_v49, %v3795_v0  ;;  %v3460_v28 = vmul.f32 1.442695, %v2956_v17  ;;  %7583 = vpow2.f32 %v11453_v23  ;;  %v13573_v0 = vld [vmem:[#allocation231_spill] sm:$0xff]  ;;  %v2945_v17 = vsub.f32 %v13574_v3, %v13572_v19 }
 0x434   : > { %v2958_v27 = vsub.f32 %v13569_v58, %v11378_v20  ;;  %v11587_v56 = vpop.f32.mrb[138].mxu1  ;;  %v11589_v30 = vpop.eup %7565  ;;  %13571 = vst [vmem:[#allocation199_spill] sm:$0xff] %v11597_v63  ;;  %v3448_v26 = vmul.f32 1.442695, %v2950_v51  ;;  %7585 = vpow2.f32 %v3444_v12  ;;  %v2944_v31 = vsub.f32 %v13573_v0, %v13572_v19 }
 0x435   : > { %v11592_v41 = vpop.f32.mrb[139].mxu0  ;;  %v11595_v34 = vpop.permute.xlu1 %3962  ;;  %v3797_v55 = vadd.f32 %v11579_v38, %v3796_v29  ;;  %v13575_v23 = vsub.f32 %v13552_v43, %v11461_v47  ;;  %7587 = vpow2.f32 %v3460_v28  ;;  %v2946_v51 = vsub.f32 %v13576_v15, %v13572_v19  ;;  %v13578_v15 = vld [vmem:[#allocation110_spill] sm:$0xff] }
 0x436   : > { %13570 = vst [vmem:[#allocation182_spill] sm:$0xff] %v11595_v34  ;;  %v3464_v58 = vmul.f32 1.442695, %v2958_v27  ;;  %v11599_v39 = vpop.f32.mrb[139].mxu1  ;;  %v11606_v7 = vpop.eup %7567  ;;  %v2947_v27 = vsub.f32 -inf, %v13572_v19  ;;  %7589 = vpow2.f32 %v3448_v26  ;;  %v3801_v19 = vadd.f32 %v13579_v1, %v13578_v15 }
 0x437   : > { %v3452_v24 = vmul.f32 1.442695, %v13575_v23  ;;  %v11614_v29 = vpop.eup %7569  ;;  %v3798_v12 = vadd.f32 %v11589_v30, %v3797_v55  ;;  %v3786_v0 = vadd.f32 %v11606_v7, %v3785_v37  ;;  %v3436_v3 = vmul.f32 1.442695, %v2944_v31  ;;  %v11618_v34 = vpop.f32.mrb[140].mxu0  ;;  %v13580_v55 = vld [vmem:[#allocation148_spill] sm:$0xff] }
 0x438   : > { %v11620_v63 = vpop.eup %7571  ;;  %v11622_v43 = vpop.permute.xlu0 %3967  ;;  %7591 = vpow2.f32 %v3464_v58  ;;  %v3438_v28 = vmul.f32 1.442695, %v2945_v17  ;;  %v3440_v23 = vmul.f32 1.442695, %v2946_v51  ;;  %v2961_v4 = vsub.f32 %v13580_v55, %v11378_v20 }
 0x439   : > { %13577 = vst [vmem:[#allocation69_spill] sm:$0xff] %v11622_v43  ;;  %v11626_v35 = vpop.eup %7573  ;;  %3799 = vadd.xlane.f32.xlu1 %v3798_v12  ;;  %v3787_v37 = vadd.f32 %v11614_v29, %v3786_v0  ;;  %7593 = vpow2.f32 %v3436_v3  ;;  %v11631_v26 = vpop.f32.mrb[140].mxu1  ;;  %v3442_v17 = vmul.f32 1.442695, %v2947_v27  ;;  %v6397_v1 = vadd.f32 %v11536_v25, %v11525_v18  ;;  %v13583_v25 = vld [vmem:[#allocation237_spill] sm:$0xff] }
 0x43a   : > { %v11633_v31 = vpop.f32.mrb[141].mxu0  ;;  %v11635_v43 = vpop.eup %7575  ;;  %7595 = vpow2.f32 %v3452_v24  ;;  %v6509_v0 = vadd.f32 %v11544_v6, %v11527_v40  ;;  %v2962_v48 = vsub.f32 %v13583_v25, %v11378_v20  ;;  %v2963_v6 = vsub.f32 -inf, %v11378_v20 }
 0x43b   : > { %v11637_v58 = vpop.permute.xlu1 %3972  ;;  %v11641_v51 = vpop.f32.mrb[141].mxu1  ;;  %v3788_v12 = vadd.f32 %v11620_v63, %v3787_v37  ;;  %7597 = vpow2.f32 %v3438_v28  ;;  %v3470_v54 = vmul.f32 1.442695, %v2961_v4  ;;  %v6400_v25 = vadd.f32 %v11566_v50, %v11559_v45  ;;  %v13590_v45 = vld [vmem:[#allocation40_spill] sm:$0xff] }
 0x43c   : > { %13581 = vst [vmem:[#allocation78_spill] sm:$0xff] %v11637_v58  ;;  %v7578_v15 = vpop.eup %7577  ;;  %v11646_v3 = vpop.f32.mrb[142].mxu0  ;;  %7599 = vpow2.f32 %v3440_v23  ;;  %v13582_v58 = vld [vmem:[#allocation116_spill] sm:$0xff]  ;;  %v11659_v40 = vadd.f32 %v6509_v0, %v6397_v1  ;;  %v3474_v1 = vmul.f32 1.442695, %v2963_v6  ;;  %v6512_v4 = vadd.f32 %v11577_v60, %v11564_v53 }
 0x43d   : > { %v11648_v55 = vpop.f32.mrb[142].mxu1  ;;  %v11650_v24 = vpop.eup %7579  ;;  %v4238_v27 = vpack.c.bf16 %v7578_v15, %v11635_v43  ;;  %v3802_v18 = vadd.f32 %v13582_v58, %v3801_v19  ;;  %v3789_v37 = vadd.f32 %v11626_v35, %v3788_v12  ;;  %7601 = vpow2.f32 %v3442_v17 }
 0x43e   : > { %v11656_v22 = vpop.f32.mrb[143].mxu0  ;;  %v7582_v28 = vpop.eup %7581  ;;  %13584 = vst [vmem:[#allocation201_spill] sm:$0xff] %v11659_v40  ;;  %v3472_v58 = vmul.f32 1.442695, %v2962_v48  ;;  %7603 = vpow2.f32 %v3470_v54  ;;  %v13588_v48 = vld [vmem:[#allocation106_spill] sm:$0xff]  ;;  %v4122_v50 = vpack.c.bf16 %v13590_v45, %v13589_v44  ;;  %v11684_v60 = vadd.f32 %v6512_v4, %v6400_v25 }
 0x43f   : > { %v11662_v21 = vpop.f32.mrb[143].mxu1  ;;  %v11664_v46 = vpop.eup %7583  ;;  %4909 = vmatprep.mubr.bf16.mxu0 %v4238_v27  ;;  %v4240_v23 = vpack.c.bf16 %v7582_v28, %v11650_v24  ;;  %3790 = vadd.xlane.f32.xlu0 %v3789_v37  ;;  %v13586_v27 = vld [vmem:[#allocation235_spill] sm:$0xff]  ;;  %v6403_v44 = vadd.f32 %v11592_v41, %v11585_v13  ;;  %v13594_v4 = vld [vmem:[#allocation238_spill] sm:$0xff]  ;;  %v2955_v45 = vsub.f32 -inf, %v11461_v47 }
 0x440   : > { %v11667_v19 = vpop.permute.xlu0 %3977  ;;  %v7586_v12 = vpop.eup %7585  ;;  %v2953_v40 = vsub.f32 %v13586_v27, %v11461_v47  ;;  %7605 = vpow2.f32 %v3472_v58  ;;  %13591 = vst [vmem:[#allocation56_spill] sm:$0xff] %v11684_v60 }
 0x441   : > { %13585 = vst [vmem:[#allocation202_spill] sm:$0xff] %v11667_v19  ;;  %v11673_v20 = vpop.f32.mrb[144].mxu0  ;;  %v7588_v0 = vpop.eup %7587  ;;  %5070 = vmatprep.mubr.bf16.mxu1 %v4240_v23  ;;  %v3803_v19 = vadd.f32 %v13588_v48, %v3802_v18  ;;  %v13593_v23 = vld [vmem:[#allocation152_spill] sm:$0xff]  ;;  %7607 = vpow2.f32 %v3474_v1  ;;  %v6515_v18 = vadd.f32 %v11599_v39, %v11587_v56 }
 0x442   : > { %v11677_v17 = vpop.permute.xlu1 %3982  ;;  %v11682_v37 = vpop.f32.mrb[144].mxu1  ;;  %v4237_v6 = vpack.c.bf16 %v7588_v0, %v7586_v12  ;;  %v3819_v53 = vadd.f32 %v7588_v0, %v7578_v15  ;;  %v2954_v0 = vsub.f32 %v13594_v4, %v11461_v47  ;;  %v3454_v39 = vmul.f32 1.442695, %v2953_v40 }
 0x443   : > { %13587 = vst [vmem:[#allocation77_spill] sm:$0xff] %v11677_v17  ;;  %v7590_v54 = vpop.eup %7589  ;;  %v11686_v10 = vpop.f32.mrb[145].mxu0  ;;  %v13592_v17 = vld [vmem:[#allocation34_spill] sm:$0xff]  ;;  %v11710_v41 = vadd.f32 %v6515_v18, %v6403_v44 }
 0x444   : > { %v11688_v2 = vpop.f32.mrb[145].mxu1  ;;  %v7592_v27 = vpop.eup %7591  ;;  %v4124_v16 = vpack.c.bf16 %v13593_v23, %v13592_v17  ;;  %4910 = vmatmul.mubr.bf16.gmra.mrb[188].mxu0 %v4237_v6  ;;  %v3810_v6 = vadd.f32 %v7586_v12, %v11635_v43  ;;  %v3456_v4 = vmul.f32 1.442695, %v2954_v0  ;;  %7609 = vpow2.f32 %v3454_v39  ;;  %v13598_v0 = vld [vmem:[#allocation38_spill] sm:$0xff] }
 0x445   : > { %v11696_v48 = vpop.f32.mrb[146].mxu0  ;;  %v11698_v15 = vpop.eup %7593  ;;  %v4239_v58 = vpack.c.bf16 %v7592_v27, %v7590_v54  ;;  %v3820_v25 = vadd.f32 %v7592_v27, %v3819_v53  ;;  %5111 = vmatprep.mubr.bf16.mxu0 %v4122_v50  ;;  %v6406_v43 = vadd.f32 %v11633_v31, %v11618_v34  ;;  %v6518_v12 = vadd.f32 %v11641_v51, %v11631_v26  ;;  %v13600_v39 = vld [vmem:[#allocation54_spill] sm:$0xff] }
 0x446   : > { %v11703_v17 = vpop.f32.mrb[146].mxu1  ;;  %v6414_v1 = vpop.f32.mrb[147].mxu0  ;;  %v3804_v13 = vadd.f32 %v11698_v15, %v3803_v19  ;;  %v3458_v19 = vmul.f32 1.442695, %v2955_v45  ;;  %v3811_v50 = vadd.f32 %v7590_v54, %v3810_v6  ;;  %7611 = vpow2.f32 %v3456_v4 }
 0x447   : > { %v11705_v23 = vpop.eup %7595  ;;  %v11708_v56 = vpop.permute.xlu0 %3987  ;;  %5071 = vmatmul.mubr.bf16.gmra.mrb[188].mxu1 %v4239_v58  ;;  %v3821_v47 = vadd.f32 %v7582_v28, %v3820_v25  ;;  %v13597_v25 = vld [vmem:[#allocation35_spill] sm:$0xff]  ;;  %v11735_v31 = vadd.f32 %v6518_v12, %v6406_v43  ;;  %v13604_v43 = vld [vmem:[#allocation42_spill] sm:$0xff] }
 0x448   : > { %13595 = vst [vmem:[#allocation62_spill] sm:$0xff] %v11708_v56  ;;  %v6526_v53 = vpop.f32.mrb[147].mxu1  ;;  %v11713_v27 = vpop.eup %7597  ;;  %5272 = vmatprep.mubr.bf16.mxu1 %v4124_v16  ;;  %v3812_v16 = vadd.f32 %v11650_v24, %v3811_v50  ;;  %v4121_v45 = vpack.c.bf16 %v13598_v0, %v13597_v25  ;;  %7613 = vpow2.f32 %v3458_v19  ;;  %v13602_v25 = vld [vmem:[#allocation36_spill] sm:$0xff]  ;;  %v13603_v0 = vld [vmem:[#allocation43_spill] sm:$0xff] }
 0x449   : > { %v11715_v60 = vpop.eup %7599  ;;  %v3805_v14 = vadd.f32 %v11713_v27, %v3804_v13  ;;  %v11718_v56 = vpop.permute.xlu1 %3992  ;;  %v3822_v40 = vadd.f32 %v11664_v46, %v3821_v47  ;;  %v13599_v13 = vld [vmem:[#allocation39_spill] sm:$0xff] }
 0x44a   : > { %13596 = vst [vmem:[#allocation73_spill] sm:$0xff] %v11718_v56  ;;  %v6416_v28 = vpop.f32.mrb[148].mxu0  ;;  %v11725_v44 = vpop.eup %7601  ;;  %v4130_v34 = vpack.c.bf16 %v13600_v39, %v13599_v13  ;;  %v3813_v24 = vadd.f32 %v11705_v23, %v3812_v16  ;;  %v4123_v13 = vpack.c.bf16 %v13603_v0, %v13602_v25  ;;  %v13605_v12 = vld [vmem:[#allocation151_spill] sm:$0xff]  ;;  %v6524_v25 = vadd.f32 %v11688_v2, %v11682_v37 }
 0x44b   : > { %v3806_v18 = vadd.f32 %v11715_v60, %v3805_v14  ;;  %v6528_v58 = vpop.f32.mrb[148].mxu1  ;;  %v11729_v54 = vpop.eup %7603  ;;  %v4132_v39 = vpack.c.bf16 %v13605_v12, %v13604_v43 }
 0x44c   : > { %v6417_v26 = vpop.f32.mrb[149].mxu0  ;;  %v6529_v51 = vpop.f32.mrb[149].mxu1  ;;  %v3823_v14 = vadd.f32 %v11729_v54, %v3822_v40  ;;  %5112 = vmatmul.mubr.bf16.vlgmr.msra.gmra.mrb[192].mxu0 %v4121_v45  ;;  %v6521_v40 = vadd.f32 %v11662_v21, %v11648_v55  ;;  %v6412_v45 = vadd.f32 %v11686_v10, %v11673_v20  ;;  %v6415_v55 = vadd.f32 %v6414_v1, %v11696_v48  ;;  %v13613_v48 = vld [vmem:[#allocation154_spill] sm:$0xff] }
 0x44d   : > { %v3807_v6 = vadd.f32 %v11725_v44, %v3806_v18  ;;  %v11739_v47 = vpop.permute.xlu0 %3997  ;;  %v6419_v4 = vpop.f32.mrb[150].mxu0  ;;  %v6409_v18 = vadd.f32 %v11656_v22, %v11646_v3  ;;  %5119 = vmatprep.mubr.bf16.mxu0 %v4130_v34  ;;  %v6527_v34 = vadd.f32 %v6526_v53, %v11703_v17  ;;  %v6418_v10 = vadd.f32 %v6417_v26, %v6416_v28  ;;  %v13617_v26 = vld [vmem:[#allocation53_spill] sm:$0xff] }
 0x44e   : > { %13601 = vst [vmem:[#allocation68_spill] sm:$0xff] %v11739_v47  ;;  %v11742_v50 = vpop.eup %7605  ;;  %v6531_v47 = vpop.f32.mrb[150].mxu1  ;;  %v11764_v3 = vadd.f32 %v6524_v25, %v6412_v45  ;;  %v6530_v2 = vadd.f32 %v6529_v51, %v6528_v58  ;;  %v13616_v58 = vld [vmem:[#allocation44_spill] sm:$0xff] }
 0x44f   : > { %v6420_v19 = vpop.f32.mrb[151].mxu0  ;;  %v11752_v56 = vpop.eup %7607  ;;  %3808 = vadd.xlane.f32.xlu0 %v3807_v6  ;;  %v3824_v16 = vadd.f32 %v11742_v50, %v3823_v14  ;;  %5273 = vmatmul.mubr.bf16.vlgmr.msra.gmra.mrb[192].mxu1 %v4123_v13  ;;  %v11761_v22 = vadd.f32 %v6521_v40, %v6409_v18  ;;  %v13609_v14 = vld [vmem:[#allocation37_spill] sm:$0xff]  ;;  %v13610_v13 = vld [vmem:[#allocation47_spill] sm:$0xff]  ;;  %v11775_v18 = vadd.f32 %v6527_v34, %v6415_v55  ;;  %v13612_v40 = vld [vmem:[#allocation48_spill] sm:$0xff] }
 0x450   : > { %v6532_v0 = vpop.f32.mrb[151].mxu1  ;;  %v11759_v43 = vpop.permute.xlu1 %4002  ;;  %5280 = vmatprep.mubr.bf16.mxu1 %v4132_v39  ;;  %13607 = vst [vmem:[#allocation184_spill] sm:$0xff] %v11764_v3  ;;  %v4129_v12 = vpack.c.bf16 %v13610_v13, %v13609_v14  ;;  %v4138_v1 = vpack.c.bf16 %v13613_v48, %v13612_v40  ;;  %v11781_v17 = vadd.f32 %v6530_v2, %v6418_v10  ;;  %v13618_v25 = vld [vmem:[#allocation52_spill] sm:$0xff]  ;;  %v13621_v2 = vld [vmem:[#allocation155_spill] sm:$0xff]  ;;  %v13629_v48 = vld [vmem:[#allocation41_spill] sm:$0xff] }
 0x451   : > { %13606 = vst [vmem:[#allocation209_spill] sm:$0xff] %v11759_v43  ;;  %v3825_v21 = vadd.f32 %v11752_v56, %v3824_v16  ;;  %v11768_v6 = vpop.eup %7609  ;;  %v11771_v37 = vpop.permute.xlu0 %4007  ;;  %13611 = vst [vmem:[#allocation163_spill] sm:$0xff] %v11775_v18  ;;  %v4131_v51 = vpack.c.bf16 %v13617_v26, %v13616_v58  ;;  %v6533_v16 = vadd.f32 %v6532_v0, %v6531_v47  ;;  %v13625_v47 = vld [vmem:[#allocation45_spill] sm:$0xff]  ;;  %v13632_v26 = vld [vmem:[#allocation166_spill] sm:$0xff] }
 0x452   : > { %v3814_v20 = vadd.f32 %v11768_v6, %v3813_v24  ;;  %13608 = vst [vmem:[#allocation87_spill] sm:$0xff] %v11771_v37  ;;  %v11777_v39 = vpop.eup %7611  ;;  %13614 = vst [vmem:[#allocation67_spill] sm:$0xff] %v11781_v17  ;;  %v6421_v24 = vadd.f32 %v6420_v19, %v6419_v4  ;;  %v13626_v4 = vld [vmem:[#allocation49_spill] sm:$0xff]  ;;  %v3480_v37 = vld [vmem:[#allocation3 + $0x20] sm:$0xff] }
 0x453   : > { %3826 = vadd.xlane.f32.xlu0 %v3825_v21  ;;  %v11788_v45 = vpop.eup %7613  ;;  %v13619_v21 = vld [vmem:[#allocation162_spill] sm:$0xff]  ;;  %v13627_v19 = vsub.f32 %v13625_v47, %v13626_v4  ;;  %v13631_v58 = vld [vmem:[#allocation57_spill] sm:$0xff] }
 0x454   : > { %v11783_v53 = vpop.permute.xlu1 %4012  ;;  %v3815_v28 = vadd.f32 %v11777_v39, %v3814_v20  ;;  %5120 = vmatmul.mubr.bf16.gmra.mrb[196].mxu0 %v4129_v12  ;;  %v4140_v55 = vpack.c.bf16 %v13619_v21, %v13618_v25  ;;  %v11793_v10 = vadd.f32 %v6533_v16, %v6421_v24  ;;  %v13622_v20 = vld [vmem:[#allocation157_spill] sm:$0xff]  ;;  %v13633_v24 = vld [vmem:[#allocation51_spill] sm:$0xff]  ;;  %v13634_v16 = vld [vmem:[#allocation156_spill] sm:$0xff] }
 0x455   : > { %13615 = vst [vmem:[#allocation210_spill] sm:$0xff] %v11783_v53  ;;  %5127 = vmatprep.mubr.bf16.mxu0 %v4138_v1  ;;  %v13623_v14 = vsub.f32 %v13621_v2, %v13622_v20  ;;  %v11798_v12 = vpop.permute.xlu0 %4017  ;;  %v2546_v0 = vmul.f32 1.442695, %v13627_v19  ;;  %v13630_v1 = vld [vmem:[#allocation61_spill] sm:$0xff]  ;;  %v4139_v25 = vpack.c.bf16 %v13634_v16, %v13633_v24  ;;  %v13635_v21 = vld [vmem:[#allocation58_spill] sm:$0xff]  ;;  %v13652_v16 = vld [vmem:[#allocation180_spill] sm:$0xff] }
 0x456   : > { %v3816_v34 = vadd.f32 %v11788_v45, %v3815_v28  ;;  %13620 = vst [vmem:[#allocation89_spill] sm:$0xff] %v11793_v10  ;;  %13624 = vst [vmem:[#allocation212_spill] sm:$0xff] %v11798_v12  ;;  %v4137_v28 = vpack.c.bf16 %v13630_v1, %v13629_v48  ;;  %v13640_v48 = vld [vmem:[#allocation170_spill] sm:$0xff]  ;;  %v13676_v12 = vld [vmem:[#allocation131_spill] sm:$0xff] }
 0x457   : > { %5281 = vmatmul.mubr.bf16.gmra.mrb[196].mxu1 %v4131_v51  ;;  %v2544_v13 = vmul.f32 1.442695, %v13623_v14  ;;  %v4146_v51 = vpack.c.bf16 %v13632_v26, %v13631_v58  ;;  %v13641_v26 = vld [vmem:[#allocation160_spill] sm:$0xff]  ;;  %v3492_v3 = vld [vmem:[#allocation3 + $0x80] sm:$0xff] }
 0x458   : > { %5288 = vmatprep.mubr.bf16.mxu1 %v4140_v55  ;;  %3817 = vadd.xlane.f32.xlu1 %v3816_v34  ;;  %v11803_v40 = vpop.permute.xlu1 %4022  ;;  %v13636_v55 = vld [vmem:[#allocation172_spill] sm:$0xff] }
 0x459   : > { %13628 = vst [vmem:[#allocation92_spill] sm:$0xff] %v11803_v40  ;;  %7615 = vpow2.f32 %v2544_v13  ;;  %v4148_v34 = vpack.c.bf16 %v13636_v55, %v13635_v21  ;;  %v11813_v2 = vpop.permute.xlu0 %4027  ;;  %v13644_v55 = vld [vmem:[#allocation60_spill] sm:$0xff] }
 0x45a   : > { %7617 = vpow2.f32 %v2546_v0  ;;  %13637 = vst [vmem:[#allocation63_spill] sm:$0xff] %v11813_v2  ;;  %v13639_v0 = vld [vmem:[#allocation59_spill] sm:$0xff] }
 0x45b   : > { %v4145_v1 = vpack.c.bf16 %v13640_v48, %v13639_v0 }
 0x45c   : > { %5128 = vmatmul.mubr.bf16.gmra.mrb[200].mxu0 %v4137_v28  ;;  %v11819_v13 = vpop.permute.xlu1 %4032 }
 0x45d   : > { %5135 = vmatprep.mubr.bf16.mxu0 %v4146_v51  ;;  %13638 = vst [vmem:[#allocation205_spill] sm:$0xff] %v11819_v13  ;;  %v13642_v51 = vld [vmem:[#allocation114_spill] sm:$0xff]  ;;  %v11839_v21 = vpop.permute.xlu0 %4037  ;;  %v13673_v13 = vld [vmem:[#allocation191_spill] sm:$0xff] }
 0x45e   : > { %v4154_v24 = vpack.c.bf16 %v13642_v51, %v13641_v26  ;;  %13643 = vst [vmem:[#allocation86_spill] sm:$0xff] %v11839_v21  ;;  %v13646_v26 = vld [vmem:[#allocation168_spill] sm:$0xff]  ;;  %v13647_v51 = vld [vmem:[#allocation118_spill] sm:$0xff] }
 0x45f   : > { %5289 = vmatmul.mubr.bf16.gmra.mrb[200].mxu1 %v4139_v25  ;;  %v4156_v28 = vpack.c.bf16 %v13647_v51, %v13646_v26  ;;  %v13650_v51 = vld [vmem:[#allocation164_spill] sm:$0xff]  ;;  %v13651_v25 = vld [vmem:[#allocation111_spill] sm:$0xff] }
 0x460   : > { %5296 = vmatprep.mubr.bf16.mxu1 %v4148_v34  ;;  %v13645_v34 = vld [vmem:[#allocation176_spill] sm:$0xff]  ;;  %v11855_v19 = vpop.permute.xlu1 %4042  ;;  %v4153_v58 = vpack.c.bf16 %v13651_v25, %v13650_v51  ;;  %v13660_v25 = vld [vmem:[#allocation179_spill] sm:$0xff]  ;;  %v13661_v51 = vld [vmem:[#allocation121_spill] sm:$0xff] }
 0x461   : > { %v4147_v0 = vpack.c.bf16 %v13645_v34, %v13644_v55  ;;  %13648 = vst [vmem:[#allocation82_spill] sm:$0xff] %v11855_v19  ;;  %v11865_v26 = vpop.permute.xlu0 %4047  ;;  %v13655_v55 = vld [vmem:[#allocation167_spill] sm:$0xff]  ;;  %v4161_v19 = vpack.c.bf16 %v13661_v51, %v13660_v25 }
 0x462   : > { %13649 = vst [vmem:[#allocation76_spill] sm:$0xff] %v11865_v26  ;;  %v13669_v51 = vld [vmem:[#allocation239_spill] sm:$0xff] }
 0x464   : > { %5136 = vmatmul.mubr.bf16.gmra.mrb[204].mxu0 %v4145_v1  ;;  %v11853_v1 = vpop.eup %7615  ;;  %v11871_v47 = vpop.permute.xlu1 %4052 }
 0x465   : > { %5143 = vmatprep.mubr.bf16.mxu0 %v4154_v24  ;;  %v11862_v34 = vpop.eup %7617  ;;  %13654 = vst [vmem:[#allocation207_spill] sm:$0xff] %v11871_v47  ;;  %v13656_v24 = vld [vmem:[#allocation113_spill] sm:$0xff]  ;;  %v11877_v20 = vpop.permute.xlu0 %4057  ;;  %v13664_v47 = vld [vmem:[#allocation123_spill] sm:$0xff] }
 0x466   : > { %v4155_v4 = vpack.c.bf16 %v13656_v24, %v13655_v55  ;;  %13658 = vst [vmem:[#allocation81_spill] sm:$0xff] %v11877_v20  ;;  %v13666_v24 = vld [vmem:[#allocation133_spill] sm:$0xff] }
 0x467   : > { %5297 = vmatmul.mubr.bf16.gmra.mrb[204].mxu1 %v4147_v0  ;;  %v13653_v0 = vld [vmem:[#allocation124_spill] sm:$0xff] }
 0x468   : > { %5304 = vmatprep.mubr.bf16.mxu1 %v4156_v28  ;;  %v4162_v48 = vpack.c.bf16 %v13653_v0, %v13652_v16  ;;  %v13657_v28 = vld [vmem:[#allocation119_spill] sm:$0xff]  ;;  %v11879_v26 = vpop.permute.xlu1 %4062  ;;  %v13662_v16 = vld [vmem:[#allocation126_spill] sm:$0xff] }
 0x469   : > { %4077 = vperm.xlu0 %6897, %v11853_v1   ;;  %4082 = vperm.xlu1 %6898, %v11862_v34   ;;  %v4164_v14 = vpack.c.bf16 %v11197_v61, %v13657_v28  ;;  %13659 = vst [vmem:[#allocation208_spill] sm:$0xff] %v11879_v26  ;;  %v4170_v0 = vpack.c.bf16 %v11237_v36, %v13662_v16  ;;  %v3477_v26 = vld [vmem:[#allocation3 + $0x8] sm:$0xff]  ;;  %v13670_v36 = vld [vmem:[#allocation122_spill] sm:$0xff] }
 0x46c   : > { %5144 = vmatmul.mubr.bf16.gmra.mrb[208].mxu0 %v4153_v58  ;;  %v13663_v58 = vld [vmem:[#allocation115_spill] sm:$0xff]  ;;  %v11891_v28 = vpop.permute.xlu1 %4072 }
 0x46d   : > { %5151 = vmatprep.mubr.bf16.mxu0 %v4162_v48  ;;  %v4163_v55 = vpack.c.bf16 %v13664_v47, %v13663_v58  ;;  %v13665_v48 = vld [vmem:[#allocation129_spill] sm:$0xff]  ;;  %13668 = vst [vmem:[#allocation71_spill] sm:$0xff] %v11891_v28  ;;  %v13672_v58 = vld [vmem:[#allocation132_spill] sm:$0xff] }
 0x46e   : > { %v4172_v61 = vpack.c.bf16 %v13666_v24, %v13665_v48  ;;  %v4178_v48 = vpack.c.bf16 %v13673_v13, %v13672_v58  ;;  %v13675_v28 = vld [vmem:[#allocation125_spill] sm:$0xff] }
 0x46f   : > { %5305 = vmatmul.mubr.bf16.gmra.mrb[208].mxu1 %v4155_v4  ;;  %v11889_v4 = vpop.permute.xlu0 %4067  ;;  %v4171_v53 = vpack.c.bf16 %v13676_v12, %v13675_v28  ;;  %v3479_v12 = vld [vmem:[#allocation3 + $0x18] sm:$0xff] }
 0x470   : > { %5312 = vmatprep.mubr.bf16.mxu1 %v4164_v14  ;;  %13667 = vst [vmem:[#allocation100_spill] sm:$0xff] %v11889_v4  ;;  %v3476_v14 = vld [vmem:[#allocation3] sm:$0xff] }
 0x471   : > { %v3508_v20 = vmul.f32 %v13669_v51, %v3476_v14 }
 0x474   : > { %5152 = vmatmul.mubr.bf16.gmra.mrb[212].mxu0 %v4161_v19  ;;  %v6422_v25 = vpop.f32.mrb[152].mxu0  ;;  %v13671_v19 = vld [vmem:[#allocation138_spill] sm:$0xff] }
 0x475   : > { %5159 = vmatprep.mubr.bf16.mxu0 %v4170_v0  ;;  %v4169_v16 = vpack.c.bf16 %v13671_v19, %v13670_v36  ;;  %v6423_v21 = vpop.f32.mrb[153].mxu0  ;;  %v3478_v0 = vld [vmem:[#allocation3 + $0x10] sm:$0xff]  ;;  %v13677_v36 = vld [vmem:[#allocation135_spill] sm:$0xff]  ;;  %v13678_v19 = vld [vmem:[#allocation178_spill] sm:$0xff] }
 0x476   : > { %v6534_v24 = vpop.f32.mrb[152].mxu1  ;;  %v6424_v4 = vadd.f32 %v6423_v21, %v6422_v25  ;;  %v4180_v43 = vpack.c.bf16 %v13678_v19, %v13677_v36  ;;  %v13684_v36 = vld [vmem:[#allocation128_spill] sm:$0xff] }
 0x477   : > { %5313 = vmatmul.mubr.bf16.gmra.mrb[212].mxu1 %v4163_v55  ;;  %v6425_v55 = vpop.f32.mrb[154].mxu0  ;;  %v6535_v14 = vpop.f32.mrb[153].mxu1 }
 0x478   : > { %5320 = vmatprep.mubr.bf16.mxu1 %v4172_v61  ;;  %v3548_v47 = vpop.xlane.xlu0 %3547  ;;  %v13674_v61 = vld [vmem:[#allocation240_spill] sm:$0xff]  ;;  %v3557_v51 = vpop.xlane.xlu1 %3556  ;;  %v6536_v10 = vadd.f32 %v6535_v14, %v6534_v24  ;;  %v13681_v24 = vld [vmem:[#allocation243_spill] sm:$0xff] }
 0x479   : > { %v3828_v2 = vadd.f32 %v3548_v47, %v3508_v20  ;;  %v3509_v40 = vmul.f32 %v13674_v61, %v3477_v26  ;;  %v6537_v17 = vpop.f32.mrb[154].mxu1  ;;  %v6426_v21 = vpop.f32.mrb[155].mxu0  ;;  %v13679_v20 = vld [vmem:[#allocation241_spill] sm:$0xff]  ;;  %v3512_v61 = vmul.f32 %v13681_v24, %v3480_v37  ;;  %v13690_v24 = vld [vmem:[#allocation192_spill] sm:$0xff] }
 0x47a   : > { %v3510_v25 = vmul.f32 %v13679_v20, %v3478_v0  ;;  %v6427_v26 = vadd.f32 %v6426_v21, %v6425_v55  ;;  %v11905_v28 = vadd.f32 %v6536_v10, %v6424_v4  ;;  %v13683_v55 = vld [vmem:[#allocation242_spill] sm:$0xff]  ;;  %v13687_v21 = vld [vmem:[#allocation153_spill] sm:$0xff] }
 0x47b   : > { %3861 = vst.msk [vmem:[#allocation3] sm:$0xff] %vm308_vm0, %v3828_v2  ;;  %v3829_v13 = vadd.f32 %v3557_v51, %v3509_v40  ;;  %v3482_v2 = vld [vmem:[#allocation3 + $0x30] sm:$0xff]  ;;  %v3511_v51 = vmul.f32 %v13683_v55, %v3479_v12  ;;  %v13692_v55 = vld [vmem:[#allocation159_spill] sm:$0xff] }
 0x47c   : > { %5160 = vmatmul.mubr.bf16.gmra.mrb[216].mxu0 %v4169_v16  ;;  %v6538_v16 = vpop.f32.mrb[155].mxu1  ;;  %v3566_v47 = vpop.xlane.xlu0 %3565  ;;  %13680 = vst [vmem:[#allocation215_spill] sm:$0xff] %v11905_v28  ;;  %v13689_v12 = vld [vmem:[#allocation136_spill] sm:$0xff] }
 0x47d   : > { %5167 = vmatprep.mubr.bf16.mxu0 %v4178_v48  ;;  %3862 = vst.msk [vmem:[#allocation3 + $0x8] sm:$0xff] %vm308_vm0, %v3829_v13  ;;  %v6539_v58 = vadd.f32 %v6538_v16, %v6537_v17  ;;  %v3830_v48 = vadd.f32 %v3566_v47, %v3510_v25  ;;  %v3584_v14 = vpop.xlane.xlu1 %3583  ;;  %v3481_v13 = vld [vmem:[#allocation3 + $0x28] sm:$0xff]  ;;  %v13686_v17 = vld [vmem:[#allocation137_spill] sm:$0xff] }
 0x47e   : > { %v6428_v0 = vpop.f32.mrb[156].mxu0  ;;  %v4186_v20 = vpack.c.bf16 %v13687_v21, %v13686_v17  ;;  %v13688_v47 = vld [vmem:[#allocation245_spill] sm:$0xff] }
 0x47f   : > { %5321 = vmatmul.mubr.bf16.gmra.mrb[216].mxu1 %v4171_v53  ;;  %v11909_v40 = vadd.f32 %v6539_v58, %v6427_v26  ;;  %3863 = vst.msk [vmem:[#allocation3 + $0x10] sm:$0xff] %vm308_vm0, %v3830_v48  ;;  %v3832_v53 = vadd.f32 %v3584_v14, %v3512_v61  ;;  %v6429_v4 = vpop.f32.mrb[157].mxu0  ;;  %v3514_v58 = vmul.f32 %v13688_v47, %v3482_v2  ;;  %v3484_v48 = vld [vmem:[#allocation3 + $0x40] sm:$0xff]  ;;  %v13691_v14 = vld [vmem:[#allocation188_spill] sm:$0xff]  ;;  %v13694_v47 = vld [vmem:[#allocation247_spill] sm:$0xff] }
 0x480   : > { %5328 = vmatprep.mubr.bf16.mxu1 %v4180_v43  ;;  %v13685_v43 = vld [vmem:[#allocation186_spill] sm:$0xff]  ;;  %v3575_v19 = vpop.xlane.xlu0 %3574  ;;  %v6540_v37 = vpop.f32.mrb[156].mxu1  ;;  %v6430_v25 = vadd.f32 %v6429_v4, %v6428_v0  ;;  %v4179_v61 = vpack.c.bf16 %v13690_v24, %v13689_v12  ;;  %v13693_v4 = vld [vmem:[#allocation244_spill] sm:$0xff]  ;;  %v3516_v12 = vmul.f32 %v13694_v47, %v3484_v48  ;;  %v3483_v24 = vld [vmem:[#allocation3 + $0x38] sm:$0xff] }
 0x481   : > { %13682 = vst [vmem:[#allocation216_spill] sm:$0xff] %v11909_v40  ;;  %v4177_v10 = vpack.c.bf16 %v13685_v43, %v13684_v36  ;;  %3865 = vst.msk [vmem:[#allocation3 + $0x20] sm:$0xff] %vm308_vm0, %v3832_v53  ;;  %v6431_v26 = vpop.f32.mrb[158].mxu0  ;;  %v3831_v16 = vadd.f32 %v3575_v19, %v3511_v51  ;;  %v4188_v36 = vpack.c.bf16 %v13692_v55, %v13691_v14  ;;  %v6541_v43 = vpop.f32.mrb[157].mxu1  ;;  %v13697_v48 = vld [vmem:[#allocation246_spill] sm:$0xff] }
 0x482   : > { %v3602_v40 = vpop.xlane.xlu1 %3601  ;;  %v5500_v28 = vld [vmem:[#allocation3] sm:$0xff]  ;;  %v6542_v17 = vadd.f32 %v6541_v43, %v6540_v37  ;;  %v6543_v53 = vpop.f32.mrb[158].mxu1  ;;  %v3513_v2 = vmul.f32 %v13693_v4, %v3481_v13 }
 0x483   : > { %3864 = vst.msk [vmem:[#allocation3 + $0x18] sm:$0xff] %vm308_vm0, %v3831_v16  ;;  %v3834_v0 = vadd.f32 %v3602_v40, %v3514_v58  ;;  %v6432_v51 = vpop.f32.mrb[159].mxu0  ;;  %7619 = vrcp.f32 %v5500_v28  ;;  %v6544_v19 = vpop.f32.mrb[159].mxu1  ;;  %v3486_v16 = vld [vmem:[#allocation3 + $0x50] sm:$0xff] }
 0x484   : > { %5168 = vmatmul.mubr.bf16.gmra.mrb[220].mxu0 %v4177_v10  ;;  %v6433_v10 = vadd.f32 %v6432_v51, %v6431_v26  ;;  %v3593_v21 = vpop.xlane.xlu0 %3592  ;;  %v5501_v14 = vld [vmem:[#allocation3 + $0x8] sm:$0xff]  ;;  %v11926_v55 = vadd.f32 %v6542_v17, %v6430_v25  ;;  %v13699_v25 = vld [vmem:[#allocation64_spill] sm:$0xff] }
 0x485   : > { %5175 = vmatprep.mubr.bf16.mxu0 %v4186_v20  ;;  %3867 = vst.msk [vmem:[#allocation3 + $0x30] sm:$0xff] %vm308_vm0, %v3834_v0  ;;  %v6545_v20 = vadd.f32 %v6544_v19, %v6543_v53  ;;  %v3833_v37 = vadd.f32 %v3593_v21, %v3513_v2  ;;  %7621 = vrcp.f32 %v5501_v14  ;;  %v13700_v17 = vld [vmem:[#allocation55_spill] sm:$0xff]  ;;  %v13701_v0 = vld [vmem:[#allocation173_spill] sm:$0xff] }
 0x486   : > { %13695 = vst [vmem:[#allocation218_spill] sm:$0xff] %v11926_v55  ;;  %v3620_v40 = vpop.xlane.xlu1 %3619  ;;  %v5502_v13 = vld [vmem:[#allocation3 + $0x10] sm:$0xff]  ;;  %v6434_v58 = vpop.f32.mrb[160].mxu0  ;;  %v4194_v53 = vpack.c.bf16 %v13701_v0, %v13700_v17  ;;  %v3485_v2 = vld [vmem:[#allocation3 + $0x48] sm:$0xff]  ;;  %v13702_v14 = vld [vmem:[#allocation249_spill] sm:$0xff] }
 0x487   : > { %5329 = vmatmul.mubr.bf16.gmra.mrb[220].mxu1 %v4179_v61  ;;  %v11929_v28 = vadd.f32 %v6545_v20, %v6433_v10  ;;  %3866 = vst.msk [vmem:[#allocation3 + $0x28] sm:$0xff] %vm308_vm0, %v3833_v37  ;;  %v3836_v26 = vadd.f32 %v3620_v40, %v3516_v12  ;;  %v3515_v61 = vmul.f32 %v13697_v48, %v3483_v24  ;;  %7623 = vrcp.f32 %v5502_v13  ;;  %v6435_v51 = vpop.f32.mrb[161].mxu0  ;;  %v13703_v24 = vld [vmem:[#allocation185_spill] sm:$0xff]  ;;  %v13704_v37 = vld [vmem:[#allocation32_spill] sm:$0xff]  ;;  %v13705_v13 = vld [vmem:[#allocation187_spill] sm:$0xff] }
 0x488   : > { %5336 = vmatprep.mubr.bf16.mxu1 %v4188_v36  ;;  %v13698_v36 = vld [vmem:[#allocation134_spill] sm:$0xff]  ;;  %v3611_v4 = vpop.xlane.xlu0 %3610  ;;  %v6546_v10 = vpop.f32.mrb[160].mxu1  ;;  %v6436_v21 = vadd.f32 %v6435_v51, %v6434_v58  ;;  %v3518_v20 = vmul.f32 %v13702_v14, %v3486_v16  ;;  %v4187_v40 = vpack.c.bf16 %v13704_v37, %v13703_v24  ;;  %v13706_v48 = vld [vmem:[#allocation171_spill] sm:$0xff]  ;;  %v13707_v16 = vld [vmem:[#allocation248_spill] sm:$0xff] }
 0x489   : > { %13696 = vst [vmem:[#allocation28_spill] sm:$0xff] %v11929_v28  ;;  %v4185_v43 = vpack.c.bf16 %v13699_v25, %v13698_v36  ;;  %v5504_v19 = vld [vmem:[#allocation3 + $0x20] sm:$0xff]  ;;  %3869 = vst.msk [vmem:[#allocation3 + $0x40] sm:$0xff] %vm308_vm0, %v3836_v26  ;;  %v6437_v47 = vpop.f32.mrb[162].mxu0  ;;  %v3835_v12 = vadd.f32 %v3611_v4, %v3515_v61  ;;  %v4196_v36 = vpack.c.bf16 %v13706_v48, %v13705_v13  ;;  %v6547_v25 = vpop.f32.mrb[161].mxu1  ;;  %v3487_v14 = vld [vmem:[#allocation3 + $0x58] sm:$0xff] }
 0x48a   : > { %7625 = vrcp.f32 %v5504_v19  ;;  %v3638_v17 = vpop.xlane.xlu1 %3637  ;;  %v3488_v0 = vld [vmem:[#allocation3 + $0x60] sm:$0xff]  ;;  %v5503_v28 = vld [vmem:[#allocation3 + $0x18] sm:$0xff]  ;;  %v6548_v26 = vadd.f32 %v6547_v25, %v6546_v10  ;;  %v6549_v55 = vpop.f32.mrb[162].mxu1  ;;  %v3517_v51 = vmul.f32 %v13707_v16, %v3485_v2  ;;  %v3490_v25 = vld [vmem:[#allocation3 + $0x70] sm:$0xff] }
 0x48b   : > { %3868 = vst.msk [vmem:[#allocation3 + $0x38] sm:$0xff] %vm308_vm0, %v3835_v12  ;;  %v3838_v58 = vadd.f32 %v3638_v17, %v3518_v20  ;;  %v6438_v61 = vpop.f32.mrb[163].mxu0  ;;  %7627 = vrcp.f32 %v5503_v28  ;;  %v6550_v4 = vpop.f32.mrb[163].mxu1  ;;  %v13709_v12 = vld [vmem:[#allocation251_spill] sm:$0xff] }
 0x48c   : > { %5176 = vmatmul.mubr.bf16.gmra.mrb[224].mxu0 %v4185_v43  ;;  %v6439_v43 = vadd.f32 %v6438_v61, %v6437_v47  ;;  %v3629_v19 = vpop.xlane.xlu0 %3628  ;;  %v5506_v24 = vld [vmem:[#allocation3 + $0x30] sm:$0xff]  ;;  %v11945_v13 = vadd.f32 %v6548_v26, %v6436_v21  ;;  %v3520_v20 = vmul.f32 %v13709_v12, %v3488_v0  ;;  %v13711_v21 = vld [vmem:[#allocation250_spill] sm:$0xff] }
 0x48d   : > { %5183 = vmatprep.mubr.bf16.mxu0 %v4194_v53  ;;  %v7620_v37 = vpop.eup %7619  ;;  %3871 = vst.msk [vmem:[#allocation3 + $0x50] sm:$0xff] %vm308_vm0, %v3838_v58  ;;  %v6551_v53 = vadd.f32 %v6550_v4, %v6549_v55  ;;  %v3837_v10 = vadd.f32 %v3629_v19, %v3517_v51  ;;  %7629 = vrcp.f32 %v5506_v24  ;;  %v3519_v26 = vmul.f32 %v13711_v21, %v3487_v14  ;;  %v13712_v58 = vld [vmem:[#allocation194_spill] sm:$0xff]  ;;  %v13713_v55 = vld [vmem:[#allocation165_spill] sm:$0xff]  ;;  %v3489_v4 = vld [vmem:[#allocation3 + $0x68] sm:$0xff] }
 0x48e   : > { %13708 = vst [vmem:[#allocation91_spill] sm:$0xff] %v11945_v13  ;;  %v3656_v48 = vpop.xlane.xlu1 %3655  ;;  %v5596_v2 = vmul.f32 0.25, %v7620_v37  ;;  %v5505_v28 = vld [vmem:[#allocation3 + $0x28] sm:$0xff]  ;;  %v4193_v61 = vpack.c.bf16 %v13713_v55, %v13712_v58  ;;  %v13714_v37 = vld [vmem:[#allocation190_spill] sm:$0xff]  ;;  %v13718_v58 = vld [vmem:[#allocation197_spill] sm:$0xff] }
 0x48f   : > { %5337 = vmatmul.mubr.bf16.gmra.mrb[224].mxu1 %v4187_v40  ;;  %v7622_v47 = vpop.eup %7621  ;;  %v11949_v40 = vadd.f32 %v6551_v53, %v6439_v43  ;;  %3870 = vst.msk [vmem:[#allocation3 + $0x48] sm:$0xff] %vm308_vm0, %v3837_v10  ;;  %v3840_v17 = vadd.f32 %v3656_v48, %v3520_v20  ;;  %7631 = vrcp.f32 %v5505_v28  ;;  %v13715_v43 = vld [vmem:[#allocation169_spill] sm:$0xff]  ;;  %v13717_v21 = vld [vmem:[#allocation158_spill] sm:$0xff] }
 0x490   : > { %5344 = vmatprep.mubr.bf16.mxu1 %v4196_v36  ;;  %v6440_v36 = vpop.f32.mrb[164].mxu0  ;;  %v3647_v0 = vpop.xlane.xlu0 %3646  ;;  %v5597_v51 = vmul.f32 0.25, %v7622_v47  ;;  %5630 = vperm.xlu0 %6897, %v5596_v2   ;;  %v5508_v19 = vld [vmem:[#allocation3 + $0x40] sm:$0xff]  ;;  %v4202_v53 = vpack.c.bf16 %v13715_v43, %v13714_v37  ;;  %v13716_v48 = vld [vmem:[#allocation253_spill] sm:$0xff]  ;;  %v4195_v55 = vpack.c.bf16 %v13718_v58, %v13717_v21  ;;  %v13720_v2 = vld [vmem:[#allocation195_spill] sm:$0xff] }
 0x491   : > { %13710 = vst [vmem:[#allocation90_spill] sm:$0xff] %v11949_v40  ;;  %v6441_v16 = vpop.f32.mrb[165].mxu0  ;;  %v7624_v24 = vpop.eup %7623  ;;  %3873 = vst.msk [vmem:[#allocation3 + $0x60] sm:$0xff] %vm308_vm0, %v3840_v17  ;;  %v3839_v14 = vadd.f32 %v3647_v0, %v3519_v26  ;;  %v3522_v28 = vmul.f32 %v13716_v48, %v3490_v25  ;;  %v13719_v47 = vld [vmem:[#allocation174_spill] sm:$0xff]  ;;  %7633 = vrcp.f32 %v5508_v19  ;;  %v3491_v58 = vld [vmem:[#allocation3 + $0x78] sm:$0xff] }
 0x492   : > { %v6552_v10 = vpop.f32.mrb[164].mxu1  ;;  %v6442_v12 = vadd.f32 %v6441_v16, %v6440_v36  ;;  %v6443_v20 = vpop.f32.mrb[166].mxu0  ;;  %v4204_v40 = vpack.c.bf16 %v13720_v2, %v13719_v47  ;;  %5635 = vperm.xlu1 %6898, %v5597_v51   ;;  %v5598_v37 = vmul.f32 0.25, %v7624_v24  ;;  %v5507_v43 = vld [vmem:[#allocation3 + $0x38] sm:$0xff]  ;;  %v13721_v16 = vld [vmem:[#allocation252_spill] sm:$0xff] }
 0x493   : > { %v6553_v13 = vpop.f32.mrb[165].mxu1  ;;  %v3674_v18 = vpop.xlane.xlu1 %3673  ;;  %3872 = vst.msk [vmem:[#allocation3 + $0x58] sm:$0xff] %vm308_vm0, %v3839_v14  ;;  %v3521_v0 = vmul.f32 %v13721_v16, %v3489_v4  ;;  %7635 = vrcp.f32 %v5507_v43 }
 0x494   : > { %5184 = vmatmul.mubr.bf16.gmra.mrb[228].mxu0 %v4193_v61  ;;  %v7626_v17 = vpop.eup %7625  ;;  %v6554_v36 = vadd.f32 %v6553_v13, %v6552_v10  ;;  %v6555_v26 = vpop.f32.mrb[166].mxu1  ;;  %v3842_v25 = vadd.f32 %v3674_v18, %v3522_v28  ;;  %5640 = vperm.xlu0 %6897, %v5598_v37   ;;  %v5510_v24 = vld [vmem:[#allocation3 + $0x50] sm:$0xff]  ;;  %v13723_v18 = vld [vmem:[#allocation19_spill] sm:$0xff] }
 0x495   : > { %5191 = vmatprep.mubr.bf16.mxu0 %v4202_v53  ;;  %v6444_v61 = vpop.f32.mrb[167].mxu0  ;;  %v6556_v21 = vpop.f32.mrb[167].mxu1  ;;  %v3524_v10 = vmul.f32 %v13723_v18, %v3492_v3  ;;  %v3494_v28 = vld [vmem:[#allocation3 + $0x90] sm:$0xff]  ;;  %7637 = vrcp.f32 %v5510_v24 }
 0x496   : > { %v6445_v48 = vadd.f32 %v6444_v61, %v6443_v20  ;;  %v3665_v51 = vpop.xlane.xlu0 %3664  ;;  %v7628_v47 = vpop.eup %7627  ;;  %v11965_v19 = vadd.f32 %v6554_v36, %v6442_v12  ;;  %3875 = vst.msk [vmem:[#allocation3 + $0x70] sm:$0xff] %vm308_vm0, %v3842_v25  ;;  %v6557_v13 = vadd.f32 %v6556_v21, %v6555_v26  ;;  %v5509_v20 = vld [vmem:[#allocation3 + $0x48] sm:$0xff]  ;;  %v13725_v12 = vld [vmem:[#allocation254_spill] sm:$0xff]  ;;  %v13726_v26 = vld [vmem:[#allocation189_spill] sm:$0xff] }
 0x497   : > { %5345 = vmatmul.mubr.bf16.gmra.mrb[228].mxu1 %v4195_v55  ;;  %v3841_v53 = vadd.f32 %v3665_v51, %v3521_v0  ;;  %v3692_v14 = vpop.xlane.xlu1 %3691  ;;  %v5599_v4 = vmul.f32 0.25, %v7628_v47  ;;  %v5600_v55 = vmul.f32 0.25, %v7626_v17  ;;  %v3523_v43 = vmul.f32 %v13725_v12, %v3491_v58  ;;  %v7630_v36 = vpop.eup %7629  ;;  %v13727_v25 = vld [vmem:[#allocation72_spill] sm:$0xff]  ;;  %v13728_v21 = vld [vmem:[#allocation198_spill] sm:$0xff] }
 0x498   : > { %5352 = vmatprep.mubr.bf16.mxu1 %v4204_v40  ;;  %13722 = vst [vmem:[#allocation30_spill] sm:$0xff] %v11965_v19  ;;  %v11969_v2 = vadd.f32 %v6557_v13, %v6445_v48  ;;  %v3844_v37 = vadd.f32 %v3692_v14, %v3524_v10  ;;  %v6446_v40 = vpop.f32.mrb[168].mxu0  ;;  %7639 = vrcp.f32 %v5509_v20  ;;  %v4201_v61 = vpack.c.bf16 %v13727_v25, %v13726_v26  ;;  %v5512_v17 = vld [vmem:[#allocation3 + $0x60] sm:$0xff]  ;;  %v13729_v48 = vld [vmem:[#allocation80_spill] sm:$0xff]  ;;  %v6558_v24 = vpop.f32.mrb[168].mxu1  ;;  %v3493_v10 = vld [vmem:[#allocation3 + $0x88] sm:$0xff] }
 0x499   : > { %3874 = vst.msk [vmem:[#allocation3 + $0x68] sm:$0xff] %vm308_vm0, %v3841_v53  ;;  %v6447_v3 = vpop.f32.mrb[169].mxu0  ;;  %5645 = vperm.xlu1 %6898, %v5599_v4   ;;  %5650 = vperm.xlu0 %6897, %v5600_v55   ;;  %v7632_v0 = vpop.eup %7631  ;;  %v4210_v51 = vpack.c.bf16 %v13729_v48, %v13728_v21  ;;  %v13730_v53 = vld [vmem:[#allocation18_spill] sm:$0xff]  ;;  %v13731_v14 = vld [vmem:[#allocation175_spill] sm:$0xff]  ;;  %v13732_v20 = vld [vmem:[#allocation193_spill] sm:$0xff]  ;;  %7641 = vrcp.f32 %v5512_v17 }
 0x49a   : > { %13724 = vst [vmem:[#allocation211_spill] sm:$0xff] %v11969_v2  ;;  %v3683_v16 = vpop.xlane.xlu0 %3682  ;;  %3877 = vst.msk [vmem:[#allocation3 + $0x80] sm:$0xff] %vm308_vm0, %v3844_v37  ;;  %v6448_v47 = vadd.f32 %v6447_v3, %v6446_v40  ;;  %v6449_v13 = vpop.f32.mrb[170].mxu0  ;;  %v3526_v18 = vmul.f32 %v13730_v53, %v3494_v28  ;;  %v4203_v12 = vpack.c.bf16 %v13732_v20, %v13731_v14  ;;  %v13733_v4 = vld [vmem:[#allocation70_spill] sm:$0xff]  ;;  %v13734_v55 = vld [vmem:[#allocation161_spill] sm:$0xff]  ;;  %v5601_v19 = vmul.f32 0.25, %v7632_v0 }
 0x49b   : > { %v3843_v58 = vadd.f32 %v3683_v16, %v3523_v43  ;;  %v4212_v26 = vpack.c.bf16 %v13734_v55, %v13733_v4  ;;  %v6559_v25 = vpop.f32.mrb[169].mxu1  ;;  %v3710_v2 = vpop.xlane.xlu1 %3709  ;;  %v5511_v21 = vld [vmem:[#allocation3 + $0x58] sm:$0xff]  ;;  %v5602_v3 = vmul.f32 0.25, %v7630_v36  ;;  %v13735_v53 = vld [vmem:[#allocation22_spill] sm:$0xff] }
 0x49c   : > { %5192 = vmatmul.mubr.bf16.gmra.mrb[232].mxu0 %v4201_v61  ;;  %v6560_v37 = vadd.f32 %v6559_v25, %v6558_v24  ;;  %v6561_v40 = vpop.f32.mrb[170].mxu1  ;;  %v3846_v43 = vadd.f32 %v3710_v2, %v3526_v18  ;;  %v6450_v28 = vpop.f32.mrb[171].mxu0  ;;  %7643 = vrcp.f32 %v5511_v21  ;;  %v3525_v14 = vmul.f32 %v13735_v53, %v3493_v10  ;;  %v3496_v20 = vld [vmem:[#allocation3 + $0xa0] sm:$0xff]  ;;  %v13736_v18 = vld [vmem:[#allocation23_spill] sm:$0xff]  ;;  %v13738_v25 = vld [vmem:[#allocation65_spill] sm:$0xff] }
 0x49d   : > { %5199 = vmatprep.mubr.bf16.mxu0 %v4210_v51  ;;  %3876 = vst.msk [vmem:[#allocation3 + $0x78] sm:$0xff] %vm308_vm0, %v3843_v58  ;;  %v7634_v61 = vpop.eup %7633  ;;  %v6451_v16 = vadd.f32 %v6450_v28, %v6449_v13  ;;  %v6562_v48 = vpop.f32.mrb[171].mxu1  ;;  %5655 = vperm.xlu1 %6898, %v5601_v19   ;;  %v5514_v0 = vld [vmem:[#allocation3 + $0x70] sm:$0xff]  ;;  %v3528_v10 = vmul.f32 %v13736_v18, %v3496_v20 }
 0x49e   : > { %v7636_v4 = vpop.eup %7635  ;;  %v11985_v17 = vadd.f32 %v6560_v37, %v6448_v47  ;;  %3879 = vst.msk [vmem:[#allocation3 + $0x90] sm:$0xff] %vm308_vm0, %v3846_v43  ;;  %v6563_v51 = vadd.f32 %v6562_v48, %v6561_v40  ;;  %v3701_v2 = vpop.xlane.xlu0 %3700  ;;  %5660 = vperm.xlu0 %6897, %v5602_v3   ;;  %7645 = vrcp.f32 %v5514_v0  ;;  %v5604_v55 = vmul.f32 0.25, %v7634_v61  ;;  %v13737_v47 = vld [vmem:[#allocation74_spill] sm:$0xff]  ;;  %v13740_v61 = vld [vmem:[#allocation181_spill] sm:$0xff] }
 0x49f   : > { %5353 = vmatmul.mubr.bf16.gmra.mrb[232].mxu1 %v4203_v12  ;;  %v3845_v36 = vadd.f32 %v3701_v2, %v3525_v14  ;;  %v5603_v24 = vmul.f32 0.25, %v7636_v4  ;;  %v6452_v19 = vpop.f32.mrb[172].mxu0  ;;  %v3495_v12 = vld [vmem:[#allocation3 + $0x98] sm:$0xff]  ;;  %v4209_v21 = vpack.c.bf16 %v13738_v25, %v13737_v47  ;;  %v13739_v14 = vld [vmem:[#allocation200_spill] sm:$0xff] }
 0x4a0   : > { %5360 = vmatprep.mubr.bf16.mxu1 %v4212_v26  ;;  %v5513_v58 = vld [vmem:[#allocation3 + $0x68] sm:$0xff]  ;;  %v11988_v13 = vadd.f32 %v6563_v51, %v6451_v16  ;;  %v7638_v26 = vpop.eup %7637  ;;  %v6453_v40 = vpop.f32.mrb[173].mxu0  ;;  %v4211_v20 = vpack.c.bf16 %v13740_v61, %v13739_v14  ;;  %v13741_v4 = vld [vmem:[#allocation20_spill] sm:$0xff] }
 0x4a1   : > { %7647 = vrcp.f32 %v5513_v58  ;;  %3878 = vst.msk [vmem:[#allocation3 + $0x88] sm:$0xff] %vm308_vm0, %v3845_v36  ;;  %v3728_v37 = vpop.xlane.xlu1 %3727  ;;  %5665 = vperm.xlu1 %6898, %v5603_v24   ;;  %v5516_v43 = vld [vmem:[#allocation3 + $0x80] sm:$0xff]  ;;  %v6564_v16 = vpop.f32.mrb[172].mxu1  ;;  %v6454_v48 = vadd.f32 %v6453_v40, %v6452_v19  ;;  %v3527_v51 = vmul.f32 %v13741_v4, %v3495_v12  ;;  %v13742_v24 = vpack.c.bf16 %v11529_v57, %v11451_v62 }
 0x4a2   : > { %v7640_v28 = vpop.eup %7639  ;;  %v3848_v3 = vadd.f32 %v3728_v37, %v3528_v10  ;;  %v6455_v53 = vpop.f32.mrb[174].mxu0  ;;  %5670 = vperm.xlu0 %6897, %v5604_v55   ;;  %7649 = vrcp.f32 %v5516_v43  ;;  %v5606_v55 = vmul.f32 0.25, %v7638_v26  ;;  %v13743_v43 = vpack.c.bf16 %v11546_v42, %v11472_v52  ;;  %v13744_v26 = vld [vmem:[#allocation24_spill] sm:$0xff]  ;;  %v13745_v4 = vld [vmem:[#allocation66_spill] sm:$0xff] }
 0x4a3   : > { %v6565_v0 = vpop.f32.mrb[173].mxu1  ;;  %v6456_v2 = vpop.f32.mrb[175].mxu0  ;;  %v5605_v58 = vmul.f32 0.25, %v7640_v28  ;;  %v13746_v52 = vld [vmem:[#allocation206_spill] sm:$0xff] }
 0x4a4   : > { %5200 = vmatmul.mubr.bf16.gmra.mrb[236].mxu0 %v4209_v21  ;;  %v5515_v36 = vld [vmem:[#allocation3 + $0x78] sm:$0xff]  ;;  %3881 = vst.msk [vmem:[#allocation3 + $0xa0] sm:$0xff] %vm308_vm0, %v3848_v3  ;;  %v6566_v18 = vadd.f32 %v6565_v0, %v6564_v16  ;;  %v6567_v10 = vpop.f32.mrb[174].mxu1  ;;  %v6457_v19 = vadd.f32 %v6456_v2, %v6455_v53  ;;  %v7642_v47 = vpop.eup %7641  ;;  %v3498_v21 = vld [vmem:[#allocation3 + $0xb0] sm:$0xff]  ;;  %v4217_v42 = vpack.c.bf16 %v13746_v52, %v13745_v4 }
 0x4a5   : > { %5207 = vmatprep.mubr.bf16.mxu0 %v13742_v24  ;;  %7651 = vrcp.f32 %v5515_v36  ;;  %v3719_v25 = vpop.xlane.xlu0 %3718  ;;  %v6568_v12 = vpop.f32.mrb[175].mxu1  ;;  %5675 = vperm.xlu1 %6898, %v5605_v58   ;;  %v5518_v37 = vld [vmem:[#allocation3 + $0x90] sm:$0xff]  ;;  %v3530_v16 = vmul.f32 %v13744_v26, %v3498_v21  ;;  %v5608_v61 = vmul.f32 0.25, %v7642_v47  ;;  %v3497_v36 = vld [vmem:[#allocation3 + $0xa8] sm:$0xff]  ;;  %v13747_v21 = vpack.c.bf16 %v11614_v29, %v11499_v5 }
 0x4a6   : > { %v7644_v40 = vpop.eup %7643  ;;  %v12004_v62 = vadd.f32 %v6566_v18, %v6454_v48  ;;  %v3847_v57 = vadd.f32 %v3719_v25, %v3527_v51  ;;  %v6569_v28 = vadd.f32 %v6568_v12, %v6567_v10  ;;  %5680 = vperm.xlu0 %6897, %v5606_v55   ;;  %v6458_v14 = vpop.f32.mrb[176].mxu0  ;;  %7653 = vrcp.f32 %v5518_v37 }
 0x4a7   : > { %5361 = vmatmul.mubr.bf16.gmra.mrb[236].mxu1 %v4211_v20  ;;  %v5607_v3 = vmul.f32 0.25, %v7644_v40  ;;  %v6459_v2 = vpop.f32.mrb[177].mxu0  ;;  %v13750_v5 = vpack.c.bf16 %v11626_v35, %v11521_v59 }
 0x4a8   : > { %5368 = vmatprep.mubr.bf16.mxu1 %v13743_v43  ;;  %3880 = vst.msk [vmem:[#allocation3 + $0x98] sm:$0xff] %vm308_vm0, %v3847_v57  ;;  %v12008_v53 = vadd.f32 %v6569_v28, %v6457_v19  ;;  %v5517_v20 = vld [vmem:[#allocation3 + $0x88] sm:$0xff]  ;;  %v7646_v0 = vpop.eup %7645  ;;  %v6570_v24 = vpop.f32.mrb[176].mxu1  ;;  %v6460_v18 = vadd.f32 %v6459_v2, %v6458_v14  ;;  %v13748_v28 = vpack.c.bf16 %v11538_v8, %v11459_v32  ;;  %v13751_v2 = vld [vmem:[#allocation26_spill] sm:$0xff] }
 0x4a9   : > { %v3746_v48 = vpop.xlane.xlu1 %3745  ;;  %5685 = vperm.xlu1 %6898, %v5607_v3   ;;  %7655 = vrcp.f32 %v5517_v20  ;;  %v6461_v10 = vpop.f32.mrb[178].mxu0  ;;  %v5610_v43 = vmul.f32 0.25, %v7646_v0  ;;  %v13749_v3 = vld [vmem:[#allocation21_spill] sm:$0xff] }
 0x4aa   : > { %v3850_v58 = vadd.f32 %v3746_v48, %v3530_v16  ;;  %5690 = vperm.xlu0 %6897, %v5608_v61   ;;  %v6571_v19 = vpop.f32.mrb[177].mxu1  ;;  %v6462_v55 = vpop.f32.mrb[179].mxu0  ;;  %v3529_v26 = vmul.f32 %v13749_v3, %v3497_v36  ;;  %v3500_v61 = vld [vmem:[#allocation3 + $0xc0] sm:$0xff]  ;;  %v3499_v36 = vld [vmem:[#allocation3 + $0xb8] sm:$0xff] }
 0x4ab   : > { %v7648_v51 = vpop.eup %7647  ;;  %v5520_v25 = vld [vmem:[#allocation3 + $0xa0] sm:$0xff]  ;;  %v6572_v12 = vadd.f32 %v6571_v19, %v6570_v24  ;;  %v6573_v37 = vpop.f32.mrb[178].mxu1  ;;  %v6463_v40 = vadd.f32 %v6462_v55, %v6461_v10  ;;  %v13752_v19 = vpack.c.bf16 %v11606_v7, %v11488_v11  ;;  %v13755_v7 = vld [vmem:[#allocation255_spill] sm:$0xff] }
 0x4ac   : > { %5208 = vmatmul.mubr.bf16.gmra.mrb[240].mxu0 %v4217_v42  ;;  %v5609_v47 = vmul.f32 0.25, %v7648_v51  ;;  %3883 = vst.msk [vmem:[#allocation3 + $0xb0] sm:$0xff] %vm308_vm0, %v3850_v58  ;;  %7657 = vrcp.f32 %v5520_v25  ;;  %v7650_v57 = vpop.eup %7649  ;;  %v6574_v16 = vpop.f32.mrb[179].mxu1  ;;  %v3532_v51 = vmul.f32 %v13751_v2, %v3500_v61  ;;  %v3531_v11 = vmul.f32 %v13755_v7, %v3499_v36 }
 0x4ad   : > { %5215 = vmatprep.mubr.bf16.mxu0 %v13747_v21  ;;  %v3737_v29 = vpop.xlane.xlu0 %3736  ;;  %v12023_v20 = vadd.f32 %v6572_v12, %v6460_v18  ;;  %v6575_v0 = vadd.f32 %v6574_v16, %v6573_v37  ;;  %v5612_v48 = vmul.f32 0.25, %v7650_v57  ;;  %v13753_v12 = vpack.c.bf16 %v11713_v27, %v11568_v49 }
 0x4ae   : > { %5695 = vperm.xlu1 %6898, %v5609_v47   ;;  %5700 = vperm.xlu0 %6897, %v5610_v43   ;;  %v3849_v4 = vadd.f32 %v3737_v29, %v3529_v26  ;;  %v13756_v49 = vpack.c.bf16 %v11725_v44, %v11589_v30  ;;  %v13757_v30 = vld [vmem:[#allocation27_spill] sm:$0xff] }
 0x4af   : > { %5369 = vmatmul.mubr.bf16.gmra.mrb[240].mxu1 %v13748_v28  ;;  %v7652_v14 = vpop.eup %7651  ;;  %v5519_v42 = vld [vmem:[#allocation3 + $0x98] sm:$0xff]  ;;  %v12025_v32 = vadd.f32 %v6575_v0, %v6463_v40  ;;  %v6464_v8 = vpop.f32.mrb[180].mxu0  ;;  %v13754_v28 = vpack.c.bf16 %v11620_v63, %v11507_v33  ;;  %v3502_v33 = vld [vmem:[#allocation3 + $0xd0] sm:$0xff] }
 0x4b0   : > { %5376 = vmatprep.mubr.bf16.mxu1 %v13750_v5  ;;  %v5611_v52 = vmul.f32 0.25, %v7652_v14  ;;  %7659 = vrcp.f32 %v5519_v42  ;;  %3882 = vst.msk [vmem:[#allocation3 + $0xa8] sm:$0xff] %vm308_vm0, %v3849_v4  ;;  %v6465_v35 = vpop.f32.mrb[181].mxu0  ;;  %v7654_v59 = vpop.eup %7653  ;;  %v3534_v44 = vmul.f32 %v13757_v30, %v3502_v33  ;;  %v3503_v33 = vld [vmem:[#allocation3 + $0xd8] sm:$0xff] }
 0x4b1   : > { %v6576_v24 = vpop.f32.mrb[180].mxu1  ;;  %v6466_v18 = vadd.f32 %v6465_v35, %v6464_v8  ;;  %v6467_v25 = vpop.f32.mrb[182].mxu0  ;;  %v5614_v16 = vmul.f32 0.25, %v7654_v59  ;;  %v13758_v35 = vpack.c.bf16 %v11698_v15, %v11561_v9 }
 0x4b2   : > { %5705 = vperm.xlu1 %6898, %v5611_v52   ;;  %v3764_v58 = vpop.xlane.xlu1 %3763  ;;  %5710 = vperm.xlu0 %6897, %v5612_v48   ;;  %v6577_v47 = vpop.f32.mrb[181].mxu1 }
 0x4b3   : > { %v7656_v10 = vpop.eup %7655  ;;  %v3852_v55 = vadd.f32 %v3764_v58, %v3532_v51  ;;  %v5522_v21 = vld [vmem:[#allocation3 + $0xb0] sm:$0xff]  ;;  %v6578_v37 = vadd.f32 %v6577_v47, %v6576_v24  ;;  %v6579_v40 = vpop.f32.mrb[182].mxu1  ;;  %v3501_v58 = vld [vmem:[#allocation3 + $0xc8] sm:$0xff] }
 0x4b4   : > { %5216 = vmatmul.mubr.bf16.gmra.mrb[244].mxu0 %v13752_v19  ;;  %v6468_v43 = vpop.f32.mrb[183].mxu0  ;;  %v5613_v57 = vmul.f32 0.25, %v7656_v10  ;;  %7661 = vrcp.f32 %v5522_v21  ;;  %v6580_v26 = vpop.f32.mrb[183].mxu1  ;;  %v13760_v21 = vpack.c.bf16 %v11715_v60, %v11579_v38 }
 0x4b5   : > { %5223 = vmatprep.mubr.bf16.mxu0 %v13753_v12  ;;  %3885 = vst.msk [vmem:[#allocation3 + $0xc0] sm:$0xff] %vm308_vm0, %v3852_v55  ;;  %v6469_v3 = vadd.f32 %v6468_v43, %v6467_v25  ;;  %v12043_v5 = vadd.f32 %v6578_v37, %v6466_v18  ;;  %v6581_v29 = vadd.f32 %v6580_v26, %v6579_v40 }
 0x4b6   : > { %v7658_v14 = vpop.eup %7657  ;;  %v3755_v27 = vpop.xlane.xlu0 %3754  ;;  %5715 = vperm.xlu1 %6898, %v5613_v57   ;;  %5720 = vperm.xlu0 %6897, %v5614_v16   ;;  %v13759_v18 = vpack.c.bf16 %v11729_v54, %v11768_v6  ;;  %v13761_v37 = vpack.c.bf16 %v11752_v56, %v11788_v45  ;;  %v13762_v54 = vld [vmem:[#allocation25_spill] sm:$0xff]  ;;  %v13763_v45 = vpack.c.bf16 %v11664_v46, %v11705_v23  ;;  %v13765_v16 = vld [vmem:[#allocation31_spill] sm:$0xff] }
 0x4b7   : > { %5377 = vmatmul.mubr.bf16.gmra.mrb[244].mxu1 %v13754_v28  ;;  %v3851_v61 = vadd.f32 %v3755_v27, %v3531_v11  ;;  %v12045_v63 = vadd.f32 %v6581_v29, %v6469_v3  ;;  %v5521_v4 = vld [vmem:[#allocation3 + $0xa8] sm:$0xff]  ;;  %v5616_v42 = vmul.f32 0.25, %v7658_v14  ;;  %v3533_v6 = vmul.f32 %v13762_v54, %v3501_v58  ;;  %v3504_v11 = vld [vmem:[#allocation3 + $0xe0] sm:$0xff]  ;;  %v13766_v23 = vld [vmem:[#allocation29_spill] sm:$0xff] }
 0x4b8   : > { %5384 = vmatprep.mubr.bf16.mxu1 %v13756_v49  ;;  %v6470_v0 = vpop.f32.mrb[184].mxu0  ;;  %7663 = vrcp.f32 %v5521_v4  ;;  %v13764_v26 = vpack.c.bf16 %v11742_v50, %v11777_v39  ;;  %v3536_v14 = vmul.f32 %v13765_v16, %v3504_v11 }
 0x4b9   : > { %3884 = vst.msk [vmem:[#allocation3 + $0xb8] sm:$0xff] %vm308_vm0, %v3851_v61  ;;  %v6471_v52 = vpop.f32.mrb[185].mxu0  ;;  %v6582_v48 = vpop.f32.mrb[184].mxu1 }
 0x4ba   : > { %v7660_v8 = vpop.eup %7659  ;;  %v6472_v2 = vadd.f32 %v6471_v52, %v6470_v0  ;;  %v6473_v51 = vpop.f32.mrb[186].mxu0  ;;  %5730 = vperm.xlu0 %6897, %v5616_v42   ;;  %v3535_v52 = vmul.f32 %v13766_v23, %v3503_v33 }
 0x4bb   : > { %v3782_v59 = vpop.xlane.xlu1 %3781  ;;  %v6583_v36 = vpop.f32.mrb[185].mxu1  ;;  %v5615_v24 = vmul.f32 0.25, %v7660_v8 }
 0x4bc   : > { %5224 = vmatmul.mubr.bf16.gmra.mrb[248].mxu0 %v13758_v35  ;;  %v3854_v10 = vadd.f32 %v3782_v59, %v3534_v44  ;;  %v6584_v19 = vadd.f32 %v6583_v36, %v6582_v48  ;;  %v6585_v55 = vpop.f32.mrb[186].mxu1  ;;  %v6474_v47 = vpop.f32.mrb[187].mxu0  ;;  %v5524_v25 = vld [vmem:[#allocation3 + $0xc0] sm:$0xff]  ;;  %v13767_v59 = vld [vmem:[#allocation33_spill] sm:$0xff] }
 0x4bd   : > { %5231 = vmatprep.mubr.bf16.mxu0 %v13759_v18  ;;  %5725 = vperm.xlu1 %6898, %v5615_v24   ;;  %v6475_v9 = vadd.f32 %v6474_v47, %v6473_v51  ;;  %v6586_v15 = vpop.f32.mrb[187].mxu1  ;;  %7665 = vrcp.f32 %v5524_v25  ;;  %v3507_v24 = vld [vmem:[#allocation3 + $0xf8] sm:$0xff] }
 0x4be   : > { %v7662_v12 = vpop.eup %7661  ;;  %3887 = vst.msk [vmem:[#allocation3 + $0xd0] sm:$0xff] %vm308_vm0, %v3854_v10  ;;  %v12063_v40 = vadd.f32 %v6584_v19, %v6472_v2  ;;  %v6587_v43 = vadd.f32 %v6586_v15, %v6585_v55  ;;  %v3505_v2 = vld [vmem:[#allocation3 + $0xe8] sm:$0xff]  ;;  %v3539_v19 = vmul.f32 %v11862_v34, %v3507_v24  ;;  %v13769_v24 = vld [vmem:[#allocation149_spill] sm:$0xff] }
 0x4bf   : > { %5385 = vmatmul.mubr.bf16.gmra.mrb[248].mxu1 %v13760_v21  ;;  %v5618_v28 = vmul.f32 0.25, %v7662_v12  ;;  %v3537_v58 = vmul.f32 %v13767_v59, %v3505_v2  ;;  %v3506_v21 = vld [vmem:[#allocation3 + $0xf0] sm:$0xff] }
 0x4c0   : > { %5392 = vmatprep.mubr.bf16.mxu1 %v13761_v37  ;;  %v3773_v57 = vpop.xlane.xlu0 %3772  ;;  %v12065_v60 = vadd.f32 %v6587_v43, %v6475_v9  ;;  %v5523_v7 = vld [vmem:[#allocation3 + $0xb8] sm:$0xff]  ;;  %v3538_v12 = vmul.f32 %v11853_v1, %v3506_v21  ;;  %v13771_v21 = vld [vmem:[#allocation203_spill] sm:$0xff] }
 0x4c1   : > { %v3853_v38 = vadd.f32 %v3773_v57, %v3533_v6  ;;  %5740 = vperm.xlu0 %6897, %v5618_v28   ;;  %7667 = vrcp.f32 %v5523_v7 }
 0x4c2   : > { %v7664_v56 = vpop.eup %7663 }
 0x4c3   : > { %3886 = vst.msk [vmem:[#allocation3 + $0xc8] sm:$0xff] %vm308_vm0, %v3853_v38  ;;  %v5617_v3 = vmul.f32 0.25, %v7664_v56 }
 0x4c4   : > { %5232 = vmatmul.mubr.bf16.gmra.mrb[252].mxu0 %v13763_v45 }
 0x4c5   : > { %v5526_v49 = vld [vmem:[#allocation3 + $0xd0] sm:$0xff]  ;;  %5735 = vperm.xlu1 %6898, %v5617_v3  }
 0x4c6   : > { %v3800_v27 = vpop.xlane.xlu1 %3799  ;;  %7669 = vrcp.f32 %v5526_v49 }
 0x4c7   : > { %5393 = vmatmul.mubr.bf16.gmra.mrb[252].mxu1 %v13764_v26  ;;  %v7666_v29 = vpop.eup %7665  ;;  %v3856_v61 = vadd.f32 %v3800_v27, %v3536_v14 }
 0x4c8   : > { %v5620_v0 = vmul.f32 0.25, %v7666_v29 }
 0x4c9   : > { %3889 = vst.msk [vmem:[#allocation3 + $0xe0] sm:$0xff] %vm308_vm0, %v3856_v61 }
 0x4ca   : > { %v5525_v4 = vld [vmem:[#allocation3 + $0xc8] sm:$0xff]  ;;  %5750 = vperm.xlu0 %6897, %v5620_v0  }
 0x4cb   : > { %7671 = vrcp.f32 %v5525_v4  ;;  %v7668_v46 = vpop.eup %7667 }
 0x4cc   : > { %v3791_v50 = vpop.xlane.xlu0 %3790  ;;  %v5619_v39 = vmul.f32 0.25, %v7668_v46 }
 0x4cd   : > { %v3855_v42 = vadd.f32 %v3791_v50, %v3535_v52 }
 0x4ce   : > { %5745 = vperm.xlu1 %6898, %v5619_v39  }
 0x4cf   : > { %3888 = vst.msk [vmem:[#allocation3 + $0xd8] sm:$0xff] %vm308_vm0, %v3855_v42 }
 0x4d0   : > { %v7670_v8 = vpop.eup %7669  ;;  %v5528_v30 = vld [vmem:[#allocation3 + $0xe0] sm:$0xff] }
 0x4d1   : > { %v5622_v44 = vmul.f32 0.25, %v7670_v8  ;;  %7673 = vrcp.f32 %v5528_v30 }
 0x4d3   : > { %5760 = vperm.xlu0 %6897, %v5622_v44  }
 0x4d5   : > { %v7672_v48 = vpop.eup %7671 }
 0x4d6   : > { %v5621_v51 = vmul.f32 0.25, %v7672_v48  ;;  %v5527_v35 = vld [vmem:[#allocation3 + $0xd8] sm:$0xff] }
 0x4d7   : > { %7675 = vrcp.f32 %v5527_v35  ;;  %v13768_v48 = vld [vmem:[#allocation177_spill] sm:$0xff] }
 0x4d8   : > { %5755 = vperm.xlu1 %6898, %v5621_v51  }
 0x4db   : > { %v7674_v10 = vpop.eup %7673 }
 0x4dc   : > { %v3809_v36 = vpop.xlane.xlu0 %3808  ;;  %v5624_v55 = vmul.f32 0.25, %v7674_v10 }
 0x4dd   : > { %v3857_v18 = vadd.f32 %v3809_v36, %v3537_v58 }
 0x4de   : > { %5770 = vperm.xlu0 %6897, %v5624_v55  }
 0x4df   : > { %3890 = vst.msk [vmem:[#allocation3 + $0xe8] sm:$0xff] %vm308_vm0, %v3857_v18  ;;  %v4085_v18 = vmul.f32 0.0, %v13769_v24 }
 0x4e0   : > { %v3827_v47 = vpop.xlane.xlu0 %3826 }
 0x4e1   : > { %v3859_v25 = vadd.f32 %v3827_v47, %v3539_v19  ;;  %v7676_v9 = vpop.eup %7675  ;;  %v13770_v19 = vld [vmem:[#allocation183_spill] sm:$0xff] }
 0x4e2   : > { %v5623_v15 = vmul.f32 0.25, %v7676_v9  ;;  %v4086_v9 = vmul.f32 0.0, %v13771_v21 }
 0x4e3   : > { %3892 = vst.msk [vmem:[#allocation3 + $0xf8] sm:$0xff] %vm308_vm0, %v3859_v25 }
 0x4e4   : > { %5765 = vperm.xlu1 %6898, %v5623_v15  }
 0x4e5   : > { %v3818_v54 = vpop.xlane.xlu1 %3817 }
 0x4e6   : > { %v5529_v37 = vld [vmem:[#allocation3 + $0xe8] sm:$0xff]  ;;  %v3858_v6 = vadd.f32 %v3818_v54, %v3538_v12 }
 0x4e7   : > { %7677 = vrcp.f32 %v5529_v37 }
 0x4e8   : > { %3891 = vst.msk [vmem:[#allocation3 + $0xf0] sm:$0xff] %vm308_vm0, %v3858_v6  ;;  %v12088_v52 = vpop.permute.xlu0 %4077 }
 0x4e9   : > { %v12091_v58 = vpop.permute.xlu1 %4082 }
 0x4ea   : > { %v5531_v43 = vld [vmem:[#allocation3 + $0xf8] sm:$0xff] }
 0x4eb   : > { %7679 = vrcp.f32 %v5531_v43 }
 0x4ef   : > { %v5530_v57 = vld [vmem:[#allocation3 + $0xf0] sm:$0xff] }
 0x4f0   : > { %7681 = vrcp.f32 %v5530_v57 }
 0x4f1   : > { %v7678_v34 = vpop.eup %7677 }
 0x4f2   : > { %v5625_v28 = vmul.f32 0.25, %v7678_v34 }
 0x4f4   : > { %5775 = vperm.xlu1 %6898, %v5625_v28  }
 0x4f5   : > { %v7680_v38 = vpop.eup %7679 }
 0x4f6   : > { %v5627_v7 = vmul.f32 0.25, %v7680_v38 }
 0x4f8   : > { %5785 = vperm.xlu1 %6898, %v5627_v7  }
 0x4fa   : > { %v7682_v11 = vpop.eup %7681 }
 0x4fb   : > { %v5626_v56 = vmul.f32 0.25, %v7682_v11 }
 0x4fd   : > { %5780 = vperm.xlu0 %6897, %v5626_v56   ;;  %v13772_v56 = vld [vmem:[#allocation199_spill] sm:$0xff] }
 0x50f   : > { %v5631_v25 = vpop.permute.xlu0 %5630 }
 0x511   : > { %v5636_v6 = vpop.permute.xlu1 %5635 }
 0x517   : > { %v6476_v1 = vpop.f32.mrb[188].mxu0 }
 0x518   : > { %v6477_v45 = vpop.f32.mrb[189].mxu0 }
 0x519   : > { %v6478_v26 = vadd.f32 %v6477_v45, %v6476_v1  ;;  %v6479_v16 = vpop.f32.mrb[190].mxu0 }
 0x51a   : > { %v6588_v3 = vpop.f32.mrb[188].mxu1  ;;  %v6480_v49 = vpop.f32.mrb[191].mxu0 }
 0x51b   : > { %v6589_v14 = vpop.f32.mrb[189].mxu1  ;;  %v6481_v61 = vadd.f32 %v6480_v49, %v6479_v16  ;;  %v13773_v49 = vld [vmem:[#allocation196_spill] sm:$0xff] }
 0x51c   : > { %v6590_v27 = vadd.f32 %v6589_v14, %v6588_v3  ;;  %v6591_v29 = vpop.f32.mrb[190].mxu1 }
 0x51d   : > { %v6592_v33 = vpop.f32.mrb[191].mxu1 }
 0x51e   : > { %v12084_v0 = vadd.f32 %v6590_v27, %v6478_v26  ;;  %v6593_v4 = vadd.f32 %v6592_v33, %v6591_v29  ;;  %v4087_v27 = vmul.f32 0.0, %v13773_v49 }
 0x51f   : > { %v6610_v23 = vpop.f32.mrb[192].mxu0 }
 0x520   : > { %v12086_v46 = vadd.f32 %v6593_v4, %v6481_v61  ;;  %v6611_v50 = vpop.f32.mrb[193].mxu0  ;;  %v13774_v61 = vld [vmem:[#allocation201_spill] sm:$0xff] }
 0x521   : > { %v6612_v42 = vadd.f32 %v6611_v50, %v6610_v23  ;;  %v6613_v8 = vpop.f32.mrb[194].mxu0  ;;  %v5641_v23 = vpop.permute.xlu0 %5640  ;;  %v13775_v50 = vld [vmem:[#allocation204_spill] sm:$0xff] }
 0x522   : > { %v6722_v39 = vpop.f32.mrb[192].mxu1  ;;  %v6614_v44 = vpop.f32.mrb[195].mxu0 }
 0x523   : > { %v6723_v30 = vpop.f32.mrb[193].mxu1  ;;  %v5114_v2 = vadd.f32 %v6612_v42, %v13768_v48  ;;  %v6615_v59 = vadd.f32 %v6614_v44, %v6613_v8  ;;  %v5646_v48 = vpop.permute.xlu1 %5645 }
 0x524   : > { %v6724_v51 = vadd.f32 %v6723_v30, %v6722_v39  ;;  %v6725_v35 = vpop.f32.mrb[194].mxu1  ;;  %v4088_v39 = vmul.f32 0.0, %v13775_v50 }
 0x525   : > { %v6726_v36 = vpop.f32.mrb[195].mxu1  ;;  %v5117_v55 = vadd.f32 %v6615_v59, %v13770_v19 }
 0x526   : > { %v5275_v10 = vadd.f32 %v6724_v51, %v5114_v2  ;;  %v6727_v47 = vadd.f32 %v6726_v36, %v6725_v35 }
 0x527   : > { %v6616_v12 = vpop.f32.mrb[196].mxu0 }
 0x528   : > { %v5278_v15 = vadd.f32 %v6727_v47, %v5117_v55  ;;  %v5401_v37 = vadd.f32 %v5275_v10, %v4085_v18  ;;  %v6617_v54 = vpop.f32.mrb[197].mxu0  ;;  %v13776_v10 = vld [vmem:[#allocation56_spill] sm:$0xff] }
 0x529   : > { %v6618_v34 = vadd.f32 %v6617_v54, %v6616_v12  ;;  %v6619_v57 = vpop.f32.mrb[198].mxu0 }
 0x52a   : > { %v6728_v43 = vpop.f32.mrb[196].mxu1  ;;  %v5402_v28 = vadd.f32 %v5278_v15, %v4086_v9  ;;  %v5788_v38 = vmul.f32 %v5631_v25, %v5401_v37  ;;  %v6620_v11 = vpop.f32.mrb[199].mxu0  ;;  %v13777_v15 = vld [vmem:[#allocation79_spill] sm:$0xff] }
 0x52b   : > { %v6729_v7 = vpop.f32.mrb[197].mxu1  ;;  %v5122_v1 = vadd.f32 %v6618_v34, %v13772_v56  ;;  %v6621_v26 = vadd.f32 %v6620_v11, %v6619_v57  ;;  %v4089_v12 = vmul.f32 0.0, %v13777_v15  ;;  %v5656_v56 = vpop.permute.xlu1 %5655 }
 0x52c   : > { %v6730_v45 = vadd.f32 %v6729_v7, %v6728_v43  ;;  %v6731_v3 = vpop.f32.mrb[198].mxu1  ;;  %v5789_v16 = vmul.f32 %v5636_v6, %v5402_v28  ;;  %5820 = vst [vmem:[%s12098_s22] sm:$0xff] %v5788_v38  ;;  %v13778_v43 = vld [vmem:[#allocation46_spill] sm:$0xff]  ;;  %v5651_v38 = vpop.permute.xlu0 %5650 }
 0x52d   : > { %v6732_v14 = vpop.f32.mrb[199].mxu1  ;;  %v5125_v33 = vadd.f32 %v6621_v26, %v13774_v61  ;;  %v4090_v34 = vmul.f32 0.0, %v13778_v43 }
 0x52e   : > { %v5283_v29 = vadd.f32 %v6730_v45, %v5122_v1  ;;  %v6733_v4 = vadd.f32 %v6732_v14, %v6731_v3  ;;  %5821 = vst [vmem:[%s12098_s22 + $0x8] sm:$0xff] %v5789_v16 }
 0x52f   : > { %v6622_v8 = vpop.f32.mrb[200].mxu0 }
 0x530   : > { %v5286_v42 = vadd.f32 %v6733_v4, %v5125_v33  ;;  %v5403_v30 = vadd.f32 %v5283_v29, %v4087_v27  ;;  %v6623_v44 = vpop.f32.mrb[201].mxu0 }
 0x531   : > { %v6624_v51 = vadd.f32 %v6623_v44, %v6622_v8  ;;  %v6625_v35 = vpop.f32.mrb[202].mxu0 }
 0x532   : > { %v6734_v2 = vpop.f32.mrb[200].mxu1  ;;  %v5790_v59 = vmul.f32 %v5641_v23, %v5403_v30  ;;  %v5404_v36 = vadd.f32 %v5286_v42, %v4088_v39  ;;  %v6626_v18 = vpop.f32.mrb[203].mxu0  ;;  %v13779_v23 = vld [vmem:[#allocation50_spill] sm:$0xff] }
 0x533   : > { %v6735_v24 = vpop.f32.mrb[201].mxu1  ;;  %v5130_v19 = vadd.f32 %v6624_v51, %v13776_v10  ;;  %v6627_v25 = vadd.f32 %v6626_v18, %v6625_v35  ;;  %v4091_v50 = vmul.f32 0.0, %v13779_v23  ;;  %v13780_v30 = vld [vmem:[#allocation182_spill] sm:$0xff] }
 0x534   : > { %v6736_v55 = vadd.f32 %v6735_v24, %v6734_v2  ;;  %v6737_v47 = vpop.f32.mrb[202].mxu1  ;;  %5822 = vst [vmem:[%s12098_s22 + $0x10] sm:$0xff] %v5790_v59  ;;  %v5791_v21 = vmul.f32 %v5646_v48, %v5404_v36  ;;  %v4092_v44 = vmul.f32 0.0, %v13780_v30  ;;  %v5661_v2 = vpop.permute.xlu0 %5660  ;;  %v13786_v30 = vld [vmem:[#allocation202_spill] sm:$0xff] }
 0x535   : > { %v6738_v9 = vpop.f32.mrb[203].mxu1  ;;  %v5133_v54 = vadd.f32 %v6627_v25, %v11710_v41  ;;  %v13781_v25 = vld [vmem:[#allocation184_spill] sm:$0xff] }
 0x536   : > { %v5291_v37 = vadd.f32 %v6736_v55, %v5130_v19  ;;  %v6739_v6 = vadd.f32 %v6738_v9, %v6737_v47  ;;  %5823 = vst [vmem:[%s12098_s22 + $0x18] sm:$0xff] %v5791_v21 }
 0x537   : > { %v6628_v7 = vpop.f32.mrb[204].mxu0 }
 0x538   : > { %v5294_v57 = vadd.f32 %v6739_v6, %v5133_v54  ;;  %v5405_v28 = vadd.f32 %v5291_v37, %v4089_v12  ;;  %v6629_v11 = vpop.f32.mrb[205].mxu0  ;;  %v13782_v54 = vld [vmem:[#allocation69_spill] sm:$0xff] }
 0x539   : > { %v6630_v3 = vadd.f32 %v6629_v11, %v6628_v7  ;;  %v6631_v26 = vpop.f32.mrb[206].mxu0  ;;  %v4093_v6 = vmul.f32 0.0, %v13782_v54  ;;  %v5671_v11 = vpop.permute.xlu0 %5670  ;;  %v13789_v54 = vld [vmem:[#allocation215_spill] sm:$0xff] }
 0x53a   : > { %v5792_v1 = vmul.f32 %v5651_v38, %v5405_v28  ;;  %v6740_v45 = vpop.f32.mrb[204].mxu1  ;;  %v5406_v16 = vadd.f32 %v5294_v57, %v4090_v34  ;;  %v6632_v49 = vpop.f32.mrb[207].mxu0  ;;  %v13783_v34 = vld [vmem:[#allocation163_spill] sm:$0xff]  ;;  %v13784_v38 = vld [vmem:[#allocation78_spill] sm:$0xff] }
 0x53b   : > { %v6741_v14 = vpop.f32.mrb[205].mxu1  ;;  %v5138_v41 = vadd.f32 %v6630_v3, %v11735_v31  ;;  %v6633_v33 = vadd.f32 %v6632_v49, %v6631_v26  ;;  %v5666_v31 = vpop.permute.xlu1 %5665  ;;  %v4094_v7 = vmul.f32 0.0, %v13784_v38  ;;  %v13790_v38 = vld [vmem:[#allocation62_spill] sm:$0xff] }
 0x53c   : > { %5824 = vst [vmem:[%s12098_s22 + $0x20] sm:$0xff] %v5792_v1  ;;  %v6742_v27 = vadd.f32 %v6741_v14, %v6740_v45  ;;  %v6743_v29 = vpop.f32.mrb[206].mxu1  ;;  %v5793_v61 = vmul.f32 %v5656_v56, %v5406_v16 }
 0x53d   : > { %v6744_v4 = vpop.f32.mrb[207].mxu1  ;;  %v5141_v42 = vadd.f32 %v6633_v33, %v11761_v22 }
 0x53e   : > { %v5299_v39 = vadd.f32 %v6742_v27, %v5138_v41  ;;  %5825 = vst [vmem:[%s12098_s22 + $0x28] sm:$0xff] %v5793_v61  ;;  %v6745_v8 = vadd.f32 %v6744_v4, %v6743_v29  ;;  %v13785_v4 = vld [vmem:[#allocation67_spill] sm:$0xff] }
 0x53f   : > { %v6634_v35 = vpop.f32.mrb[208].mxu0  ;;  %v5676_v3 = vpop.permute.xlu1 %5675 }
 0x540   : > { %v5407_v48 = vadd.f32 %v5299_v39, %v4091_v50  ;;  %v5302_v51 = vadd.f32 %v6745_v8, %v5141_v42  ;;  %v6635_v59 = vpop.f32.mrb[209].mxu0 }
 0x541   : > { %v6636_v10 = vadd.f32 %v6635_v59, %v6634_v35  ;;  %v6637_v19 = vpop.f32.mrb[210].mxu0 }
 0x542   : > { %v5794_v36 = vmul.f32 %v5661_v2, %v5407_v48  ;;  %v5408_v24 = vadd.f32 %v5302_v51, %v4092_v44  ;;  %v6746_v18 = vpop.f32.mrb[208].mxu1  ;;  %v6638_v47 = vpop.f32.mrb[211].mxu0  ;;  %v4095_v44 = vmul.f32 0.0, %v13786_v30  ;;  %v13787_v2 = vld [vmem:[#allocation89_spill] sm:$0xff]  ;;  %v13793_v30 = vld [vmem:[#allocation218_spill] sm:$0xff] }
 0x543   : > { %v6747_v55 = vpop.f32.mrb[209].mxu1  ;;  %v5146_v21 = vadd.f32 %v6636_v10, %v13781_v25  ;;  %v6639_v12 = vadd.f32 %v6638_v47, %v6637_v19  ;;  %v5686_v19 = vpop.permute.xlu1 %5685 }
 0x544   : > { %5826 = vst [vmem:[%s12098_s22 + $0x30] sm:$0xff] %v5794_v36  ;;  %v5795_v22 = vmul.f32 %v5666_v31, %v5408_v24  ;;  %v6748_v9 = vadd.f32 %v6747_v55, %v6746_v18  ;;  %v6749_v15 = vpop.f32.mrb[210].mxu1  ;;  %v13788_v31 = vld [vmem:[#allocation77_spill] sm:$0xff]  ;;  %v5681_v36 = vpop.permute.xlu0 %5680 }
 0x545   : > { %v6750_v37 = vpop.f32.mrb[211].mxu1  ;;  %v5149_v57 = vadd.f32 %v6639_v12, %v13783_v34  ;;  %v4096_v59 = vmul.f32 0.0, %v13788_v31  ;;  %v13794_v31 = vld [vmem:[#allocation68_spill] sm:$0xff] }
 0x546   : > { %5827 = vst [vmem:[%s12098_s22 + $0x38] sm:$0xff] %v5795_v22  ;;  %v5307_v43 = vadd.f32 %v6748_v9, %v5146_v21  ;;  %v6751_v28 = vadd.f32 %v6750_v37, %v6749_v15 }
 0x547   : > { %v6640_v45 = vpop.f32.mrb[212].mxu0 }
 0x548   : > { %v5409_v56 = vadd.f32 %v5307_v43, %v4093_v6  ;;  %v5310_v1 = vadd.f32 %v6751_v28, %v5149_v57  ;;  %v6641_v26 = vpop.f32.mrb[213].mxu0 }
 0x549   : > { %v6642_v41 = vadd.f32 %v6641_v26, %v6640_v45  ;;  %v6643_v27 = vpop.f32.mrb[214].mxu0 }
 0x54a   : > { %v5796_v16 = vmul.f32 %v5671_v11, %v5409_v56  ;;  %v5410_v14 = vadd.f32 %v5310_v1, %v4094_v7  ;;  %v6752_v49 = vpop.f32.mrb[212].mxu1  ;;  %v6644_v61 = vpop.f32.mrb[215].mxu0  ;;  %v4097_v7 = vmul.f32 0.0, %v13790_v38  ;;  %v13791_v56 = vld [vmem:[#allocation216_spill] sm:$0xff]  ;;  %v13797_v38 = vld [vmem:[#allocation91_spill] sm:$0xff] }
 0x54b   : > { %v6753_v29 = vpop.f32.mrb[213].mxu1  ;;  %v5154_v23 = vadd.f32 %v6642_v41, %v13785_v4  ;;  %v6645_v42 = vadd.f32 %v6644_v61, %v6643_v27  ;;  %v5696_v27 = vpop.permute.xlu1 %5695 }
 0x54c   : > { %5828 = vst [vmem:[%s12098_s22 + $0x40] sm:$0xff] %v5796_v16  ;;  %v5797_v33 = vmul.f32 %v5676_v3, %v5410_v14  ;;  %v6754_v50 = vadd.f32 %v6753_v29, %v6752_v49  ;;  %v6755_v39 = vpop.f32.mrb[214].mxu1  ;;  %v13792_v3 = vld [vmem:[#allocation73_spill] sm:$0xff]  ;;  %v5691_v16 = vpop.permute.xlu0 %5690 }
 0x54d   : > { %v6756_v8 = vpop.f32.mrb[215].mxu1  ;;  %v5157_v51 = vadd.f32 %v6645_v42, %v13787_v2  ;;  %v4098_v26 = vmul.f32 0.0, %v13792_v3  ;;  %v13798_v3 = vld [vmem:[#allocation87_spill] sm:$0xff] }
 0x54e   : > { %5829 = vst [vmem:[%s12098_s22 + $0x48] sm:$0xff] %v5797_v33  ;;  %v5315_v48 = vadd.f32 %v6754_v50, %v5154_v23  ;;  %v6757_v35 = vadd.f32 %v6756_v8, %v6755_v39 }
 0x54f   : > { %v6646_v10 = vpop.f32.mrb[216].mxu0 }
 0x550   : > { %v5411_v24 = vadd.f32 %v5315_v48, %v4095_v44  ;;  %v5318_v18 = vadd.f32 %v6757_v35, %v5157_v51  ;;  %v6647_v55 = vpop.f32.mrb[217].mxu0 }
 0x551   : > { %v6648_v21 = vadd.f32 %v6647_v55, %v6646_v10  ;;  %v6649_v9 = vpop.f32.mrb[218].mxu0 }
 0x552   : > { %v5798_v47 = vmul.f32 %v5681_v36, %v5411_v24  ;;  %v5412_v22 = vadd.f32 %v5318_v18, %v4096_v59  ;;  %v6758_v25 = vpop.f32.mrb[216].mxu1  ;;  %v6650_v12 = vpop.f32.mrb[219].mxu0  ;;  %v4099_v59 = vmul.f32 0.0, %v13794_v31  ;;  %v13795_v24 = vld [vmem:[#allocation28_spill] sm:$0xff]  ;;  %v13801_v31 = vld [vmem:[#allocation30_spill] sm:$0xff] }
 0x553   : > { %v6759_v15 = vpop.f32.mrb[217].mxu1  ;;  %v5162_v6 = vadd.f32 %v6648_v21, %v13789_v54  ;;  %v6651_v57 = vadd.f32 %v6650_v12, %v6649_v9  ;;  %v5706_v9 = vpop.permute.xlu1 %5705 }
 0x554   : > { %5830 = vst [vmem:[%s12098_s22 + $0x50] sm:$0xff] %v5798_v47  ;;  %v5799_v37 = vmul.f32 %v5686_v19, %v5412_v22  ;;  %v6760_v43 = vadd.f32 %v6759_v15, %v6758_v25  ;;  %v6761_v34 = vpop.f32.mrb[218].mxu1  ;;  %v13796_v19 = vld [vmem:[#allocation209_spill] sm:$0xff]  ;;  %v5701_v47 = vpop.permute.xlu0 %5700 }
 0x555   : > { %v6762_v28 = vpop.f32.mrb[219].mxu1  ;;  %v5165_v1 = vadd.f32 %v6651_v57, %v13791_v56  ;;  %v4100_v55 = vmul.f32 0.0, %v13796_v19  ;;  %v13802_v19 = vld [vmem:[#allocation212_spill] sm:$0xff] }
 0x556   : > { %5831 = vst [vmem:[%s12098_s22 + $0x58] sm:$0xff] %v5799_v37  ;;  %v5323_v11 = vadd.f32 %v6760_v43, %v5162_v6  ;;  %v6763_v45 = vadd.f32 %v6762_v28, %v6761_v34 }
 0x557   : > { %v6652_v41 = vpop.f32.mrb[220].mxu0 }
 0x558   : > { %v5413_v14 = vadd.f32 %v5323_v11, %v4097_v7  ;;  %v5326_v49 = vadd.f32 %v6763_v45, %v5165_v1  ;;  %v6653_v29 = vpop.f32.mrb[221].mxu0 }
 0x559   : > { %v6654_v23 = vadd.f32 %v6653_v29, %v6652_v41  ;;  %v6655_v50 = vpop.f32.mrb[222].mxu0 }
 0x55a   : > { %v5800_v61 = vmul.f32 %v5691_v16, %v5413_v14  ;;  %v5414_v33 = vadd.f32 %v5326_v49, %v4098_v26  ;;  %v6764_v4 = vpop.f32.mrb[220].mxu1  ;;  %v6656_v42 = vpop.f32.mrb[223].mxu0  ;;  %v4101_v26 = vmul.f32 0.0, %v13798_v3  ;;  %v13799_v14 = vld [vmem:[#allocation90_spill] sm:$0xff] }
 0x55b   : > { %v6765_v39 = vpop.f32.mrb[221].mxu1  ;;  %v5170_v44 = vadd.f32 %v6654_v23, %v13793_v30  ;;  %v6657_v51 = vadd.f32 %v6656_v42, %v6655_v50  ;;  %v5716_v50 = vpop.permute.xlu1 %5715 }
 0x55c   : > { %5832 = vst [vmem:[%s12098_s22 + $0x60] sm:$0xff] %v5800_v61  ;;  %v5801_v8 = vmul.f32 %v5696_v27, %v5414_v33  ;;  %v6766_v48 = vadd.f32 %v6765_v39, %v6764_v4  ;;  %v6767_v2 = vpop.f32.mrb[222].mxu1  ;;  %v13800_v27 = vld [vmem:[#allocation210_spill] sm:$0xff]  ;;  %v5711_v61 = vpop.permute.xlu0 %5710 }
 0x55d   : > { %v6768_v35 = vpop.f32.mrb[223].mxu1  ;;  %v5173_v18 = vadd.f32 %v6657_v51, %v13795_v24  ;;  %v4102_v29 = vmul.f32 0.0, %v13800_v27 }
 0x55e   : > { %5833 = vst [vmem:[%s12098_s22 + $0x68] sm:$0xff] %v5801_v8  ;;  %v5331_v36 = vadd.f32 %v6766_v48, %v5170_v44  ;;  %v6769_v10 = vadd.f32 %v6768_v35, %v6767_v2 }
 0x55f   : > { %v6658_v21 = vpop.f32.mrb[224].mxu0 }
 0x560   : > { %v5415_v22 = vadd.f32 %v5331_v36, %v4099_v59  ;;  %v5334_v25 = vadd.f32 %v6769_v10, %v5173_v18  ;;  %v6659_v15 = vpop.f32.mrb[225].mxu0 }
 0x561   : > { %v6660_v6 = vadd.f32 %v6659_v15, %v6658_v21  ;;  %v6661_v43 = vpop.f32.mrb[226].mxu0 }
 0x562   : > { %v5802_v12 = vmul.f32 %v5701_v47, %v5415_v22  ;;  %v5416_v37 = vadd.f32 %v5334_v25, %v4100_v55  ;;  %v6770_v54 = vpop.f32.mrb[224].mxu1  ;;  %v6662_v57 = vpop.f32.mrb[227].mxu0  ;;  %v4103_v55 = vmul.f32 0.0, %v13802_v19  ;;  %v13803_v22 = vld [vmem:[#allocation211_spill] sm:$0xff] }
 0x563   : > { %v6771_v34 = vpop.f32.mrb[225].mxu1  ;;  %v5178_v7 = vadd.f32 %v6660_v6, %v13797_v38  ;;  %v6663_v1 = vadd.f32 %v6662_v57, %v6661_v43  ;;  %v5721_v6 = vpop.permute.xlu0 %5720 }
 0x564   : > { %5834 = vst [vmem:[%s12098_s22 + $0x70] sm:$0xff] %v5802_v12  ;;  %v5803_v28 = vmul.f32 %v5706_v9, %v5416_v37  ;;  %v6772_v11 = vadd.f32 %v6771_v34, %v6770_v54  ;;  %v6773_v56 = vpop.f32.mrb[226].mxu1  ;;  %v13804_v9 = vld [vmem:[#allocation92_spill] sm:$0xff]  ;;  %v5726_v34 = vpop.permute.xlu1 %5725 }
 0x565   : > { %v6774_v45 = vpop.f32.mrb[227].mxu1  ;;  %v5181_v49 = vadd.f32 %v6663_v1, %v13799_v14  ;;  %v4104_v15 = vmul.f32 0.0, %v13804_v9  ;;  %v13808_v9 = vld [vmem:[#allocation82_spill] sm:$0xff] }
 0x566   : > { %5835 = vst [vmem:[%s12098_s22 + $0x78] sm:$0xff] %v5803_v28  ;;  %v5339_v16 = vadd.f32 %v6772_v11, %v5178_v7  ;;  %v6775_v41 = vadd.f32 %v6774_v45, %v6773_v56 }
 0x567   : > { %v6664_v23 = vpop.f32.mrb[228].mxu0 }
 0x568   : > { %v5417_v33 = vadd.f32 %v5339_v16, %v4101_v26  ;;  %v5342_v4 = vadd.f32 %v6775_v41, %v5181_v49  ;;  %v6665_v39 = vpop.f32.mrb[229].mxu0  ;;  %v13805_v41 = vld [vmem:[#allocation63_spill] sm:$0xff] }
 0x569   : > { %v6666_v44 = vadd.f32 %v6665_v39, %v6664_v23  ;;  %v6667_v48 = vpop.f32.mrb[230].mxu0  ;;  %v4105_v27 = vmul.f32 0.0, %v13805_v41  ;;  %v13806_v39 = vld [vmem:[#allocation205_spill] sm:$0xff] }
 0x56a   : > { %v5804_v42 = vmul.f32 %v5711_v61, %v5417_v33  ;;  %v5418_v8 = vadd.f32 %v5342_v4, %v4102_v29  ;;  %v6776_v30 = vpop.f32.mrb[228].mxu1  ;;  %v6668_v51 = vpop.f32.mrb[231].mxu0 }
 0x56b   : > { %v6777_v2 = vpop.f32.mrb[229].mxu1  ;;  %v5186_v59 = vadd.f32 %v6666_v44, %v13801_v31  ;;  %v6669_v18 = vadd.f32 %v6668_v51, %v6667_v48  ;;  %v5731_v4 = vpop.permute.xlu0 %5730 }
 0x56c   : > { %5836 = vst [vmem:[%s12098_s22 + $0x80] sm:$0xff] %v5804_v42  ;;  %v5805_v35 = vmul.f32 %v5716_v50, %v5418_v8  ;;  %v6778_v36 = vadd.f32 %v6777_v2, %v6776_v30  ;;  %v6779_v24 = vpop.f32.mrb[230].mxu1  ;;  %v4106_v42 = vmul.f32 0.0, %v13806_v39  ;;  %v5736_v8 = vpop.permute.xlu1 %5735 }
 0x56d   : > { %v6780_v10 = vpop.f32.mrb[231].mxu1  ;;  %v5189_v25 = vadd.f32 %v6669_v18, %v13803_v22 }
 0x56e   : > { %5837 = vst [vmem:[%s12098_s22 + $0x88] sm:$0xff] %v5805_v35  ;;  %v5347_v47 = vadd.f32 %v6778_v36, %v5186_v59  ;;  %v6781_v21 = vadd.f32 %v6780_v10, %v6779_v24 }
 0x56f   : > { %v6670_v54 = vpop.f32.mrb[232].mxu0 }
 0x570   : > { %v5419_v12 = vadd.f32 %v5347_v47, %v4103_v55  ;;  %v5350_v37 = vadd.f32 %v6781_v21, %v5189_v25  ;;  %v6671_v43 = vpop.f32.mrb[233].mxu0  ;;  %v13807_v55 = vld [vmem:[#allocation86_spill] sm:$0xff] }
 0x571   : > { %v6672_v7 = vadd.f32 %v6671_v43, %v6670_v54  ;;  %v6673_v56 = vpop.f32.mrb[234].mxu0  ;;  %v4107_v47 = vmul.f32 0.0, %v13807_v55 }
 0x572   : > { %v5806_v57 = vmul.f32 %v5721_v6, %v5419_v12  ;;  %v5420_v28 = vadd.f32 %v5350_v37, %v4104_v15  ;;  %v6782_v38 = vpop.f32.mrb[232].mxu1  ;;  %v6674_v16 = vpop.f32.mrb[235].mxu0  ;;  %v4108_v15 = vmul.f32 0.0, %v13808_v9 }
 0x573   : > { %v6783_v11 = vpop.f32.mrb[233].mxu1  ;;  %v5194_v45 = vadd.f32 %v6672_v7, %v11985_v17  ;;  %v6675_v14 = vadd.f32 %v6674_v16, %v6673_v56  ;;  %v5741_v12 = vpop.permute.xlu0 %5740 }
 0x574   : > { %5838 = vst [vmem:[%s12098_s22 + $0x90] sm:$0xff] %v5806_v57  ;;  %v5807_v1 = vmul.f32 %v5726_v34, %v5420_v28  ;;  %v6784_v3 = vadd.f32 %v6783_v11, %v6782_v38  ;;  %v6785_v26 = vpop.f32.mrb[234].mxu1 }
 0x575   : > { %v6786_v49 = vpop.f32.mrb[235].mxu1  ;;  %v5197_v33 = vadd.f32 %v6675_v14, %v11988_v13  ;;  %v13809_v14 = vld [vmem:[#allocation76_spill] sm:$0xff] }
 0x576   : > { %5839 = vst [vmem:[%s12098_s22 + $0x98] sm:$0xff] %v5807_v1  ;;  %v5355_v29 = vadd.f32 %v6784_v3, %v5194_v45  ;;  %v6787_v61 = vadd.f32 %v6786_v49, %v6785_v26  ;;  %v4109_v49 = vmul.f32 0.0, %v13809_v14 }
 0x577   : > { %v6676_v50 = vpop.f32.mrb[236].mxu0 }
 0x578   : > { %v5421_v23 = vadd.f32 %v5355_v29, %v4105_v27  ;;  %v5358_v17 = vadd.f32 %v6787_v61, %v5197_v33  ;;  %v6677_v30 = vpop.f32.mrb[237].mxu0  ;;  %v13810_v61 = vld [vmem:[#allocation207_spill] sm:$0xff] }
 0x579   : > { %v6678_v2 = vadd.f32 %v6677_v30, %v6676_v50  ;;  %v6679_v51 = vpop.f32.mrb[238].mxu0  ;;  %v4110_v33 = vmul.f32 0.0, %v13810_v61 }
 0x57a   : > { %v5808_v44 = vmul.f32 %v5731_v4, %v5421_v23  ;;  %v6788_v48 = vpop.f32.mrb[236].mxu1  ;;  %v5422_v35 = vadd.f32 %v5358_v17, %v4106_v42  ;;  %v6680_v59 = vpop.f32.mrb[239].mxu0 }
 0x57b   : > { %v6789_v31 = vpop.f32.mrb[237].mxu1  ;;  %v5202_v36 = vadd.f32 %v6678_v2, %v12004_v62  ;;  %v6681_v18 = vadd.f32 %v6680_v59, %v6679_v51  ;;  %v5746_v62 = vpop.permute.xlu1 %5745 }
 0x57c   : > { %5840 = vst [vmem:[%s12098_s22 + $0xa0] sm:$0xff] %v5808_v44  ;;  %v6790_v13 = vadd.f32 %v6789_v31, %v6788_v48  ;;  %v6791_v24 = vpop.f32.mrb[238].mxu1  ;;  %v5809_v10 = vmul.f32 %v5736_v8, %v5422_v35  ;;  %v5751_v4 = vpop.permute.xlu0 %5750 }
 0x57d   : > { %v6792_v19 = vpop.f32.mrb[239].mxu1  ;;  %v5205_v25 = vadd.f32 %v6681_v18, %v12008_v53 }
 0x57e   : > { %v5363_v22 = vadd.f32 %v6790_v13, %v5202_v36  ;;  %v6793_v21 = vadd.f32 %v6792_v19, %v6791_v24  ;;  %5841 = vst [vmem:[%s12098_s22 + $0xa8] sm:$0xff] %v5809_v10  ;;  %v13811_v24 = vld [vmem:[#allocation81_spill] sm:$0xff] }
 0x57f   : > { %v6682_v6 = vpop.f32.mrb[240].mxu0  ;;  %v5756_v42 = vpop.permute.xlu1 %5755  ;;  %v4111_v18 = vmul.f32 0.0, %v13811_v24 }
 0x580   : > { %v5423_v37 = vadd.f32 %v5363_v22, %v4107_v47  ;;  %v5366_v54 = vadd.f32 %v6793_v21, %v5205_v25  ;;  %v6683_v43 = vpop.f32.mrb[241].mxu0  ;;  %v13812_v47 = vld [vmem:[#allocation208_spill] sm:$0xff]  ;;  %v5761_v25 = vpop.permute.xlu0 %5760 }
 0x581   : > { %v6684_v38 = vadd.f32 %v6683_v43, %v6682_v6  ;;  %v6685_v7 = vpop.f32.mrb[242].mxu0  ;;  %v4112_v22 = vmul.f32 0.0, %v13812_v47 }
 0x582   : > { %v5810_v34 = vmul.f32 %v5741_v12, %v5423_v37  ;;  %v5424_v57 = vadd.f32 %v5366_v54, %v4108_v15  ;;  %v6794_v28 = vpop.f32.mrb[240].mxu1  ;;  %v6686_v56 = vpop.f32.mrb[243].mxu0 }
 0x583   : > { %v6795_v11 = vpop.f32.mrb[241].mxu1  ;;  %v5210_v1 = vadd.f32 %v6684_v38, %v12023_v20  ;;  %v6687_v26 = vadd.f32 %v6686_v56, %v6685_v7  ;;  %v5766_v12 = vpop.permute.xlu1 %5765 }
 0x584   : > { %5842 = vst [vmem:[%s12098_s22 + $0xb0] sm:$0xff] %v5810_v34  ;;  %v5811_v53 = vmul.f32 %v5746_v62, %v5424_v57  ;;  %v6796_v45 = vadd.f32 %v6795_v11, %v6794_v28  ;;  %v6797_v3 = vpop.f32.mrb[242].mxu1 }
 0x585   : > { %v6798_v16 = vpop.f32.mrb[243].mxu1  ;;  %v5213_v27 = vadd.f32 %v6687_v26, %v12025_v32 }
 0x586   : > { %5843 = vst [vmem:[%s12098_s22 + $0xb8] sm:$0xff] %v5811_v53  ;;  %v5371_v41 = vadd.f32 %v6796_v45, %v5210_v1  ;;  %v6799_v29 = vadd.f32 %v6798_v16, %v6797_v3  ;;  %v13813_v53 = vld [vmem:[#allocation100_spill] sm:$0xff]  ;;  %v13814_v16 = vld [vmem:[#allocation71_spill] sm:$0xff] }
 0x587   : > { %v6688_v39 = vpop.f32.mrb[244].mxu0  ;;  %v4113_v1 = vmul.f32 0.0, %v13813_v53  ;;  %v4114_v14 = vmul.f32 0.0, %v13814_v16  ;;  %v5776_v61 = vpop.permute.xlu1 %5775 }
 0x588   : > { %v5425_v23 = vadd.f32 %v5371_v41, %v4109_v49  ;;  %v5374_v50 = vadd.f32 %v6799_v29, %v5213_v27  ;;  %v6689_v20 = vpop.f32.mrb[245].mxu0  ;;  %v5771_v49 = vpop.permute.xlu0 %5770 }
 0x589   : > { %v6690_v44 = vadd.f32 %v6689_v20, %v6688_v39  ;;  %v6691_v48 = vpop.f32.mrb[246].mxu0 }
 0x58a   : > { %v5812_v8 = vmul.f32 %v5751_v4, %v5425_v23  ;;  %v5426_v17 = vadd.f32 %v5374_v50, %v4110_v33  ;;  %v6800_v30 = vpop.f32.mrb[244].mxu1  ;;  %v6692_v51 = vpop.f32.mrb[247].mxu0 }
 0x58b   : > { %v6801_v2 = vpop.f32.mrb[245].mxu1  ;;  %v5218_v35 = vadd.f32 %v6690_v44, %v12043_v5  ;;  %v6693_v36 = vadd.f32 %v6692_v51, %v6691_v48 }
 0x58c   : > { %5844 = vst [vmem:[%s12098_s22 + $0xc0] sm:$0xff] %v5812_v8  ;;  %v5813_v32 = vmul.f32 %v5756_v42, %v5426_v17  ;;  %v6802_v31 = vadd.f32 %v6801_v2, %v6800_v30  ;;  %v6803_v59 = vpop.f32.mrb[246].mxu1  ;;  %v4115_v2 = vmul.f32 0.0, %v12088_v52 }
 0x58d   : > { %v6804_v13 = vpop.f32.mrb[247].mxu1  ;;  %v5221_v19 = vadd.f32 %v6693_v36, %v12045_v63 }
 0x58e   : > { %5845 = vst [vmem:[%s12098_s22 + $0xc8] sm:$0xff] %v5813_v32  ;;  %v5379_v10 = vadd.f32 %v6802_v31, %v5218_v35  ;;  %v6805_v55 = vadd.f32 %v6804_v13, %v6803_v59  ;;  %v4116_v31 = vmul.f32 0.0, %v12091_v58 }
 0x58f   : > { %v6694_v15 = vpop.f32.mrb[248].mxu0 }
 0x590   : > { %v5427_v21 = vadd.f32 %v5379_v10, %v4111_v18  ;;  %v5382_v9 = vadd.f32 %v6805_v55, %v5221_v19  ;;  %v6695_v5 = vpop.f32.mrb[249].mxu0  ;;  %v5786_v18 = vpop.permute.xlu1 %5785 }
 0x591   : > { %v6696_v62 = vadd.f32 %v6695_v5, %v6694_v15  ;;  %v6697_v43 = vpop.f32.mrb[250].mxu0 }
 0x592   : > { %v5814_v37 = vmul.f32 %v5761_v25, %v5427_v21  ;;  %v5428_v54 = vadd.f32 %v5382_v9, %v4112_v22  ;;  %v6806_v6 = vpop.f32.mrb[248].mxu1  ;;  %v6698_v57 = vpop.f32.mrb[251].mxu0 }
 0x593   : > { %v6807_v34 = vpop.f32.mrb[249].mxu1  ;;  %v5226_v28 = vadd.f32 %v6696_v62, %v12063_v40  ;;  %v6699_v11 = vadd.f32 %v6698_v57, %v6697_v43 }
 0x594   : > { %5846 = vst [vmem:[%s12098_s22 + $0xd0] sm:$0xff] %v5814_v37  ;;  %v5815_v63 = vmul.f32 %v5766_v12, %v5428_v54  ;;  %v6808_v38 = vadd.f32 %v6807_v34, %v6806_v6  ;;  %v6809_v7 = vpop.f32.mrb[250].mxu1 }
 0x595   : > { %v6810_v56 = vpop.f32.mrb[251].mxu1  ;;  %v5229_v3 = vadd.f32 %v6699_v11, %v12065_v60 }
 0x596   : > { %5847 = vst [vmem:[%s12098_s22 + $0xd8] sm:$0xff] %v5815_v63  ;;  %v5387_v45 = vadd.f32 %v6808_v38, %v5226_v28  ;;  %v6811_v26 = vadd.f32 %v6810_v56, %v6809_v7 }
 0x597   : > { %v6700_v29 = vpop.f32.mrb[252].mxu0 }
 0x598   : > { %v5429_v41 = vadd.f32 %v5387_v45, %v4113_v1  ;;  %v5390_v27 = vadd.f32 %v6811_v26, %v5229_v3  ;;  %v6701_v40 = vpop.f32.mrb[253].mxu0 }
 0x599   : > { %v6702_v50 = vadd.f32 %v6701_v40, %v6700_v29  ;;  %v6703_v39 = vpop.f32.mrb[254].mxu0 }
 0x59a   : > { %v5816_v33 = vmul.f32 %v5771_v49, %v5429_v41  ;;  %v5430_v4 = vadd.f32 %v5390_v27, %v4114_v14  ;;  %v6812_v23 = vpop.f32.mrb[252].mxu1  ;;  %v6704_v20 = vpop.f32.mrb[255].mxu0 }
 0x59b   : > { %v6813_v42 = vpop.f32.mrb[253].mxu1  ;;  %v5234_v8 = vadd.f32 %v6702_v50, %v12084_v0  ;;  %v6705_v44 = vadd.f32 %v6704_v20, %v6703_v39  ;;  %v5781_v0 = vpop.permute.xlu0 %5780 }
 0x59c   : > { %5848 = vst [vmem:[%s12098_s22 + $0xe0] sm:$0xff] %v5816_v33  ;;  %v5817_v60 = vmul.f32 %v5776_v61, %v5430_v4  ;;  %v6814_v17 = vadd.f32 %v6813_v42, %v6812_v23  ;;  %v6815_v30 = vpop.f32.mrb[254].mxu1 }
 0x59d   : > { %v6816_v48 = vpop.f32.mrb[255].mxu1  ;;  %v5237_v32 = vadd.f32 %v6705_v44, %v12086_v46 }
 0x59e   : > { %5849 = vst [vmem:[%s12098_s22 + $0xe8] sm:$0xff] %v5817_v60  ;;  %v5395_v51 = vadd.f32 %v6814_v17, %v5234_v8  ;;  %v6817_v35 = vadd.f32 %v6816_v48, %v6815_v30 }
 0x5a0   : > { %v5431_v59 = vadd.f32 %v5395_v51, %v4115_v2  ;;  %v5398_v36 = vadd.f32 %v6817_v35, %v5237_v32 }
 0x5a2   : > { %v5818_v13 = vmul.f32 %v5781_v0, %v5431_v59  ;;  %v5432_v24 = vadd.f32 %v5398_v36, %v4116_v31 }
 0x5a4   : > { %5850 = vst [vmem:[%s12098_s22 + $0xf0] sm:$0xff] %v5818_v13  ;;  %v5819_v46 = vmul.f32 %v5786_v18, %v5432_v24 }
 0x5a6   : > { %5851 = vst [vmem:[%s12098_s22 + $0xf8] sm:$0xff] %v5819_v46 }
 0x5a7   : > { %7786 = shalt.err (!%p7783_p13)
}
 0x5a8   : > { %s7787_s9 = scalar_lea.hbm %s12194_s4, 4096  ;;  %s7791_s26 = scalar_lea.hbm %s12250_s3, 8192 }
 0x5a9   : > { %p7788_p7 = scmp.ne.s32.totalorder %s12194_s4, %s7787_s9  ;;  %p7792_p5 = scmp.lt.u32.totalorder %s12194_s4, %s12250_s3 }
 0x5aa   : > { %p7793_p2 = scmp.lt.u32.totalorder %s7791_s26, %s7787_s9  ;;  %p7795_p0 = scmp.lt.u32.totalorder %s7787_s9, %s12194_s4 }
 0x5ab   : > { %p7789_p11 = pnand %p7788_p7, %p13815_p6 }
 0x5ac   : > { %p7794_p1 = por %p7793_p2, %p7792_p5 }
 0x5ad   : > { %p7790_p3 = pneg %p7789_p11 }
 0x5ae   : > { %p7796_p8 = por %p7795_p0, %p7794_p1 }
 0x5b0   : > { %p7797_p9 = pnand %p7796_p8, %p7790_p3 }
 0x5b2   : > { %7800 = shalt.err (!%p7797_p9)
}
 0x5b3   : > { %s7870_s11 = smov 128   ;;  %s7871_s6 = smov 8  }
 0x5b4   : > { %6824 = dma.vmem_to_hbm [thread:$0]  (%p13815_p6), %s12196_s30, 4096, %s12194_s4, %s5853_s23, %s7870_s11, %s7870_s11, %s7871_s6  }
 0x5b5 PF: > { %s5883_s18 = sand.u32 1, %s7839_s12   ;;  %p13816_p12 = scmp.ne.s32.totalorder %s12719_s27, 0 }
 0x5b6   : > { %p13817_p4 = scmp.ge.s32.totalorder %s7859_s17, 2  ;;  %s5884_s24 = scalar_lea.sflag [#allocation7], %s5883_s18 }
 0x5b8   : > { %p6837_p10 = pnand %p13817_p4, %p13816_p12 }
 0x5ba   : > { %7834 = dma.done.wait (!%p6837_p10), %s5884_s24, 4096  }
 0x5bb   : > { %7836 = vsyncadd (!%p6837_p10), %s5884_s24, 4294963200  ;;  %s22_s17 = sadd.s32 1, %s7859_s17   ;;  %s13818_s22 = sld [smem:[#allocation15_spill]] }
 0x5bc   : > { %p19_p13 = scmp.ge.s32.totalorder %s22_s17, 4   ;;  %s13819_s14 = sld [smem:[#allocation17_spill]] }
 0x5bd   : > { %s13820_s25 = sld [smem:[#allocation16_spill]]  ;;  %s13821_s12 = smov %s7843_s13 }
 0x5be   : > { %s13823_s15 = smov %s7855_s16  ;;  %21 = sbr.rel (!%p19_p13) target bundleno = 10 (0xa), region = 109 }
 0x5c1   : > { %s13822_s13 = smov %s13818_s22 }
 0x5c3   : > { %s13824_s16 = smov %s13820_s25 }
 0x5c5   :  { %5889 = vsyncpa [#allocation6], 1 }
 0x5c6   :  { %5891 = vsyncpa [#allocation6 + $0x1], 1 }
 0x5c7   :  { %5892 = vsyncpa [#allocation9], 1 }
 0x5c8   :  { %5894 = vsyncpa [#allocation9 + $0x1], 1 }
 0x5c9   :  { %5895 = vsyncpa [#allocation7], 1 }
 0x5ca   :  { %5897 = vsyncpa [#allocation7 + $0x1], 1 }

</bundles_post_ra>
